<compile_context>
chip_gen: v5e
topology: v5e:2x2
jax: 0.10.0
libtpu: 0.0.40
codegen_flags: <defaults>
</compile_context>

<pallas_src>
import functools

import jax
import jax.numpy as jnp
import numpy as np
from jax.experimental import pallas as pl
from jax.experimental.pallas import tpu as pltpu

RATES = (1, 3, 9, 27)


# ----------------------------------------------------------------------------
# Host-side "plan": fold convs / pools / BN / final conv into lane-dense matrices
# ----------------------------------------------------------------------------
def _conv_to_stacked(w, rate, H, W):
    """w: (K,K,Cin,Cout) -> (dhs, K-stacked matrix of shape (len(dhs)*W*Cin, W*Cout)).

    Each kernel row kh (row shift dh=(kh-K//2)*rate) becomes one (W*Cin, W*Cout) block
    that applies all its kw taps (W shift + zero padding folded in); the blocks are
    stacked along the contraction axis so the whole conv is ONE MXU matmul.  Taps whose
    shift exceeds the image are pruned exactly (they only multiply zero padding).
    """
    K = w.shape[0]
    mats, dhs = [], []
    for kh in range(K):
        dh = (kh - K // 2) * rate
        if abs(dh) >= H:
            continue
        m = None
        for kw in range(K):
            dw = (kw - K // 2) * rate
            if abs(dw) >= W:
                continue
            term = jnp.kron(jnp.eye(W, k=-dw, dtype=jnp.float32), w[kh, kw])
            m = term if m is None else m + term
        if m is None:
            continue
        mats.append(m)
        dhs.append(dh)
    return tuple(dhs), jnp.concatenate(mats, axis=0)


def build_plan(params, H, W):
    in_chs = params["gave"]["w"].shape[2]
    mid_chs = params["branches"][0][0]["w"].shape[3]
    out_chs = params["gave"]["w"].shape[3]
    WCin, WCmid, WCout = W * in_chs, W * mid_chs, W * out_chs
    WCmax = max(WCin, WCmid, WCout)
    HI = jax.lax.Precision.HIGHEST

    mats, sb_rows = [], []
    row_off = [0]

    def add_mat(m):
        m = jnp.asarray(m, jnp.float32)
        if m.shape[1] < WCmax:
            m = jnp.pad(m, ((0, 0), (0, WCmax - m.shape[1])))
        off = row_off[0]
        row_off[0] += m.shape[0]
        mats.append(m)
        return off

    def add_sb(scale, bias, C):
        s = jnp.tile(jnp.asarray(scale, jnp.float32), W)
        b = jnp.tile(jnp.asarray(bias, jnp.float32), W)
        if W * C < WCmax:
            s = jnp.pad(s, (0, WCmax - W * C))
            b = jnp.pad(b, (0, WCmax - W * C))
        off = len(sb_rows)
        sb_rows.extend([s, b])
        return off

    meta = {}

    # 3x3 stride-1 pad-1 avg pool (count_include_pad -> /9): W direction folded into a
    # banded block matrix; the H direction 3-row sum is done in-kernel via the halo buf.
    band = (jnp.eye(W, dtype=jnp.float32) + jnp.eye(W, k=1, dtype=jnp.float32)
            + jnp.eye(W, k=-1, dtype=jnp.float32))
    P = jnp.kron(band, jnp.eye(in_chs, dtype=jnp.float32)) / 9.0
    meta["pool"] = (add_mat(P), WCin, WCin)

    # gave branch fully folded: GAP -> 1x1 conv -> BN scale -> final-conv slice 0.
    # Its BN bias contribution is folded into the final affine bias below.
    g = params["gave"]
    wf = params["final"]["w"][0, 0]                     # (5*out_chs, out_chs)
    Wf0 = wf[0:out_chs, :]
    A = jnp.matmul(g["w"][0, 0] * g["scale"][None, :], Wf0, precision=HI)
    meta["gave"] = (add_mat(jnp.kron(jnp.ones((W, W), jnp.float32), A) / float(H * W)),
                    WCin, WCout)
    b_gave = jnp.matmul(g["bias"][None, :], Wf0, precision=HI)[0]

    maxdh = 1                                           # avg pools need +-1 rows of halo
    meta["branches"] = []
    for bi, (bp, rate) in enumerate(zip(params["branches"], RATES)):
        convs = []
        # conv1 (1x1, in -> mid).  Branch 4: the 3rd avg pool is folded in (P @ M1).
        M1 = jnp.kron(jnp.eye(W, dtype=jnp.float32), bp[0]["w"][0, 0])
        if bi == 3:
            M1 = jnp.matmul(P, M1, precision=HI)
        convs.append(dict(off=add_mat(M1), rows=WCin, cols=WCmid, dhs=(0,), cin=WCin,
                          sb=add_sb(bp[0]["scale"], bp[0]["bias"], mid_chs)))
        # conv2, conv3 (dilated 3x3, mid -> mid): row taps K-stacked into one matrix.
        for ci in (1, 2):
            dhs, stk = _conv_to_stacked(bp[ci]["w"], rate, H, W)
            maxdh = max(maxdh, max(abs(d) for d in dhs))
            convs.append(dict(off=add_mat(stk), rows=stk.shape[0], cols=WCmid,
                              dhs=dhs, cin=WCmid,
                              sb=add_sb(bp[ci]["scale"], bp[ci]["bias"], mid_chs)))
        # conv4 (1x1, mid -> out)
        M4 = jnp.kron(jnp.eye(W, dtype=jnp.float32), bp[3]["w"][0, 0])
        convs.append(dict(off=add_mat(M4), rows=WCmid, cols=WCout, dhs=(0,), cin=WCmid,
                          sb=add_sb(bp[3]["scale"], bp[3]["bias"], out_chs)))
        meta["branches"].append(convs)

    # Final 1x1 conv over the 4 dilated-branch slices of the concat, K-stacked into one
    # (4*WCout, WCout) matrix (the gave slice is handled by the folded matrix above).
    F = jnp.concatenate(
        [jnp.kron(jnp.eye(W, dtype=jnp.float32),
                  wf[(b + 1) * out_chs:(b + 2) * out_chs, :]) for b in range(4)], axis=0)
    scale_f = params["final"]["scale"]
    bias_f = params["final"]["bias"] + b_gave * scale_f
    meta["final"] = (add_mat(F), 4 * WCout, WCout, add_sb(scale_f, bias_f, out_chs))

    w_all = jnp.concatenate(mats, axis=0).astype(jnp.bfloat16)   # one bf16 weight slab
    sb_all = jnp.stack(sb_rows, axis=0)                          # (2*n_sb, WCmax) f32

    dims = dict(in_chs=in_chs, mid_chs=mid_chs, out_chs=out_chs,
                wcin=WCin, wcmid=WCmid, wcout=WCout, wcmax=WCmax,
                cbuf=max(WCin, WCmid), padmax=maxdh)
    return w_all, sb_all, meta, dims


# ----------------------------------------------------------------------------
# The single fused Pallas kernel (B images per grid step)
# ----------------------------------------------------------------------------
def make_fused_kernel(meta, dims, H, W, B):
    BH = B * H
    WCin, WCout = dims["wcin"], dims["wcout"]
    Cbuf = dims["cbuf"]
    pm = dims["padmax"]
    f32, bf16 = jnp.float32, jnp.bfloat16

    def kernel(x_ref, w_ref, sb_ref, o_ref, buf):
        # Zero ONLY the +-pm halo rows (centre rows are always rewritten before use).
        # Done every step (not under program_id==0): with megacore "parallel" sharding
        # another core may never execute step 0 and scratch VMEM is uninitialized.
        buf[:, 0:pm, :] = jnp.zeros((B, pm, Cbuf), f32)
        buf[:, pm + H:pm + H + pm, :] = jnp.zeros((B, pm, Cbuf), f32)

        def wmat(off, rows, cols):
            return w_ref[off:off + rows, 0:cols]               # bf16 weight slice

        def affine(y, sb_off, cols, relu):                     # folded BN (f32 epilogue)
            s = sb_ref[sb_off:sb_off + 1, 0:cols]
            b = sb_ref[sb_off + 1:sb_off + 2, 0:cols]
            y = y * s + b
            return jnp.maximum(y, 0.0) if relu else y

        def stash(x2, cols):                                   # write centre rows
            buf[:, pm:pm + H, 0:cols] = x2.reshape(B, H, cols)

        def shifted(dh, cols):                                 # per-image row shift
            return buf[:, pm + dh:pm + dh + H, 0:cols].reshape(BH, cols)

        def conv(x2, spec, relu):                              # x2: (BH, cin) f32
            dhs = spec["dhs"]
            if dhs == (0,):                                    # 1x1 (incl. pruned r=27)
                lhs = x2
            else:                                              # K-stack the row taps
                stash(x2, spec["cin"])
                lhs = jnp.concatenate(
                    [x2 if dh == 0 else shifted(dh, spec["cin"]) for dh in dhs], axis=1)
            y = jnp.dot(lhs.astype(bf16),
                        wmat(spec["off"], spec["rows"], spec["cols"]),
                        preferred_element_type=f32)
            return affine(y, spec["sb"], spec["cols"], relu)

        def branch(x2, convs):
            for c in convs:
                x2 = conv(x2, c, relu=True)
            return x2.astype(bf16)                             # feeds final bf16 dot

        def rowsum3(x2, cols):                                 # H part of the avg pool
            stash(x2, cols)
            return shifted(-1, cols) + x2 + shifted(1, cols)

        def pool(x2):                                          # full 3x3 avg pool
            off, wc, _ = meta["pool"]
            return jnp.dot(rowsum3(x2, wc).astype(bf16), wmat(off, wc, wc),
                           preferred_element_type=f32)

        x3 = x_ref[...].astype(f32)                            # (B, H, WCin)
        x2 = x3.reshape(BH, WCin)

        # Four dilated branches; the 3rd avg pool is folded into branch 4's first conv.
        b1 = branch(x2, meta["branches"][0])
        xp1 = pool(x2)
        b2 = branch(xp1, meta["branches"][1])
        xp2 = pool(xp1)
        b3 = branch(xp2, meta["branches"][2])
        b4 = branch(rowsum3(xp2, WCin), meta["branches"][3])

        # Final 1x1 conv: one K-stacked dot over the 4 branch slices of the concat.
        foff, frows, fcols, fsb = meta["final"]
        cat = jnp.concatenate([b1, b2, b3, b4], axis=1)        # (BH, 4*WCout) bf16
        acc = jnp.dot(cat, wmat(foff, frows, fcols), preferred_element_type=f32)

        # gave branch: per-image global mean through the fully folded matrix; the
        # broadcast-over-(H,W) is just a row broadcast of the (B, WCout) result.
        goff, grows, gcols = meta["gave"]
        gsum = jnp.sum(x3, axis=1)                             # (B, WCin)
        grow = jnp.dot(gsum.astype(bf16), wmat(goff, grows, gcols),
                       preferred_element_type=f32)             # (B, WCout)
        acc = acc + jnp.broadcast_to(grow.reshape(B, 1, WCout),
                                     (B, H, WCout)).reshape(BH, WCout)

        y = affine(acc, fsb, WCout, relu=False)
        # TODO(synk): nn.Dropout2d(p=0.2) is identity in eval mode; training-mode
        # per-channel dropout is intentionally not implemented.
        o_ref[...] = y.reshape(B, H, WCout).astype(o_ref.dtype)

    return kernel


# ----------------------------------------------------------------------------
# Forward wrapper (single pallas_call; NCHW <-> lane-dense glue is metadata only)
# ----------------------------------------------------------------------------
def vortex_forward(x_nchw, params, block_b=8):
    N, Cin, H, W = x_nchw.shape
    w_all, sb_all, meta, dims = build_plan(params, H, W)
    out_chs = dims["out_chs"]
    WCin, WCout = W * Cin, W * out_chs

    B = int(min(block_b, N))                     # images per grid step (M = B*H rows)
    Npad = ((N + B - 1) // B) * B

    x2d = jnp.transpose(x_nchw, (0, 2, 3, 1)).reshape(N, H, WCin).astype(jnp.bfloat16)
    if Npad != N:
        x2d = jnp.concatenate(
            [x2d, jnp.zeros((Npad - N, H, WCin), jnp.bfloat16)], axis=0)

    out = pl.pallas_call(
        make_fused_kernel(meta, dims, H, W, B),
        out_shape=jax.ShapeDtypeStruct((Npad, H, WCout), jnp.float32),
        grid=(Npad // B,),
        in_specs=[
            pl.BlockSpec((B, H, WCin), lambda n: (n, 0, 0)),
            pl.BlockSpec(w_all.shape, lambda n: (0, 0)),   # whole folded weight slab
            pl.BlockSpec(sb_all.shape, lambda n: (0, 0)),  # all BN scale/bias rows
        ],
        out_specs=pl.BlockSpec((B, H, WCout), lambda n: (n, 0, 0)),
        scratch_shapes=[pltpu.VMEM((B, H + 2 * dims["padmax"], dims["cbuf"]),
                                   jnp.float32)],
        compiler_params=pltpu.CompilerParams(
            dimension_semantics=("parallel",),
            vmem_limit_bytes=32 * 1024 * 1024),
    )(x2d, w_all, sb_all)

    out = out[:N].reshape(N, H, W, out_chs)
    return jnp.transpose(out, (0, 3, 1, 2))                 # -> NCHW


# ----------------------------------------------------------------------------
# Deterministic parameter construction (BN folded to scale/bias, inference mode)
# ----------------------------------------------------------------------------
def _fold_bn(gamma, beta, mean, var, conv_bias, eps=1e-5):
    scale = gamma / jnp.sqrt(var + eps)
    bias = beta + (conv_bias - mean) * scale
    return scale, bias


def _conv_bn_params(key, cin, cout, k):
    ks = jax.random.split(key, 6)
    w = 0.1 * jax.random.normal(ks[0], (k, k, cin, cout), jnp.float32)
    b = 0.1 * jax.random.normal(ks[1], (cout,), jnp.float32)
    gamma = 1.0 + 0.1 * jax.random.normal(ks[2], (cout,), jnp.float32)
    beta = 0.1 * jax.random.normal(ks[3], (cout,), jnp.float32)
    mean = 0.1 * jax.random.normal(ks[4], (cout,), jnp.float32)
    var = 0.5 + jax.random.uniform(ks[5], (cout,), jnp.float32)
    scale, bias = _fold_bn(gamma, beta, mean, var, b)
    return {"w": w, "scale": scale, "bias": bias}


def make_params(key, in_chs, mid_chs, out_chs):
    kg, kb, kf = jax.random.split(key, 3)
    branches = []
    for kb_i in jax.random.split(kb, 4):
        k1, k2, k3, k4 = jax.random.split(kb_i, 4)
        branches.append([
            _conv_bn_params(k1, in_chs, mid_chs, 1),
            _conv_bn_params(k2, mid_chs, mid_chs, 3),
            _conv_bn_params(k3, mid_chs, mid_chs, 3),
            _conv_bn_params(k4, mid_chs, out_chs, 1),
        ])
    return {
        "gave": _conv_bn_params(kg, in_chs, out_chs, 1),
        "branches": branches,
        "final": _conv_bn_params(kf, 5 * out_chs, out_chs, 1),
    }


# ----------------------------------------------------------------------------
# Pure-JAX reference for correctness checking
# ----------------------------------------------------------------------------
def _ref_conv_bn(x, p, K, rate, relu):
    pad = rate * (K // 2)
    y = jax.lax.conv_general_dilated(
        x, p["w"], window_strides=(1, 1),
        padding=((pad, pad), (pad, pad)),
        rhs_dilation=(rate, rate),
        dimension_numbers=("NHWC", "HWIO", "NHWC"),
        precision=jax.lax.Precision.HIGHEST)
    y = y * p["scale"] + p["bias"]
    return jnp.maximum(y, 0.0) if relu else y


def _ref_avgpool(x):
    s = jax.lax.reduce_window(
        x, 0.0, jax.lax.add, (1, 3, 3, 1), (1, 1, 1, 1),
        padding=((0, 0), (1, 1), (1, 1), (0, 0)))
    return s / 9.0


def _ref_gave(x, p):
    N, H, W, Cin = x.shape
    Cout = p["w"].shape[-1]
    g = jnp.mean(x, axis=(1, 2))
    y = g @ p["w"].reshape(Cin, Cout)
    y = y * p["scale"] + p["bias"]
    return jnp.broadcast_to(y[:, None, None, :], (N, H, W, Cout))


def vortex_ref(x_nchw, params):
    x = jnp.transpose(x_nchw, (0, 2, 3, 1))

    def branch(xb, bp, rate):
        y = _ref_conv_bn(xb, bp[0], 1, 1, True)
        y = _ref_conv_bn(y, bp[1], 3, rate, True)
        y = _ref_conv_bn(y, bp[2], 3, rate, True)
        y = _ref_conv_bn(y, bp[3], 1, 1, True)
        return y

    x1 = _ref_gave(x, params["gave"])
    x2 = branch(x, params["branches"][0], RATES[0])
    xp = _ref_avgpool(x)
    x3 = branch(xp, params["branches"][1], RATES[1])
    xp = _ref_avgpool(xp)
    x4 = branch(xp, params["branches"][2], RATES[2])
    xp = _ref_avgpool(xp)
    x5 = branch(xp, params["branches"][3], RATES[3])
    out = jnp.concatenate([x1, x2, x3, x4, x5], axis=-1)
    out = _ref_conv_bn(out, params["final"], 1, 1, False)
    return jnp.transpose(out, (0, 3, 1, 2))


# ----------------------------------------------------------------------------
if __name__ == "__main__":
    # N=10 exercises batching (B=8), the zero-padded tail and a 2-step grid.
    N, in_chs, mid_chs, out_chs = 10, 8, 8, 8
    H = W = 16                                   # feat_res = (16, 16)
    key = jax.random.PRNGKey(0)
    kx, kp = jax.random.split(key)
    x = jax.random.normal(kx, (N, in_chs, H, W), jnp.float32)   # NCHW, like PyTorch
    params = make_params(kp, in_chs, mid_chs, out_chs)

    fwd = jax.jit(functools.partial(vortex_forward, params=params))
    out = jax.block_until_ready(fwd(x))

    ref = jax.block_until_ready(
        jax.jit(functools.partial(vortex_ref, params=params))(x))

    assert out.shape == (N, out_chs, H, W), out.shape
    # bf16 MXU inputs (f32 accumulation) across a ~6-matmul chain need a looser
    # tolerance than the all-f32 HIGHEST reference; structural bugs would be O(0.1-1).
    np.testing.assert_allclose(np.asarray(out), np.asarray(ref), rtol=3e-2, atol=5e-2)
    print("KERNEL_OK")
</pallas_src>

<mosaic_0001>
module attributes {stable_mosaic.version = 11 : i64} {
  func.func @kernel(%arg0: i32, %arg1: memref<8x16x128xbf16, #tpu.memory_space<vmem>>, %arg2: memref<4352x128xbf16, #tpu.memory_space<vmem>>, %arg3: memref<34x128xf32, #tpu.memory_space<vmem>>, %arg4: memref<8x16x128xf32, #tpu.memory_space<vmem>>, %arg5: memref<8x34x128xf32, #tpu.memory_space<vmem>>) attributes {dimension_semantics = [#tpu.dimension_semantics<parallel>], iteration_bounds = array<i64: 2>, scalar_prefetch = 0 : i64, scratch_operands = 1 : i64, tpu.core_type = #tpu.core_type<tc>, window_params = [{transform_indices = @transform_0, window_bounds = array<i64: 8, 16, 128>}, {pipeline_mode = #tpu.pipeline_mode<synchronous>, transform_indices = @transform_1, window_bounds = array<i64: 4352, 128>}, {pipeline_mode = #tpu.pipeline_mode<synchronous>, transform_indices = @transform_2, window_bounds = array<i64: 34, 128>}, {transform_indices = @transform_3, window_bounds = array<i64: 8, 16, 128>}]} {
    %cst = arith.constant 0.000000e+00 : f32
    %0 = vector.broadcast %cst : f32 to vector<8x9x128xf32>
    %c0 = arith.constant 0 : index
    %c0_0 = arith.constant 0 : index
    %c0_1 = arith.constant 0 : index
    %1 = vector.load %arg5[%c0, %c0_0, %c0_1] : memref<8x34x128xf32, #tpu.memory_space<vmem>>, vector<8x9x128xf32>
    tpu.vector_store %arg5[%c0, %c0_0, %c0_1], %0 {strides = array<i32>} : memref<8x34x128xf32, #tpu.memory_space<vmem>>, vector<8x9x128xf32>,
    %cst_2 = arith.constant 0.000000e+00 : f32
    %2 = vector.broadcast %cst_2 : f32 to vector<8x9x128xf32>
    %c0_3 = arith.constant 0 : index
    %c25 = arith.constant 25 : index
    %c0_4 = arith.constant 0 : index
    %3 = vector.load %arg5[%c0_3, %c25, %c0_4] : memref<8x34x128xf32, #tpu.memory_space<vmem>>, vector<8x9x128xf32>
    tpu.vector_store %arg5[%c0_3, %c25, %c0_4], %2 {strides = array<i32>} : memref<8x34x128xf32, #tpu.memory_space<vmem>>, vector<8x9x128xf32>,
    %c0_5 = arith.constant 0 : index
    %c0_6 = arith.constant 0 : index
    %c0_7 = arith.constant 0 : index
    %4 = vector.load %arg1[%c0_5, %c0_6, %c0_7] : memref<8x16x128xbf16, #tpu.memory_space<vmem>>, vector<8x16x128xbf16>
    %5 = arith.extf %4 : vector<8x16x128xbf16> to vector<8x16x128xf32>
    %6 = vector.shape_cast %5 : vector<8x16x128xf32> to vector<128x128xf32>
    %7 = arith.truncf %6 : vector<128x128xf32> to vector<128x128xbf16>
    %c256 = arith.constant 256 : index
    %c0_8 = arith.constant 0 : index
    %8 = vector.load %arg2[%c256, %c0_8] : memref<4352x128xbf16, #tpu.memory_space<vmem>>, vector<128x128xbf16>
    %cst_9 = arith.constant dense<0.000000e+00> : vector<128x128xf32>
    %9 = tpu.matmul %7, %8, %cst_9 {dimension_numbers = #tpu.dot_dimension_numbers<[1], [0], [0], [1], [0, 0, 1, 1], [], []>} : vector<128x128xbf16>, vector<128x128xbf16>, vector<128x128xf32> -> vector<128x128xf32>
    %c0_10 = arith.constant 0 : index
    %c0_11 = arith.constant 0 : index
    %10 = vector.load %arg3[%c0_10, %c0_11] : memref<34x128xf32, #tpu.memory_space<vmem>>, vector<1x128xf32>
    %c1 = arith.constant 1 : index
    %c0_12 = arith.constant 0 : index
    %11 = vector.load %arg3[%c1, %c0_12] : memref<34x128xf32, #tpu.memory_space<vmem>>, vector<1x128xf32>
    %12 = vector.broadcast %10 : vector<1x128xf32> to vector<128x128xf32>
    %13 = arith.mulf %9, %12 : vector<128x128xf32>
    %14 = vector.broadcast %11 : vector<1x128xf32> to vector<128x128xf32>
    %15 = arith.addf %13, %14 : vector<128x128xf32>
    %cst_13 = arith.constant 0.000000e+00 : f32
    %16 = vector.broadcast %cst_13 : f32 to vector<128x128xf32>
    %17 = arith.maximumf %15, %16 : vector<128x128xf32>
    %18 = vector.shape_cast %17 : vector<128x128xf32> to vector<8x16x128xf32>
    %c0_14 = arith.constant 0 : index
    %c9 = arith.constant 9 : index
    %c0_15 = arith.constant 0 : index
    %19 = vector.load %arg5[%c0_14, %c9, %c0_15] : memref<8x34x128xf32, #tpu.memory_space<vmem>>, vector<8x16x128xf32>
    tpu.vector_store %arg5[%c0_14, %c9, %c0_15], %18 {strides = array<i32>} : memref<8x34x128xf32, #tpu.memory_space<vmem>>, vector<8x16x128xf32>,
    %c0_16 = arith.constant 0 : index
    %c8 = arith.constant 8 : index
    %c0_17 = arith.constant 0 : index
    %20 = vector.load %arg5[%c0_16, %c8, %c0_17] : memref<8x34x128xf32, #tpu.memory_space<vmem>>, vector<8x16x128xf32>
    %21 = vector.shape_cast %20 : vector<8x16x128xf32> to vector<128x128xf32>
    %c0_18 = arith.constant 0 : index
    %c10 = arith.constant 10 : index
    %c0_19 = arith.constant 0 : index
    %22 = vector.load %arg5[%c0_18, %c10, %c0_19] : memref<8x34x128xf32, #tpu.memory_space<vmem>>, vector<8x16x128xf32>
    %23 = vector.shape_cast %22 : vector<8x16x128xf32> to vector<128x128xf32>
    %24 = tpu.concatenate %21, %17, %23 in 1 : vector<128x128xf32>, vector<128x128xf32>, vector<128x128xf32> -> vector<128x384xf32>
    %25 = arith.truncf %24 : vector<128x384xf32> to vector<128x384xbf16>
    %c384 = arith.constant 384 : index
    %c0_20 = arith.constant 0 : index
    %26 = vector.load %arg2[%c384, %c0_20] : memref<4352x128xbf16, #tpu.memory_space<vmem>>, vector<384x128xbf16>
    %cst_21 = arith.constant dense<0.000000e+00> : vector<128x128xf32>
    %27 = tpu.matmul %25, %26, %cst_21 {dimension_numbers = #tpu.dot_dimension_numbers<[1], [0], [0], [1], [0, 0, 1, 1], [], []>} : vector<128x384xbf16>, vector<384x128xbf16>, vector<128x128xf32> -> vector<128x128xf32>
    %c2 = arith.constant 2 : index
    %c0_22 = arith.constant 0 : index
    %28 = vector.load %arg3[%c2, %c0_22] : memref<34x128xf32, #tpu.memory_space<vmem>>, vector<1x128xf32>
    %c3 = arith.constant 3 : index
    %c0_23 = arith.constant 0 : index
    %29 = vector.load %arg3[%c3, %c0_23] : memref<34x128xf32, #tpu.memory_space<vmem>>, vector<1x128xf32>
    %30 = vector.broadcast %28 : vector<1x128xf32> to vector<128x128xf32>
    %31 = arith.mulf %27, %30 : vector<128x128xf32>
    %32 = vector.broadcast %29 : vector<1x128xf32> to vector<128x128xf32>
    %33 = arith.addf %31, %32 : vector<128x128xf32>
    %cst_24 = arith.constant 0.000000e+00 : f32
    %34 = vector.broadcast %cst_24 : f32 to vector<128x128xf32>
    %35 = arith.maximumf %33, %34 : vector<128x128xf32>
    %36 = vector.shape_cast %35 : vector<128x128xf32> to vector<8x16x128xf32>
    %c0_25 = arith.constant 0 : index
    %c9_26 = arith.constant 9 : index
    %c0_27 = arith.constant 0 : index
    %37 = vector.load %arg5[%c0_25, %c9_26, %c0_27] : memref<8x34x128xf32, #tpu.memory_space<vmem>>, vector<8x16x128xf32>
    tpu.vector_store %arg5[%c0_25, %c9_26, %c0_27], %36 {strides = array<i32>} : memref<8x34x128xf32, #tpu.memory_space<vmem>>, vector<8x16x128xf32>,
    %c0_28 = arith.constant 0 : index
    %c8_29 = arith.constant 8 : index
    %c0_30 = arith.constant 0 : index
    %38 = vector.load %arg5[%c0_28, %c8_29, %c0_30] : memref<8x34x128xf32, #tpu.memory_space<vmem>>, vector<8x16x128xf32>
    %39 = vector.shape_cast %38 : vector<8x16x128xf32> to vector<128x128xf32>
    %c0_31 = arith.constant 0 : index
    %c10_32 = arith.constant 10 : index
    %c0_33 = arith.constant 0 : index
    %40 = vector.load %arg5[%c0_31, %c10_32, %c0_33] : memref<8x34x128xf32, #tpu.memory_space<vmem>>, vector<8x16x128xf32>
    %41 = vector.shape_cast %40 : vector<8x16x128xf32> to vector<128x128xf32>
    %42 = tpu.concatenate %39, %35, %41 in 1 : vector<128x128xf32>, vector<128x128xf32>, vector<128x128xf32> -> vector<128x384xf32>
    %43 = arith.truncf %42 : vector<128x384xf32> to vector<128x384xbf16>
    %c768 = arith.constant 768 : index
    %c0_34 = arith.constant 0 : index
    %44 = vector.load %arg2[%c768, %c0_34] : memref<4352x128xbf16, #tpu.memory_space<vmem>>, vector<384x128xbf16>
    %cst_35 = arith.constant dense<0.000000e+00> : vector<128x128xf32>
    %45 = tpu.matmul %43, %44, %cst_35 {dimension_numbers = #tpu.dot_dimension_numbers<[1], [0], [0], [1], [0, 0, 1, 1], [], []>} : vector<128x384xbf16>, vector<384x128xbf16>, vector<128x128xf32> -> vector<128x128xf32>
    %c4 = arith.constant 4 : index
    %c0_36 = arith.constant 0 : index
    %46 = vector.load %arg3[%c4, %c0_36] : memref<34x128xf32, #tpu.memory_space<vmem>>, vector<1x128xf32>
    %c5 = arith.constant 5 : index
    %c0_37 = arith.constant 0 : index
    %47 = vector.load %arg3[%c5, %c0_37] : memref<34x128xf32, #tpu.memory_space<vmem>>, vector<1x128xf32>
    %48 = vector.broadcast %46 : vector<1x128xf32> to vector<128x128xf32>
    %49 = arith.mulf %45, %48 : vector<128x128xf32>
    %50 = vector.broadcast %47 : vector<1x128xf32> to vector<128x128xf32>
    %51 = arith.addf %49, %50 : vector<128x128xf32>
    %cst_38 = arith.constant 0.000000e+00 : f32
    %52 = vector.broadcast %cst_38 : f32 to vector<128x128xf32>
    %53 = arith.maximumf %51, %52 : vector<128x128xf32>
    %54 = arith.truncf %53 : vector<128x128xf32> to vector<128x128xbf16>
    %c1152 = arith.constant 1152 : index
    %c0_39 = arith.constant 0 : index
    %55 = vector.load %arg2[%c1152, %c0_39] : memref<4352x128xbf16, #tpu.memory_space<vmem>>, vector<128x128xbf16>
    %cst_40 = arith.constant dense<0.000000e+00> : vector<128x128xf32>
    %56 = tpu.matmul %54, %55, %cst_40 {dimension_numbers = #tpu.dot_dimension_numbers<[1], [0], [0], [1], [0, 0, 1, 1], [], []>} : vector<128x128xbf16>, vector<128x128xbf16>, vector<128x128xf32> -> vector<128x128xf32>
    %c6 = arith.constant 6 : index
    %c0_41 = arith.constant 0 : index
    %57 = vector.load %arg3[%c6, %c0_41] : memref<34x128xf32, #tpu.memory_space<vmem>>, vector<1x128xf32>
    %c7 = arith.constant 7 : index
    %c0_42 = arith.constant 0 : index
    %58 = vector.load %arg3[%c7, %c0_42] : memref<34x128xf32, #tpu.memory_space<vmem>>, vector<1x128xf32>
    %59 = vector.broadcast %57 : vector<1x128xf32> to vector<128x128xf32>
    %60 = arith.mulf %56, %59 : vector<128x128xf32>
    %61 = vector.broadcast %58 : vector<1x128xf32> to vector<128x128xf32>
    %62 = arith.addf %60, %61 : vector<128x128xf32>
    %cst_43 = arith.constant 0.000000e+00 : f32
    %63 = vector.broadcast %cst_43 : f32 to vector<128x128xf32>
    %64 = arith.maximumf %62, %63 : vector<128x128xf32>
    %65 = arith.truncf %64 : vector<128x128xf32> to vector<128x128xbf16>
    %66 = vector.shape_cast %6 : vector<128x128xf32> to vector<8x16x128xf32>
    %c0_44 = arith.constant 0 : index
    %c9_45 = arith.constant 9 : index
    %c0_46 = arith.constant 0 : index
    %67 = vector.load %arg5[%c0_44, %c9_45, %c0_46] : memref<8x34x128xf32, #tpu.memory_space<vmem>>, vector<8x16x128xf32>
    tpu.vector_store %arg5[%c0_44, %c9_45, %c0_46], %66 {strides = array<i32>} : memref<8x34x128xf32, #tpu.memory_space<vmem>>, vector<8x16x128xf32>,
    %c0_47 = arith.constant 0 : index
    %c8_48 = arith.constant 8 : index
    %c0_49 = arith.constant 0 : index
    %68 = vector.load %arg5[%c0_47, %c8_48, %c0_49] : memref<8x34x128xf32, #tpu.memory_space<vmem>>, vector<8x16x128xf32>
    %69 = vector.shape_cast %68 : vector<8x16x128xf32> to vector<128x128xf32>
    %70 = arith.addf %69, %6 : vector<128x128xf32>
    %c0_50 = arith.constant 0 : index
    %c10_51 = arith.constant 10 : index
    %c0_52 = arith.constant 0 : index
    %71 = vector.load %arg5[%c0_50, %c10_51, %c0_52] : memref<8x34x128xf32, #tpu.memory_space<vmem>>, vector<8x16x128xf32>
    %72 = vector.shape_cast %71 : vector<8x16x128xf32> to vector<128x128xf32>
    %73 = arith.addf %70, %72 : vector<128x128xf32>
    %74 = arith.truncf %73 : vector<128x128xf32> to vector<128x128xbf16>
    %c0_53 = arith.constant 0 : index
    %c0_54 = arith.constant 0 : index
    %75 = vector.load %arg2[%c0_53, %c0_54] : memref<4352x128xbf16, #tpu.memory_space<vmem>>, vector<128x128xbf16>
    %cst_55 = arith.constant dense<0.000000e+00> : vector<128x128xf32>
    %76 = tpu.matmul %74, %75, %cst_55 {dimension_numbers = #tpu.dot_dimension_numbers<[1], [0], [0], [1], [0, 0, 1, 1], [], []>} : vector<128x128xbf16>, vector<128x128xbf16>, vector<128x128xf32> -> vector<128x128xf32>
    %77 = arith.truncf %76 : vector<128x128xf32> to vector<128x128xbf16>
    %c1280 = arith.constant 1280 : index
    %c0_56 = arith.constant 0 : index
    %78 = vector.load %arg2[%c1280, %c0_56] : memref<4352x128xbf16, #tpu.memory_space<vmem>>, vector<128x128xbf16>
    %cst_57 = arith.constant dense<0.000000e+00> : vector<128x128xf32>
    %79 = tpu.matmul %77, %78, %cst_57 {dimension_numbers = #tpu.dot_dimension_numbers<[1], [0], [0], [1], [0, 0, 1, 1], [], []>} : vector<128x128xbf16>, vector<128x128xbf16>, vector<128x128xf32> -> vector<128x128xf32>
    %c8_58 = arith.constant 8 : index
    %c0_59 = arith.constant 0 : index
    %80 = vector.load %arg3[%c8_58, %c0_59] : memref<34x128xf32, #tpu.memory_space<vmem>>, vector<1x128xf32>
    %c9_60 = arith.constant 9 : index
    %c0_61 = arith.constant 0 : index
    %81 = vector.load %arg3[%c9_60, %c0_61] : memref<34x128xf32, #tpu.memory_space<vmem>>, vector<1x128xf32>
    %82 = vector.broadcast %80 : vector<1x128xf32> to vector<128x128xf32>
    %83 = arith.mulf %79, %82 : vector<128x128xf32>
    %84 = vector.broadcast %81 : vector<1x128xf32> to vector<128x128xf32>
    %85 = arith.addf %83, %84 : vector<128x128xf32>
    %cst_62 = arith.constant 0.000000e+00 : f32
    %86 = vector.broadcast %cst_62 : f32 to vector<128x128xf32>
    %87 = arith.maximumf %85, %86 : vector<128x128xf32>
    %88 = vector.shape_cast %87 : vector<128x128xf32> to vector<8x16x128xf32>
    %c0_63 = arith.constant 0 : index
    %c9_64 = arith.constant 9 : index
    %c0_65 = arith.constant 0 : index
    %89 = vector.load %arg5[%c0_63, %c9_64, %c0_65] : memref<8x34x128xf32, #tpu.memory_space<vmem>>, vector<8x16x128xf32>
    tpu.vector_store %arg5[%c0_63, %c9_64, %c0_65], %88 {strides = array<i32>} : memref<8x34x128xf32, #tpu.memory_space<vmem>>, vector<8x16x128xf32>,
    %c0_66 = arith.constant 0 : index
    %c6_67 = arith.constant 6 : index
    %c0_68 = arith.constant 0 : index
    %90 = vector.load %arg5[%c0_66, %c6_67, %c0_68] : memref<8x34x128xf32, #tpu.memory_space<vmem>>, vector<8x16x128xf32>
    %91 = vector.shape_cast %90 : vector<8x16x128xf32> to vector<128x128xf32>
    %c0_69 = arith.constant 0 : index
    %c12 = arith.constant 12 : index
    %c0_70 = arith.constant 0 : index
    %92 = vector.load %arg5[%c0_69, %c12, %c0_70] : memref<8x34x128xf32, #tpu.memory_space<vmem>>, vector<8x16x128xf32>
    %93 = vector.shape_cast %92 : vector<8x16x128xf32> to vector<128x128xf32>
    %94 = tpu.concatenate %91, %87, %93 in 1 : vector<128x128xf32>, vector<128x128xf32>, vector<128x128xf32> -> vector<128x384xf32>
    %95 = arith.truncf %94 : vector<128x384xf32> to vector<128x384xbf16>
    %c1408 = arith.constant 1408 : index
    %c0_71 = arith.constant 0 : index
    %96 = vector.load %arg2[%c1408, %c0_71] : memref<4352x128xbf16, #tpu.memory_space<vmem>>, vector<384x128xbf16>
    %cst_72 = arith.constant dense<0.000000e+00> : vector<128x128xf32>
    %97 = tpu.matmul %95, %96, %cst_72 {dimension_numbers = #tpu.dot_dimension_numbers<[1], [0], [0], [1], [0, 0, 1, 1], [], []>} : vector<128x384xbf16>, vector<384x128xbf16>, vector<128x128xf32> -> vector<128x128xf32>
    %c10_73 = arith.constant 10 : index
    %c0_74 = arith.constant 0 : index
    %98 = vector.load %arg3[%c10_73, %c0_74] : memref<34x128xf32, #tpu.memory_space<vmem>>, vector<1x128xf32>
    %c11 = arith.constant 11 : index
    %c0_75 = arith.constant 0 : index
    %99 = vector.load %arg3[%c11, %c0_75] : memref<34x128xf32, #tpu.memory_space<vmem>>, vector<1x128xf32>
    %100 = vector.broadcast %98 : vector<1x128xf32> to vector<128x128xf32>
    %101 = arith.mulf %97, %100 : vector<128x128xf32>
    %102 = vector.broadcast %99 : vector<1x128xf32> to vector<128x128xf32>
    %103 = arith.addf %101, %102 : vector<128x128xf32>
    %cst_76 = arith.constant 0.000000e+00 : f32
    %104 = vector.broadcast %cst_76 : f32 to vector<128x128xf32>
    %105 = arith.maximumf %103, %104 : vector<128x128xf32>
    %106 = vector.shape_cast %105 : vector<128x128xf32> to vector<8x16x128xf32>
    %c0_77 = arith.constant 0 : index
    %c9_78 = arith.constant 9 : index
    %c0_79 = arith.constant 0 : index
    %107 = vector.load %arg5[%c0_77, %c9_78, %c0_79] : memref<8x34x128xf32, #tpu.memory_space<vmem>>, vector<8x16x128xf32>
    tpu.vector_store %arg5[%c0_77, %c9_78, %c0_79], %106 {strides = array<i32>} : memref<8x34x128xf32, #tpu.memory_space<vmem>>, vector<8x16x128xf32>,
    %c0_80 = arith.constant 0 : index
    %c6_81 = arith.constant 6 : index
    %c0_82 = arith.constant 0 : index
    %108 = vector.load %arg5[%c0_80, %c6_81, %c0_82] : memref<8x34x128xf32, #tpu.memory_space<vmem>>, vector<8x16x128xf32>
    %109 = vector.shape_cast %108 : vector<8x16x128xf32> to vector<128x128xf32>
    %c0_83 = arith.constant 0 : index
    %c12_84 = arith.constant 12 : index
    %c0_85 = arith.constant 0 : index
    %110 = vector.load %arg5[%c0_83, %c12_84, %c0_85] : memref<8x34x128xf32, #tpu.memory_space<vmem>>, vector<8x16x128xf32>
    %111 = vector.shape_cast %110 : vector<8x16x128xf32> to vector<128x128xf32>
    %112 = tpu.concatenate %109, %105, %111 in 1 : vector<128x128xf32>, vector<128x128xf32>, vector<128x128xf32> -> vector<128x384xf32>
    %113 = arith.truncf %112 : vector<128x384xf32> to vector<128x384xbf16>
    %c1792 = arith.constant 1792 : index
    %c0_86 = arith.constant 0 : index
    %114 = vector.load %arg2[%c1792, %c0_86] : memref<4352x128xbf16, #tpu.memory_space<vmem>>, vector<384x128xbf16>
    %cst_87 = arith.constant dense<0.000000e+00> : vector<128x128xf32>
    %115 = tpu.matmul %113, %114, %cst_87 {dimension_numbers = #tpu.dot_dimension_numbers<[1], [0], [0], [1], [0, 0, 1, 1], [], []>} : vector<128x384xbf16>, vector<384x128xbf16>, vector<128x128xf32> -> vector<128x128xf32>
    %c12_88 = arith.constant 12 : index
    %c0_89 = arith.constant 0 : index
    %116 = vector.load %arg3[%c12_88, %c0_89] : memref<34x128xf32, #tpu.memory_space<vmem>>, vector<1x128xf32>
    %c13 = arith.constant 13 : index
    %c0_90 = arith.constant 0 : index
    %117 = vector.load %arg3[%c13, %c0_90] : memref<34x128xf32, #tpu.memory_space<vmem>>, vector<1x128xf32>
    %118 = vector.broadcast %116 : vector<1x128xf32> to vector<128x128xf32>
    %119 = arith.mulf %115, %118 : vector<128x128xf32>
    %120 = vector.broadcast %117 : vector<1x128xf32> to vector<128x128xf32>
    %121 = arith.addf %119, %120 : vector<128x128xf32>
    %cst_91 = arith.constant 0.000000e+00 : f32
    %122 = vector.broadcast %cst_91 : f32 to vector<128x128xf32>
    %123 = arith.maximumf %121, %122 : vector<128x128xf32>
    %124 = arith.truncf %123 : vector<128x128xf32> to vector<128x128xbf16>
    %c2176 = arith.constant 2176 : index
    %c0_92 = arith.constant 0 : index
    %125 = vector.load %arg2[%c2176, %c0_92] : memref<4352x128xbf16, #tpu.memory_space<vmem>>, vector<128x128xbf16>
    %cst_93 = arith.constant dense<0.000000e+00> : vector<128x128xf32>
    %126 = tpu.matmul %124, %125, %cst_93 {dimension_numbers = #tpu.dot_dimension_numbers<[1], [0], [0], [1], [0, 0, 1, 1], [], []>} : vector<128x128xbf16>, vector<128x128xbf16>, vector<128x128xf32> -> vector<128x128xf32>
    %c14 = arith.constant 14 : index
    %c0_94 = arith.constant 0 : index
    %127 = vector.load %arg3[%c14, %c0_94] : memref<34x128xf32, #tpu.memory_space<vmem>>, vector<1x128xf32>
    %c15 = arith.constant 15 : index
    %c0_95 = arith.constant 0 : index
    %128 = vector.load %arg3[%c15, %c0_95] : memref<34x128xf32, #tpu.memory_space<vmem>>, vector<1x128xf32>
    %129 = vector.broadcast %127 : vector<1x128xf32> to vector<128x128xf32>
    %130 = arith.mulf %126, %129 : vector<128x128xf32>
    %131 = vector.broadcast %128 : vector<1x128xf32> to vector<128x128xf32>
    %132 = arith.addf %130, %131 : vector<128x128xf32>
    %cst_96 = arith.constant 0.000000e+00 : f32
    %133 = vector.broadcast %cst_96 : f32 to vector<128x128xf32>
    %134 = arith.maximumf %132, %133 : vector<128x128xf32>
    %135 = arith.truncf %134 : vector<128x128xf32> to vector<128x128xbf16>
    %136 = vector.shape_cast %76 : vector<128x128xf32> to vector<8x16x128xf32>
    %c0_97 = arith.constant 0 : index
    %c9_98 = arith.constant 9 : index
    %c0_99 = arith.constant 0 : index
    %137 = vector.load %arg5[%c0_97, %c9_98, %c0_99] : memref<8x34x128xf32, #tpu.memory_space<vmem>>, vector<8x16x128xf32>
    tpu.vector_store %arg5[%c0_97, %c9_98, %c0_99], %136 {strides = array<i32>} : memref<8x34x128xf32, #tpu.memory_space<vmem>>, vector<8x16x128xf32>,
    %c0_100 = arith.constant 0 : index
    %c8_101 = arith.constant 8 : index
    %c0_102 = arith.constant 0 : index
    %138 = vector.load %arg5[%c0_100, %c8_101, %c0_102] : memref<8x34x128xf32, #tpu.memory_space<vmem>>, vector<8x16x128xf32>
    %139 = vector.shape_cast %138 : vector<8x16x128xf32> to vector<128x128xf32>
    %140 = arith.addf %139, %76 : vector<128x128xf32>
    %c0_103 = arith.constant 0 : index
    %c10_104 = arith.constant 10 : index
    %c0_105 = arith.constant 0 : index
    %141 = vector.load %arg5[%c0_103, %c10_104, %c0_105] : memref<8x34x128xf32, #tpu.memory_space<vmem>>, vector<8x16x128xf32>
    %142 = vector.shape_cast %141 : vector<8x16x128xf32> to vector<128x128xf32>
    %143 = arith.addf %140, %142 : vector<128x128xf32>
    %144 = arith.truncf %143 : vector<128x128xf32> to vector<128x128xbf16>
    %c0_106 = arith.constant 0 : index
    %c0_107 = arith.constant 0 : index
    %145 = vector.load %arg2[%c0_106, %c0_107] : memref<4352x128xbf16, #tpu.memory_space<vmem>>, vector<128x128xbf16>
    %cst_108 = arith.constant dense<0.000000e+00> : vector<128x128xf32>
    %146 = tpu.matmul %144, %145, %cst_108 {dimension_numbers = #tpu.dot_dimension_numbers<[1], [0], [0], [1], [0, 0, 1, 1], [], []>} : vector<128x128xbf16>, vector<128x128xbf16>, vector<128x128xf32> -> vector<128x128xf32>
    %147 = arith.truncf %146 : vector<128x128xf32> to vector<128x128xbf16>
    %c2304 = arith.constant 2304 : index
    %c0_109 = arith.constant 0 : index
    %148 = vector.load %arg2[%c2304, %c0_109] : memref<4352x128xbf16, #tpu.memory_space<vmem>>, vector<128x128xbf16>
    %cst_110 = arith.constant dense<0.000000e+00> : vector<128x128xf32>
    %149 = tpu.matmul %147, %148, %cst_110 {dimension_numbers = #tpu.dot_dimension_numbers<[1], [0], [0], [1], [0, 0, 1, 1], [], []>} : vector<128x128xbf16>, vector<128x128xbf16>, vector<128x128xf32> -> vector<128x128xf32>
    %c16 = arith.constant 16 : index
    %c0_111 = arith.constant 0 : index
    %150 = vector.load %arg3[%c16, %c0_111] : memref<34x128xf32, #tpu.memory_space<vmem>>, vector<1x128xf32>
    %c17 = arith.constant 17 : index
    %c0_112 = arith.constant 0 : index
    %151 = vector.load %arg3[%c17, %c0_112] : memref<34x128xf32, #tpu.memory_space<vmem>>, vector<1x128xf32>
    %152 = vector.broadcast %150 : vector<1x128xf32> to vector<128x128xf32>
    %153 = arith.mulf %149, %152 : vector<128x128xf32>
    %154 = vector.broadcast %151 : vector<1x128xf32> to vector<128x128xf32>
    %155 = arith.addf %153, %154 : vector<128x128xf32>
    %cst_113 = arith.constant 0.000000e+00 : f32
    %156 = vector.broadcast %cst_113 : f32 to vector<128x128xf32>
    %157 = arith.maximumf %155, %156 : vector<128x128xf32>
    %158 = vector.shape_cast %157 : vector<128x128xf32> to vector<8x16x128xf32>
    %c0_114 = arith.constant 0 : index
    %c9_115 = arith.constant 9 : index
    %c0_116 = arith.constant 0 : index
    %159 = vector.load %arg5[%c0_114, %c9_115, %c0_116] : memref<8x34x128xf32, #tpu.memory_space<vmem>>, vector<8x16x128xf32>
    tpu.vector_store %arg5[%c0_114, %c9_115, %c0_116], %158 {strides = array<i32>} : memref<8x34x128xf32, #tpu.memory_space<vmem>>, vector<8x16x128xf32>,
    %c0_117 = arith.constant 0 : index
    %c0_118 = arith.constant 0 : index
    %c0_119 = arith.constant 0 : index
    %160 = vector.load %arg5[%c0_117, %c0_118, %c0_119] : memref<8x34x128xf32, #tpu.memory_space<vmem>>, vector<8x16x128xf32>
    %161 = vector.shape_cast %160 : vector<8x16x128xf32> to vector<128x128xf32>
    %c0_120 = arith.constant 0 : index
    %c18 = arith.constant 18 : index
    %c0_121 = arith.constant 0 : index
    %162 = vector.load %arg5[%c0_120, %c18, %c0_121] : memref<8x34x128xf32, #tpu.memory_space<vmem>>, vector<8x16x128xf32>
    %163 = vector.shape_cast %162 : vector<8x16x128xf32> to vector<128x128xf32>
    %164 = tpu.concatenate %161, %157, %163 in 1 : vector<128x128xf32>, vector<128x128xf32>, vector<128x128xf32> -> vector<128x384xf32>
    %165 = arith.truncf %164 : vector<128x384xf32> to vector<128x384xbf16>
    %c2432 = arith.constant 2432 : index
    %c0_122 = arith.constant 0 : index
    %166 = vector.load %arg2[%c2432, %c0_122] : memref<4352x128xbf16, #tpu.memory_space<vmem>>, vector<384x128xbf16>
    %cst_123 = arith.constant dense<0.000000e+00> : vector<128x128xf32>
    %167 = tpu.matmul %165, %166, %cst_123 {dimension_numbers = #tpu.dot_dimension_numbers<[1], [0], [0], [1], [0, 0, 1, 1], [], []>} : vector<128x384xbf16>, vector<384x128xbf16>, vector<128x128xf32> -> vector<128x128xf32>
    %c18_124 = arith.constant 18 : index
    %c0_125 = arith.constant 0 : index
    %168 = vector.load %arg3[%c18_124, %c0_125] : memref<34x128xf32, #tpu.memory_space<vmem>>, vector<1x128xf32>
    %c19 = arith.constant 19 : index
    %c0_126 = arith.constant 0 : index
    %169 = vector.load %arg3[%c19, %c0_126] : memref<34x128xf32, #tpu.memory_space<vmem>>, vector<1x128xf32>
    %170 = vector.broadcast %168 : vector<1x128xf32> to vector<128x128xf32>
    %171 = arith.mulf %167, %170 : vector<128x128xf32>
    %172 = vector.broadcast %169 : vector<1x128xf32> to vector<128x128xf32>
    %173 = arith.addf %171, %172 : vector<128x128xf32>
    %cst_127 = arith.constant 0.000000e+00 : f32
    %174 = vector.broadcast %cst_127 : f32 to vector<128x128xf32>
    %175 = arith.maximumf %173, %174 : vector<128x128xf32>
    %176 = vector.shape_cast %175 : vector<128x128xf32> to vector<8x16x128xf32>
    %c0_128 = arith.constant 0 : index
    %c9_129 = arith.constant 9 : index
    %c0_130 = arith.constant 0 : index
    %177 = vector.load %arg5[%c0_128, %c9_129, %c0_130] : memref<8x34x128xf32, #tpu.memory_space<vmem>>, vector<8x16x128xf32>
    tpu.vector_store %arg5[%c0_128, %c9_129, %c0_130], %176 {strides = array<i32>} : memref<8x34x128xf32, #tpu.memory_space<vmem>>, vector<8x16x128xf32>,
    %c0_131 = arith.constant 0 : index
    %c0_132 = arith.constant 0 : index
    %c0_133 = arith.constant 0 : index
    %178 = vector.load %arg5[%c0_131, %c0_132, %c0_133] : memref<8x34x128xf32, #tpu.memory_space<vmem>>, vector<8x16x128xf32>
    %179 = vector.shape_cast %178 : vector<8x16x128xf32> to vector<128x128xf32>
    %c0_134 = arith.constant 0 : index
    %c18_135 = arith.constant 18 : index
    %c0_136 = arith.constant 0 : index
    %180 = vector.load %arg5[%c0_134, %c18_135, %c0_136] : memref<8x34x128xf32, #tpu.memory_space<vmem>>, vector<8x16x128xf32>
    %181 = vector.shape_cast %180 : vector<8x16x128xf32> to vector<128x128xf32>
    %182 = tpu.concatenate %179, %175, %181 in 1 : vector<128x128xf32>, vector<128x128xf32>, vector<128x128xf32> -> vector<128x384xf32>
    %183 = arith.truncf %182 : vector<128x384xf32> to vector<128x384xbf16>
    %c2816 = arith.constant 2816 : index
    %c0_137 = arith.constant 0 : index
    %184 = vector.load %arg2[%c2816, %c0_137] : memref<4352x128xbf16, #tpu.memory_space<vmem>>, vector<384x128xbf16>
    %cst_138 = arith.constant dense<0.000000e+00> : vector<128x128xf32>
    %185 = tpu.matmul %183, %184, %cst_138 {dimension_numbers = #tpu.dot_dimension_numbers<[1], [0], [0], [1], [0, 0, 1, 1], [], []>} : vector<128x384xbf16>, vector<384x128xbf16>, vector<128x128xf32> -> vector<128x128xf32>
    %c20 = arith.constant 20 : index
    %c0_139 = arith.constant 0 : index
    %186 = vector.load %arg3[%c20, %c0_139] : memref<34x128xf32, #tpu.memory_space<vmem>>, vector<1x128xf32>
    %c21 = arith.constant 21 : index
    %c0_140 = arith.constant 0 : index
    %187 = vector.load %arg3[%c21, %c0_140] : memref<34x128xf32, #tpu.memory_space<vmem>>, vector<1x128xf32>
    %188 = vector.broadcast %186 : vector<1x128xf32> to vector<128x128xf32>
    %189 = arith.mulf %185, %188 : vector<128x128xf32>
    %190 = vector.broadcast %187 : vector<1x128xf32> to vector<128x128xf32>
    %191 = arith.addf %189, %190 : vector<128x128xf32>
    %cst_141 = arith.constant 0.000000e+00 : f32
    %192 = vector.broadcast %cst_141 : f32 to vector<128x128xf32>
    %193 = arith.maximumf %191, %192 : vector<128x128xf32>
    %194 = arith.truncf %193 : vector<128x128xf32> to vector<128x128xbf16>
    %c3200 = arith.constant 3200 : index
    %c0_142 = arith.constant 0 : index
    %195 = vector.load %arg2[%c3200, %c0_142] : memref<4352x128xbf16, #tpu.memory_space<vmem>>, vector<128x128xbf16>
    %cst_143 = arith.constant dense<0.000000e+00> : vector<128x128xf32>
    %196 = tpu.matmul %194, %195, %cst_143 {dimension_numbers = #tpu.dot_dimension_numbers<[1], [0], [0], [1], [0, 0, 1, 1], [], []>} : vector<128x128xbf16>, vector<128x128xbf16>, vector<128x128xf32> -> vector<128x128xf32>
    %c22 = arith.constant 22 : index
    %c0_144 = arith.constant 0 : index
    %197 = vector.load %arg3[%c22, %c0_144] : memref<34x128xf32, #tpu.memory_space<vmem>>, vector<1x128xf32>
    %c23 = arith.constant 23 : index
    %c0_145 = arith.constant 0 : index
    %198 = vector.load %arg3[%c23, %c0_145] : memref<34x128xf32, #tpu.memory_space<vmem>>, vector<1x128xf32>
    %199 = vector.broadcast %197 : vector<1x128xf32> to vector<128x128xf32>
    %200 = arith.mulf %196, %199 : vector<128x128xf32>
    %201 = vector.broadcast %198 : vector<1x128xf32> to vector<128x128xf32>
    %202 = arith.addf %200, %201 : vector<128x128xf32>
    %cst_146 = arith.constant 0.000000e+00 : f32
    %203 = vector.broadcast %cst_146 : f32 to vector<128x128xf32>
    %204 = arith.maximumf %202, %203 : vector<128x128xf32>
    %205 = arith.truncf %204 : vector<128x128xf32> to vector<128x128xbf16>
    %206 = vector.shape_cast %146 : vector<128x128xf32> to vector<8x16x128xf32>
    %c0_147 = arith.constant 0 : index
    %c9_148 = arith.constant 9 : index
    %c0_149 = arith.constant 0 : index
    %207 = vector.load %arg5[%c0_147, %c9_148, %c0_149] : memref<8x34x128xf32, #tpu.memory_space<vmem>>, vector<8x16x128xf32>
    tpu.vector_store %arg5[%c0_147, %c9_148, %c0_149], %206 {strides = array<i32>} : memref<8x34x128xf32, #tpu.memory_space<vmem>>, vector<8x16x128xf32>,
    %c0_150 = arith.constant 0 : index
    %c8_151 = arith.constant 8 : index
    %c0_152 = arith.constant 0 : index
    %208 = vector.load %arg5[%c0_150, %c8_151, %c0_152] : memref<8x34x128xf32, #tpu.memory_space<vmem>>, vector<8x16x128xf32>
    %209 = vector.shape_cast %208 : vector<8x16x128xf32> to vector<128x128xf32>
    %210 = arith.addf %209, %146 : vector<128x128xf32>
    %c0_153 = arith.constant 0 : index
    %c10_154 = arith.constant 10 : index
    %c0_155 = arith.constant 0 : index
    %211 = vector.load %arg5[%c0_153, %c10_154, %c0_155] : memref<8x34x128xf32, #tpu.memory_space<vmem>>, vector<8x16x128xf32>
    %212 = vector.shape_cast %211 : vector<8x16x128xf32> to vector<128x128xf32>
    %213 = arith.addf %210, %212 : vector<128x128xf32>
    %214 = arith.truncf %213 : vector<128x128xf32> to vector<128x128xbf16>
    %c3328 = arith.constant 3328 : index
    %c0_156 = arith.constant 0 : index
    %215 = vector.load %arg2[%c3328, %c0_156] : memref<4352x128xbf16, #tpu.memory_space<vmem>>, vector<128x128xbf16>
    %cst_157 = arith.constant dense<0.000000e+00> : vector<128x128xf32>
    %216 = tpu.matmul %214, %215, %cst_157 {dimension_numbers = #tpu.dot_dimension_numbers<[1], [0], [0], [1], [0, 0, 1, 1], [], []>} : vector<128x128xbf16>, vector<128x128xbf16>, vector<128x128xf32> -> vector<128x128xf32>
    %c24 = arith.constant 24 : index
    %c0_158 = arith.constant 0 : index
    %217 = vector.load %arg3[%c24, %c0_158] : memref<34x128xf32, #tpu.memory_space<vmem>>, vector<1x128xf32>
    %c25_159 = arith.constant 25 : index
    %c0_160 = arith.constant 0 : index
    %218 = vector.load %arg3[%c25_159, %c0_160] : memref<34x128xf32, #tpu.memory_space<vmem>>, vector<1x128xf32>
    %219 = vector.broadcast %217 : vector<1x128xf32> to vector<128x128xf32>
    %220 = arith.mulf %216, %219 : vector<128x128xf32>
    %221 = vector.broadcast %218 : vector<1x128xf32> to vector<128x128xf32>
    %222 = arith.addf %220, %221 : vector<128x128xf32>
    %cst_161 = arith.constant 0.000000e+00 : f32
    %223 = vector.broadcast %cst_161 : f32 to vector<128x128xf32>
    %224 = arith.maximumf %222, %223 : vector<128x128xf32>
    %225 = arith.truncf %224 : vector<128x128xf32> to vector<128x128xbf16>
    %c3456 = arith.constant 3456 : index
    %c0_162 = arith.constant 0 : index
    %226 = vector.load %arg2[%c3456, %c0_162] : memref<4352x128xbf16, #tpu.memory_space<vmem>>, vector<128x128xbf16>
    %cst_163 = arith.constant dense<0.000000e+00> : vector<128x128xf32>
    %227 = tpu.matmul %225, %226, %cst_163 {dimension_numbers = #tpu.dot_dimension_numbers<[1], [0], [0], [1], [0, 0, 1, 1], [], []>} : vector<128x128xbf16>, vector<128x128xbf16>, vector<128x128xf32> -> vector<128x128xf32>
    %c26 = arith.constant 26 : index
    %c0_164 = arith.constant 0 : index
    %228 = vector.load %arg3[%c26, %c0_164] : memref<34x128xf32, #tpu.memory_space<vmem>>, vector<1x128xf32>
    %c27 = arith.constant 27 : index
    %c0_165 = arith.constant 0 : index
    %229 = vector.load %arg3[%c27, %c0_165] : memref<34x128xf32, #tpu.memory_space<vmem>>, vector<1x128xf32>
    %230 = vector.broadcast %228 : vector<1x128xf32> to vector<128x128xf32>
    %231 = arith.mulf %227, %230 : vector<128x128xf32>
    %232 = vector.broadcast %229 : vector<1x128xf32> to vector<128x128xf32>
    %233 = arith.addf %231, %232 : vector<128x128xf32>
    %cst_166 = arith.constant 0.000000e+00 : f32
    %234 = vector.broadcast %cst_166 : f32 to vector<128x128xf32>
    %235 = arith.maximumf %233, %234 : vector<128x128xf32>
    %236 = arith.truncf %235 : vector<128x128xf32> to vector<128x128xbf16>
    %c3584 = arith.constant 3584 : index
    %c0_167 = arith.constant 0 : index
    %237 = vector.load %arg2[%c3584, %c0_167] : memref<4352x128xbf16, #tpu.memory_space<vmem>>, vector<128x128xbf16>
    %cst_168 = arith.constant dense<0.000000e+00> : vector<128x128xf32>
    %238 = tpu.matmul %236, %237, %cst_168 {dimension_numbers = #tpu.dot_dimension_numbers<[1], [0], [0], [1], [0, 0, 1, 1], [], []>} : vector<128x128xbf16>, vector<128x128xbf16>, vector<128x128xf32> -> vector<128x128xf32>
    %c28 = arith.constant 28 : index
    %c0_169 = arith.constant 0 : index
    %239 = vector.load %arg3[%c28, %c0_169] : memref<34x128xf32, #tpu.memory_space<vmem>>, vector<1x128xf32>
    %c29 = arith.constant 29 : index
    %c0_170 = arith.constant 0 : index
    %240 = vector.load %arg3[%c29, %c0_170] : memref<34x128xf32, #tpu.memory_space<vmem>>, vector<1x128xf32>
    %241 = vector.broadcast %239 : vector<1x128xf32> to vector<128x128xf32>
    %242 = arith.mulf %238, %241 : vector<128x128xf32>
    %243 = vector.broadcast %240 : vector<1x128xf32> to vector<128x128xf32>
    %244 = arith.addf %242, %243 : vector<128x128xf32>
    %cst_171 = arith.constant 0.000000e+00 : f32
    %245 = vector.broadcast %cst_171 : f32 to vector<128x128xf32>
    %246 = arith.maximumf %244, %245 : vector<128x128xf32>
    %247 = arith.truncf %246 : vector<128x128xf32> to vector<128x128xbf16>
    %c3712 = arith.constant 3712 : index
    %c0_172 = arith.constant 0 : index
    %248 = vector.load %arg2[%c3712, %c0_172] : memref<4352x128xbf16, #tpu.memory_space<vmem>>, vector<128x128xbf16>
    %cst_173 = arith.constant dense<0.000000e+00> : vector<128x128xf32>
    %249 = tpu.matmul %247, %248, %cst_173 {dimension_numbers = #tpu.dot_dimension_numbers<[1], [0], [0], [1], [0, 0, 1, 1], [], []>} : vector<128x128xbf16>, vector<128x128xbf16>, vector<128x128xf32> -> vector<128x128xf32>
    %c30 = arith.constant 30 : index
    %c0_174 = arith.constant 0 : index
    %250 = vector.load %arg3[%c30, %c0_174] : memref<34x128xf32, #tpu.memory_space<vmem>>, vector<1x128xf32>
    %c31 = arith.constant 31 : index
    %c0_175 = arith.constant 0 : index
    %251 = vector.load %arg3[%c31, %c0_175] : memref<34x128xf32, #tpu.memory_space<vmem>>, vector<1x128xf32>
    %252 = vector.broadcast %250 : vector<1x128xf32> to vector<128x128xf32>
    %253 = arith.mulf %249, %252 : vector<128x128xf32>
    %254 = vector.broadcast %251 : vector<1x128xf32> to vector<128x128xf32>
    %255 = arith.addf %253, %254 : vector<128x128xf32>
    %cst_176 = arith.constant 0.000000e+00 : f32
    %256 = vector.broadcast %cst_176 : f32 to vector<128x128xf32>
    %257 = arith.maximumf %255, %256 : vector<128x128xf32>
    %258 = arith.truncf %257 : vector<128x128xf32> to vector<128x128xbf16>
    %259 = tpu.concatenate %65, %135, %205, %258 in 1 : vector<128x128xbf16>, vector<128x128xbf16>, vector<128x128xbf16>, vector<128x128xbf16> -> vector<128x512xbf16>
    %c3840 = arith.constant 3840 : index
    %c0_177 = arith.constant 0 : index
    %260 = vector.load %arg2[%c3840, %c0_177] : memref<4352x128xbf16, #tpu.memory_space<vmem>>, vector<512x128xbf16>
    %cst_178 = arith.constant dense<0.000000e+00> : vector<128x128xf32>
    %261 = tpu.matmul %259, %260, %cst_178 {dimension_numbers = #tpu.dot_dimension_numbers<[1], [0], [0], [1], [0, 0, 1, 1], [], []>} : vector<128x512xbf16>, vector<512x128xbf16>, vector<128x128xf32> -> vector<128x128xf32>
    %cst_179 = arith.constant dense<0.000000e+00> : vector<8x128xf32>
    %262 = vector.multi_reduction <add>, %5, %cst_179 [1] : vector<8x16x128xf32> to vector<8x128xf32>
    %263 = arith.truncf %262 : vector<8x128xf32> to vector<8x128xbf16>
    %c128 = arith.constant 128 : index
    %c0_180 = arith.constant 0 : index
    %264 = vector.load %arg2[%c128, %c0_180] : memref<4352x128xbf16, #tpu.memory_space<vmem>>, vector<128x128xbf16>
    %cst_181 = arith.constant dense<0.000000e+00> : vector<8x128xf32>
    %265 = tpu.matmul %263, %264, %cst_181 {dimension_numbers = #tpu.dot_dimension_numbers<[1], [0], [0], [1], [0, 0, 1, 1], [], []>} : vector<8x128xbf16>, vector<128x128xbf16>, vector<8x128xf32> -> vector<8x128xf32>
    %266 = vector.shape_cast %265 : vector<8x128xf32> to vector<8x1x128xf32>
    %267 = vector.shape_cast %266 : vector<8x1x128xf32> to vector<8x1x128xf32>
    %268 = vector.broadcast %267 : vector<8x1x128xf32> to vector<8x16x128xf32>
    %269 = vector.shape_cast %268 : vector<8x16x128xf32> to vector<128x128xf32>
    %270 = arith.addf %261, %269 : vector<128x128xf32>
    %c32 = arith.constant 32 : index
    %c0_182 = arith.constant 0 : index
    %271 = vector.load %arg3[%c32, %c0_182] : memref<34x128xf32, #tpu.memory_space<vmem>>, vector<1x128xf32>
    %c33 = arith.constant 33 : index
    %c0_183 = arith.constant 0 : index
    %272 = vector.load %arg3[%c33, %c0_183] : memref<34x128xf32, #tpu.memory_space<vmem>>, vector<1x128xf32>
    %273 = vector.broadcast %271 : vector<1x128xf32> to vector<128x128xf32>
    %274 = arith.mulf %270, %273 : vector<128x128xf32>
    %275 = vector.broadcast %272 : vector<1x128xf32> to vector<128x128xf32>
    %276 = arith.addf %274, %275 : vector<128x128xf32>
    %277 = vector.shape_cast %276 : vector<128x128xf32> to vector<8x16x128xf32>
    %c0_184 = arith.constant 0 : index
    %c0_185 = arith.constant 0 : index
    %c0_186 = arith.constant 0 : index
    %278 = vector.load %arg4[%c0_184, %c0_185, %c0_186] : memref<8x16x128xf32, #tpu.memory_space<vmem>>, vector<8x16x128xf32>
    tpu.vector_store %arg4[%c0_184, %c0_185, %c0_186], %277 {strides = array<i32>} : memref<8x16x128xf32, #tpu.memory_space<vmem>>, vector<8x16x128xf32>,
    return
  }
  func.func @transform_0(%arg0: i32) -> (i32, i32, i32) {
    %c0_i32 = arith.constant 0 : i32
    %c0_i32_0 = arith.constant 0 : i32
    %c0_i32_1 = arith.constant 0 : i32
    return %arg0, %c0_i32, %c0_i32_0 : i32, i32, i32
  }
  func.func @transform_1(%arg0: i32) -> (i32, i32) {
    %c0_i32 = arith.constant 0 : i32
    %c0_i32_0 = arith.constant 0 : i32
    %c0_i32_1 = arith.constant 0 : i32
    return %c0_i32, %c0_i32_0 : i32, i32
  }
  func.func @transform_2(%arg0: i32) -> (i32, i32) {
    %c0_i32 = arith.constant 0 : i32
    %c0_i32_0 = arith.constant 0 : i32
    %c0_i32_1 = arith.constant 0 : i32
    return %c0_i32, %c0_i32_0 : i32, i32
  }
  func.func @transform_3(%arg0: i32) -> (i32, i32, i32) {
    %c0_i32 = arith.constant 0 : i32
    %c0_i32_0 = arith.constant 0 : i32
    %c0_i32_1 = arith.constant 0 : i32
    return %arg0, %c0_i32, %c0_i32_0 : i32, i32, i32
  }
}

</mosaic_0001>

<bundles_post_ra>
// kernel: tile.139
= control target key start
LH: loop header
LB: loop body
LE: loop exit
PB: predicated region body
PF: predicated region fallthrough
CT: control target
= control target key end

     0   :  { %2 = vsyncpa [#allocation1], 0  ;;  %s51_s8 = smov [#allocation0]   ;;  %s71_s0 = inlined_call_operand.hbm [shape: f32[8], index: 0, kind: input, shape index: {}]   ;;  %s72_s1 = inlined_call_operand.vmem [shape: f32[16,8], index: 1, kind: output, shape index: {}]  }
   0x1   :  { %s8_s0 = sshll.u32 %s71_s0, 4  ;;  %s10_s9 = sshll.u32 %s51_s8, 4  ;;  %s9_s0 = int_to_ptr.hbm [resolvable:$true] %s8_s0  ;;  %s11_s9 = int_to_ptr.vmem [resolvable:$true] %s10_s9 }
   0x2   :  { %13 = dma.hbm_to_vmem [thread:$0]  %s9_s0, 16, %s11_s9, [#allocation1]  }
   0x3   :  { %49 = dma.done.wait [#allocation1], 16  }
   0x4   :  { %50 = vsyncadd [#allocation1], 4294967280  ;;  %v18_v0 = vld [vmem:[#allocation0] ss:$0 sm:$0xff] }
   0x5   :  { %19 = vst [vmem:[%s72_s1] sm:$0xff] %v18_v0 }
   0x6   :  { %23 = vst [vmem:[%s72_s1 + $0x8] sm:$0xff] %v18_v0 }
   0x7   :  { %22 = vsyncpa [#allocation1], 1 }

// kernel: tile.240
= control target key start
LH: loop header
LB: loop body
LE: loop exit
PB: predicated region body
PF: predicated region fallthrough
CT: control target
= control target key end

     0   :  { %s131_s10 = smov 120   ;;  %s132_s11 = smov 104   ;;  %vm3_vm0 = vcmask 64512   ;;  %vm9_vm1 = vcmask 1048512   ;;  %vm15_vm2 = vcmask 982912   ;;  %vm21_vm3 = vcmask 917312   ;;  %s207_s0 = inlined_call_operand.vmem [shape: f32[16,8], index: 0, kind: input, shape index: {}]   ;;  %s208_s1 = inlined_call_operand.vmem [shape: f32[1,128], index: 1, kind: output, shape index: {}]  }
   0x1   :  { %v101_v0 = vld [vmem:[%s207_s0 + $0xf] sm:$0x1]   ;;  %v103_v1 = vld [vmem:[%s207_s0 + $0xd] sm:$0x1]   ;;  %v105_v2 = vld [vmem:[%s207_s0 + $0xb] sm:$0x1]  }
   0x2   :  { %7 = vrot.lane.b32.xlu0 %v101_v0, %s131_s10  ;;  %19 = vrot.lane.b32.xlu1 %v103_v1, %s132_s11  ;;  %s133_s14 = smov 88   ;;  %v102_v3 = vld [vmem:[%s207_s0 + $0xe] sm:$0x1]   ;;  %v104_v4 = vld [vmem:[%s207_s0 + $0xc] sm:$0x1]   ;;  %s134_s19 = smov 112  }
   0x3   :  { %31 = vrot.lane.b32.xlu2 %v105_v2, %s133_s14  ;;  %s135_s20 = smov 96   ;;  %v106_v5 = vld [vmem:[%s207_s0 + $0xa] sm:$0x1]   ;;  %s136_s23 = smov 80   ;;  %v107_v6 = vld [vmem:[%s207_s0 + $0x9] sm:$0x1]  }
   0x4   :  { %v108_v7 = vld [vmem:[%s207_s0 + $0x8] sm:$0x1]   ;;  %s137_s28 = smov 72   ;;  %s138_s29 = smov 64   ;;  %v109_v8 = vld [vmem:[%s207_s0 + $0x7] sm:$0x1]  }
   0x5   :  { %s139_s3 = smov 56   ;;  %v110_v9 = vld [vmem:[%s207_s0 + $0x6] sm:$0x1]   ;;  %v111_v10 = vld [vmem:[%s207_s0 + $0x5] sm:$0x1]   ;;  %s140_s8 = smov 48  }
   0x6   :  { %s141_s9 = smov 40   ;;  %v112_v11 = vld [vmem:[%s207_s0 + $0x4] sm:$0x1]   ;;  %s142_s12 = smov 32   ;;  %v113_v12 = vld [vmem:[%s207_s0 + $0x3] sm:$0x1]  }
   0x7   :  { %v114_v13 = vld [vmem:[%s207_s0 + $0x2] sm:$0x1]   ;;  %s143_s17 = smov 24   ;;  %s144_s18 = smov 16   ;;  %v115_v14 = vld [vmem:[%s207_s0 + $0x1] sm:$0x1]  }
   0x8   :  { %s145_s21 = smov 8   ;;  %v2_v15 = vld [vmem:[%s207_s0] sm:$0x1]   ;;  %vm27_vm4 = vcmask 851712   ;;  %vm33_vm5 = vcmask 786112   ;;  %vm39_vm6 = vcmask 720512  }
   0x9   :  { %4 = vst.msk [vmem:[#allocation0] sm:$0x1] %vm3_vm0, %v2_v15   ;;  %vm45_vm7 = vcmask 654912   ;;  %vm51_vm8 = vcmask 589312   ;;  %vm57_vm9 = vcmask 523712   ;;  %vm63_vm10 = vcmask 458112  }
   0xa   :  { %13 = vrot.lane.b32.xlu0 %v102_v3, %s134_s19  ;;  %25 = vrot.lane.b32.xlu1 %v104_v4, %s135_s20  ;;  %vm69_vm11 = vcmask 392512   ;;  %vm75_vm12 = vcmask 326912   ;;  %vm81_vm13 = vcmask 261312   ;;  %vm87_vm14 = vcmask 195712  }
   0xb   :  { %37 = vrot.lane.b32.xlu2 %v106_v5, %s136_s23  ;;  %vm93_vm15 = vcmask 130112  }
  0x12   :  { %43 = vrot.lane.b32.xlu0 %v107_v6, %s137_s28  ;;  %49 = vrot.lane.b32.xlu1 %v108_v7, %s138_s29 }
  0x13   :  { %55 = vrot.lane.b32.xlu2 %v109_v8, %s139_s3 }
  0x1a   :  { %61 = vrot.lane.b32.xlu0 %v110_v9, %s140_s8  ;;  %67 = vrot.lane.b32.xlu1 %v111_v10, %s141_s9 }
  0x1b   :  { %73 = vrot.lane.b32.xlu2 %v112_v11, %s142_s12 }
  0x22   :  { %79 = vrot.lane.b32.xlu0 %v113_v12, %s143_s17  ;;  %85 = vrot.lane.b32.xlu1 %v114_v13, %s144_s18 }
  0x23   :  { %91 = vrot.lane.b32.xlu2 %v115_v14, %s145_s21 }
  0x5d   :  { %v32_v16 = vpop.permute.xlu2 %31  }
  0x65   :  { %v38_v17 = vpop.permute.xlu2 %37  }
  0x6d   :  { %v56_v18 = vpop.permute.xlu2 %55  }
  0x74   :  { %v8_v19 = vpop.permute.xlu0 %7   ;;  %v20_v20 = vpop.permute.xlu1 %19  }
  0x75   :  { %10 = vst.msk [vmem:[#allocation0] sm:$0x1] %vm9_vm1, %v8_v19   ;;  %v74_v21 = vpop.permute.xlu2 %73  }
  0x7c   :  { %v14_v22 = vpop.permute.xlu0 %13   ;;  %v26_v23 = vpop.permute.xlu1 %25  }
  0x7d   :  { %16 = vst.msk [vmem:[#allocation0] sm:$0x1] %vm15_vm2, %v14_v22   ;;  %v92_v24 = vpop.permute.xlu2 %91  }
  0x7e   :  { %22 = vst.msk [vmem:[#allocation0] sm:$0x1] %vm21_vm3, %v20_v20  }
  0x7f   :  { %28 = vst.msk [vmem:[#allocation0] sm:$0x1] %vm27_vm4, %v26_v23  }
  0x80   :  { %34 = vst.msk [vmem:[#allocation0] sm:$0x1] %vm33_vm5, %v32_v16  }
  0x81   :  { %40 = vst.msk [vmem:[#allocation0] sm:$0x1] %vm39_vm6, %v38_v17  }
  0x84   :  { %v44_v25 = vpop.permute.xlu0 %43   ;;  %v50_v26 = vpop.permute.xlu1 %49  }
  0x85   :  { %46 = vst.msk [vmem:[#allocation0] sm:$0x1] %vm45_vm7, %v44_v25  }
  0x86   :  { %52 = vst.msk [vmem:[#allocation0] sm:$0x1] %vm51_vm8, %v50_v26  }
  0x87   :  { %58 = vst.msk [vmem:[#allocation0] sm:$0x1] %vm57_vm9, %v56_v18  }
  0x8c   :  { %v62_v27 = vpop.permute.xlu0 %61   ;;  %v68_v28 = vpop.permute.xlu1 %67  }
  0x8d   :  { %64 = vst.msk [vmem:[#allocation0] sm:$0x1] %vm63_vm10, %v62_v27  }
  0x8e   :  { %70 = vst.msk [vmem:[#allocation0] sm:$0x1] %vm69_vm11, %v68_v28  }
  0x8f   :  { %76 = vst.msk [vmem:[#allocation0] sm:$0x1] %vm75_vm12, %v74_v21  }
  0x94   :  { %v80_v29 = vpop.permute.xlu0 %79   ;;  %v86_v30 = vpop.permute.xlu1 %85  }
  0x95   :  { %82 = vst.msk [vmem:[#allocation0] sm:$0x1] %vm81_vm13, %v80_v29  }
  0x96   :  { %88 = vst.msk [vmem:[#allocation0] sm:$0x1] %vm87_vm14, %v86_v30  }
  0x97   :  { %94 = vst.msk [vmem:[#allocation0] sm:$0x1] %vm93_vm15, %v92_v24  }
  0x9e   :  { %v97_v31 = vld [vmem:[#allocation0] sm:$0x1] }
  0x9f   :  { %100 = vst [vmem:[%s208_s1] sm:$0x1] %v97_v31 }

// kernel: vortex_forward.1
= control target key start
LH: loop header
LB: loop body
LE: loop exit
PB: predicated region body
PF: predicated region fallthrough
CT: control target
= control target key end

     0   :  { %s7794_s12 = smov 0   ;;  %s9928_s0 = inlined_call_operand.vmem [shape: bf16[16,16,128], index: 0, kind: input, shape index: {}]   ;;  %s9929_s1 = inlined_call_operand.vmem [shape: bf16[4352,128], index: 1, kind: input, shape index: {}]   ;;  %s9930_s2 = inlined_call_operand.vmem [shape: f32[34,128], index: 2, kind: input, shape index: {}]   ;;  %s9931_s3 = inlined_call_operand.vmem [shape: f32[16,16,128], index: 3, kind: output, shape index: {}]  }
   0x1 LB: > { %s6248_s13 = sadd.s32 4294967295, %s7771_s12   ;;  %p6252_p0 = scmp.ge.s32.totalorder %s7771_s12, 1  ;;  %s7771_s12 = sphi %s7794_s12, %s13_s12  }
   0x2   : > { %p139_p1 = scmp.lt.s32.totalorder %s7771_s12, 3 }
   0x4   : > { %p140_p2 = pnand %p6252_p0, %p139_p1 }
   0x6   : > { %143 = sbr.rel (%p140_p2) target bundleno = 2510 (0x9ce), region = 32 }
   0xb   : > { %v7390_v0 = vld [vmem:[%s9929_s1 + $0xb8] sm:$0xff]  ;;  %v7389_v1 = vld [vmem:[%s9929_s1 + $0xb0] sm:$0xff]  ;;  %v7388_v2 = vld [vmem:[%s9929_s1 + $0xa8] sm:$0xff]  ;;  %s6253_s24 = sshll.u32 %s6248_s13, 3  ;;  %v7773_v26 = vmov 0.0   ;;  %vm5649_vm0 = vcmask 1041409  }
   0xc   : > { %315 = vmatpush.bf16.msra.mxu0 %v7390_v0  ;;  %7702 = vmatpush.bf16.msra.mxu3 %v7390_v0  ;;  %v7387_v3 = vld [vmem:[%s9929_s1 + $0xa0] sm:$0xff]  ;;  %v7386_v4 = vld [vmem:[%s9929_s1 + $0x98] sm:$0xff]  ;;  %p166_p3 = scmp.lt.s32.totalorder %s6253_s24, 15  ;;  %v7385_v5 = vld [vmem:[%s9929_s1 + $0x90] sm:$0xff]  ;;  %195 = vst [vmem:[#allocation2 + $0x19] sm:$0xff] %v7773_v26  ;;  %vm5651_vm1 = vcmask 1042434  }
   0xd   : > { %v7384_v6 = vld [vmem:[%s9929_s1 + $0x88] sm:$0xff]  ;;  %v7383_v7 = vld [vmem:[%s9929_s1 + $0x80] sm:$0xff]  ;;  %v7414_v14 = vld [vmem:[%s9929_s1 + $0x178] sm:$0xff]  ;;  %179 = vst [vmem:[#allocation2] sm:$0xff] %v7773_v26  ;;  %vm5653_vm2 = vcmask 1043459   ;;  %vm5655_vm3 = vcmask 1044484  }
   0xe   : > { %s9989_s24 = smov (!%p166_p3, %s6253_s24), 15  ;;  %v7413_v15 = vld [vmem:[%s9929_s1 + $0x170] sm:$0xff]  ;;  %v7398_v18 = vld [vmem:[%s9929_s1 + $0xf8] sm:$0xff]  ;;  %v7412_v19 = vld [vmem:[%s9929_s1 + $0x168] sm:$0xff]  ;;  %180 = vst [vmem:[#allocation2 + $0x8] sm:$0x1] %v7773_v26 }
   0xf   : > { %s7381_s29 = sshll.u32 %s9989_s24, 3  ;;  %7710 = vmatpush.bf16.msra.mxu2 %v7398_v18  ;;  %680 = vmatpush.bf16.msra.mxu1 %v7398_v18  ;;  %v7397_v20 = vld [vmem:[%s9929_s1 + $0xf0] sm:$0xff]  ;;  %v7411_v21 = vld [vmem:[%s9929_s1 + $0x160] sm:$0xff]  ;;  %v7396_v22 = vld [vmem:[%s9929_s1 + $0xe8] sm:$0xff]  ;;  %181 = vst [vmem:[#allocation2 + $0x28] sm:$0xff] %v7773_v26  ;;  %vm5657_vm4 = vcmask 1045509  }
  0x10   : > { %316 = vmatpush.bf16.msra.mxu0 %v7389_v1  ;;  %7703 = vmatpush.bf16.msra.mxu3 %v7389_v1  ;;  %s7832_s7 = scalar_lea.vmem %s9928_s0, %s7381_s29  ;;  %v7410_v23 = vld [vmem:[%s9929_s1 + $0x158] sm:$0xff]  ;;  %v7395_v24 = vld [vmem:[%s9929_s1 + $0xe0] sm:$0xff]  ;;  %v7409_v25 = vld [vmem:[%s9929_s1 + $0x150] sm:$0xff]  ;;  %182 = vst [vmem:[#allocation2 + $0x30] sm:$0x1] %v7773_v26  ;;  %vm5659_vm5 = vcmask 1046534  }
  0x11   : > { %v7835_v8 = vld [vmem:[%s7832_s7] sm:$0xff]   ;;  %v7699_v9 = vld [vmem:[%s7832_s7 + $0x28] sm:$0xff]   ;;  %v7700_v11 = vld [vmem:[%s7832_s7 + $0x30] sm:$0xff]   ;;  %183 = vst [vmem:[#allocation2 + $0x50] sm:$0xff] %v7773_v26  ;;  %vm5661_vm6 = vcmask 1047559   ;;  %s7382_s23 = sshll.u32 %s9989_s24, 4 }
  0x12   : > { %v7840_v10 = vld [vmem:[%s7832_s7 + $0x8] sm:$0xff]   ;;  %v7845_v12 = vld [vmem:[%s7832_s7 + $0x10] sm:$0xff]   ;;  %v7701_v13 = vld [vmem:[%s7832_s7 + $0x38] sm:$0xff]   ;;  %184 = vst [vmem:[#allocation2 + $0x58] sm:$0x1] %v7773_v26  ;;  %s9870_s29 = scalar_lea.vmem %s9931_s3, %s7382_s23 }
  0x13   : > { %v7856_v16 = vld [vmem:[%s7832_s7 + $0x18] sm:$0xff]   ;;  %v7860_v17 = vld [vmem:[%s7832_s7 + $0x20] sm:$0xff]   ;;  %7711 = vmatpush.bf16.msra.mxu2 %v7397_v20  ;;  %681 = vmatpush.bf16.msra.mxu1 %v7397_v20  ;;  %v7408_v28 = vld [vmem:[%s9929_s1 + $0x148] sm:$0xff]  ;;  %185 = vst [vmem:[#allocation2 + $0x78] sm:$0xff] %v7773_v26 }
  0x14   : > { %317 = vmatpush.bf16.msra.mxu0 %v7388_v2  ;;  %7704 = vmatpush.bf16.msra.mxu3 %v7388_v2  ;;  %v7394_v27 = vld [vmem:[%s9929_s1 + $0xd8] sm:$0xff]  ;;  %v7393_v29 = vld [vmem:[%s9929_s1 + $0xd0] sm:$0xff]  ;;  %v7407_v30 = vld [vmem:[%s9929_s1 + $0x140] sm:$0xff]  ;;  %186 = vst [vmem:[#allocation2 + $0x80] sm:$0x1] %v7773_v26 }
  0x15   : > { %v7392_v31 = vld [vmem:[%s9929_s1 + $0xc8] sm:$0xff]  ;;  %187 = vst [vmem:[#allocation2 + $0xa0] sm:$0xff] %v7773_v26  ;;  %v7391_v32 = vld [vmem:[%s9929_s1 + $0xc0] sm:$0xff]  ;;  %v7406_v46 = vld [vmem:[%s9929_s1 + $0x138] sm:$0xff] }
  0x16   : > { %188 = vst [vmem:[#allocation2 + $0xa8] sm:$0x1] %v7773_v26  ;;  %v7926_v33 = vld [vmem:[%s9930_s2] ss:$0 sm:$0xff]  ;;  %v7934_v36 = vld [vmem:[%s9930_s2 + $0x1] ss:$0 sm:$0xff] }
  0x17   : > { %7712 = vmatpush.bf16.msra.mxu2 %v7396_v22  ;;  %682 = vmatpush.bf16.msra.mxu1 %v7396_v22  ;;  %189 = vst [vmem:[#allocation2 + $0xc8] sm:$0xff] %v7773_v26  ;;  %v7405_v49 = vld [vmem:[%s9929_s1 + $0x130] sm:$0xff]  ;;  %v7404_v63 = vld [vmem:[%s9929_s1 + $0x128] sm:$0xff] }
  0x18   : > { %318 = vmatpush.bf16.msra.mxu0 %v7387_v3  ;;  %7705 = vmatpush.bf16.msra.mxu3 %v7387_v3  ;;  %190 = vst [vmem:[#allocation2 + $0xd0] sm:$0x1] %v7773_v26  ;;  %v7403_v3 = vld [vmem:[%s9929_s1 + $0x120] sm:$0xff] }
  0x19   : > { %191 = vst [vmem:[#allocation2 + $0xf0] sm:$0xff] %v7773_v26 }
  0x1a   : > { %192 = vst [vmem:[#allocation2 + $0xf8] sm:$0x1] %v7773_v26 }
  0x1b   : > { %7713 = vmatpush.bf16.msra.mxu2 %v7395_v24  ;;  %683 = vmatpush.bf16.msra.mxu1 %v7395_v24  ;;  %193 = vst [vmem:[#allocation2 + $0x118] sm:$0xff] %v7773_v26  ;;  %v7401_v24 = vld [vmem:[%s9929_s1 + $0x110] sm:$0xff] }
  0x1c   : > { %319 = vmatpush.bf16.msra.mxu0 %v7386_v4  ;;  %7706 = vmatpush.bf16.msra.mxu3 %v7386_v4  ;;  %194 = vst [vmem:[#allocation2 + $0x120] sm:$0x1] %v7773_v26 }
  0x1d   : > { %196 = vst [vmem:[#allocation2 + $0x21] sm:$0x1] %v7773_v26 }
  0x1e   : > { %197 = vst [vmem:[#allocation2 + $0x41] sm:$0xff] %v7773_v26 }
  0x1f   : > { %7714 = vmatpush.bf16.msra.mxu2 %v7394_v27  ;;  %684 = vmatpush.bf16.msra.mxu1 %v7394_v27  ;;  %198 = vst [vmem:[#allocation2 + $0x49] sm:$0x1] %v7773_v26 }
  0x20   : > { %320 = vmatpush.bf16.msra.mxu0 %v7385_v5  ;;  %7707 = vmatpush.bf16.msra.mxu3 %v7385_v5  ;;  %199 = vst [vmem:[#allocation2 + $0x69] sm:$0xff] %v7773_v26 }
  0x21   : > { %200 = vst [vmem:[#allocation2 + $0x71] sm:$0x1] %v7773_v26 }
  0x22   : > { %201 = vst [vmem:[#allocation2 + $0x91] sm:$0xff] %v7773_v26 }
  0x23   : > { %7715 = vmatpush.bf16.msra.mxu2 %v7393_v29  ;;  %685 = vmatpush.bf16.msra.mxu1 %v7393_v29  ;;  %202 = vst [vmem:[#allocation2 + $0x99] sm:$0x1] %v7773_v26 }
  0x24   : > { %321 = vmatpush.bf16.msra.mxu0 %v7384_v6  ;;  %7708 = vmatpush.bf16.msra.mxu3 %v7384_v6  ;;  %203 = vst [vmem:[#allocation2 + $0xb9] sm:$0xff] %v7773_v26 }
  0x25   : > { %204 = vst [vmem:[#allocation2 + $0xc1] sm:$0x1] %v7773_v26 }
  0x26   : > { %205 = vst [vmem:[#allocation2 + $0xe1] sm:$0xff] %v7773_v26 }
  0x27   : > { %7716 = vmatpush.bf16.msra.mxu2 %v7392_v31  ;;  %686 = vmatpush.bf16.msra.mxu1 %v7392_v31  ;;  %206 = vst [vmem:[#allocation2 + $0xe9] sm:$0x1] %v7773_v26 }
  0x28   : > { %322 = vmatpush.bf16.msra.mxu0 %v7383_v7  ;;  %7709 = vmatpush.bf16.msra.mxu3 %v7383_v7  ;;  %207 = vst [vmem:[#allocation2 + $0x109] sm:$0xff] %v7773_v26 }
  0x29   : > { %208 = vst [vmem:[#allocation2 + $0x111] sm:$0x1] %v7773_v26 }
  0x2a   : > { %209 = vst [vmem:[#allocation2 + $0x131] sm:$0xff] %v7773_v26 }
  0x2b   : > { %323 = vmatmul.bf16.vlgmr.msra.gmra.mxu0 %v7835_v8  ;;  %348 = vmatmul.bf16.vlgmr.msra.gmra.mxu3 %v7699_v9  ;;  %210 = vst [vmem:[#allocation2 + $0x139] sm:$0x1] %v7773_v26 }
  0x2c   : > { %778 = vmatpush.bf16.msrb.mxu3 %v7414_v14  ;;  %7717 = vmatpush.bf16.msra.mxu2 %v7391_v32  ;;  %v7402_v14 = vld [vmem:[%s9929_s1 + $0x118] sm:$0xff] }
  0x2d   : > { %687 = vmatpush.bf16.msra.mxu1 %v7391_v32 }
  0x30   : > { %779 = vmatpush.bf16.msrb.mxu3 %v7413_v15  ;;  %729 = vmatpush.bf16.msrb.mxu2 %v7406_v46 }
  0x34   : > { %780 = vmatpush.bf16.msrb.mxu3 %v7412_v19  ;;  %730 = vmatpush.bf16.msrb.mxu2 %v7405_v49 }
  0x38   : > { %781 = vmatpush.bf16.msrb.mxu3 %v7411_v21  ;;  %731 = vmatpush.bf16.msrb.mxu2 %v7404_v63 }
  0x3b   : > { %328 = vmatmul.bf16.gmra.mxu0 %v7840_v10  ;;  %353 = vmatmul.bf16.gmra.mxu3 %v7700_v11 }
  0x3c   : > { %782 = vmatpush.bf16.msrb.mxu3 %v7410_v23  ;;  %732 = vmatpush.bf16.msrb.mxu2 %v7403_v3 }
  0x40   : > { %783 = vmatpush.bf16.msrb.mxu3 %v7409_v25  ;;  %733 = vmatpush.bf16.msrb.mxu2 %v7402_v14 }
  0x44   : > { %784 = vmatpush.bf16.msrb.mxu3 %v7408_v28  ;;  %734 = vmatpush.bf16.msrb.mxu2 %v7401_v24 }
  0x48   : > { %785 = vmatpush.bf16.msrb.mxu3 %v7407_v30 }
  0x4b   : > { %333 = vmatmul.bf16.gmra.mxu0 %v7845_v12  ;;  %358 = vmatmul.bf16.gmra.mxu3 %v7701_v13 }
  0x5b   : > { %338 = vmatmul.bf16.gmra.mxu0 %v7856_v16 }
  0x6b   : > { %343 = vmatmul.bf16.gmra.mxu0 %v7860_v17 }
  0xa8   : > { %v324_v34 = vpop.f32.mrf.mxu0 }
  0xa9   : > { %v367_v35 = vmul.f32 %v7926_v33, %v324_v34 }
  0xab   : > { %v7939_v37 = vadd.f32 %v7934_v36, %v367_v35  ;;  %v7400_v35 = vld [vmem:[%s9929_s1 + $0x108] sm:$0xff] }
  0xac   : > { %735 = vmatpush.bf16.msrb.mxu2 %v7400_v35 }
  0xad   : > { %v400_v38 = vmax.f32 %v7939_v37, 0.0 }
  0xae   : > { %v349_v39 = vpop.f32.mrf.mxu3 }
  0xaf   : > { %416 = vst [vmem:[#allocation2 + $0x9] sm:$0xff] %v400_v38  ;;  %v377_v40 = vmul.f32 %v7926_v33, %v349_v39 }
  0xb0   : > { %v326_v41 = vpop.f32.mrf.mxu0 }
  0xb1   : > { %v394_v42 = vadd.f32 %v7934_v36, %v377_v40  ;;  %v368_v43 = vmul.f32 %v7926_v33, %v326_v41 }
  0xb3   : > { %v410_v44 = vmax.f32 %v394_v42, 0.0  ;;  %v7955_v45 = vadd.f32 %v7934_v36, %v368_v43  ;;  %v7399_v42 = vld [vmem:[%s9929_s1 + $0x100] sm:$0xff] }
  0xb4   : > { %736 = vmatpush.bf16.msrb.mxu2 %v7399_v42 }
  0xb5   : > { %426 = vst [vmem:[#allocation2 + $0xd1] sm:$0xff] %v410_v44  ;;  %v401_v47 = vmax.f32 %v7955_v45, 0.0 }
  0xb6   : > { %v351_v48 = vpop.f32.mrf.mxu3  ;;  %v432_v18 = vld [vmem:[#allocation2 + $0x8] sm:$0xff] }
  0xb7   : > { %417 = vst [vmem:[#allocation2 + $0x11] sm:$0xff] %v401_v47  ;;  %v378_v50 = vmul.f32 %v7926_v33, %v351_v48 }
  0xb8   : > { %v329_v51 = vpop.f32.mrf.mxu0 }
  0xb9   : > { %v395_v52 = vadd.f32 %v7934_v36, %v378_v50  ;;  %v369_v53 = vmul.f32 %v7926_v33, %v329_v51 }
  0xbb   : > { %v411_v54 = vmax.f32 %v395_v52, 0.0  ;;  %v7973_v55 = vadd.f32 %v7934_v36, %v369_v53 }
  0xbc   : > { %v442_v9 = vld [vmem:[#allocation2 + $0xd0] sm:$0xff] }
  0xbd   : > { %427 = vst [vmem:[#allocation2 + $0xd9] sm:$0xff] %v411_v54  ;;  %v402_v56 = vmax.f32 %v7973_v55, 0.0  ;;  %v7976_v57 = vpack.c.bf16 %v411_v54, %v410_v44 }
  0xbe   : > { %v448_v58 = vld [vmem:[#allocation2 + $0xa] sm:$0xff]  ;;  %v354_v59 = vpop.f32.mrf.mxu3  ;;  %v449_v60 = vld [vmem:[#allocation2 + $0x12] sm:$0xff] }
  0xbf   : > { %418 = vst [vmem:[#allocation2 + $0x31] sm:$0xff] %v402_v56  ;;  %v379_v61 = vmul.f32 %v7926_v33, %v354_v59  ;;  %v466_v62 = vpack.c.bf16 %v449_v60, %v448_v58  ;;  %v433_v6 = vld [vmem:[#allocation2 + $0x10] sm:$0xff] }
  0xc0   : > { %v331_v0 = vpop.f32.mrf.mxu0  ;;  %v464_v20 = vpack.c.bf16 %v433_v6, %v432_v18 }
  0xc1   : > { %v396_v1 = vadd.f32 %v7934_v36, %v379_v61  ;;  %v370_v2 = vmul.f32 %v7926_v33, %v331_v0  ;;  %786 = vmatmul.bf16.vlgmr.msrb.gmra.mxu3 %v466_v62 }
  0xc2   : > { %688 = vmatmul.bf16.vlgmr.msra.gmra.mxu1 %v464_v20 }
  0xc3   : > { %v412_v4 = vmax.f32 %v396_v1, 0.0  ;;  %v7990_v5 = vadd.f32 %v7934_v36, %v370_v2 }
  0xc4   : > { %v443_v7 = vld [vmem:[#allocation2 + $0xd8] sm:$0xff] }
  0xc5   : > { %428 = vst [vmem:[#allocation2 + $0xf9] sm:$0xff] %v412_v4  ;;  %v403_v11 = vmax.f32 %v7990_v5, 0.0  ;;  %v479_v13 = vpack.c.bf16 %v443_v7, %v442_v9  ;;  %v459_v45 = vld [vmem:[#allocation2 + $0xda] sm:$0xff] }
  0xc6   : > { %v356_v15 = vpop.f32.mrf.mxu3  ;;  %v434_v53 = vld [vmem:[#allocation2 + $0x30] sm:$0xff] }
  0xc7   : > { %419 = vst [vmem:[#allocation2 + $0x39] sm:$0xff] %v403_v11  ;;  %v380_v19 = vmul.f32 %v7926_v33, %v356_v15  ;;  %713 = vmatmul.bf16.vlgmr.msra.gmra.mxu2 %v479_v13 }
  0xc8   : > { %v334_v21 = vpop.f32.mrf.mxu0 }
  0xc9   : > { %v397_v22 = vadd.f32 %v7934_v36, %v380_v19  ;;  %v371_v23 = vmul.f32 %v7926_v33, %v334_v21 }
  0xcb   : > { %v413_v25 = vmax.f32 %v397_v22, 0.0  ;;  %v8005_v26 = vadd.f32 %v7934_v36, %v371_v23 }
  0xcc   : > { %v444_v49 = vld [vmem:[#allocation2 + $0xf8] sm:$0xff] }
  0xcd   : > { %429 = vst [vmem:[#allocation2 + $0x101] sm:$0xff] %v413_v25  ;;  %v404_v27 = vmax.f32 %v8005_v26, 0.0  ;;  %v8008_v28 = vpack.c.bf16 %v413_v25, %v412_v4  ;;  %v7421_v26 = vld [vmem:[%s9929_s1 + $0x1b0] sm:$0xff] }
  0xce   : > { %v450_v29 = vld [vmem:[#allocation2 + $0x32] sm:$0xff]  ;;  %v359_v30 = vpop.f32.mrf.mxu3  ;;  %v451_v31 = vld [vmem:[#allocation2 + $0x3a] sm:$0xff] }
  0xcf   : > { %420 = vst [vmem:[#allocation2 + $0x59] sm:$0xff] %v404_v27  ;;  %v381_v32 = vmul.f32 %v7926_v33, %v359_v30  ;;  %v469_v34 = vpack.c.bf16 %v451_v31, %v450_v29  ;;  %v435_v46 = vld [vmem:[#allocation2 + $0x38] sm:$0xff] }
  0xd0   : > { %v336_v39 = vpop.f32.mrf.mxu0  ;;  %v467_v58 = vpack.c.bf16 %v435_v46, %v434_v53 }
  0xd1   : > { %v398_v40 = vadd.f32 %v7934_v36, %v381_v32  ;;  %v372_v41 = vmul.f32 %v7926_v33, %v336_v39  ;;  %791 = vmatmul.bf16.gmra.mxu3 %v469_v34 }
  0xd2   : > { %693 = vmatmul.bf16.gmra.mxu1 %v467_v58 }
  0xd3   : > { %v414_v43 = vmax.f32 %v398_v40, 0.0  ;;  %v8022_v44 = vadd.f32 %v7934_v36, %v372_v41  ;;  %v465_v41 = vpack.c.bf16 %v401_v47, %v400_v38  ;;  %v458_v38 = vld [vmem:[#allocation2 + $0xd2] sm:$0xff] }
  0xd4   : > { %v445_v48 = vld [vmem:[#allocation2 + $0x100] sm:$0xff]  ;;  %v481_v47 = vpack.c.bf16 %v459_v45, %v458_v38 }
  0xd5   : > { %430 = vst [vmem:[#allocation2 + $0x121] sm:$0xff] %v414_v43  ;;  %v405_v50 = vmax.f32 %v8022_v44, 0.0  ;;  %v482_v51 = vpack.c.bf16 %v445_v48, %v444_v49  ;;  %v460_v53 = vld [vmem:[#allocation2 + $0xfa] sm:$0xff] }
  0xd6   : > { %v361_v52 = vpop.f32.mrf.mxu3  ;;  %v436_v20 = vld [vmem:[#allocation2 + $0x58] sm:$0xff] }
  0xd7   : > { %421 = vst [vmem:[#allocation2 + $0x61] sm:$0xff] %v405_v50  ;;  %v382_v54 = vmul.f32 %v7926_v33, %v361_v52  ;;  %718 = vmatmul.bf16.gmra.mxu2 %v482_v51  ;;  %v471_v52 = vpack.c.bf16 %v405_v50, %v404_v27  ;;  %v7420_v50 = vld [vmem:[%s9929_s1 + $0x1a8] sm:$0xff] }
  0xd8   : > { %v339_v59 = vpop.f32.mrf.mxu0 }
  0xd9   : > { %v399_v60 = vadd.f32 %v7934_v36, %v382_v54  ;;  %v373_v61 = vmul.f32 %v7926_v33, %v339_v59  ;;  %v461_v54 = vld [vmem:[#allocation2 + $0x102] sm:$0xff] }
  0xda   : > { %v484_v55 = vpack.c.bf16 %v461_v54, %v460_v53  ;;  %v7419_v59 = vld [vmem:[%s9929_s1 + $0x1a0] sm:$0xff]  ;;  %v7453_v54 = vld [vmem:[%s9929_s1 + $0x30] sm:$0xff] }
  0xdb   : > { %v415_v62 = vmax.f32 %v399_v60, 0.0  ;;  %v8031_v63 = vadd.f32 %v7934_v36, %v373_v61  ;;  %v7418_v61 = vld [vmem:[%s9929_s1 + $0x198] sm:$0xff] }
  0xdc   : > { %v446_v15 = vld [vmem:[#allocation2 + $0x120] sm:$0xff] }
  0xdd   : > { %431 = vst [vmem:[#allocation2 + $0x129] sm:$0xff] %v415_v62  ;;  %v406_v0 = vmax.f32 %v8031_v63, 0.0  ;;  %v8034_v1 = vpack.c.bf16 %v415_v62, %v414_v43  ;;  %v7430_v62 = vld [vmem:[%s9929_s1 + $0x1f8] sm:$0xff] }
  0xde   : > { %v452_v2 = vld [vmem:[#allocation2 + $0x5a] sm:$0xff]  ;;  %v453_v3 = vld [vmem:[#allocation2 + $0x62] sm:$0xff]  ;;  %1192 = vmatpush.bf16.msrb.mxu1 %v7430_v62  ;;  %v8167_v62 = vunpack.c.h.bf16 %v7835_v8 }
  0xdf   : > { %422 = vst [vmem:[#allocation2 + $0x81] sm:$0xff] %v406_v0  ;;  %v472_v4 = vpack.c.bf16 %v453_v3, %v452_v2  ;;  %v437_v13 = vld [vmem:[#allocation2 + $0x60] sm:$0xff]  ;;  %v7417_v2 = vld [vmem:[%s9929_s1 + $0x190] sm:$0xff]  ;;  %v7428_v3 = vld [vmem:[%s9929_s1 + $0x1e8] sm:$0xff] }
  0xe0   : > { %v341_v6 = vpop.f32.mrf.mxu0  ;;  %v470_v21 = vpack.c.bf16 %v437_v13, %v436_v20  ;;  %v7426_v13 = vld [vmem:[%s9929_s1 + $0x1d8] sm:$0xff]  ;;  %v7416_v20 = vld [vmem:[%s9929_s1 + $0x188] sm:$0xff] }
  0xe1   : > { %v374_v7 = vmul.f32 %v7926_v33, %v341_v6  ;;  %796 = vmatmul.bf16.gmra.mxu3 %v472_v4  ;;  %v7427_v6 = vld [vmem:[%s9929_s1 + $0x1e0] sm:$0xff] }
  0xe2   : > { %698 = vmatmul.bf16.gmra.mxu1 %v470_v21  ;;  %v7424_v21 = vld [vmem:[%s9929_s1 + $0x1c8] sm:$0xff] }
  0xe3   : > { %v391_v9 = vadd.f32 %v7934_v36, %v374_v7  ;;  %v7437_v7 = vld [vmem:[%s9929_s1 + $0x230] sm:$0xff] }
  0xe4   : > { %v447_v14 = vld [vmem:[#allocation2 + $0x128] sm:$0xff] }
  0xe5   : > { %v407_v18 = vmax.f32 %v391_v9, 0.0  ;;  %v485_v19 = vpack.c.bf16 %v447_v14, %v446_v15  ;;  %v463_v58 = vld [vmem:[#allocation2 + $0x12a] sm:$0xff] }
  0xe6   : > { %v438_v42 = vld [vmem:[#allocation2 + $0x80] sm:$0xff]  ;;  %v7425_v15 = vld [vmem:[%s9929_s1 + $0x1d0] sm:$0xff] }
  0xe7   : > { %423 = vst [vmem:[#allocation2 + $0x89] sm:$0xff] %v407_v18  ;;  %723 = vmatmul.bf16.gmra.mxu2 %v485_v19  ;;  %v474_v5 = vpack.c.bf16 %v407_v18, %v406_v0  ;;  %v7429_v0 = vld [vmem:[%s9929_s1 + $0x1f0] sm:$0xff]  ;;  %v7435_v18 = vld [vmem:[%s9929_s1 + $0x220] sm:$0xff] }
  0xe8   : > { %v344_v22 = vpop.f32.mrf.mxu0  ;;  %1193 = vmatpush.bf16.msrb.mxu1 %v7429_v0 }
  0xe9   : > { %v375_v23 = vmul.f32 %v7926_v33, %v344_v22  ;;  %v7434_v22 = vld [vmem:[%s9929_s1 + $0x218] sm:$0xff] }
  0xeb   : > { %v392_v24 = vadd.f32 %v7934_v36, %v375_v23 }
  0xec   : > { %1194 = vmatpush.bf16.msrb.mxu1 %v7428_v3 }
  0xed   : > { %v408_v25 = vmax.f32 %v392_v24, 0.0 }
  0xee   : > { %v454_v29 = vld [vmem:[#allocation2 + $0x82] sm:$0xff]  ;;  %v455_v30 = vld [vmem:[#allocation2 + $0x8a] sm:$0xff] }
  0xef   : > { %424 = vst [vmem:[#allocation2 + $0xa9] sm:$0xff] %v408_v25  ;;  %v475_v31 = vpack.c.bf16 %v455_v30, %v454_v29  ;;  %v439_v39 = vld [vmem:[#allocation2 + $0x88] sm:$0xff]  ;;  %v7415_v29 = vld [vmem:[%s9929_s1 + $0x180] sm:$0xff] }
  0xf0   : > { %v346_v32 = vpop.f32.mrf.mxu0  ;;  %v473_v43 = vpack.c.bf16 %v439_v39, %v438_v42  ;;  %1195 = vmatpush.bf16.msrb.mxu1 %v7427_v6  ;;  %v7432_v30 = vld [vmem:[%s9929_s1 + $0x208] sm:$0xff]  ;;  %v7454_v39 = vld [vmem:[%s9929_s1 + $0x38] sm:$0xff] }
  0xf1   : > { %v376_v34 = vmul.f32 %v7926_v33, %v346_v32  ;;  %801 = vmatmul.bf16.gmra.mxu3 %v475_v31 }
  0xf2   : > { %703 = vmatmul.bf16.gmra.mxu1 %v473_v43  ;;  %v8147_v43 = vld [vmem:[%s9930_s2 + $0x2] ss:$0 sm:$0xff] }
  0xf3   : > { %v393_v35 = vadd.f32 %v7934_v36, %v376_v34  ;;  %v468_v36 = vpack.c.bf16 %v403_v11, %v402_v56  ;;  %v7422_v56 = vld [vmem:[%s9929_s1 + $0x1b8] sm:$0xff]  ;;  %v462_v11 = vld [vmem:[#allocation2 + $0x122] sm:$0xff] }
  0xf4   : > { %1143 = vmatpush.bf16.msrb.mxu0 %v7422_v56  ;;  %v487_v27 = vpack.c.bf16 %v463_v58, %v462_v11  ;;  %1196 = vmatpush.bf16.msrb.mxu1 %v7426_v13 }
  0xf5   : > { %v409_v40 = vmax.f32 %v393_v35, 0.0  ;;  %v7431_v35 = vld [vmem:[%s9929_s1 + $0x200] sm:$0xff] }
  0xf6   : > { %v440_v37 = vld [vmem:[#allocation2 + $0xa8] sm:$0xff] }
  0xf7   : > { %425 = vst [vmem:[#allocation2 + $0xb1] sm:$0xff] %v409_v40  ;;  %737 = vmatmul.bf16.vlgmr.msrb.gmra.mxu2 %v465_v41  ;;  %v477_v44 = vpack.c.bf16 %v409_v40, %v408_v25  ;;  %v7433_v25 = vld [vmem:[%s9929_s1 + $0x210] sm:$0xff] }
  0xf8   : > { %1144 = vmatpush.bf16.msrb.mxu0 %v7421_v26  ;;  %1197 = vmatpush.bf16.msrb.mxu1 %v7425_v15 }
  0xfc   : > { %1145 = vmatpush.bf16.msrb.mxu0 %v7420_v50  ;;  %1198 = vmatpush.bf16.msrb.mxu1 %v7424_v21 }
  0xfe   : > { %v456_v46 = vld [vmem:[#allocation2 + $0xaa] sm:$0xff]  ;;  %v457_v48 = vld [vmem:[#allocation2 + $0xb2] sm:$0xff] }
  0xff   : > { %v478_v49 = vpack.c.bf16 %v457_v48, %v456_v46  ;;  %v441_v33 = vld [vmem:[#allocation2 + $0xb0] sm:$0xff] }
 0x100   : > { %v476_v51 = vpack.c.bf16 %v441_v33, %v440_v37  ;;  %1146 = vmatpush.bf16.msrb.mxu0 %v7419_v59  ;;  %v8163_v59 = vunpack.c.l.bf16 %v7835_v8  ;;  %v7452_v8 = vld [vmem:[%s9929_s1 + $0x28] sm:$0xff] }
 0x101   : > { %806 = vmatmul.bf16.gmra.mxu3 %v478_v49  ;;  %v8152_v49 = vld [vmem:[%s9930_s2 + $0x3] ss:$0 sm:$0xff] }
 0x102   : > { %708 = vmatmul.bf16.gmra.mxu1 %v476_v51 }
 0x104   : > { %1147 = vmatpush.bf16.msrb.mxu0 %v7418_v61 }
 0x107   : > { %742 = vmatmul.bf16.gmra.mxu2 %v468_v36 }
 0x108   : > { %1148 = vmatpush.bf16.msrb.mxu0 %v7417_v2 }
 0x10c   : > { %1149 = vmatpush.bf16.msrb.mxu0 %v7416_v20 }
 0x110   : > { %1150 = vmatpush.bf16.msrb.mxu0 %v7415_v29 }
 0x111   : > { %811 = vmatmul.bf16.gmra.mxu3 %v481_v47 }
 0x114   : > { %1683 = vmatpush.bf16.msra.mxu0 %v7454_v39 }
 0x117   : > { %747 = vmatmul.bf16.gmra.mxu2 %v471_v52 }
 0x118   : > { %1684 = vmatpush.bf16.msra.mxu0 %v7453_v54 }
 0x11c   : > { %1685 = vmatpush.bf16.msra.mxu0 %v7452_v8 }
 0x121   : > { %816 = vmatmul.bf16.gmra.mxu3 %v484_v55 }
 0x127   : > { %752 = vmatmul.bf16.gmra.mxu2 %v474_v5 }
 0x131   : > { %821 = vmatmul.bf16.gmra.mxu3 %v487_v27 }
 0x137   : > { %757 = vmatmul.bf16.gmra.mxu2 %v477_v44 }
 0x13f   : > { %v689_v19 = vpop.f32.mrf.mxu1 }
 0x144   : > { %v787_v9 = vpop.f32.mrf.mxu3 }
 0x147   : > { %762 = vmatmul.bf16.gmra.mxu2 %v7976_v57  ;;  %v7438_v57 = vld [vmem:[%s9929_s1 + $0x238] sm:$0xff]  ;;  %v691_v31 = vpop.f32.mrf.mxu1 }
 0x148   : > { %1241 = vmatpush.bf16.msra.mxu2 %v7438_v57 }
 0x14a   : > { %v8067_v60 = vpop.f32.mrf.mxu2 }
 0x14c   : > { %1242 = vmatpush.bf16.msra.mxu2 %v7437_v7  ;;  %v789_v23 = vpop.f32.mrf.mxu3 }
 0x14f   : > { %v694_v41 = vpop.f32.mrf.mxu1 }
 0x152   : > { %v8075_v63 = vpop.f32.mrf.mxu2 }
 0x154   : > { %v792_v32 = vpop.f32.mrf.mxu3 }
 0x157   : > { %767 = vmatmul.bf16.gmra.mxu2 %v8008_v28  ;;  %v7436_v28 = vld [vmem:[%s9929_s1 + $0x228] sm:$0xff]  ;;  %v696_v45 = vpop.f32.mrf.mxu1 }
 0x158   : > { %1243 = vmatpush.bf16.msra.mxu2 %v7436_v28 }
 0x15a   : > { %v8090_v4 = vpop.f32.mrf.mxu2 }
 0x15c   : > { %1244 = vmatpush.bf16.msra.mxu2 %v7435_v18  ;;  %v794_v46 = vpop.f32.mrf.mxu3 }
 0x15f   : > { %v699_v27 = vpop.f32.mrf.mxu1 }
 0x160   : > { %1245 = vmatpush.bf16.msra.mxu2 %v7434_v22 }
 0x162   : > { %v8104_v14 = vpop.f32.mrf.mxu2 }
 0x164   : > { %1246 = vmatpush.bf16.msra.mxu2 %v7433_v25  ;;  %v797_v52 = vpop.f32.mrf.mxu3 }
 0x167   : > { %772 = vmatmul.bf16.gmra.mxu2 %v8034_v1  ;;  %v7423_v1 = vld [vmem:[%s9929_s1 + $0x1c0] sm:$0xff] }
 0x168   : > { %1199 = vmatpush.bf16.msrb.mxu1 %v7423_v1  ;;  %1247 = vmatpush.bf16.msra.mxu2 %v7432_v30 }
 0x16a   : > { %v8122_v24 = vpop.f32.mrf.mxu2 }
 0x16c   : > { %1248 = vmatpush.bf16.msra.mxu2 %v7431_v35  ;;  %v799_v50 = vpop.f32.mrf.mxu3  ;;  %v8182_v35 = vunpack.c.h.bf16 %v7840_v10 }
 0x172   : > { %v8136_v34 = vpop.f32.mrf.mxu2 }
 0x174   : > { %v802_v21 = vpop.f32.mrf.mxu3 }
 0x17a   : > { %v738_v40 = vpop.f32.mrf.mxu2 }
 0x17b   : > { %v739_v42 = vadd.f32 %v738_v40, %v689_v19  ;;  %v701_v19 = vpop.f32.mrf.mxu1 }
 0x17d   : > { %v788_v48 = vadd.f32 %v787_v9, %v739_v42 }
 0x17f   : > { %v830_v33 = vmul.f32 %v8147_v43, %v788_v48  ;;  %v804_v48 = vpop.f32.mrf.mxu3 }
 0x181   : > { %v847_v36 = vadd.f32 %v8152_v49, %v830_v33 }
 0x182   : > { %v740_v37 = vpop.f32.mrf.mxu2 }
 0x183   : > { %v741_v51 = vadd.f32 %v740_v37, %v691_v31  ;;  %v863_v38 = vmax.f32 %v847_v36, 0.0  ;;  %v8178_v31 = vunpack.c.l.bf16 %v7840_v10  ;;  %v704_v40 = vpop.f32.mrf.mxu1  ;;  %v7451_v10 = vld [vmem:[%s9929_s1 + $0x20] sm:$0xff] }
 0x184   : > { %1686 = vmatpush.bf16.msra.mxu0 %v7451_v10 }
 0x185   : > { %v790_v47 = vadd.f32 %v789_v23, %v741_v51  ;;  %879 = vst [vmem:[#allocation2 + $0x9] sm:$0xff] %v863_v38 }
 0x187   : > { %v831_v53 = vmul.f32 %v8147_v43, %v790_v47 }
 0x189   : > { %v848_v55 = vadd.f32 %v8152_v49, %v831_v53 }
 0x18a   : > { %v743_v5 = vpop.f32.mrf.mxu2 }
 0x18b   : > { %v744_v56 = vadd.f32 %v743_v5, %v694_v41  ;;  %v864_v11 = vmax.f32 %v848_v55, 0.0  ;;  %v706_v5 = vpop.f32.mrf.mxu1 }
 0x18c   : > { %v895_v2 = vld [vmem:[#allocation2 + $0x8] sm:$0xff] }
 0x18d   : > { %v793_v58 = vadd.f32 %v792_v32, %v744_v56  ;;  %880 = vst [vmem:[#allocation2 + $0x11] sm:$0xff] %v864_v11  ;;  %v928_v26 = vpack.c.bf16 %v864_v11, %v863_v38 }
 0x18f   : > { %v832_v44 = vmul.f32 %v8147_v43, %v793_v58  ;;  %1200 = vmatmul.bf16.vlgmr.msrb.gmra.mxu1 %v928_v26  ;;  %v807_v58 = vpop.f32.mrf.mxu3 }
 0x191   : > { %v849_v61 = vadd.f32 %v8152_v49, %v832_v44 }
 0x192   : > { %v745_v0 = vpop.f32.mrf.mxu2 }
 0x193   : > { %v746_v57 = vadd.f32 %v745_v0, %v696_v45  ;;  %v865_v3 = vmax.f32 %v849_v61, 0.0 }
 0x194   : > { %v896_v6 = vld [vmem:[#allocation2 + $0x10] sm:$0xff] }
 0x195   : > { %v911_v7 = vld [vmem:[#allocation2 + $0xa] sm:$0xff]  ;;  %v912_v9 = vld [vmem:[#allocation2 + $0x12] sm:$0xff]  ;;  %v795_v13 = vadd.f32 %v794_v46, %v746_v57  ;;  %v927_v28 = vpack.c.bf16 %v896_v6, %v895_v2  ;;  %881 = vst [vmem:[#allocation2 + $0x31] sm:$0xff] %v865_v3 }
 0x196   : > { %1531 = vst [vmem:[#allocation2 + $0x9] sm:$0xff] %v8163_v59  ;;  %v929_v15 = vpack.c.bf16 %v912_v9, %v911_v7 }
 0x197   : > { %1532 = vst [vmem:[#allocation2 + $0x11] sm:$0xff] %v8167_v62  ;;  %v833_v18 = vmul.f32 %v8147_v43, %v795_v13  ;;  %1151 = vmatmul.bf16.vlgmr.msrb.gmra.mxu0 %v927_v28  ;;  %v809_v8 = vpop.f32.mrf.mxu3 }
 0x198   : > { %1249 = vmatmul.bf16.vlgmr.msra.gmra.mxu2 %v929_v15  ;;  %v709_v15 = vpop.f32.mrf.mxu1 }
 0x199   : > { %v850_v20 = vadd.f32 %v8152_v49, %v833_v18 }
 0x19a   : > { %v748_v22 = vpop.f32.mrf.mxu2 }
 0x19b   : > { %v749_v23 = vadd.f32 %v748_v22, %v699_v27  ;;  %v866_v1 = vmax.f32 %v850_v20, 0.0  ;;  %v8193_v27 = vunpack.c.l.bf16 %v7845_v12 }
 0x19c   : > { %v897_v42 = vld [vmem:[#allocation2 + $0x30] sm:$0xff] }
 0x19d   : > { %v798_v25 = vadd.f32 %v797_v52, %v749_v23  ;;  %882 = vst [vmem:[#allocation2 + $0x39] sm:$0xff] %v866_v1  ;;  %v931_v29 = vpack.c.bf16 %v866_v1, %v865_v3 }
 0x19f   : > { %v834_v30 = vmul.f32 %v8147_v43, %v798_v25  ;;  %1205 = vmatmul.bf16.gmra.mxu1 %v931_v29  ;;  %v8208_v29 = vunpack.c.l.bf16 %v7856_v16 }
 0x1a1   : > { %v851_v32 = vadd.f32 %v8152_v49, %v834_v30  ;;  %v711_v30 = vpop.f32.mrf.mxu1 }
 0x1a2   : > { %v750_v39 = vpop.f32.mrf.mxu2 }
 0x1a3   : > { %v751_v41 = vadd.f32 %v750_v39, %v701_v19  ;;  %v867_v46 = vmax.f32 %v851_v32, 0.0  ;;  %v8212_v39 = vunpack.c.h.bf16 %v7856_v16  ;;  %v7449_v16 = vld [vmem:[%s9929_s1 + $0x10] sm:$0xff] }
 0x1a4   : > { %v898_v33 = vld [vmem:[#allocation2 + $0x38] sm:$0xff] }
 0x1a5   : > { %v913_v36 = vld [vmem:[#allocation2 + $0x32] sm:$0xff]  ;;  %v914_v37 = vld [vmem:[#allocation2 + $0x3a] sm:$0xff]  ;;  %v800_v51 = vadd.f32 %v799_v50, %v751_v41  ;;  %v930_v38 = vpack.c.bf16 %v898_v33, %v897_v42  ;;  %883 = vst [vmem:[#allocation2 + $0x59] sm:$0xff] %v867_v46  ;;  %v8197_v50 = vunpack.c.h.bf16 %v7845_v12 }
 0x1a6   : > { %1533 = vst [vmem:[#allocation2 + $0x31] sm:$0xff] %v8178_v31  ;;  %v932_v45 = vpack.c.bf16 %v914_v37, %v913_v36  ;;  %v7450_v12 = vld [vmem:[%s9929_s1 + $0x18] sm:$0xff] }
 0x1a7   : > { %1534 = vst [vmem:[#allocation2 + $0x39] sm:$0xff] %v8182_v35  ;;  %v835_v47 = vmul.f32 %v8147_v43, %v800_v51  ;;  %1156 = vmatmul.bf16.gmra.mxu0 %v930_v38 }
 0x1a8   : > { %1254 = vmatmul.bf16.gmra.mxu2 %v932_v45  ;;  %1687 = vmatpush.bf16.msra.mxu0 %v7450_v12 }
 0x1a9   : > { %v852_v52 = vadd.f32 %v8152_v49, %v835_v47 }
 0x1aa   : > { %v753_v53 = vpop.f32.mrf.mxu2 }
 0x1ab   : > { %v754_v54 = vadd.f32 %v753_v53, %v704_v40  ;;  %v868_v55 = vmax.f32 %v852_v52, 0.0  ;;  %v812_v40 = vpop.f32.mrf.mxu3 }
 0x1ac   : > { %v899_v57 = vld [vmem:[#allocation2 + $0x58] sm:$0xff]  ;;  %1688 = vmatpush.bf16.msra.mxu0 %v7449_v16 }
 0x1ad   : > { %v803_v56 = vadd.f32 %v802_v21, %v754_v54  ;;  %884 = vst [vmem:[#allocation2 + $0x61] sm:$0xff] %v868_v55  ;;  %v934_v11 = vpack.c.bf16 %v868_v55, %v867_v46 }
 0x1af   : > { %v836_v26 = vmul.f32 %v8147_v43, %v803_v56  ;;  %1210 = vmatmul.bf16.gmra.mxu1 %v934_v11 }
 0x1b1   : > { %v853_v44 = vadd.f32 %v8152_v49, %v836_v26 }
 0x1b2   : > { %v755_v61 = vpop.f32.mrf.mxu2 }
 0x1b3   : > { %v756_v0 = vadd.f32 %v755_v61, %v706_v5  ;;  %v869_v2 = vmax.f32 %v853_v44, 0.0  ;;  %v814_v55 = vpop.f32.mrf.mxu3  ;;  %v8228_v44 = vunpack.c.h.bf16 %v7860_v17 }
 0x1b4   : > { %v900_v3 = vld [vmem:[#allocation2 + $0x60] sm:$0xff] }
 0x1b5   : > { %v915_v6 = vld [vmem:[#allocation2 + $0x5a] sm:$0xff]  ;;  %v916_v7 = vld [vmem:[#allocation2 + $0x62] sm:$0xff]  ;;  %v805_v9 = vadd.f32 %v804_v48, %v756_v0  ;;  %v933_v13 = vpack.c.bf16 %v900_v3, %v899_v57  ;;  %885 = vst [vmem:[#allocation2 + $0x81] sm:$0xff] %v869_v2 }
 0x1b6   : > { %1535 = vst [vmem:[#allocation2 + $0x59] sm:$0xff] %v8193_v27  ;;  %v935_v28 = vpack.c.bf16 %v916_v7, %v915_v6 }
 0x1b7   : > { %1536 = vst [vmem:[#allocation2 + $0x61] sm:$0xff] %v8197_v50  ;;  %v837_v18 = vmul.f32 %v8147_v43, %v805_v9  ;;  %1161 = vmatmul.bf16.gmra.mxu0 %v933_v13 }
 0x1b8   : > { %1259 = vmatmul.bf16.gmra.mxu2 %v935_v28 }
 0x1b9   : > { %v854_v19 = vadd.f32 %v8152_v49, %v837_v18 }
 0x1ba   : > { %v758_v20 = vpop.f32.mrf.mxu2 }
 0x1bb   : > { %v759_v21 = vadd.f32 %v758_v20, %v709_v15  ;;  %v870_v22 = vmax.f32 %v854_v19, 0.0  ;;  %v817_v28 = vpop.f32.mrf.mxu3 }
 0x1bc   : > { %v901_v46 = vld [vmem:[#allocation2 + $0x80] sm:$0xff] }
 0x1bd   : > { %v808_v23 = vadd.f32 %v807_v58, %v759_v21  ;;  %886 = vst [vmem:[#allocation2 + $0x89] sm:$0xff] %v870_v22  ;;  %v937_v1 = vpack.c.bf16 %v870_v22, %v869_v2  ;;  %v8224_v58 = vunpack.c.l.bf16 %v7860_v17  ;;  %v7448_v17 = vld [vmem:[%s9929_s1 + $0x8] sm:$0xff] }
 0x1be   : > { %1689 = vmatpush.bf16.msra.mxu0 %v7448_v17 }
 0x1bf   : > { %v838_v25 = vmul.f32 %v8147_v43, %v808_v23  ;;  %1215 = vmatmul.bf16.gmra.mxu1 %v937_v1  ;;  %v7761_v23 = vld [vmem:[%s7832_s7 + $0x28] sm:$0xff]  }
 0x1c0   : > { %v8241_v1 = vunpack.c.l.bf16 %v7761_v23 }
 0x1c1   : > { %v855_v32 = vadd.f32 %v8152_v49, %v838_v25 }
 0x1c2   : > { %v760_v41 = vpop.f32.mrf.mxu2 }
 0x1c3   : > { %v761_v42 = vadd.f32 %v760_v41, %v711_v30  ;;  %v871_v48 = vmax.f32 %v855_v32, 0.0  ;;  %v819_v22 = vpop.f32.mrf.mxu3  ;;  %v8244_v30 = vunpack.c.h.bf16 %v7761_v23 }
 0x1c4   : > { %v902_v33 = vld [vmem:[#allocation2 + $0x88] sm:$0xff] }
 0x1c5   : > { %v917_v36 = vld [vmem:[#allocation2 + $0x82] sm:$0xff]  ;;  %v918_v37 = vld [vmem:[#allocation2 + $0x8a] sm:$0xff]  ;;  %v810_v51 = vadd.f32 %v809_v8, %v761_v42  ;;  %v936_v38 = vpack.c.bf16 %v902_v33, %v901_v46  ;;  %887 = vst [vmem:[#allocation2 + $0xa9] sm:$0xff] %v871_v48 }
 0x1c6   : > { %1537 = vst [vmem:[#allocation2 + $0x81] sm:$0xff] %v8208_v29  ;;  %v938_v45 = vpack.c.bf16 %v918_v37, %v917_v36 }
 0x1c7   : > { %1538 = vst [vmem:[#allocation2 + $0x89] sm:$0xff] %v8212_v39  ;;  %v839_v47 = vmul.f32 %v8147_v43, %v810_v51  ;;  %1166 = vmatmul.bf16.gmra.mxu0 %v936_v38 }
 0x1c8   : > { %1264 = vmatmul.bf16.gmra.mxu2 %v938_v45 }
 0x1c9   : > { %v856_v10 = vadd.f32 %v8152_v49, %v839_v47 }
 0x1ca   : > { %v763_v52 = vpop.f32.mrf.mxu2 }
 0x1cb   : > { %v764_v53 = vadd.f32 %v763_v52, %v8067_v60  ;;  %v872_v54 = vmax.f32 %v856_v10, 0.0  ;;  %v822_v45 = vpop.f32.mrf.mxu3  ;;  %v7446_v52 = vld [vmem:[%s9929_s1 + $0x278] sm:$0xff] }
 0x1cc   : > { %v903_v60 = vld [vmem:[#allocation2 + $0xa8] sm:$0xff]  ;;  %1414 = vmatpush.bf16.msra.mxu3 %v7446_v52 }
 0x1cd   : > { %v813_v5 = vadd.f32 %v812_v40, %v764_v53  ;;  %888 = vst [vmem:[#allocation2 + $0xb1] sm:$0xff] %v872_v54  ;;  %v940_v56 = vpack.c.bf16 %v872_v54, %v871_v48 }
 0x1cf   : > { %v840_v11 = vmul.f32 %v8147_v43, %v813_v5  ;;  %1220 = vmatmul.bf16.gmra.mxu1 %v940_v56  ;;  %v7762_v56 = vld [vmem:[%s7832_s7 + $0x30] sm:$0xff]  }
 0x1d1   : > { %v857_v26 = vadd.f32 %v8152_v49, %v840_v11  ;;  %v8263_v11 = vunpack.c.l.bf16 %v7762_v56 }
 0x1d2   : > { %v765_v61 = vpop.f32.mrf.mxu2 }
 0x1d3   : > { %v766_v0 = vadd.f32 %v765_v61, %v8075_v63  ;;  %v873_v57 = vmax.f32 %v857_v26, 0.0  ;;  %v8266_v26 = vunpack.c.h.bf16 %v7762_v56 }
 0x1d4   : > { %v904_v2 = vld [vmem:[#allocation2 + $0xb0] sm:$0xff] }
 0x1d5   : > { %v919_v3 = vld [vmem:[#allocation2 + $0xaa] sm:$0xff]  ;;  %v920_v6 = vld [vmem:[#allocation2 + $0xb2] sm:$0xff]  ;;  %v815_v7 = vadd.f32 %v814_v55, %v766_v0  ;;  %v939_v9 = vpack.c.bf16 %v904_v2, %v903_v60  ;;  %889 = vst [vmem:[#allocation2 + $0xd1] sm:$0xff] %v873_v57  ;;  %v824_v2 = vpop.f32.mrf.mxu3 }
 0x1d6   : > { %1539 = vst [vmem:[#allocation2 + $0xa9] sm:$0xff] %v8224_v58  ;;  %v941_v13 = vpack.c.bf16 %v920_v6, %v919_v3  ;;  %v7445_v55 = vld [vmem:[%s9929_s1 + $0x270] sm:$0xff] }
 0x1d7   : > { %1540 = vst [vmem:[#allocation2 + $0xb1] sm:$0xff] %v8228_v44  ;;  %v841_v15 = vmul.f32 %v8147_v43, %v815_v7  ;;  %1171 = vmatmul.bf16.gmra.mxu0 %v939_v9  ;;  %1415 = vmatpush.bf16.msra.mxu3 %v7445_v55 }
 0x1d8   : > { %1269 = vmatmul.bf16.gmra.mxu2 %v941_v13 }
 0x1d9   : > { %v858_v63 = vadd.f32 %v8152_v49, %v841_v15  ;;  %v7444_v15 = vld [vmem:[%s9929_s1 + $0x268] sm:$0xff] }
 0x1da   : > { %v768_v18 = vpop.f32.mrf.mxu2 }
 0x1db   : > { %v769_v12 = vadd.f32 %v768_v18, %v8090_v4  ;;  %v874_v8 = vmax.f32 %v858_v63, 0.0  ;;  %1416 = vmatpush.bf16.msra.mxu3 %v7444_v15  ;;  %v7443_v63 = vld [vmem:[%s9929_s1 + $0x260] sm:$0xff]  ;;  %v7460_v15 = vld [vmem:[%s9929_s1 + $0x2a8] sm:$0xff] }
 0x1dc   : > { %v905_v41 = vld [vmem:[#allocation2 + $0xd0] sm:$0xff] }
 0x1dd   : > { %v818_v19 = vadd.f32 %v817_v28, %v769_v12  ;;  %890 = vst [vmem:[#allocation2 + $0xd9] sm:$0xff] %v874_v8  ;;  %v943_v20 = vpack.c.bf16 %v874_v8, %v873_v57  ;;  %v7442_v8 = vld [vmem:[%s9929_s1 + $0x258] sm:$0xff] }
 0x1df   : > { %v842_v21 = vmul.f32 %v8147_v43, %v818_v19  ;;  %1225 = vmatmul.bf16.gmra.mxu1 %v943_v20  ;;  %1417 = vmatpush.bf16.msra.mxu3 %v7443_v63 }
 0x1e1   : > { %v859_v25 = vadd.f32 %v8152_v49, %v842_v21  ;;  %v7441_v21 = vld [vmem:[%s9929_s1 + $0x250] sm:$0xff] }
 0x1e2   : > { %v770_v32 = vpop.f32.mrf.mxu2 }
 0x1e3   : > { %v771_v40 = vadd.f32 %v770_v32, %v8104_v14  ;;  %v875_v4 = vmax.f32 %v859_v25, 0.0  ;;  %v7447_v14 = vld [vmem:[%s9929_s1] sm:$0xff]  ;;  %1418 = vmatpush.bf16.msra.mxu3 %v7442_v8 }
 0x1e4   : > { %v906_v42 = vld [vmem:[#allocation2 + $0xd8] sm:$0xff]  ;;  %1690 = vmatpush.bf16.msra.mxu0 %v7447_v14 }
 0x1e5   : > { %v921_v46 = vld [vmem:[#allocation2 + $0xd2] sm:$0xff]  ;;  %v922_v48 = vld [vmem:[#allocation2 + $0xda] sm:$0xff]  ;;  %v820_v33 = vadd.f32 %v819_v22, %v771_v40  ;;  %v942_v36 = vpack.c.bf16 %v906_v42, %v905_v41  ;;  %891 = vst [vmem:[#allocation2 + $0xf9] sm:$0xff] %v875_v4  ;;  %v1547_v42 = vld [vmem:[#allocation2 + $0x8] sm:$0xff] }
 0x1e6   : > { %1541 = vst [vmem:[#allocation2 + $0xd1] sm:$0xff] %v8241_v1  ;;  %v944_v37 = vpack.c.bf16 %v922_v48, %v921_v46  ;;  %v1548_v46 = vld [vmem:[#allocation2 + $0x10] sm:$0xff]  ;;  %v7439_v48 = vld [vmem:[%s9929_s1 + $0x240] sm:$0xff] }
 0x1e7   : > { %1542 = vst [vmem:[#allocation2 + $0xd9] sm:$0xff] %v8244_v30  ;;  %v843_v51 = vmul.f32 %v8147_v43, %v820_v33  ;;  %1176 = vmatmul.bf16.gmra.mxu0 %v942_v36  ;;  %1419 = vmatpush.bf16.msra.mxu3 %v7441_v21  ;;  %v1563_v33 = vadd.f32 %v8163_v59, %v1547_v42  ;;  %v1580_v14 = vld [vmem:[#allocation2 + $0x12] sm:$0xff] }
 0x1e8   : > { %1274 = vmatmul.bf16.gmra.mxu2 %v944_v37  ;;  %v1564_v36 = vadd.f32 %v8167_v62, %v1548_v46  ;;  %v1551_v21 = vld [vmem:[#allocation2 + $0x58] sm:$0xff] }
 0x1e9   : > { %v860_v38 = vadd.f32 %v8152_v49, %v843_v51  ;;  %v1579_v51 = vld [vmem:[#allocation2 + $0xa] sm:$0xff] }
 0x1ea   : > { %v773_v47 = vpop.f32.mrf.mxu2 }
 0x1eb   : > { %v774_v16 = vadd.f32 %v773_v47, %v8122_v24  ;;  %v876_v10 = vmax.f32 %v860_v38, 0.0  ;;  %v1595_v38 = vadd.f32 %v1579_v51, %v1563_v33  ;;  %v7461_v47 = vld [vmem:[%s9929_s1 + $0x2b0] sm:$0xff]  ;;  %v1583_v33 = vld [vmem:[#allocation2 + $0x5a] sm:$0xff] }
 0x1ec   : > { %v907_v60 = vld [vmem:[#allocation2 + $0xf8] sm:$0xff] }
 0x1ed   : > { %v823_v53 = vadd.f32 %v822_v45, %v774_v16  ;;  %892 = vst [vmem:[#allocation2 + $0x101] sm:$0xff] %v876_v10  ;;  %v946_v54 = vpack.c.bf16 %v876_v10, %v875_v4  ;;  %v7440_v4 = vld [vmem:[%s9929_s1 + $0x248] sm:$0xff]  ;;  %v1596_v45 = vadd.f32 %v1580_v14, %v1564_v36 }
 0x1ee   : > { %1420 = vmatpush.bf16.msra.mxu3 %v7440_v4  ;;  %v1567_v4 = vadd.f32 %v8193_v27, %v1551_v21  ;;  %v1584_v36 = vld [vmem:[#allocation2 + $0x62] sm:$0xff] }
 0x1ef   : > { %v844_v5 = vmul.f32 %v8147_v43, %v823_v53  ;;  %1230 = vmatmul.bf16.gmra.mxu1 %v946_v54  ;;  %v1611_v16 = vpack.c.bf16 %v1596_v45, %v1595_v38  ;;  %v1549_v53 = vld [vmem:[#allocation2 + $0x30] sm:$0xff]  ;;  %v1550_v54 = vld [vmem:[#allocation2 + $0x38] sm:$0xff] }
 0x1f0   : > { %v1565_v56 = vadd.f32 %v8178_v31, %v1549_v53  ;;  %v1599_v51 = vadd.f32 %v1583_v33, %v1567_v4 }
 0x1f1   : > { %v861_v24 = vadd.f32 %v8152_v49, %v844_v5 }
 0x1f2   : > { %v775_v61 = vpop.f32.mrf.mxu2  ;;  %1421 = vmatpush.bf16.msra.mxu3 %v7439_v48 }
 0x1f3   : > { %v776_v0 = vadd.f32 %v775_v61, %v8136_v34  ;;  %v877_v57 = vmax.f32 %v861_v24, 0.0  ;;  %v1566_v24 = vadd.f32 %v8182_v35, %v1550_v54 }
 0x1f4   : > { %v908_v3 = vld [vmem:[#allocation2 + $0x100] sm:$0xff] }
 0x1f5   : > { %v923_v6 = vld [vmem:[#allocation2 + $0xfa] sm:$0xff]  ;;  %v924_v7 = vld [vmem:[#allocation2 + $0x102] sm:$0xff]  ;;  %v825_v9 = vadd.f32 %v824_v2, %v776_v0  ;;  %v945_v13 = vpack.c.bf16 %v908_v3, %v907_v60  ;;  %893 = vst [vmem:[#allocation2 + $0x121] sm:$0xff] %v877_v57  ;;  %v1581_v60 = vld [vmem:[#allocation2 + $0x32] sm:$0xff] }
 0x1f6   : > { %1543 = vst [vmem:[#allocation2 + $0xf9] sm:$0xff] %v8263_v11  ;;  %v947_v28 = vpack.c.bf16 %v924_v7, %v923_v6  ;;  %v8311_v3 = vld [vmem:[%s9930_s2 + $0x4] ss:$0 sm:$0xff]  ;;  %v1597_v6 = vadd.f32 %v1581_v60, %v1565_v56 }
 0x1f7   : > { %1544 = vst [vmem:[#allocation2 + $0x101] sm:$0xff] %v8266_v26  ;;  %v845_v34 = vmul.f32 %v8147_v43, %v825_v9  ;;  %1181 = vmatmul.bf16.gmra.mxu0 %v945_v13  ;;  %v7763_v43 = vld [vmem:[%s7832_s7 + $0x38] sm:$0xff]   ;;  %v8317_v13 = vld [vmem:[%s9930_s2 + $0x5] ss:$0 sm:$0xff] }
 0x1f8   : > { %1279 = vmatmul.bf16.gmra.mxu2 %v947_v28  ;;  %v8283_v19 = vunpack.c.l.bf16 %v7763_v43  ;;  %v8288_v20 = vunpack.c.h.bf16 %v7763_v43 }
 0x1f9   : > { %v862_v17 = vadd.f32 %v8152_v49, %v845_v34  ;;  %v7462_v49 = vld [vmem:[%s9929_s1 + $0x2b8] sm:$0xff] }
 0x1fa   : > { %1804 = vmatpush.bf16.msra.mxu1 %v7462_v49 }
 0x1fb   : > { %v878_v18 = vmax.f32 %v862_v17, 0.0 }
 0x1fc   : > { %v909_v22 = vld [vmem:[#allocation2 + $0x120] sm:$0xff] }
 0x1fd   : > { %894 = vst [vmem:[#allocation2 + $0x129] sm:$0xff] %v878_v18  ;;  %v949_v12 = vpack.c.bf16 %v878_v18, %v877_v57  ;;  %v1582_v57 = vld [vmem:[#allocation2 + $0x3a] sm:$0xff] }
 0x1fe   : > { %1805 = vmatpush.bf16.msra.mxu1 %v7461_v47  ;;  %v1598_v7 = vadd.f32 %v1582_v57, %v1566_v24  ;;  %v7459_v47 = vld [vmem:[%s9929_s1 + $0x2a0] sm:$0xff] }
 0x1ff   : > { %1235 = vmatmul.bf16.gmra.mxu1 %v949_v12  ;;  %v1553_v24 = vld [vmem:[#allocation2 + $0x80] sm:$0xff] }
 0x200   : > { %v1612_v63 = vpack.c.bf16 %v1598_v7, %v1597_v6  ;;  %v1569_v7 = vadd.f32 %v8208_v29, %v1553_v24 }
 0x202   : > { %1806 = vmatpush.bf16.msra.mxu1 %v7460_v15 }
 0x204   : > { %v910_v23 = vld [vmem:[#allocation2 + $0x128] sm:$0xff] }
 0x205   : > { %v925_v25 = vld [vmem:[#allocation2 + $0x122] sm:$0xff]  ;;  %v926_v32 = vld [vmem:[#allocation2 + $0x12a] sm:$0xff]  ;;  %v948_v40 = vpack.c.bf16 %v910_v23, %v909_v22 }
 0x206   : > { %1545 = vst [vmem:[#allocation2 + $0x121] sm:$0xff] %v8283_v19  ;;  %v950_v41 = vpack.c.bf16 %v926_v32, %v925_v25  ;;  %v1552_v22 = vld [vmem:[#allocation2 + $0x60] sm:$0xff]  ;;  %1807 = vmatpush.bf16.msra.mxu1 %v7459_v47 }
 0x207   : > { %1546 = vst [vmem:[#allocation2 + $0x129] sm:$0xff] %v8288_v20  ;;  %1186 = vmatmul.bf16.gmra.mxu0 %v948_v40  ;;  %v1568_v42 = vadd.f32 %v8197_v50, %v1552_v22 }
 0x208   : > { %1284 = vmatmul.bf16.gmra.mxu2 %v950_v41 }
 0x209   : > { %v1600_v14 = vadd.f32 %v1584_v36, %v1568_v42  ;;  %v1555_v42 = vld [vmem:[#allocation2 + $0xa8] sm:$0xff] }
 0x20c   : > { %v1201_v37 = vpop.f32.mrf.mxu1 }
 0x214   : > { %v1152_v10 = vpop.f32.mrf.mxu0  ;;  %v1203_v52 = vpop.f32.mrf.mxu1 }
 0x215   : > { %v1202_v5 = vadd.f32 %v1201_v37, %v1152_v10 }
 0x217   : > { %1691 = vmatmul.bf16.vlgmr.msra.gmra.mxu0 %v1611_v16 }
 0x21b   : > { %v1250_v55 = vpop.f32.mrf.mxu2 }
 0x21c   : > { %v1154_v61 = vpop.f32.mrf.mxu0  ;;  %v1206_v0 = vpop.f32.mrf.mxu1  ;;  %v1251_v2 = vadd.f32 %v1250_v55, %v1202_v5 }
 0x21d   : > { %v1204_v28 = vadd.f32 %v1203_v52, %v1154_v61  ;;  %v1613_v52 = vpack.c.bf16 %v1600_v14, %v1599_v51  ;;  %v1554_v61 = vld [vmem:[#allocation2 + $0x88] sm:$0xff]  ;;  %v1571_v14 = vadd.f32 %v8224_v58, %v1555_v42 }
 0x21e   : > { %v1293_v9 = vmul.f32 %v8311_v3, %v1251_v2 }
 0x220   : > { %v1310_v8 = vadd.f32 %v8317_v13, %v1293_v9  ;;  %v1570_v9 = vadd.f32 %v8212_v39, %v1554_v61 }
 0x222   : > { %v1326_v23 = vmax.f32 %v1310_v8, 0.0 }
 0x223   : > { %v1252_v34 = vpop.f32.mrf.mxu2 }
 0x224   : > { %v1253_v17 = vadd.f32 %v1252_v34, %v1204_v28  ;;  %v1157_v18 = vpop.f32.mrf.mxu0  ;;  %v1208_v12 = vpop.f32.mrf.mxu1  ;;  %v1585_v34 = vld [vmem:[#allocation2 + $0x82] sm:$0xff] }
 0x225   : > { %v1207_v40 = vadd.f32 %v1206_v0, %v1157_v18  ;;  %v1601_v18 = vadd.f32 %v1585_v34, %v1569_v7 }
 0x226   : > { %v1294_v43 = vmul.f32 %v8311_v3, %v1253_v17  ;;  %v1586_v17 = vld [vmem:[#allocation2 + $0x8a] sm:$0xff] }
 0x227   : > { %1696 = vmatmul.bf16.gmra.mxu0 %v1612_v63 }
 0x228   : > { %v1311_v49 = vadd.f32 %v8317_v13, %v1294_v43 }
 0x22a   : > { %v1327_v25 = vmax.f32 %v1311_v49, 0.0  ;;  %v7458_v49 = vld [vmem:[%s9929_s1 + $0x298] sm:$0xff] }
 0x22b   : > { %v1255_v32 = vpop.f32.mrf.mxu2  ;;  %1808 = vmatpush.bf16.msra.mxu1 %v7458_v49  ;;  %v1589_v49 = vld [vmem:[#allocation2 + $0xd2] sm:$0xff] }
 0x22c   : > { %v1342_v41 = vpack.c.bf16 %v1327_v25, %v1326_v23  ;;  %v1159_v46 = vpop.f32.mrf.mxu0  ;;  %v1211_v48 = vpop.f32.mrf.mxu1  ;;  %v1256_v37 = vadd.f32 %v1255_v32, %v1207_v40 }
 0x22d   : > { %v1209_v45 = vadd.f32 %v1208_v12, %v1159_v46  ;;  %v1602_v12 = vadd.f32 %v1586_v17, %v1570_v9  ;;  %v1556_v46 = vld [vmem:[#allocation2 + $0xb0] sm:$0xff] }
 0x22e   : > { %1422 = vmatmul.bf16.vlgmr.msra.gmra.mxu3 %v1342_v41  ;;  %v1295_v38 = vmul.f32 %v8311_v3, %v1256_v37  ;;  %v1557_v9 = vld [vmem:[#allocation2 + $0xd0] sm:$0xff] }
 0x22f   : > { %v1614_v23 = vpack.c.bf16 %v1602_v12, %v1601_v18  ;;  %v1573_v12 = vadd.f32 %v8241_v1, %v1557_v9 }
 0x230   : > { %v1312_v55 = vadd.f32 %v8317_v13, %v1295_v38  ;;  %v1572_v38 = vadd.f32 %v8228_v44, %v1556_v46 }
 0x232   : > { %v1328_v0 = vmax.f32 %v1312_v55, 0.0 }
 0x233   : > { %v1257_v16 = vpop.f32.mrf.mxu2 }
 0x234   : > { %v1258_v10 = vadd.f32 %v1257_v16, %v1209_v45  ;;  %v1162_v53 = vpop.f32.mrf.mxu0  ;;  %v1213_v54 = vpop.f32.mrf.mxu1  ;;  %v1587_v16 = vld [vmem:[#allocation2 + $0xaa] sm:$0xff] }
 0x235   : > { %v1212_v2 = vadd.f32 %v1211_v48, %v1162_v53  ;;  %v1603_v53 = vadd.f32 %v1587_v16, %v1571_v14 }
 0x236   : > { %v1296_v5 = vmul.f32 %v8311_v3, %v1258_v10  ;;  %v1588_v10 = vld [vmem:[#allocation2 + $0xb2] sm:$0xff] }
 0x237   : > { %1701 = vmatmul.bf16.gmra.mxu0 %v1613_v52 }
 0x238   : > { %v1313_v56 = vadd.f32 %v8317_v13, %v1296_v5 }
 0x23a   : > { %v1329_v60 = vmax.f32 %v1313_v56, 0.0  ;;  %v7457_v56 = vld [vmem:[%s9929_s1 + $0x290] sm:$0xff] }
 0x23b   : > { %v1260_v57 = vpop.f32.mrf.mxu2  ;;  %1809 = vmatpush.bf16.msra.mxu1 %v7457_v56  ;;  %v1591_v56 = vld [vmem:[#allocation2 + $0xfa] sm:$0xff] }
 0x23c   : > { %v1343_v6 = vpack.c.bf16 %v1329_v60, %v1328_v0  ;;  %v1164_v28 = vpop.f32.mrf.mxu0  ;;  %v1216_v15 = vpop.f32.mrf.mxu1  ;;  %v1261_v63 = vadd.f32 %v1260_v57, %v1212_v2 }
 0x23d   : > { %v1214_v43 = vadd.f32 %v1213_v54, %v1164_v28  ;;  %v1604_v54 = vadd.f32 %v1588_v10, %v1572_v38  ;;  %v1558_v28 = vld [vmem:[#allocation2 + $0xd8] sm:$0xff] }
 0x23e   : > { %1427 = vmatmul.bf16.gmra.mxu3 %v1343_v6  ;;  %v1297_v8 = vmul.f32 %v8311_v3, %v1261_v63  ;;  %v1559_v38 = vld [vmem:[#allocation2 + $0xf8] sm:$0xff] }
 0x23f   : > { %v1615_v0 = vpack.c.bf16 %v1604_v54, %v1603_v53  ;;  %v1575_v54 = vadd.f32 %v8263_v11, %v1559_v38 }
 0x240   : > { %v1314_v40 = vadd.f32 %v8317_v13, %v1297_v8  ;;  %v1574_v8 = vadd.f32 %v8244_v30, %v1558_v28 }
 0x242   : > { %v1330_v48 = vmax.f32 %v1314_v40, 0.0 }
 0x243   : > { %v1262_v21 = vpop.f32.mrf.mxu2 }
 0x244   : > { %v1263_v22 = vadd.f32 %v1262_v21, %v1214_v43  ;;  %v1167_v25 = vpop.f32.mrf.mxu0  ;;  %v1218_v32 = vpop.f32.mrf.mxu1  ;;  %v1590_v21 = vld [vmem:[#allocation2 + $0xda] sm:$0xff] }
 0x245   : > { %v1217_v37 = vadd.f32 %v1216_v15, %v1167_v25  ;;  %v1605_v25 = vadd.f32 %v1589_v49, %v1573_v12  ;;  %v1561_v12 = vld [vmem:[#allocation2 + $0x120] sm:$0xff] }
 0x246   : > { %v1298_v41 = vmul.f32 %v8311_v3, %v1263_v22 }
 0x247   : > { %1706 = vmatmul.bf16.gmra.mxu0 %v1614_v23 }
 0x248   : > { %v1315_v4 = vadd.f32 %v8317_v13, %v1298_v41 }
 0x24a   : > { %v1331_v33 = vmax.f32 %v1315_v4, 0.0  ;;  %v7456_v4 = vld [vmem:[%s9929_s1 + $0x288] sm:$0xff] }
 0x24b   : > { %v1265_v36 = vpop.f32.mrf.mxu2  ;;  %1810 = vmatpush.bf16.msra.mxu1 %v7456_v4  ;;  %v1593_v4 = vld [vmem:[#allocation2 + $0x122] sm:$0xff] }
 0x24c   : > { %v1344_v51 = vpack.c.bf16 %v1331_v33, %v1330_v48  ;;  %v1169_v45 = vpop.f32.mrf.mxu0  ;;  %v1221_v47 = vpop.f32.mrf.mxu1  ;;  %v1266_v52 = vadd.f32 %v1265_v36, %v1217_v37 }
 0x24d   : > { %v1219_v5 = vadd.f32 %v1218_v32, %v1169_v45  ;;  %v1606_v32 = vadd.f32 %v1590_v21, %v1574_v8  ;;  %v1560_v45 = vld [vmem:[#allocation2 + $0x100] sm:$0xff]  ;;  %v1562_v8 = vld [vmem:[#allocation2 + $0x128] sm:$0xff] }
 0x24e   : > { %1432 = vmatmul.bf16.gmra.mxu3 %v1344_v51  ;;  %v1299_v55 = vmul.f32 %v8311_v3, %v1266_v52 }
 0x24f   : > { %v1616_v48 = vpack.c.bf16 %v1606_v32, %v1605_v25  ;;  %v1577_v25 = vadd.f32 %v8283_v19, %v1561_v12  ;;  %v1578_v32 = vadd.f32 %v8288_v20, %v1562_v8 }
 0x250   : > { %v1316_v2 = vadd.f32 %v8317_v13, %v1299_v55  ;;  %v1576_v55 = vadd.f32 %v8266_v26, %v1560_v45 }
 0x252   : > { %v1332_v15 = vmax.f32 %v1316_v2, 0.0 }
 0x253   : > { %v1267_v24 = vpop.f32.mrf.mxu2 }
 0x254   : > { %v1268_v61 = vadd.f32 %v1267_v24, %v1219_v5  ;;  %v1172_v60 = vpop.f32.mrf.mxu0  ;;  %v1223_v57 = vpop.f32.mrf.mxu1  ;;  %v1592_v24 = vld [vmem:[#allocation2 + $0x102] sm:$0xff] }
 0x255   : > { %v1222_v63 = vadd.f32 %v1221_v47, %v1172_v60  ;;  %v1608_v60 = vadd.f32 %v1592_v24, %v1576_v55 }
 0x256   : > { %v1300_v6 = vmul.f32 %v8311_v3, %v1268_v61 }
 0x257   : > { %1711 = vmatmul.bf16.gmra.mxu0 %v1615_v0  ;;  %v1607_v0 = vadd.f32 %v1591_v56, %v1575_v54 }
 0x258   : > { %v1317_v7 = vadd.f32 %v8317_v13, %v1300_v6  ;;  %v7455_v6 = vld [vmem:[%s9929_s1 + $0x280] sm:$0xff] }
 0x259   : > { %1811 = vmatpush.bf16.msra.mxu1 %v7455_v6 }
 0x25a   : > { %v1333_v34 = vmax.f32 %v1317_v7, 0.0 }
 0x25b   : > { %v1270_v17 = vpop.f32.mrf.mxu2 }
 0x25c   : > { %v1345_v18 = vpack.c.bf16 %v1333_v34, %v1332_v15  ;;  %v1174_v43 = vpop.f32.mrf.mxu0  ;;  %v1271_v22 = vadd.f32 %v1270_v17, %v1222_v63  ;;  %v1226_v23 = vpop.f32.mrf.mxu1  ;;  %v1617_v15 = vpack.c.bf16 %v1608_v60, %v1607_v0 }
 0x25d   : > { %v1224_v41 = vadd.f32 %v1223_v57, %v1174_v43 }
 0x25e   : > { %1437 = vmatmul.bf16.gmra.mxu3 %v1345_v18  ;;  %v1301_v40 = vmul.f32 %v8311_v3, %v1271_v22 }
 0x260   : > { %v1318_v36 = vadd.f32 %v8317_v13, %v1301_v40 }
 0x262   : > { %v1334_v47 = vmax.f32 %v1318_v36, 0.0 }
 0x263   : > { %v1272_v42 = vpop.f32.mrf.mxu2 }
 0x264   : > { %v1273_v46 = vadd.f32 %v1272_v42, %v1224_v41  ;;  %v1177_v33 = vpop.f32.mrf.mxu0  ;;  %v1228_v14 = vpop.f32.mrf.mxu1  ;;  %v1594_v42 = vld [vmem:[#allocation2 + $0x12a] sm:$0xff] }
 0x265   : > { %v1227_v52 = vadd.f32 %v1226_v23, %v1177_v33  ;;  %v1610_v33 = vadd.f32 %v1594_v42, %v1578_v32 }
 0x266   : > { %v1302_v37 = vmul.f32 %v8311_v3, %v1273_v46 }
 0x267   : > { %1716 = vmatmul.bf16.gmra.mxu0 %v1616_v48  ;;  %v1609_v48 = vadd.f32 %v1593_v4, %v1577_v25  ;;  %v7485_v25 = vld [vmem:[%s9929_s1 + $0x370] sm:$0xff] }
 0x268   : > { %v1319_v51 = vadd.f32 %v8317_v13, %v1302_v37 }
 0x269   : > { %v1618_v38 = vpack.c.bf16 %v1610_v33, %v1609_v48  ;;  %v7467_v33 = vld [vmem:[%s9929_s1 + $0x2e0] sm:$0xff] }
 0x26a   : > { %v1335_v16 = vmax.f32 %v1319_v51, 0.0 }
 0x26b   : > { %v1275_v10 = vpop.f32.mrf.mxu2 }
 0x26c   : > { %v1346_v53 = vpack.c.bf16 %v1335_v16, %v1334_v47  ;;  %v1179_v5 = vpop.f32.mrf.mxu0  ;;  %v1276_v61 = vadd.f32 %v1275_v10, %v1227_v52  ;;  %v1231_v7 = vpop.f32.mrf.mxu1 }
 0x26d   : > { %v1229_v2 = vadd.f32 %v1228_v14, %v1179_v5 }
 0x26e   : > { %1442 = vmatmul.bf16.gmra.mxu3 %v1346_v53  ;;  %v1303_v57 = vmul.f32 %v8311_v3, %v1276_v61 }
 0x270   : > { %v1320_v17 = vadd.f32 %v8317_v13, %v1303_v57 }
 0x272   : > { %v1336_v43 = vmax.f32 %v1320_v17, 0.0 }
 0x273   : > { %v1277_v9 = vpop.f32.mrf.mxu2 }
 0x274   : > { %v1278_v28 = vadd.f32 %v1277_v9, %v1229_v2  ;;  %v1182_v34 = vpop.f32.mrf.mxu0  ;;  %v1233_v40 = vpop.f32.mrf.mxu1 }
 0x275   : > { %v1232_v22 = vadd.f32 %v1231_v7, %v1182_v34 }
 0x276   : > { %v1304_v63 = vmul.f32 %v8311_v3, %v1278_v28 }
 0x277   : > { %1721 = vmatmul.bf16.gmra.mxu0 %v1617_v15 }
 0x278   : > { %v1321_v18 = vadd.f32 %v8317_v13, %v1304_v63  ;;  %v7470_v63 = vld [vmem:[%s9929_s1 + $0x2f8] sm:$0xff] }
 0x279   : > { %2169 = vmatpush.bf16.msrb.mxu2 %v7470_v63 }
 0x27a   : > { %v1337_v49 = vmax.f32 %v1321_v18, 0.0  ;;  %v7478_v18 = vld [vmem:[%s9929_s1 + $0x338] sm:$0xff] }
 0x27b   : > { %v1280_v21 = vpop.f32.mrf.mxu2  ;;  %2218 = vmatpush.bf16.msrb.mxu3 %v7478_v18  ;;  %v7479_v18 = vld [vmem:[%s9929_s1 + $0x340] sm:$0xff] }
 0x27c   : > { %v1347_v23 = vpack.c.bf16 %v1337_v49, %v1336_v43  ;;  %v1184_v41 = vpop.f32.mrf.mxu0  ;;  %v1281_v46 = vadd.f32 %v1280_v21, %v1232_v22  ;;  %v1236_v10 = vpop.f32.mrf.mxu1  ;;  %v7469_v49 = vld [vmem:[%s9929_s1 + $0x2f0] sm:$0xff] }
 0x27d   : > { %v1234_v37 = vadd.f32 %v1233_v40, %v1184_v41  ;;  %v7477_v21 = vld [vmem:[%s9929_s1 + $0x330] sm:$0xff]  ;;  %2170 = vmatpush.bf16.msrb.mxu2 %v7469_v49  ;;  %v7468_v40 = vld [vmem:[%s9929_s1 + $0x2e8] sm:$0xff] }
 0x27e   : > { %1447 = vmatmul.bf16.gmra.mxu3 %v1347_v23  ;;  %v1305_v36 = vmul.f32 %v8311_v3, %v1281_v46  ;;  %v7476_v41 = vld [vmem:[%s9929_s1 + $0x328] sm:$0xff] }
 0x27f   : > { %2219 = vmatpush.bf16.msrb.mxu3 %v7477_v21  ;;  %v7484_v46 = vld [vmem:[%s9929_s1 + $0x368] sm:$0xff] }
 0x280   : > { %v1322_v47 = vadd.f32 %v8317_v13, %v1305_v36  ;;  %v7475_v36 = vld [vmem:[%s9929_s1 + $0x320] sm:$0xff] }
 0x281   : > { %2171 = vmatpush.bf16.msrb.mxu2 %v7468_v40 }
 0x282   : > { %v1338_v53 = vmax.f32 %v1322_v47, 0.0  ;;  %v7474_v47 = vld [vmem:[%s9929_s1 + $0x318] sm:$0xff] }
 0x283   : > { %v1282_v51 = vpop.f32.mrf.mxu2  ;;  %2220 = vmatpush.bf16.msrb.mxu3 %v7476_v41 }
 0x284   : > { %v1283_v14 = vadd.f32 %v1282_v51, %v1234_v37  ;;  %v1187_v45 = vpop.f32.mrf.mxu0  ;;  %v1238_v0 = vpop.f32.mrf.mxu1 }
 0x285   : > { %v1237_v5 = vadd.f32 %v1236_v10, %v1187_v45  ;;  %2172 = vmatpush.bf16.msrb.mxu2 %v7467_v33  ;;  %v7466_v45 = vld [vmem:[%s9929_s1 + $0x2d8] sm:$0xff] }
 0x286   : > { %v1306_v16 = vmul.f32 %v8311_v3, %v1283_v14  ;;  %v7483_v14 = vld [vmem:[%s9929_s1 + $0x360] sm:$0xff] }
 0x287   : > { %1726 = vmatmul.bf16.gmra.mxu0 %v1618_v38  ;;  %2221 = vmatpush.bf16.msrb.mxu3 %v7475_v36 }
 0x288   : > { %v1323_v52 = vadd.f32 %v8317_v13, %v1306_v16 }
 0x289   : > { %2173 = vmatpush.bf16.msrb.mxu2 %v7466_v45 }
 0x28a   : > { %v1339_v54 = vmax.f32 %v1323_v52, 0.0  ;;  %v7482_v52 = vld [vmem:[%s9929_s1 + $0x358] sm:$0xff] }
 0x28b   : > { %v1285_v55 = vpop.f32.mrf.mxu2  ;;  %2222 = vmatpush.bf16.msrb.mxu3 %v7474_v47 }
 0x28c   : > { %v1348_v56 = vpack.c.bf16 %v1339_v54, %v1338_v53  ;;  %v1189_v24 = vpop.f32.mrf.mxu0  ;;  %v1286_v61 = vadd.f32 %v1285_v55, %v1237_v5  ;;  %v7465_v54 = vld [vmem:[%s9929_s1 + $0x2d0] sm:$0xff] }
 0x28d   : > { %v1239_v57 = vadd.f32 %v1238_v0, %v1189_v24  ;;  %v7473_v55 = vld [vmem:[%s9929_s1 + $0x310] sm:$0xff]  ;;  %2174 = vmatpush.bf16.msrb.mxu2 %v7465_v54  ;;  %v7464_v0 = vld [vmem:[%s9929_s1 + $0x2c8] sm:$0xff] }
 0x28e   : > { %1452 = vmatmul.bf16.gmra.mxu3 %v1348_v56  ;;  %v1307_v60 = vmul.f32 %v8311_v3, %v1286_v61  ;;  %v7481_v24 = vld [vmem:[%s9929_s1 + $0x350] sm:$0xff] }
 0x28f   : > { %2223 = vmatpush.bf16.msrb.mxu3 %v7473_v55 }
 0x290   : > { %v1324_v9 = vadd.f32 %v8317_v13, %v1307_v60  ;;  %v7472_v60 = vld [vmem:[%s9929_s1 + $0x308] sm:$0xff] }
 0x291   : > { %2175 = vmatpush.bf16.msrb.mxu2 %v7464_v0 }
 0x292   : > { %v1340_v34 = vmax.f32 %v1324_v9, 0.0 }
 0x293   : > { %v1287_v2 = vpop.f32.mrf.mxu2  ;;  %2224 = vmatpush.bf16.msrb.mxu3 %v7472_v60 }
 0x294   : > { %v1288_v6 = vadd.f32 %v1287_v2, %v1239_v57  ;;  %v8377_v7 = vpop.f32.mrf.mxu0 }
 0x296   : > { %v1308_v28 = vmul.f32 %v8311_v3, %v1288_v6  ;;  %v7480_v6 = vld [vmem:[%s9929_s1 + $0x348] sm:$0xff] }
 0x298   : > { %v1325_v15 = vadd.f32 %v8317_v13, %v1308_v28  ;;  %v7486_v13 = vld [vmem:[%s9929_s1 + $0x378] sm:$0xff]  ;;  %v7471_v28 = vld [vmem:[%s9929_s1 + $0x300] sm:$0xff] }
 0x299   : > { %2267 = vmatpush.bf16.msrb.mxu0 %v7486_v13  ;;  %2225 = vmatpush.bf16.msrb.mxu3 %v7471_v28 }
 0x29a   : > { %v1341_v17 = vmax.f32 %v1325_v15, 0.0  ;;  %v7463_v15 = vld [vmem:[%s9929_s1 + $0x2c0] sm:$0xff] }
 0x29b   : > { %2176 = vmatpush.bf16.msrb.mxu2 %v7463_v15 }
 0x29c   : > { %v1349_v12 = vpack.c.bf16 %v1341_v17, %v1340_v34  ;;  %v8388_v8 = vpop.f32.mrf.mxu0 }
 0x29d   : > { %v1732_v3 = vpack.c.bf16 %v8388_v8, %v8377_v7  ;;  %2268 = vmatpush.bf16.msrb.mxu0 %v7485_v25 }
 0x29e   : > { %1457 = vmatmul.bf16.gmra.mxu3 %v1349_v12  ;;  %v8505_v12 = vld [vmem:[%s9930_s2 + $0x8] ss:$0 sm:$0xff] }
 0x29f   : > { %1812 = vmatmul.bf16.vlgmr.msra.gmra.mxu1 %v1732_v3  ;;  %v8510_v3 = vld [vmem:[%s9930_s2 + $0x9] ss:$0 sm:$0xff] }
 0x2a1   : > { %2269 = vmatpush.bf16.msrb.mxu0 %v7484_v46 }
 0x2a4   : > { %v8395_v43 = vpop.f32.mrf.mxu0 }
 0x2a5   : > { %2270 = vmatpush.bf16.msrb.mxu0 %v7483_v14 }
 0x2a9   : > { %2271 = vmatpush.bf16.msrb.mxu0 %v7482_v52 }
 0x2ac   : > { %v8403_v22 = vpop.f32.mrf.mxu0 }
 0x2ad   : > { %v1733_v23 = vpack.c.bf16 %v8403_v22, %v8395_v43  ;;  %2272 = vmatpush.bf16.msrb.mxu0 %v7481_v24 }
 0x2af   : > { %1817 = vmatmul.bf16.gmra.mxu1 %v1733_v23 }
 0x2b1   : > { %2273 = vmatpush.bf16.msrb.mxu0 %v7480_v6  ;;  %v8497_v63 = vpop.f32.mrf.mxu3 }
 0x2b2   : > { %9932 = vst [vmem:[#allocation3_spill] sm:$0xff] %v8497_v63 }
 0x2b4   : > { %v8410_v32 = vpop.f32.mrf.mxu0 }
 0x2b5   : > { %2274 = vmatpush.bf16.msrb.mxu0 %v7479_v18  ;;  %v7494_v18 = vld [vmem:[%s9929_s1 + $0x3b8] sm:$0xff] }
 0x2b6   : > { %2632 = vmatpush.bf16.msrb.mxu1 %v7494_v18 }
 0x2b9   : > { %v8512_v13 = vpop.f32.mrf.mxu3 }
 0x2ba   : > { %9933 = vst [vmem:[#allocation4_spill] sm:$0xff] %v8512_v13 }
 0x2bc   : > { %v8418_v4 = vpop.f32.mrf.mxu0 }
 0x2bd   : > { %v1734_v42 = vpack.c.bf16 %v8418_v4, %v8410_v32 }
 0x2bf   : > { %1822 = vmatmul.bf16.gmra.mxu1 %v1734_v42 }
 0x2c1   : > { %v8517_v42 = vpop.f32.mrf.mxu3 }
 0x2c2   : > { %9934 = vst [vmem:[#allocation5_spill] sm:$0xff] %v8517_v42 }
 0x2c4   : > { %v8425_v48 = vpop.f32.mrf.mxu0 }
 0x2c9   : > { %v8522_v47 = vpop.f32.mrf.mxu3 }
 0x2ca   : > { %9935 = vst [vmem:[#allocation6_spill] sm:$0xff] %v8522_v47 }
 0x2cc   : > { %v8433_v37 = vpop.f32.mrf.mxu0 }
 0x2cd   : > { %v1735_v51 = vpack.c.bf16 %v8433_v37, %v8425_v48 }
 0x2cf   : > { %1827 = vmatmul.bf16.gmra.mxu1 %v1735_v51 }
 0x2d1   : > { %v8526_v15 = vpop.f32.mrf.mxu3 }
 0x2d2   : > { %9936 = vst [vmem:[#allocation7_spill] sm:$0xff] %v8526_v15 }
 0x2d4   : > { %v8440_v38 = vpop.f32.mrf.mxu0 }
 0x2dc   : > { %v8448_v16 = vpop.f32.mrf.mxu0 }
 0x2dd   : > { %v1736_v10 = vpack.c.bf16 %v8448_v16, %v8440_v38 }
 0x2df   : > { %1832 = vmatmul.bf16.gmra.mxu1 %v1736_v10 }
 0x2e4   : > { %v8455_v53 = vpop.f32.mrf.mxu0 }
 0x2ec   : > { %v8463_v5 = vpop.f32.mrf.mxu0 }
 0x2ed   : > { %v1737_v56 = vpack.c.bf16 %v8463_v5, %v8455_v53 }
 0x2ef   : > { %1837 = vmatmul.bf16.gmra.mxu1 %v1737_v56 }
 0x2f4   : > { %v8470_v61 = vpop.f32.mrf.mxu0 }
 0x2fc   : > { %v8478_v57 = vpop.f32.mrf.mxu0 }
 0x2fd   : > { %v1738_v2 = vpack.c.bf16 %v8478_v57, %v8470_v61 }
 0x2ff   : > { %1842 = vmatmul.bf16.gmra.mxu1 %v1738_v2 }
 0x304   : > { %v8485_v9 = vpop.f32.mrf.mxu0 }
 0x30c   : > { %v8493_v34 = vpop.f32.mrf.mxu0 }
 0x30d   : > { %v1739_v17 = vpack.c.bf16 %v8493_v34, %v8485_v9 }
 0x30f   : > { %1847 = vmatmul.bf16.gmra.mxu1 %v1739_v17 }
 0x31c   : > { %v1813_v49 = vpop.f32.mrf.mxu1 }
 0x31d   : > { %v1856_v21 = vmul.f32 %v8505_v12, %v1813_v49 }
 0x31f   : > { %v1873_v23 = vadd.f32 %v8510_v3, %v1856_v21 }
 0x321   : > { %v1889_v25 = vmax.f32 %v1873_v23, 0.0 }
 0x323   : > { %1905 = vst [vmem:[#allocation2 + $0x9] sm:$0xff] %v1889_v25 }
 0x324   : > { %v1815_v40 = vpop.f32.mrf.mxu1 }
 0x325   : > { %v1857_v41 = vmul.f32 %v8505_v12, %v1815_v40 }
 0x327   : > { %v1874_v46 = vadd.f32 %v8510_v3, %v1857_v41 }
 0x329   : > { %v1890_v33 = vmax.f32 %v1874_v46, 0.0 }
 0x32a   : > { %v1921_v52 = vld [vmem:[#allocation2 + $0x6] sm:$0xff] }
 0x32b   : > { %1906 = vst [vmem:[#allocation2 + $0x11] sm:$0xff] %v1890_v33  ;;  %v1954_v36 = vpack.c.bf16 %v1890_v33, %v1889_v25 }
 0x32c   : > { %v1818_v51 = vpop.f32.mrf.mxu1 }
 0x32d   : > { %v1858_v14 = vmul.f32 %v8505_v12, %v1818_v51  ;;  %2226 = vmatmul.bf16.vlgmr.msrb.gmra.mxu3 %v1954_v36 }
 0x32f   : > { %v1875_v45 = vadd.f32 %v8510_v3, %v1858_v14  ;;  %v8533_v14 = vpop.f32.mrf.mxu3 }
 0x330   : > { %9937 = vst [vmem:[#allocation8_spill] sm:$0xff] %v8533_v14 }
 0x331   : > { %v1891_v10 = vmax.f32 %v1875_v45, 0.0 }
 0x332   : > { %v1922_v54 = vld [vmem:[#allocation2 + $0xe] sm:$0xff] }
 0x333   : > { %v1937_v55 = vld [vmem:[#allocation2 + $0xc] sm:$0xff]  ;;  %v1938_v56 = vld [vmem:[#allocation2 + $0x14] sm:$0xff]  ;;  %1907 = vst [vmem:[#allocation2 + $0x31] sm:$0xff] %v1891_v10  ;;  %v1953_v24 = vpack.c.bf16 %v1922_v54, %v1921_v52 }
 0x334   : > { %v1955_v0 = vpack.c.bf16 %v1938_v56, %v1937_v55  ;;  %v1820_v60 = vpop.f32.mrf.mxu1  ;;  %v7493_v56 = vld [vmem:[%s9929_s1 + $0x3b0] sm:$0xff] }
 0x335   : > { %v1859_v2 = vmul.f32 %v8505_v12, %v1820_v60  ;;  %2177 = vmatmul.bf16.vlgmr.msrb.gmra.mxu2 %v1953_v24  ;;  %2633 = vmatpush.bf16.msrb.mxu1 %v7493_v56 }
 0x336   : > { %2275 = vmatmul.bf16.vlgmr.msrb.gmra.mxu0 %v1955_v0 }
 0x337   : > { %v1876_v6 = vadd.f32 %v8510_v3, %v1859_v2  ;;  %v8541_v60 = vpop.f32.mrf.mxu3 }
 0x338   : > { %9938 = vst [vmem:[#allocation9_spill] sm:$0xff] %v8541_v60 }
 0x339   : > { %v1892_v28 = vmax.f32 %v1876_v6, 0.0 }
 0x33a   : > { %v1923_v40 = vld [vmem:[#allocation2 + $0x2e] sm:$0xff] }
 0x33b   : > { %1908 = vst [vmem:[#allocation2 + $0x39] sm:$0xff] %v1892_v28  ;;  %v1957_v17 = vpack.c.bf16 %v1892_v28, %v1891_v10 }
 0x33c   : > { %v1823_v49 = vpop.f32.mrf.mxu1 }
 0x33d   : > { %v1860_v21 = vmul.f32 %v8505_v12, %v1823_v49  ;;  %2231 = vmatmul.bf16.gmra.mxu3 %v1957_v17 }
 0x33f   : > { %v1877_v23 = vadd.f32 %v8510_v3, %v1860_v21 }
 0x341   : > { %v1893_v25 = vmax.f32 %v1877_v23, 0.0 }
 0x342   : > { %v1924_v41 = vld [vmem:[#allocation2 + $0x36] sm:$0xff] }
 0x343   : > { %v1939_v46 = vld [vmem:[#allocation2 + $0x34] sm:$0xff]  ;;  %v1940_v33 = vld [vmem:[#allocation2 + $0x3c] sm:$0xff]  ;;  %1909 = vst [vmem:[#allocation2 + $0x59] sm:$0xff] %v1893_v25  ;;  %v1956_v36 = vpack.c.bf16 %v1924_v41, %v1923_v40 }
 0x344   : > { %v1958_v51 = vpack.c.bf16 %v1940_v33, %v1939_v46  ;;  %v1825_v45 = vpop.f32.mrf.mxu1  ;;  %v8546_v46 = vpop.f32.mrf.mxu3 }
 0x345   : > { %v1861_v10 = vmul.f32 %v8505_v12, %v1825_v45  ;;  %2182 = vmatmul.bf16.gmra.mxu2 %v1956_v36  ;;  %9939 = vst [vmem:[#allocation10_spill] sm:$0xff] %v8546_v46 }
 0x346   : > { %2280 = vmatmul.bf16.gmra.mxu0 %v1958_v51  ;;  %v7492_v51 = vld [vmem:[%s9929_s1 + $0x3a8] sm:$0xff] }
 0x347   : > { %v1878_v52 = vadd.f32 %v8510_v3, %v1861_v10  ;;  %2634 = vmatpush.bf16.msrb.mxu1 %v7492_v51 }
 0x349   : > { %v1894_v54 = vmax.f32 %v1878_v52, 0.0 }
 0x34a   : > { %v1925_v28 = vld [vmem:[#allocation2 + $0x56] sm:$0xff] }
 0x34b   : > { %1910 = vst [vmem:[#allocation2 + $0x61] sm:$0xff] %v1894_v54  ;;  %v1960_v55 = vpack.c.bf16 %v1894_v54, %v1893_v25 }
 0x34c   : > { %v1828_v24 = vpop.f32.mrf.mxu1  ;;  %v8553_v56 = vpop.f32.mrf.mxu3 }
 0x34d   : > { %v1862_v0 = vmul.f32 %v8505_v12, %v1828_v24  ;;  %2236 = vmatmul.bf16.gmra.mxu3 %v1960_v55  ;;  %9940 = vst [vmem:[#allocation11_spill] sm:$0xff] %v8553_v56 }
 0x34f   : > { %v1879_v2 = vadd.f32 %v8510_v3, %v1862_v0 }
 0x351   : > { %v1895_v6 = vmax.f32 %v1879_v2, 0.0 }
 0x352   : > { %v1926_v17 = vld [vmem:[#allocation2 + $0x5e] sm:$0xff] }
 0x353   : > { %v1941_v18 = vld [vmem:[#allocation2 + $0x5c] sm:$0xff]  ;;  %v1942_v49 = vld [vmem:[#allocation2 + $0x64] sm:$0xff]  ;;  %1911 = vst [vmem:[#allocation2 + $0x81] sm:$0xff] %v1895_v6  ;;  %v1959_v21 = vpack.c.bf16 %v1926_v17, %v1925_v28 }
 0x354   : > { %v1961_v23 = vpack.c.bf16 %v1942_v49, %v1941_v18  ;;  %v1830_v25 = vpop.f32.mrf.mxu1 }
 0x355   : > { %v1863_v40 = vmul.f32 %v8505_v12, %v1830_v25  ;;  %2187 = vmatmul.bf16.gmra.mxu2 %v1959_v21  ;;  %v7491_v25 = vld [vmem:[%s9929_s1 + $0x3a0] sm:$0xff] }
 0x356   : > { %2285 = vmatmul.bf16.gmra.mxu0 %v1961_v23  ;;  %2635 = vmatpush.bf16.msrb.mxu1 %v7491_v25 }
 0x357   : > { %v1880_v41 = vadd.f32 %v8510_v3, %v1863_v40  ;;  %v8560_v40 = vpop.f32.mrf.mxu3 }
 0x358   : > { %9941 = vst [vmem:[#allocation12_spill] sm:$0xff] %v8560_v40 }
 0x359   : > { %v1896_v33 = vmax.f32 %v1880_v41, 0.0 }
 0x35a   : > { %v1927_v55 = vld [vmem:[#allocation2 + $0x7e] sm:$0xff] }
 0x35b   : > { %1912 = vst [vmem:[#allocation2 + $0x89] sm:$0xff] %v1896_v33  ;;  %v1963_v36 = vpack.c.bf16 %v1896_v33, %v1895_v6 }
 0x35c   : > { %v1833_v45 = vpop.f32.mrf.mxu1 }
 0x35d   : > { %v1864_v10 = vmul.f32 %v8505_v12, %v1833_v45  ;;  %2241 = vmatmul.bf16.gmra.mxu3 %v1963_v36 }
 0x35f   : > { %v1881_v52 = vadd.f32 %v8510_v3, %v1864_v10 }
 0x361   : > { %v1897_v54 = vmax.f32 %v1881_v52, 0.0 }
 0x362   : > { %v1928_v24 = vld [vmem:[#allocation2 + $0x86] sm:$0xff] }
 0x363   : > { %v1943_v0 = vld [vmem:[#allocation2 + $0x84] sm:$0xff]  ;;  %v1944_v2 = vld [vmem:[#allocation2 + $0x8c] sm:$0xff]  ;;  %1913 = vst [vmem:[#allocation2 + $0xa9] sm:$0xff] %v1897_v54  ;;  %v1962_v6 = vpack.c.bf16 %v1928_v24, %v1927_v55 }
 0x364   : > { %v1964_v28 = vpack.c.bf16 %v1944_v2, %v1943_v0  ;;  %v1835_v17 = vpop.f32.mrf.mxu1 }
 0x365   : > { %v1865_v18 = vmul.f32 %v8505_v12, %v1835_v17  ;;  %2192 = vmatmul.bf16.gmra.mxu2 %v1962_v6  ;;  %v8565_v6 = vpop.f32.mrf.mxu3 }
 0x366   : > { %2290 = vmatmul.bf16.gmra.mxu0 %v1964_v28  ;;  %9942 = vst [vmem:[#allocation13_spill] sm:$0xff] %v8565_v6 }
 0x367   : > { %v1882_v49 = vadd.f32 %v8510_v3, %v1865_v18 }
 0x369   : > { %v1898_v21 = vmax.f32 %v1882_v49, 0.0  ;;  %v7490_v49 = vld [vmem:[%s9929_s1 + $0x398] sm:$0xff] }
 0x36a   : > { %v1929_v45 = vld [vmem:[#allocation2 + $0xa6] sm:$0xff]  ;;  %2636 = vmatpush.bf16.msrb.mxu1 %v7490_v49 }
 0x36b   : > { %1914 = vst [vmem:[#allocation2 + $0xb1] sm:$0xff] %v1898_v21  ;;  %v1966_v23 = vpack.c.bf16 %v1898_v21, %v1897_v54 }
 0x36c   : > { %v1838_v41 = vpop.f32.mrf.mxu1 }
 0x36d   : > { %v1866_v33 = vmul.f32 %v8505_v12, %v1838_v41  ;;  %2246 = vmatmul.bf16.gmra.mxu3 %v1966_v23  ;;  %v8573_v41 = vpop.f32.mrf.mxu3 }
 0x36e   : > { %9943 = vst [vmem:[#allocation14_spill] sm:$0xff] %v8573_v41 }
 0x36f   : > { %v1883_v36 = vadd.f32 %v8510_v3, %v1866_v33 }
 0x371   : > { %v1899_v51 = vmax.f32 %v1883_v36, 0.0 }
 0x372   : > { %v1930_v10 = vld [vmem:[#allocation2 + $0xae] sm:$0xff] }
 0x373   : > { %v1945_v52 = vld [vmem:[#allocation2 + $0xac] sm:$0xff]  ;;  %v1946_v55 = vld [vmem:[#allocation2 + $0xb4] sm:$0xff]  ;;  %1915 = vst [vmem:[#allocation2 + $0xd1] sm:$0xff] %v1899_v51  ;;  %v1965_v54 = vpack.c.bf16 %v1930_v10, %v1929_v45 }
 0x374   : > { %v1967_v24 = vpack.c.bf16 %v1946_v55, %v1945_v52  ;;  %v1840_v0 = vpop.f32.mrf.mxu1 }
 0x375   : > { %v1867_v2 = vmul.f32 %v8505_v12, %v1840_v0  ;;  %2197 = vmatmul.bf16.gmra.mxu2 %v1965_v54  ;;  %v7489_v0 = vld [vmem:[%s9929_s1 + $0x390] sm:$0xff] }
 0x376   : > { %2295 = vmatmul.bf16.gmra.mxu0 %v1967_v24  ;;  %2637 = vmatpush.bf16.msrb.mxu1 %v7489_v0 }
 0x377   : > { %v1884_v28 = vadd.f32 %v8510_v3, %v1867_v2  ;;  %v7502_v2 = vld [vmem:[%s9929_s1 + $0x3f8] sm:$0xff] }
 0x378   : > { %2681 = vmatpush.bf16.msra.mxu2 %v7502_v2 }
 0x379   : > { %v1900_v17 = vmax.f32 %v1884_v28, 0.0 }
 0x37a   : > { %v1931_v36 = vld [vmem:[#allocation2 + $0xce] sm:$0xff] }
 0x37b   : > { %1916 = vst [vmem:[#allocation2 + $0xd9] sm:$0xff] %v1900_v17  ;;  %v1969_v18 = vpack.c.bf16 %v1900_v17, %v1899_v51 }
 0x37c   : > { %v1843_v21 = vpop.f32.mrf.mxu1 }
 0x37d   : > { %v1868_v23 = vmul.f32 %v8505_v12, %v1843_v21  ;;  %2251 = vmatmul.bf16.gmra.mxu3 %v1969_v18  ;;  %v8583_v18 = vpop.f32.mrf.mxu3 }
 0x37e   : > { %9944 = vst [vmem:[#allocation15_spill] sm:$0xff] %v8583_v18 }
 0x37f   : > { %v1885_v25 = vadd.f32 %v8510_v3, %v1868_v23 }
 0x381   : > { %v1901_v33 = vmax.f32 %v1885_v25, 0.0 }
 0x382   : > { %v1932_v45 = vld [vmem:[#allocation2 + $0xd6] sm:$0xff] }
 0x383   : > { %v1947_v10 = vld [vmem:[#allocation2 + $0xd4] sm:$0xff]  ;;  %v1948_v52 = vld [vmem:[#allocation2 + $0xdc] sm:$0xff]  ;;  %1917 = vst [vmem:[#allocation2 + $0xf9] sm:$0xff] %v1901_v33  ;;  %v1968_v51 = vpack.c.bf16 %v1932_v45, %v1931_v36 }
 0x384   : > { %v1970_v55 = vpack.c.bf16 %v1948_v52, %v1947_v10  ;;  %v1845_v54 = vpop.f32.mrf.mxu1 }
 0x385   : > { %v1869_v24 = vmul.f32 %v8505_v12, %v1845_v54  ;;  %2202 = vmatmul.bf16.gmra.mxu2 %v1968_v51  ;;  %v8593_v0 = vpop.f32.mrf.mxu3 }
 0x386   : > { %2300 = vmatmul.bf16.gmra.mxu0 %v1970_v55  ;;  %9945 = vst [vmem:[#allocation16_spill] sm:$0xff] %v8593_v0 }
 0x387   : > { %v1886_v28 = vadd.f32 %v8510_v3, %v1869_v24  ;;  %v7501_v24 = vld [vmem:[%s9929_s1 + $0x3f0] sm:$0xff] }
 0x388   : > { %2682 = vmatpush.bf16.msra.mxu2 %v7501_v24 }
 0x389   : > { %v1902_v17 = vmax.f32 %v1886_v28, 0.0  ;;  %v7510_v28 = vld [vmem:[%s9929_s1 + $0x438] sm:$0xff] }
 0x38a   : > { %v1933_v45 = vld [vmem:[#allocation2 + $0xf6] sm:$0xff]  ;;  %2730 = vmatpush.bf16.msra.mxu3 %v7510_v28  ;;  %v7507_v28 = vld [vmem:[%s9929_s1 + $0x420] sm:$0xff] }
 0x38b   : > { %1918 = vst [vmem:[#allocation2 + $0x101] sm:$0xff] %v1902_v17  ;;  %v1972_v49 = vpack.c.bf16 %v1902_v17, %v1901_v33  ;;  %v7488_v33 = vld [vmem:[%s9929_s1 + $0x388] sm:$0xff] }
 0x38c   : > { %v1848_v21 = vpop.f32.mrf.mxu1  ;;  %2638 = vmatpush.bf16.msrb.mxu1 %v7488_v33 }
 0x38d   : > { %v1870_v23 = vmul.f32 %v8505_v12, %v1848_v21  ;;  %2256 = vmatmul.bf16.gmra.mxu3 %v1972_v49  ;;  %v7500_v49 = vld [vmem:[%s9929_s1 + $0x3e8] sm:$0xff] }
 0x38e   : > { %2683 = vmatpush.bf16.msra.mxu2 %v7500_v49  ;;  %v7506_v49 = vld [vmem:[%s9929_s1 + $0x418] sm:$0xff] }
 0x38f   : > { %v1887_v25 = vadd.f32 %v8510_v3, %v1870_v23 }
 0x391   : > { %v1903_v36 = vmax.f32 %v1887_v25, 0.0  ;;  %v7499_v25 = vld [vmem:[%s9929_s1 + $0x3e0] sm:$0xff] }
 0x392   : > { %v1934_v10 = vld [vmem:[#allocation2 + $0xfe] sm:$0xff]  ;;  %2684 = vmatpush.bf16.msra.mxu2 %v7499_v25  ;;  %v7505_v25 = vld [vmem:[%s9929_s1 + $0x410] sm:$0xff] }
 0x393   : > { %v1949_v52 = vld [vmem:[#allocation2 + $0xfc] sm:$0xff]  ;;  %v1950_v51 = vld [vmem:[#allocation2 + $0x104] sm:$0xff]  ;;  %1919 = vst [vmem:[#allocation2 + $0x121] sm:$0xff] %v1903_v36  ;;  %v1971_v55 = vpack.c.bf16 %v1934_v10, %v1933_v45  ;;  %v8609_v10 = vpop.f32.mrf.mxu3 }
 0x394   : > { %v1973_v54 = vpack.c.bf16 %v1950_v51, %v1949_v52  ;;  %v1850_v2 = vpop.f32.mrf.mxu1  ;;  %9946 = vst [vmem:[#allocation17_spill] sm:$0xff] %v8609_v10  ;;  %v7508_v52 = vld [vmem:[%s9929_s1 + $0x428] sm:$0xff] }
 0x395   : > { %v1871_v17 = vmul.f32 %v8505_v12, %v1850_v2  ;;  %2207 = vmatmul.bf16.gmra.mxu2 %v1971_v55  ;;  %v7509_v12 = vld [vmem:[%s9929_s1 + $0x430] sm:$0xff] }
 0x396   : > { %2305 = vmatmul.bf16.gmra.mxu0 %v1973_v54  ;;  %2731 = vmatpush.bf16.msra.mxu3 %v7509_v12  ;;  %v7497_v2 = vld [vmem:[%s9929_s1 + $0x3d0] sm:$0xff]  ;;  %v7487_v12 = vld [vmem:[%s9929_s1 + $0x380] sm:$0xff] }
 0x397   : > { %v1888_v21 = vadd.f32 %v8510_v3, %v1871_v17  ;;  %v7498_v3 = vld [vmem:[%s9929_s1 + $0x3d8] sm:$0xff]  ;;  %v7496_v17 = vld [vmem:[%s9929_s1 + $0x3c8] sm:$0xff]  ;;  %2639 = vmatpush.bf16.msrb.mxu1 %v7487_v12 }
 0x398   : > { %2685 = vmatpush.bf16.msra.mxu2 %v7498_v3 }
 0x399   : > { %v1904_v23 = vmax.f32 %v1888_v21, 0.0 }
 0x39a   : > { %2732 = vmatpush.bf16.msra.mxu3 %v7508_v52  ;;  %v1935_v51 = vld [vmem:[#allocation2 + $0x11e] sm:$0xff] }
 0x39b   : > { %1920 = vst [vmem:[#allocation2 + $0x129] sm:$0xff] %v1904_v23  ;;  %v1975_v45 = vpack.c.bf16 %v1904_v23, %v1903_v36  ;;  %v8629_v21 = vpop.f32.mrf.mxu3  ;;  %v7495_v23 = vld [vmem:[%s9929_s1 + $0x3c0] sm:$0xff] }
 0x39c   : > { %2686 = vmatpush.bf16.msra.mxu2 %v7497_v2  ;;  %9947 = vst [vmem:[#allocation18_spill] sm:$0xff] %v8629_v21 }
 0x39d   : > { %2261 = vmatmul.bf16.gmra.mxu3 %v1975_v45  ;;  %v7504_v45 = vld [vmem:[%s9929_s1 + $0x408] sm:$0xff] }
 0x39e   : > { %2733 = vmatpush.bf16.msra.mxu3 %v7507_v28 }
 0x3a0   : > { %2687 = vmatpush.bf16.msra.mxu2 %v7496_v17  ;;  %v8657_v17 = vld [vmem:[%s9930_s2 + $0xb] ss:$0 sm:$0xff] }
 0x3a2   : > { %v1936_v55 = vld [vmem:[#allocation2 + $0x126] sm:$0xff]  ;;  %2734 = vmatpush.bf16.msra.mxu3 %v7506_v49 }
 0x3a3   : > { %v1951_v54 = vld [vmem:[#allocation2 + $0x124] sm:$0xff]  ;;  %v1952_v24 = vld [vmem:[#allocation2 + $0x12c] sm:$0xff]  ;;  %v1974_v36 = vpack.c.bf16 %v1936_v55, %v1935_v51  ;;  %v7526_v55 = vld [vmem:[%s9929_s1 + $0x38] sm:$0xff] }
 0x3a4   : > { %v1976_v33 = vpack.c.bf16 %v1952_v24, %v1951_v54  ;;  %2688 = vmatpush.bf16.msra.mxu2 %v7495_v23  ;;  %v7503_v51 = vld [vmem:[%s9929_s1 + $0x400] sm:$0xff]  ;;  %3172 = vmatpush.bf16.msra.mxu1 %v7526_v55 }
 0x3a5   : > { %2212 = vmatmul.bf16.gmra.mxu2 %v1974_v36 }
 0x3a6   : > { %2310 = vmatmul.bf16.gmra.mxu0 %v1976_v33  ;;  %2735 = vmatpush.bf16.msra.mxu3 %v7505_v25  ;;  %v8652_v33 = vld [vmem:[%s9930_s2 + $0xa] ss:$0 sm:$0xff] }
 0x3aa   : > { %2736 = vmatpush.bf16.msra.mxu3 %v7504_v45 }
 0x3ae   : > { %2737 = vmatpush.bf16.msra.mxu3 %v7503_v51 }
 0x3b0   : > { %v2227_v3 = vpop.f32.mrf.mxu3 }
 0x3b3   : > { %v2276_v52 = vpop.f32.mrf.mxu0 }
 0x3b8   : > { %v2178_v54 = vpop.f32.mrf.mxu2  ;;  %v2229_v24 = vpop.f32.mrf.mxu3 }
 0x3b9   : > { %v2228_v36 = vadd.f32 %v2227_v3, %v2178_v54 }
 0x3bb   : > { %v2278_v2 = vpop.f32.mrf.mxu0  ;;  %v2277_v28 = vadd.f32 %v2276_v52, %v2228_v36  ;;  %v7525_v52 = vld [vmem:[%s9929_s1 + $0x30] sm:$0xff] }
 0x3bc   : > { %3173 = vmatpush.bf16.msra.mxu1 %v7525_v52 }
 0x3bd   : > { %v2319_v49 = vmul.f32 %v8652_v33, %v2277_v28 }
 0x3bf   : > { %v2336_v23 = vadd.f32 %v8657_v17, %v2319_v49 }
 0x3c0   : > { %v2180_v25 = vpop.f32.mrf.mxu2  ;;  %v2232_v12 = vpop.f32.mrf.mxu3 }
 0x3c1   : > { %v2352_v45 = vmax.f32 %v2336_v23, 0.0  ;;  %v2230_v3 = vadd.f32 %v2229_v24, %v2180_v25 }
 0x3c3   : > { %v2281_v51 = vpop.f32.mrf.mxu0  ;;  %2368 = vst [vmem:[#allocation2 + $0x9] sm:$0xff] %v2352_v45  ;;  %v2279_v55 = vadd.f32 %v2278_v2, %v2230_v3 }
 0x3c5   : > { %v2320_v54 = vmul.f32 %v8652_v33, %v2279_v55 }
 0x3c7   : > { %v2337_v36 = vadd.f32 %v8657_v17, %v2320_v54 }
 0x3c8   : > { %v2183_v10 = vpop.f32.mrf.mxu2  ;;  %v2234_v28 = vpop.f32.mrf.mxu3 }
 0x3c9   : > { %v2353_v21 = vmax.f32 %v2337_v36, 0.0  ;;  %v2233_v49 = vadd.f32 %v2232_v12, %v2183_v10 }
 0x3ca   : > { %v2384_v6 = vld [vmem:[#allocation2 + $0x6] sm:$0xff] }
 0x3cb   : > { %v2283_v18 = vpop.f32.mrf.mxu0  ;;  %v2417_v0 = vpack.c.bf16 %v2353_v21, %v2352_v45  ;;  %2369 = vst [vmem:[#allocation2 + $0x11] sm:$0xff] %v2353_v21  ;;  %v2282_v24 = vadd.f32 %v2281_v51, %v2233_v49  ;;  %v7524_v21 = vld [vmem:[%s9929_s1 + $0x28] sm:$0xff] }
 0x3cc   : > { %3174 = vmatpush.bf16.msra.mxu1 %v7524_v21 }
 0x3cd   : > { %v2321_v23 = vmul.f32 %v8652_v33, %v2282_v24  ;;  %2689 = vmatmul.bf16.vlgmr.msra.gmra.mxu2 %v2417_v0 }
 0x3cf   : > { %v2338_v2 = vadd.f32 %v8657_v17, %v2321_v23 }
 0x3d0   : > { %v2185_v25 = vpop.f32.mrf.mxu2  ;;  %v2237_v3 = vpop.f32.mrf.mxu3 }
 0x3d1   : > { %v2235_v55 = vadd.f32 %v2234_v28, %v2185_v25  ;;  %v2354_v41 = vmax.f32 %v2338_v2, 0.0 }
 0x3d2   : > { %v2385_v52 = vld [vmem:[#allocation2 + $0xe] sm:$0xff] }
 0x3d3   : > { %v2286_v54 = vpop.f32.mrf.mxu0  ;;  %v2400_v56 = vld [vmem:[#allocation2 + $0xc] sm:$0xff]  ;;  %v2401_v40 = vld [vmem:[#allocation2 + $0x14] sm:$0xff]  ;;  %v2284_v36 = vadd.f32 %v2283_v18, %v2235_v55  ;;  %v2416_v10 = vpack.c.bf16 %v2385_v52, %v2384_v6  ;;  %2370 = vst [vmem:[#allocation2 + $0x31] sm:$0xff] %v2354_v41 }
 0x3d4   : > { %v2418_v12 = vpack.c.bf16 %v2401_v40, %v2400_v56  ;;  %3020 = vst [vmem:[#allocation2 + $0x9] sm:$0xff] %v8377_v7 }
 0x3d5   : > { %3021 = vst [vmem:[#allocation2 + $0x11] sm:$0xff] %v8388_v8  ;;  %v2322_v0 = vmul.f32 %v8652_v33, %v2284_v36  ;;  %2640 = vmatmul.bf16.vlgmr.msrb.gmra.mxu1 %v2416_v10 }
 0x3d6   : > { %2738 = vmatmul.bf16.vlgmr.msra.gmra.mxu3 %v2418_v12 }
 0x3d7   : > { %v2339_v45 = vadd.f32 %v8657_v17, %v2322_v0 }
 0x3d8   : > { %v2188_v51 = vpop.f32.mrf.mxu2  ;;  %v2239_v18 = vpop.f32.mrf.mxu3 }
 0x3d9   : > { %v2238_v6 = vadd.f32 %v2237_v3, %v2188_v51  ;;  %v2355_v56 = vmax.f32 %v2339_v45, 0.0 }
 0x3da   : > { %v2386_v52 = vld [vmem:[#allocation2 + $0x2e] sm:$0xff] }
 0x3db   : > { %v2288_v40 = vpop.f32.mrf.mxu0  ;;  %v2287_v28 = vadd.f32 %v2286_v54, %v2238_v6  ;;  %v2420_v49 = vpack.c.bf16 %v2355_v56, %v2354_v41  ;;  %2371 = vst [vmem:[#allocation2 + $0x39] sm:$0xff] %v2355_v56  ;;  %v7523_v54 = vld [vmem:[%s9929_s1 + $0x20] sm:$0xff] }
 0x3dc   : > { %3175 = vmatpush.bf16.msra.mxu1 %v7523_v54 }
 0x3dd   : > { %v2323_v24 = vmul.f32 %v8652_v33, %v2287_v28  ;;  %2694 = vmatmul.bf16.gmra.mxu2 %v2420_v49 }
 0x3df   : > { %v2340_v23 = vadd.f32 %v8657_v17, %v2323_v24 }
 0x3e0   : > { %v2190_v2 = vpop.f32.mrf.mxu2  ;;  %v2242_v25 = vpop.f32.mrf.mxu3 }
 0x3e1   : > { %v2240_v55 = vadd.f32 %v2239_v18, %v2190_v2  ;;  %v2356_v36 = vmax.f32 %v2340_v23, 0.0 }
 0x3e2   : > { %v2387_v12 = vld [vmem:[#allocation2 + $0x36] sm:$0xff] }
 0x3e3   : > { %v2291_v10 = vpop.f32.mrf.mxu0  ;;  %v2402_v0 = vld [vmem:[#allocation2 + $0x34] sm:$0xff]  ;;  %v2403_v21 = vld [vmem:[#allocation2 + $0x3c] sm:$0xff]  ;;  %v2289_v3 = vadd.f32 %v2288_v40, %v2240_v55  ;;  %v2419_v45 = vpack.c.bf16 %v2387_v12, %v2386_v52  ;;  %2372 = vst [vmem:[#allocation2 + $0x59] sm:$0xff] %v2356_v36 }
 0x3e4   : > { %v2421_v51 = vpack.c.bf16 %v2403_v21, %v2402_v0  ;;  %3022 = vst [vmem:[#allocation2 + $0x31] sm:$0xff] %v8395_v43 }
 0x3e5   : > { %3023 = vst [vmem:[#allocation2 + $0x39] sm:$0xff] %v8403_v22  ;;  %v2324_v41 = vmul.f32 %v8652_v33, %v2289_v3  ;;  %2645 = vmatmul.bf16.gmra.mxu1 %v2419_v45 }
 0x3e6   : > { %2743 = vmatmul.bf16.gmra.mxu3 %v2421_v51 }
 0x3e7   : > { %v2341_v18 = vadd.f32 %v8657_v17, %v2324_v41 }
 0x3e8   : > { %v2193_v6 = vpop.f32.mrf.mxu2  ;;  %v2244_v56 = vpop.f32.mrf.mxu3 }
 0x3e9   : > { %v2243_v40 = vadd.f32 %v2242_v25, %v2193_v6  ;;  %v2357_v28 = vmax.f32 %v2341_v18, 0.0 }
 0x3ea   : > { %v2388_v21 = vld [vmem:[#allocation2 + $0x56] sm:$0xff] }
 0x3eb   : > { %v2293_v49 = vpop.f32.mrf.mxu0  ;;  %v2292_v24 = vadd.f32 %v2291_v10, %v2243_v40  ;;  %v2423_v23 = vpack.c.bf16 %v2357_v28, %v2356_v36  ;;  %2373 = vst [vmem:[#allocation2 + $0x61] sm:$0xff] %v2357_v28  ;;  %v7522_v10 = vld [vmem:[%s9929_s1 + $0x18] sm:$0xff] }
 0x3ec   : > { %3176 = vmatpush.bf16.msra.mxu1 %v7522_v10 }
 0x3ed   : > { %v2325_v2 = vmul.f32 %v8652_v33, %v2292_v24  ;;  %2699 = vmatmul.bf16.gmra.mxu2 %v2423_v23 }
 0x3ef   : > { %v2342_v55 = vadd.f32 %v8657_v17, %v2325_v2 }
 0x3f0   : > { %v2195_v52 = vpop.f32.mrf.mxu2  ;;  %v2247_v12 = vpop.f32.mrf.mxu3 }
 0x3f1   : > { %v2245_v0 = vadd.f32 %v2244_v56, %v2195_v52  ;;  %v2358_v3 = vmax.f32 %v2342_v55, 0.0 }
 0x3f2   : > { %v2389_v51 = vld [vmem:[#allocation2 + $0x5e] sm:$0xff] }
 0x3f3   : > { %v2296_v45 = vpop.f32.mrf.mxu0  ;;  %v2404_v41 = vld [vmem:[#allocation2 + $0x5c] sm:$0xff]  ;;  %v2405_v54 = vld [vmem:[#allocation2 + $0x64] sm:$0xff]  ;;  %v2294_v25 = vadd.f32 %v2293_v49, %v2245_v0  ;;  %v2422_v18 = vpack.c.bf16 %v2389_v51, %v2388_v21  ;;  %2374 = vst [vmem:[#allocation2 + $0x81] sm:$0xff] %v2358_v3 }
 0x3f4   : > { %v2424_v6 = vpack.c.bf16 %v2405_v54, %v2404_v41  ;;  %3024 = vst [vmem:[#allocation2 + $0x59] sm:$0xff] %v8410_v32 }
 0x3f5   : > { %3025 = vst [vmem:[#allocation2 + $0x61] sm:$0xff] %v8418_v4  ;;  %v2326_v36 = vmul.f32 %v8652_v33, %v2294_v25  ;;  %2650 = vmatmul.bf16.gmra.mxu1 %v2422_v18 }
 0x3f6   : > { %2748 = vmatmul.bf16.gmra.mxu3 %v2424_v6 }
 0x3f7   : > { %v2343_v56 = vadd.f32 %v8657_v17, %v2326_v36 }
 0x3f8   : > { %v2198_v40 = vpop.f32.mrf.mxu2  ;;  %v2249_v28 = vpop.f32.mrf.mxu3 }
 0x3f9   : > { %v2248_v49 = vadd.f32 %v2247_v12, %v2198_v40  ;;  %v2359_v24 = vmax.f32 %v2343_v56, 0.0 }
 0x3fa   : > { %v2390_v54 = vld [vmem:[#allocation2 + $0x7e] sm:$0xff] }
 0x3fb   : > { %v2298_v23 = vpop.f32.mrf.mxu0  ;;  %v2297_v2 = vadd.f32 %v2296_v45, %v2248_v49  ;;  %v2426_v55 = vpack.c.bf16 %v2359_v24, %v2358_v3  ;;  %2375 = vst [vmem:[#allocation2 + $0x89] sm:$0xff] %v2359_v24  ;;  %v7521_v45 = vld [vmem:[%s9929_s1 + $0x10] sm:$0xff] }
 0x3fc   : > { %3177 = vmatpush.bf16.msra.mxu1 %v7521_v45 }
 0x3fd   : > { %v2327_v52 = vmul.f32 %v8652_v33, %v2297_v2  ;;  %2704 = vmatmul.bf16.gmra.mxu2 %v2426_v55 }
 0x3ff   : > { %v2344_v0 = vadd.f32 %v8657_v17, %v2327_v52 }
 0x400   : > { %v2200_v21 = vpop.f32.mrf.mxu2  ;;  %v2252_v51 = vpop.f32.mrf.mxu3 }
 0x401   : > { %v2250_v41 = vadd.f32 %v2249_v28, %v2200_v21  ;;  %v2360_v25 = vmax.f32 %v2344_v0, 0.0 }
 0x402   : > { %v2391_v6 = vld [vmem:[#allocation2 + $0x86] sm:$0xff] }
 0x403   : > { %v2301_v18 = vpop.f32.mrf.mxu0  ;;  %v2406_v36 = vld [vmem:[#allocation2 + $0x84] sm:$0xff]  ;;  %v2407_v10 = vld [vmem:[#allocation2 + $0x8c] sm:$0xff]  ;;  %v2299_v12 = vadd.f32 %v2298_v23, %v2250_v41  ;;  %v2425_v56 = vpack.c.bf16 %v2391_v6, %v2390_v54  ;;  %2376 = vst [vmem:[#allocation2 + $0xa9] sm:$0xff] %v2360_v25 }
 0x404   : > { %v2427_v40 = vpack.c.bf16 %v2407_v10, %v2406_v36  ;;  %3026 = vst [vmem:[#allocation2 + $0x81] sm:$0xff] %v8425_v48 }
 0x405   : > { %3027 = vst [vmem:[#allocation2 + $0x89] sm:$0xff] %v8433_v37  ;;  %v2328_v3 = vmul.f32 %v8652_v33, %v2299_v12  ;;  %2655 = vmatmul.bf16.gmra.mxu1 %v2425_v56 }
 0x406   : > { %2753 = vmatmul.bf16.gmra.mxu3 %v2427_v40 }
 0x407   : > { %v2345_v28 = vadd.f32 %v8657_v17, %v2328_v3 }
 0x408   : > { %v2203_v49 = vpop.f32.mrf.mxu2  ;;  %v2254_v24 = vpop.f32.mrf.mxu3 }
 0x409   : > { %v2253_v23 = vadd.f32 %v2252_v51, %v2203_v49  ;;  %v2361_v2 = vmax.f32 %v2345_v28, 0.0  ;;  %v7520_v49 = vld [vmem:[%s9929_s1 + $0x8] sm:$0xff] }
 0x40a   : > { %v2392_v36 = vld [vmem:[#allocation2 + $0xa6] sm:$0xff]  ;;  %3178 = vmatpush.bf16.msra.mxu1 %v7520_v49 }
 0x40b   : > { %v2303_v55 = vpop.f32.mrf.mxu0  ;;  %v2302_v52 = vadd.f32 %v2301_v18, %v2253_v23  ;;  %v2429_v0 = vpack.c.bf16 %v2361_v2, %v2360_v25  ;;  %2377 = vst [vmem:[#allocation2 + $0xb1] sm:$0xff] %v2361_v2 }
 0x40d   : > { %v2329_v21 = vmul.f32 %v8652_v33, %v2302_v52  ;;  %2709 = vmatmul.bf16.gmra.mxu2 %v2429_v0 }
 0x40f   : > { %v2346_v41 = vadd.f32 %v8657_v17, %v2329_v21 }
 0x410   : > { %v2205_v54 = vpop.f32.mrf.mxu2  ;;  %v2257_v12 = vpop.f32.mrf.mxu3 }
 0x411   : > { %v2255_v6 = vadd.f32 %v2254_v24, %v2205_v54  ;;  %v2362_v10 = vmax.f32 %v2346_v41, 0.0 }
 0x412   : > { %v2393_v56 = vld [vmem:[#allocation2 + $0xae] sm:$0xff] }
 0x413   : > { %v2408_v40 = vld [vmem:[#allocation2 + $0xac] sm:$0xff]  ;;  %v2409_v3 = vld [vmem:[#allocation2 + $0xb4] sm:$0xff]  ;;  %v2304_v45 = vadd.f32 %v2303_v55, %v2255_v6  ;;  %v2428_v51 = vpack.c.bf16 %v2393_v56, %v2392_v36  ;;  %v2306_v25 = vpop.f32.mrf.mxu0  ;;  %2378 = vst [vmem:[#allocation2 + $0xd1] sm:$0xff] %v2362_v10 }
 0x414   : > { %v2430_v28 = vpack.c.bf16 %v2409_v3, %v2408_v40  ;;  %3028 = vst [vmem:[#allocation2 + $0xa9] sm:$0xff] %v8440_v38 }
 0x415   : > { %3029 = vst [vmem:[#allocation2 + $0xb1] sm:$0xff] %v8448_v16  ;;  %v2330_v18 = vmul.f32 %v8652_v33, %v2304_v45  ;;  %2660 = vmatmul.bf16.gmra.mxu1 %v2428_v51 }
 0x416   : > { %2758 = vmatmul.bf16.gmra.mxu3 %v2430_v28 }
 0x417   : > { %v2347_v24 = vadd.f32 %v8657_v17, %v2330_v18 }
 0x418   : > { %v2208_v23 = vpop.f32.mrf.mxu2  ;;  %v2259_v21 = vpop.f32.mrf.mxu3 }
 0x419   : > { %v2258_v2 = vadd.f32 %v2257_v12, %v2208_v23  ;;  %v2363_v55 = vmax.f32 %v2347_v24, 0.0  ;;  %v7518_v24 = vld [vmem:[%s9929_s1 + $0x478] sm:$0xff] }
 0x41a   : > { %v2394_v40 = vld [vmem:[#allocation2 + $0xce] sm:$0xff]  ;;  %2903 = vmatpush.bf16.msra.mxu0 %v7518_v24 }
 0x41b   : > { %v2307_v52 = vadd.f32 %v2306_v25, %v2258_v2  ;;  %v2432_v0 = vpack.c.bf16 %v2363_v55, %v2362_v10  ;;  %2379 = vst [vmem:[#allocation2 + $0xd9] sm:$0xff] %v2363_v55  ;;  %v2308_v54 = vpop.f32.mrf.mxu0  ;;  %v7519_v25 = vld [vmem:[%s9929_s1] sm:$0xff] }
 0x41c   : > { %3179 = vmatpush.bf16.msra.mxu1 %v7519_v25 }
 0x41d   : > { %v2331_v41 = vmul.f32 %v8652_v33, %v2307_v52  ;;  %2714 = vmatmul.bf16.gmra.mxu2 %v2432_v0 }
 0x41f   : > { %v2348_v6 = vadd.f32 %v8657_v17, %v2331_v41 }
 0x420   : > { %v2210_v36 = vpop.f32.mrf.mxu2  ;;  %v2262_v23 = vpop.f32.mrf.mxu3 }
 0x421   : > { %v2260_v56 = vadd.f32 %v2259_v21, %v2210_v36  ;;  %v2364_v3 = vmax.f32 %v2348_v6, 0.0 }
 0x422   : > { %v2395_v45 = vld [vmem:[#allocation2 + $0xd6] sm:$0xff] }
 0x423   : > { %v2410_v51 = vld [vmem:[#allocation2 + $0xd4] sm:$0xff]  ;;  %v2411_v28 = vld [vmem:[#allocation2 + $0xdc] sm:$0xff]  ;;  %v2309_v18 = vadd.f32 %v2308_v54, %v2260_v56  ;;  %v2431_v12 = vpack.c.bf16 %v2395_v45, %v2394_v40  ;;  %2380 = vst [vmem:[#allocation2 + $0xf9] sm:$0xff] %v2364_v3  ;;  %v2311_v55 = vpop.f32.mrf.mxu0 }
 0x424   : > { %v2433_v49 = vpack.c.bf16 %v2411_v28, %v2410_v51  ;;  %3030 = vst [vmem:[#allocation2 + $0xd1] sm:$0xff] %v8455_v53  ;;  %v7517_v45 = vld [vmem:[%s9929_s1 + $0x470] sm:$0xff] }
 0x425   : > { %3031 = vst [vmem:[#allocation2 + $0xd9] sm:$0xff] %v8463_v5  ;;  %v2332_v10 = vmul.f32 %v8652_v33, %v2309_v18  ;;  %2665 = vmatmul.bf16.gmra.mxu1 %v2431_v12  ;;  %2904 = vmatpush.bf16.msra.mxu0 %v7517_v45 }
 0x426   : > { %2763 = vmatmul.bf16.gmra.mxu3 %v2433_v49 }
 0x427   : > { %v2349_v2 = vadd.f32 %v8657_v17, %v2332_v10 }
 0x428   : > { %v2213_v52 = vpop.f32.mrf.mxu2  ;;  %v2264_v56 = vpop.f32.mrf.mxu3 }
 0x429   : > { %v2263_v0 = vadd.f32 %v2262_v23, %v2213_v52  ;;  %v2365_v21 = vmax.f32 %v2349_v2, 0.0  ;;  %v7516_v2 = vld [vmem:[%s9929_s1 + $0x468] sm:$0xff] }
 0x42a   : > { %v2396_v28 = vld [vmem:[#allocation2 + $0xf6] sm:$0xff]  ;;  %2905 = vmatpush.bf16.msra.mxu0 %v7516_v2 }
 0x42b   : > { %v2312_v41 = vadd.f32 %v2311_v55, %v2263_v0  ;;  %v2435_v54 = vpack.c.bf16 %v2365_v21, %v2364_v3  ;;  %2381 = vst [vmem:[#allocation2 + $0x101] sm:$0xff] %v2365_v21  ;;  %v2313_v12 = vpop.f32.mrf.mxu0  ;;  %v7515_v0 = vld [vmem:[%s9929_s1 + $0x460] sm:$0xff] }
 0x42d   : > { %v2333_v6 = vmul.f32 %v8652_v33, %v2312_v41  ;;  %2719 = vmatmul.bf16.gmra.mxu2 %v2435_v54  ;;  %v7514_v54 = vld [vmem:[%s9929_s1 + $0x458] sm:$0xff] }
 0x42e   : > { %2906 = vmatpush.bf16.msra.mxu0 %v7515_v0 }
 0x42f   : > { %v2350_v36 = vadd.f32 %v8657_v17, %v2333_v6 }
 0x430   : > { %v2215_v40 = vpop.f32.mrf.mxu2 }
 0x431   : > { %v2265_v51 = vadd.f32 %v2264_v56, %v2215_v40  ;;  %v2366_v18 = vmax.f32 %v2350_v36, 0.0 }
 0x432   : > { %v2397_v49 = vld [vmem:[#allocation2 + $0xfe] sm:$0xff]  ;;  %2907 = vmatpush.bf16.msra.mxu0 %v7514_v54 }
 0x433   : > { %v2412_v10 = vld [vmem:[#allocation2 + $0xfc] sm:$0xff]  ;;  %v2413_v25 = vld [vmem:[#allocation2 + $0x104] sm:$0xff]  ;;  %v2314_v3 = vadd.f32 %v2313_v12, %v2265_v51  ;;  %v2434_v24 = vpack.c.bf16 %v2397_v49, %v2396_v28  ;;  %2382 = vst [vmem:[#allocation2 + $0x121] sm:$0xff] %v2366_v18  ;;  %v3037_v12 = vld [vmem:[#allocation2 + $0x10] sm:$0xff] }
 0x434   : > { %v2436_v23 = vpack.c.bf16 %v2413_v25, %v2412_v10  ;;  %3032 = vst [vmem:[#allocation2 + $0xf9] sm:$0xff] %v8470_v61  ;;  %v7512_v28 = vld [vmem:[%s9929_s1 + $0x448] sm:$0xff]  ;;  %v7511_v49 = vld [vmem:[%s9929_s1 + $0x440] sm:$0xff]  ;;  %v3053_v25 = vadd.f32 %v3037_v12, %v8388_v8 }
 0x435   : > { %3033 = vst [vmem:[#allocation2 + $0x101] sm:$0xff] %v8478_v57  ;;  %v2334_v55 = vmul.f32 %v8652_v33, %v2314_v3  ;;  %2670 = vmatmul.bf16.gmra.mxu1 %v2434_v24  ;;  %v7534_v33 = vld [vmem:[%s9929_s1 + $0x4b8] sm:$0xff]  ;;  %v3068_v3 = vld [vmem:[#allocation2 + $0xa] sm:$0xff] }
 0x436   : > { %2768 = vmatmul.bf16.gmra.mxu3 %v2436_v23  ;;  %3293 = vmatpush.bf16.msrb.mxu2 %v7534_v33  ;;  %v3069_v24 = vld [vmem:[#allocation2 + $0x12] sm:$0xff] }
 0x437   : > { %v2351_v52 = vadd.f32 %v8657_v17, %v2334_v55  ;;  %v7513_v17 = vld [vmem:[%s9929_s1 + $0x450] sm:$0xff]  ;;  %v3085_v2 = vadd.f32 %v3069_v24, %v3053_v25  ;;  %v7532_v25 = vld [vmem:[%s9929_s1 + $0x4a8] sm:$0xff] }
 0x438   : > { %2908 = vmatpush.bf16.msra.mxu0 %v7513_v17  ;;  %v7533_v55 = vld [vmem:[%s9929_s1 + $0x4b0] sm:$0xff]  ;;  %v3039_v17 = vld [vmem:[#allocation2 + $0x38] sm:$0xff] }
 0x439   : > { %v2367_v21 = vmax.f32 %v2351_v52, 0.0  ;;  %v3038_v33 = vld [vmem:[#allocation2 + $0x30] sm:$0xff] }
 0x43a   : > { %v2398_v6 = vld [vmem:[#allocation2 + $0x11e] sm:$0xff]  ;;  %3294 = vmatpush.bf16.msrb.mxu2 %v7533_v55 }
 0x43b   : > { %v2438_v41 = vpack.c.bf16 %v2367_v21, %v2366_v18  ;;  %2383 = vst [vmem:[#allocation2 + $0x129] sm:$0xff] %v2367_v21  ;;  %v3036_v18 = vld [vmem:[#allocation2 + $0x8] sm:$0xff] }
 0x43c   : > { %2909 = vmatpush.bf16.msra.mxu0 %v7512_v28  ;;  %v3052_v10 = vadd.f32 %v3036_v18, %v8377_v7  ;;  %v8771_v18 = vld [vmem:[%s9930_s2 + $0xd] ss:$0 sm:$0xff] }
 0x43d   : > { %2724 = vmatmul.bf16.gmra.mxu2 %v2438_v41 }
 0x43e   : > { %v3084_v23 = vadd.f32 %v3068_v3, %v3052_v10  ;;  %3295 = vmatpush.bf16.msrb.mxu2 %v7532_v25 }
 0x440   : > { %2910 = vmatpush.bf16.msra.mxu0 %v7511_v49  ;;  %v3100_v21 = vpack.c.bf16 %v3085_v2, %v3084_v23 }
 0x442   : > { %v2399_v36 = vld [vmem:[#allocation2 + $0x126] sm:$0xff] }
 0x443   : > { %v2414_v56 = vld [vmem:[#allocation2 + $0x124] sm:$0xff]  ;;  %v2415_v40 = vld [vmem:[#allocation2 + $0x12c] sm:$0xff]  ;;  %v2437_v45 = vpack.c.bf16 %v2399_v36, %v2398_v6 }
 0x444   : > { %v2439_v51 = vpack.c.bf16 %v2415_v40, %v2414_v56  ;;  %3034 = vst [vmem:[#allocation2 + $0x121] sm:$0xff] %v8485_v9  ;;  %v8763_v36 = vld [vmem:[%s9930_s2 + $0xc] ss:$0 sm:$0xff]  ;;  %v3054_v56 = vadd.f32 %v3038_v33, %v8395_v43  ;;  %v3055_v40 = vadd.f32 %v3039_v17, %v8403_v22  ;;  %v3040_v33 = vld [vmem:[#allocation2 + $0x58] sm:$0xff]  ;;  %v3041_v17 = vld [vmem:[#allocation2 + $0x60] sm:$0xff] }
 0x445   : > { %3035 = vst [vmem:[#allocation2 + $0x129] sm:$0xff] %v8493_v34  ;;  %2675 = vmatmul.bf16.gmra.mxu1 %v2437_v45  ;;  %v3070_v45 = vld [vmem:[#allocation2 + $0x32] sm:$0xff] }
 0x446   : > { %2773 = vmatmul.bf16.gmra.mxu3 %v2439_v51  ;;  %v3071_v51 = vld [vmem:[#allocation2 + $0x3a] sm:$0xff]  ;;  %v3086_v49 = vadd.f32 %v3070_v45, %v3054_v56  ;;  %v3057_v45 = vadd.f32 %v3041_v17, %v8418_v4 }
 0x447   : > { %v3087_v10 = vadd.f32 %v3071_v51, %v3055_v40  ;;  %v3056_v40 = vadd.f32 %v3040_v33, %v8410_v32  ;;  %v3072_v51 = vld [vmem:[#allocation2 + $0x5a] sm:$0xff]  ;;  %v3043_v33 = vld [vmem:[#allocation2 + $0x88] sm:$0xff] }
 0x449   : > { %v3101_v55 = vpack.c.bf16 %v3087_v10, %v3086_v49  ;;  %v3088_v10 = vadd.f32 %v3072_v51, %v3056_v40  ;;  %v3059_v40 = vadd.f32 %v3043_v33, %v8433_v37  ;;  %v3075_v51 = vld [vmem:[#allocation2 + $0x8a] sm:$0xff] }
 0x450   : > { %v2690_v52 = vpop.f32.mrf.mxu2 }
 0x452   : > { %v2641_v0 = vpop.f32.mrf.mxu1 }
 0x453   : > { %v2691_v7 = vadd.f32 %v2690_v52, %v2641_v0 }
 0x455   : > { %3180 = vmatmul.bf16.vlgmr.msra.gmra.mxu1 %v3100_v21 }
 0x458   : > { %v2692_v41 = vpop.f32.mrf.mxu2 }
 0x459   : > { %v2739_v54 = vpop.f32.mrf.mxu3 }
 0x45a   : > { %v2643_v6 = vpop.f32.mrf.mxu1  ;;  %v2740_v8 = vadd.f32 %v2739_v54, %v2691_v7 }
 0x45b   : > { %v2693_v12 = vadd.f32 %v2692_v41, %v2643_v6 }
 0x45c   : > { %v2782_v28 = vmul.f32 %v8763_v36, %v2740_v8 }
 0x45e   : > { %v2799_v23 = vadd.f32 %v8771_v18, %v2782_v28  ;;  %v3073_v28 = vld [vmem:[#allocation2 + $0x62] sm:$0xff] }
 0x45f   : > { %v3089_v25 = vadd.f32 %v3073_v28, %v3057_v45  ;;  %v3074_v45 = vld [vmem:[#allocation2 + $0x82] sm:$0xff] }
 0x460   : > { %v2695_v3 = vpop.f32.mrf.mxu2  ;;  %v2815_v0 = vmax.f32 %v2799_v23, 0.0 }
 0x461   : > { %v2741_v43 = vpop.f32.mrf.mxu3 }
 0x462   : > { %v2742_v24 = vadd.f32 %v2741_v43, %v2693_v12  ;;  %v2646_v22 = vpop.f32.mrf.mxu1  ;;  %v7531_v43 = vld [vmem:[%s9929_s1 + $0x4a0] sm:$0xff] }
 0x463   : > { %v2696_v6 = vadd.f32 %v2695_v3, %v2646_v22  ;;  %3296 = vmatpush.bf16.msrb.mxu2 %v7531_v43 }
 0x464   : > { %v2783_v2 = vmul.f32 %v8763_v36, %v2742_v24 }
 0x465   : > { %3185 = vmatmul.bf16.gmra.mxu1 %v3101_v55 }
 0x466   : > { %v2800_v52 = vadd.f32 %v8771_v18, %v2783_v2  ;;  %v3102_v2 = vpack.c.bf16 %v3089_v25, %v3088_v10  ;;  %v3091_v10 = vadd.f32 %v3075_v51, %v3059_v40  ;;  %v7530_v25 = vld [vmem:[%s9929_s1 + $0x498] sm:$0xff] }
 0x467   : > { %3297 = vmatpush.bf16.msrb.mxu2 %v7530_v25 }
 0x468   : > { %v2816_v21 = vmax.f32 %v2800_v52, 0.0  ;;  %v2697_v41 = vpop.f32.mrf.mxu2 }
 0x469   : > { %v2744_v54 = vpop.f32.mrf.mxu3 }
 0x46a   : > { %v2831_v7 = vpack.c.bf16 %v2816_v21, %v2815_v0  ;;  %v2648_v8 = vpop.f32.mrf.mxu1  ;;  %v2745_v56 = vadd.f32 %v2744_v54, %v2696_v6  ;;  %v3042_v54 = vld [vmem:[#allocation2 + $0x80] sm:$0xff] }
 0x46b   : > { %v2698_v49 = vadd.f32 %v2697_v41, %v2648_v8 }
 0x46c   : > { %2911 = vmatmul.bf16.vlgmr.msra.gmra.mxu0 %v2831_v7  ;;  %v2784_v12 = vmul.f32 %v8763_v36, %v2745_v56  ;;  %v3058_v56 = vadd.f32 %v3042_v54, %v8425_v48 }
 0x46e   : > { %v2801_v32 = vadd.f32 %v8771_v18, %v2784_v12 }
 0x470   : > { %v2700_v24 = vpop.f32.mrf.mxu2  ;;  %v2817_v52 = vmax.f32 %v2801_v32, 0.0 }
 0x471   : > { %v2746_v3 = vpop.f32.mrf.mxu3 }
 0x472   : > { %v2747_v22 = vadd.f32 %v2746_v3, %v2698_v49  ;;  %v2651_v23 = vpop.f32.mrf.mxu1  ;;  %v3090_v49 = vadd.f32 %v3074_v45, %v3058_v56  ;;  %v3077_v56 = vld [vmem:[#allocation2 + $0xb2] sm:$0xff] }
 0x473   : > { %v2701_v17 = vadd.f32 %v2700_v24, %v2651_v23 }
 0x474   : > { %v2785_v4 = vmul.f32 %v8763_v36, %v2747_v22  ;;  %v3103_v23 = vpack.c.bf16 %v3091_v10, %v3090_v49 }
 0x475   : > { %3190 = vmatmul.bf16.gmra.mxu1 %v3102_v2 }
 0x476   : > { %v2802_v55 = vadd.f32 %v8771_v18, %v2785_v4 }
 0x478   : > { %v2818_v0 = vmax.f32 %v2802_v55, 0.0  ;;  %v2702_v21 = vpop.f32.mrf.mxu2 }
 0x479   : > { %v2749_v41 = vpop.f32.mrf.mxu3 }
 0x47a   : > { %v2832_v7 = vpack.c.bf16 %v2818_v0, %v2817_v52  ;;  %v2653_v6 = vpop.f32.mrf.mxu1  ;;  %v2750_v8 = vadd.f32 %v2749_v41, %v2701_v17  ;;  %v3044_v0 = vld [vmem:[#allocation2 + $0xa8] sm:$0xff] }
 0x47b   : > { %v2703_v12 = vadd.f32 %v2702_v21, %v2653_v6  ;;  %v3045_v21 = vld [vmem:[#allocation2 + $0xb0] sm:$0xff] }
 0x47c   : > { %2916 = vmatmul.bf16.gmra.mxu0 %v2832_v7  ;;  %v2786_v28 = vmul.f32 %v8763_v36, %v2750_v8  ;;  %v3060_v7 = vadd.f32 %v3044_v0, %v8440_v38  ;;  %v3061_v6 = vadd.f32 %v3045_v21, %v8448_v16  ;;  %v3076_v8 = vld [vmem:[#allocation2 + $0xaa] sm:$0xff] }
 0x47e   : > { %v2803_v48 = vadd.f32 %v8771_v18, %v2786_v28  ;;  %v3092_v51 = vadd.f32 %v3076_v8, %v3060_v7  ;;  %v3093_v28 = vadd.f32 %v3077_v56, %v3061_v6  ;;  %v7528_v56 = vld [vmem:[%s9929_s1 + $0x488] sm:$0xff] }
 0x480   : > { %v2705_v43 = vpop.f32.mrf.mxu2  ;;  %v2819_v4 = vmax.f32 %v2803_v48, 0.0 }
 0x481   : > { %v2751_v24 = vpop.f32.mrf.mxu3 }
 0x482   : > { %v2752_v3 = vadd.f32 %v2751_v24, %v2703_v12  ;;  %v2656_v22 = vpop.f32.mrf.mxu1  ;;  %v7529_v12 = vld [vmem:[%s9929_s1 + $0x490] sm:$0xff]  ;;  %v3104_v24 = vpack.c.bf16 %v3093_v28, %v3092_v51 }
 0x483   : > { %v2706_v41 = vadd.f32 %v2705_v43, %v2656_v22  ;;  %3298 = vmatpush.bf16.msrb.mxu2 %v7529_v12 }
 0x484   : > { %v2787_v37 = vmul.f32 %v8763_v36, %v2752_v3 }
 0x485   : > { %3195 = vmatmul.bf16.gmra.mxu1 %v3103_v23 }
 0x486   : > { %v2804_v32 = vadd.f32 %v8771_v18, %v2787_v37 }
 0x487   : > { %3299 = vmatpush.bf16.msrb.mxu2 %v7528_v56 }
 0x488   : > { %v2820_v2 = vmax.f32 %v2804_v32, 0.0  ;;  %v2707_v55 = vpop.f32.mrf.mxu2  ;;  %v3046_v32 = vld [vmem:[#allocation2 + $0xd0] sm:$0xff] }
 0x489   : > { %v2754_v52 = vpop.f32.mrf.mxu3  ;;  %v3062_v21 = vadd.f32 %v3046_v32, %v8455_v53 }
 0x48a   : > { %v2833_v54 = vpack.c.bf16 %v2820_v2, %v2819_v4  ;;  %v2658_v33 = vpop.f32.mrf.mxu1  ;;  %v2755_v17 = vadd.f32 %v2754_v52, %v2706_v41  ;;  %v3047_v4 = vld [vmem:[#allocation2 + $0xd8] sm:$0xff] }
 0x48b   : > { %v2708_v45 = vadd.f32 %v2707_v55, %v2658_v33  ;;  %v3063_v41 = vadd.f32 %v3047_v4, %v8463_v5  ;;  %v3079_v33 = vld [vmem:[#allocation2 + $0xda] sm:$0xff] }
 0x48c   : > { %2921 = vmatmul.bf16.gmra.mxu0 %v2833_v54  ;;  %v2788_v40 = vmul.f32 %v8763_v36, %v2755_v17  ;;  %v3078_v54 = vld [vmem:[#allocation2 + $0xd2] sm:$0xff]  ;;  %v3080_v4 = vld [vmem:[#allocation2 + $0xfa] sm:$0xff] }
 0x48d   : > { %v3094_v6 = vadd.f32 %v3078_v54, %v3062_v21  ;;  %v3095_v8 = vadd.f32 %v3079_v33, %v3063_v41  ;;  %v7527_v41 = vld [vmem:[%s9929_s1 + $0x480] sm:$0xff] }
 0x48e   : > { %v2805_v38 = vadd.f32 %v8771_v18, %v2788_v40  ;;  %3300 = vmatpush.bf16.msrb.mxu2 %v7527_v41 }
 0x48f   : > { %v3105_v12 = vpack.c.bf16 %v3095_v8, %v3094_v6 }
 0x490   : > { %v2710_v49 = vpop.f32.mrf.mxu2  ;;  %v2821_v22 = vmax.f32 %v2805_v38, 0.0 }
 0x491   : > { %v2756_v10 = vpop.f32.mrf.mxu3 }
 0x492   : > { %v2757_v25 = vadd.f32 %v2756_v10, %v2708_v45  ;;  %v2661_v43 = vpop.f32.mrf.mxu1 }
 0x493   : > { %v2711_v2 = vadd.f32 %v2710_v49, %v2661_v43 }
 0x494   : > { %v2789_v16 = vmul.f32 %v8763_v36, %v2757_v25 }
 0x495   : > { %3200 = vmatmul.bf16.gmra.mxu1 %v3104_v24  ;;  %v3049_v24 = vld [vmem:[#allocation2 + $0x100] sm:$0xff] }
 0x496   : > { %v2806_v3 = vadd.f32 %v8771_v18, %v2789_v16  ;;  %v3048_v16 = vld [vmem:[#allocation2 + $0xf8] sm:$0xff]  ;;  %v3065_v32 = vadd.f32 %v3049_v24, %v8478_v57 }
 0x498   : > { %v2822_v48 = vmax.f32 %v2806_v3, 0.0  ;;  %v2712_v37 = vpop.f32.mrf.mxu2 }
 0x499   : > { %v2759_v23 = vpop.f32.mrf.mxu3 }
 0x49a   : > { %v2834_v55 = vpack.c.bf16 %v2822_v48, %v2821_v22  ;;  %v2663_v52 = vpop.f32.mrf.mxu1  ;;  %v2760_v0 = vadd.f32 %v2759_v23, %v2711_v2  ;;  %v3064_v23 = vadd.f32 %v3048_v16, %v8470_v61  ;;  %v3081_v2 = vld [vmem:[#allocation2 + $0x102] sm:$0xff]  ;;  %v3083_v16 = vld [vmem:[#allocation2 + $0x12a] sm:$0xff] }
 0x49b   : > { %v2713_v7 = vadd.f32 %v2712_v37, %v2663_v52  ;;  %v3097_v21 = vadd.f32 %v3081_v2, %v3065_v32 }
 0x49c   : > { %2926 = vmatmul.bf16.gmra.mxu0 %v2834_v55  ;;  %v2790_v17 = vmul.f32 %v8763_v36, %v2760_v0  ;;  %v3096_v0 = vadd.f32 %v3080_v4, %v3064_v23 }
 0x49e   : > { %v2807_v53 = vadd.f32 %v8771_v18, %v2790_v17  ;;  %v3106_v6 = vpack.c.bf16 %v3097_v21, %v3096_v0 }
 0x4a0   : > { %v2715_v40 = vpop.f32.mrf.mxu2  ;;  %v2823_v10 = vmax.f32 %v2807_v53, 0.0 }
 0x4a1   : > { %v2761_v45 = vpop.f32.mrf.mxu3 }
 0x4a2   : > { %v2762_v51 = vadd.f32 %v2761_v45, %v2713_v7  ;;  %v2666_v28 = vpop.f32.mrf.mxu1 }
 0x4a3   : > { %v2716_v3 = vadd.f32 %v2715_v40, %v2666_v28  ;;  %v3051_v28 = vld [vmem:[#allocation2 + $0x128] sm:$0xff] }
 0x4a4   : > { %v2791_v5 = vmul.f32 %v8763_v36, %v2762_v51  ;;  %v3050_v51 = vld [vmem:[#allocation2 + $0x120] sm:$0xff] }
 0x4a5   : > { %3205 = vmatmul.bf16.gmra.mxu1 %v3105_v12 }
 0x4a6   : > { %v2808_v49 = vadd.f32 %v8771_v18, %v2791_v5 }
 0x4a8   : > { %v2824_v25 = vmax.f32 %v2808_v49, 0.0  ;;  %v2717_v43 = vpop.f32.mrf.mxu2 }
 0x4a9   : > { %v2764_v38 = vpop.f32.mrf.mxu3 }
 0x4aa   : > { %v2835_v22 = vpack.c.bf16 %v2824_v25, %v2823_v10  ;;  %v2668_v48 = vpop.f32.mrf.mxu1  ;;  %v2765_v37 = vadd.f32 %v2764_v38, %v2716_v3  ;;  %v3066_v25 = vadd.f32 %v3050_v51, %v8485_v9  ;;  %v3082_v38 = vld [vmem:[#allocation2 + $0x122] sm:$0xff] }
 0x4ab   : > { %v2718_v52 = vadd.f32 %v2717_v43, %v2668_v48  ;;  %v3067_v43 = vadd.f32 %v3051_v28, %v8493_v34 }
 0x4ac   : > { %2931 = vmatmul.bf16.gmra.mxu0 %v2835_v22  ;;  %v2792_v55 = vmul.f32 %v8763_v36, %v2765_v37  ;;  %v3098_v22 = vadd.f32 %v3082_v38, %v3066_v25  ;;  %v7550_v25 = vld [vmem:[%s9929_s1 + $0x538] sm:$0xff]  ;;  %v7549_v38 = vld [vmem:[%s9929_s1 + $0x530] sm:$0xff] }
 0x4ad   : > { %v3099_v48 = vadd.f32 %v3083_v16, %v3067_v43  ;;  %3707 = vmatpush.bf16.msrb.mxu0 %v7550_v25  ;;  %v7541_v43 = vld [vmem:[%s9929_s1 + $0x4f0] sm:$0xff] }
 0x4ae   : > { %v2809_v61 = vadd.f32 %v8771_v18, %v2792_v55 }
 0x4af   : > { %v3107_v55 = vpack.c.bf16 %v3099_v48, %v3098_v22  ;;  %v7540_v48 = vld [vmem:[%s9929_s1 + $0x4e8] sm:$0xff] }
 0x4b0   : > { %v2720_v54 = vpop.f32.mrf.mxu2  ;;  %v2825_v56 = vmax.f32 %v2809_v61, 0.0 }
 0x4b1   : > { %v2766_v33 = vpop.f32.mrf.mxu3  ;;  %3708 = vmatpush.bf16.msrb.mxu0 %v7549_v38 }
 0x4b2   : > { %v2767_v17 = vadd.f32 %v2766_v33, %v2718_v52  ;;  %v2671_v7 = vpop.f32.mrf.mxu1 }
 0x4b3   : > { %v2721_v53 = vadd.f32 %v2720_v54, %v2671_v7 }
 0x4b4   : > { %v2793_v57 = vmul.f32 %v8763_v36, %v2767_v17 }
 0x4b5   : > { %3210 = vmatmul.bf16.gmra.mxu1 %v3106_v6 }
 0x4b6   : > { %v2810_v8 = vadd.f32 %v8771_v18, %v2793_v57 }
 0x4b8   : > { %v2826_v40 = vmax.f32 %v2810_v8, 0.0  ;;  %v2722_v12 = vpop.f32.mrf.mxu2 }
 0x4b9   : > { %v2769_v45 = vpop.f32.mrf.mxu3 }
 0x4ba   : > { %v2836_v5 = vpack.c.bf16 %v2826_v40, %v2825_v56  ;;  %v2673_v49 = vpop.f32.mrf.mxu1  ;;  %v2770_v10 = vadd.f32 %v2769_v45, %v2721_v53 }
 0x4bb   : > { %v2723_v3 = vadd.f32 %v2722_v12, %v2673_v49 }
 0x4bc   : > { %2936 = vmatmul.bf16.gmra.mxu0 %v2836_v5  ;;  %v2794_v24 = vmul.f32 %v8763_v36, %v2770_v10  ;;  %v7542_v10 = vld [vmem:[%s9929_s1 + $0x4f8] sm:$0xff] }
 0x4bd   : > { %3658 = vmatpush.bf16.msrb.mxu3 %v7542_v10  ;;  %v7552_v10 = vld [vmem:[%s9929_s1 + $0x548] sm:$0xff] }
 0x4be   : > { %v2811_v4 = vadd.f32 %v8771_v18, %v2794_v24 }
 0x4c0   : > { %v2725_v52 = vpop.f32.mrf.mxu2  ;;  %v2827_v34 = vmax.f32 %v2811_v4, 0.0  ;;  %v7556_v4 = vld [vmem:[%s9929_s1 + $0x568] sm:$0xff] }
 0x4c1   : > { %v2771_v37 = vpop.f32.mrf.mxu3  ;;  %3659 = vmatpush.bf16.msrb.mxu3 %v7541_v43  ;;  %v7543_v43 = vld [vmem:[%s9929_s1 + $0x500] sm:$0xff] }
 0x4c2   : > { %v2772_v23 = vadd.f32 %v2771_v37, %v2723_v3  ;;  %v2676_v32 = vpop.f32.mrf.mxu1  ;;  %v7557_v3 = vld [vmem:[%s9929_s1 + $0x570] sm:$0xff]  ;;  %v7548_v37 = vld [vmem:[%s9929_s1 + $0x528] sm:$0xff] }
 0x4c3   : > { %v2726_v41 = vadd.f32 %v2725_v52, %v2676_v32  ;;  %3709 = vmatpush.bf16.msrb.mxu0 %v7548_v37  ;;  %v7547_v52 = vld [vmem:[%s9929_s1 + $0x520] sm:$0xff] }
 0x4c4   : > { %v2795_v2 = vmul.f32 %v8763_v36, %v2772_v23 }
 0x4c5   : > { %3215 = vmatmul.bf16.gmra.mxu1 %v3107_v55  ;;  %3660 = vmatpush.bf16.msrb.mxu3 %v7540_v48  ;;  %v7539_v55 = vld [vmem:[%s9929_s1 + $0x4e0] sm:$0xff] }
 0x4c6   : > { %v2812_v9 = vadd.f32 %v8771_v18, %v2795_v2 }
 0x4c7   : > { %3710 = vmatpush.bf16.msrb.mxu0 %v7547_v52 }
 0x4c8   : > { %v2828_v0 = vmax.f32 %v2812_v9, 0.0  ;;  %v2727_v7 = vpop.f32.mrf.mxu2 }
 0x4c9   : > { %v2774_v21 = vpop.f32.mrf.mxu3  ;;  %3661 = vmatpush.bf16.msrb.mxu3 %v7539_v55 }
 0x4ca   : > { %v2837_v54 = vpack.c.bf16 %v2828_v0, %v2827_v34  ;;  %v2678_v33 = vpop.f32.mrf.mxu1  ;;  %v2775_v17 = vadd.f32 %v2774_v21, %v2726_v41  ;;  %v7555_v0 = vld [vmem:[%s9929_s1 + $0x560] sm:$0xff]  ;;  %v7538_v41 = vld [vmem:[%s9929_s1 + $0x4d8] sm:$0xff] }
 0x4cb   : > { %v2728_v57 = vadd.f32 %v2727_v7, %v2678_v33  ;;  %v7554_v7 = vld [vmem:[%s9929_s1 + $0x558] sm:$0xff] }
 0x4cc   : > { %2941 = vmatmul.bf16.gmra.mxu0 %v2837_v54  ;;  %v2796_v61 = vmul.f32 %v8763_v36, %v2775_v17  ;;  %v7546_v54 = vld [vmem:[%s9929_s1 + $0x518] sm:$0xff] }
 0x4cd   : > { %3662 = vmatpush.bf16.msrb.mxu3 %v7538_v41  ;;  %3711 = vmatpush.bf16.msrb.mxu0 %v7546_v54 }
 0x4ce   : > { %v2813_v40 = vadd.f32 %v8771_v18, %v2796_v61 }
 0x4d0   : > { %v2829_v28 = vmax.f32 %v2813_v40, 0.0 }
 0x4d1   : > { %v2776_v6 = vpop.f32.mrf.mxu3 }
 0x4d2   : > { %v2777_v8 = vadd.f32 %v2776_v6, %v2728_v57  ;;  %v8831_v56 = vpop.f32.mrf.mxu1  ;;  %v7537_v57 = vld [vmem:[%s9929_s1 + $0x4d0] sm:$0xff] }
 0x4d3   : > { %v7545_v6 = vld [vmem:[%s9929_s1 + $0x510] sm:$0xff]  ;;  %3663 = vmatpush.bf16.msrb.mxu3 %v7537_v57 }
 0x4d4   : > { %v2797_v45 = vmul.f32 %v8763_v36, %v2777_v8  ;;  %v7558_v36 = vld [vmem:[%s9929_s1 + $0x578] sm:$0xff]  ;;  %3712 = vmatpush.bf16.msrb.mxu0 %v7545_v6 }
 0x4d5   : > { %3756 = vmatpush.bf16.msrb.mxu1 %v7558_v36  ;;  %v7535_v36 = vld [vmem:[%s9929_s1 + $0x4c0] sm:$0xff] }
 0x4d6   : > { %v2814_v51 = vadd.f32 %v8771_v18, %v2797_v45  ;;  %v7553_v45 = vld [vmem:[%s9929_s1 + $0x550] sm:$0xff] }
 0x4d8   : > { %v2830_v53 = vmax.f32 %v2814_v51, 0.0 }
 0x4d9   : > { %3757 = vmatpush.bf16.msrb.mxu1 %v7557_v3  ;;  %v7551_v3 = vld [vmem:[%s9929_s1 + $0x540] sm:$0xff] }
 0x4da   : > { %v2838_v5 = vpack.c.bf16 %v2830_v53, %v2829_v28  ;;  %v8836_v12 = vpop.f32.mrf.mxu1  ;;  %v7536_v28 = vld [vmem:[%s9929_s1 + $0x4c8] sm:$0xff] }
 0x4db   : > { %v3221_v49 = vpack.c.bf16 %v8836_v12, %v8831_v56  ;;  %v7544_v53 = vld [vmem:[%s9929_s1 + $0x508] sm:$0xff]  ;;  %3664 = vmatpush.bf16.msrb.mxu3 %v7536_v28  ;;  %v8976_v28 = vld [vmem:[#allocation2 + $0x19] sm:$0xff] }
 0x4dc   : > { %2946 = vmatmul.bf16.gmra.mxu0 %v2838_v5 }
 0x4dd   : > { %3301 = vmatmul.bf16.vlgmr.msrb.gmra.mxu2 %v3221_v49  ;;  %3758 = vmatpush.bf16.msrb.mxu1 %v7556_v4  ;;  %v8966_v4 = vld [vmem:[%s9930_s2 + $0x11] ss:$0 sm:$0xff] }
 0x4de   : > { %3713 = vmatpush.bf16.msrb.mxu0 %v7544_v53 }
 0x4df   : > { %3665 = vmatpush.bf16.msrb.mxu3 %v7535_v36 }
 0x4e1   : > { %3759 = vmatpush.bf16.msrb.mxu1 %v7555_v0 }
 0x4e2   : > { %v8849_v18 = vpop.f32.mrf.mxu1  ;;  %3714 = vmatpush.bf16.msrb.mxu0 %v7543_v43 }
 0x4e5   : > { %3760 = vmatpush.bf16.msrb.mxu1 %v7554_v7 }
 0x4e9   : > { %3761 = vmatpush.bf16.msrb.mxu1 %v7553_v45  ;;  %v8954_v48 = vpop.f32.mrf.mxu0 }
 0x4ea   : > { %v8857_v16 = vpop.f32.mrf.mxu1 }
 0x4eb   : > { %v3222_v24 = vpack.c.bf16 %v8857_v16, %v8849_v18 }
 0x4ed   : > { %3306 = vmatmul.bf16.gmra.mxu2 %v3222_v24  ;;  %3762 = vmatpush.bf16.msrb.mxu1 %v7552_v10 }
 0x4f1   : > { %3763 = vmatpush.bf16.msrb.mxu1 %v7551_v3  ;;  %v8956_v37 = vpop.f32.mrf.mxu0 }
 0x4f2   : > { %v8864_v22 = vpop.f32.mrf.mxu1 }
 0x4f9   : > { %v8970_v0 = vpop.f32.mrf.mxu0 }
 0x4fa   : > { %v8872_v23 = vpop.f32.mrf.mxu1 }
 0x4fb   : > { %v3223_v32 = vpack.c.bf16 %v8872_v23, %v8864_v22 }
 0x4fd   : > { %3311 = vmatmul.bf16.gmra.mxu2 %v3223_v32  ;;  %v8961_v32 = vld [vmem:[%s9930_s2 + $0x10] ss:$0 sm:$0xff] }
 0x501   : > { %v8974_v6 = vpop.f32.mrf.mxu0 }
 0x502   : > { %v8879_v2 = vpop.f32.mrf.mxu1 }
 0x50a   : > { %v8887_v9 = vpop.f32.mrf.mxu1 }
 0x50b   : > { %v3224_v34 = vpack.c.bf16 %v8887_v9, %v8879_v2 }
 0x50d   : > { %3316 = vmatmul.bf16.gmra.mxu2 %v3224_v34 }
 0x512   : > { %v8894_v21 = vpop.f32.mrf.mxu1 }
 0x51a   : > { %v8902_v33 = vpop.f32.mrf.mxu1 }
 0x51b   : > { %v3225_v17 = vpack.c.bf16 %v8902_v33, %v8894_v21 }
 0x51d   : > { %3321 = vmatmul.bf16.gmra.mxu2 %v3225_v17 }
 0x522   : > { %v8909_v61 = vpop.f32.mrf.mxu1 }
 0x52a   : > { %v8917_v8 = vpop.f32.mrf.mxu1 }
 0x52b   : > { %v3226_v40 = vpack.c.bf16 %v8917_v8, %v8909_v61 }
 0x52d   : > { %3326 = vmatmul.bf16.gmra.mxu2 %v3226_v40 }
 0x532   : > { %v8924_v51 = vpop.f32.mrf.mxu1 }
 0x53a   : > { %v8932_v5 = vpop.f32.mrf.mxu1 }
 0x53b   : > { %v3227_v49 = vpack.c.bf16 %v8932_v5, %v8924_v51 }
 0x53d   : > { %3331 = vmatmul.bf16.gmra.mxu2 %v3227_v49  ;;  %v7566_v49 = vld [vmem:[%s9929_s1 + $0x5b8] sm:$0xff] }
 0x53e   : > { %4121 = vmatpush.bf16.msra.mxu2 %v7566_v49 }
 0x542   : > { %v8939_v25 = vpop.f32.mrf.mxu1 }
 0x54a   : > { %v8947_v38 = vpop.f32.mrf.mxu1 }
 0x54b   : > { %v3228_v24 = vpack.c.bf16 %v8947_v38, %v8939_v25 }
 0x54d   : > { %3336 = vmatmul.bf16.gmra.mxu2 %v3228_v24  ;;  %v8984_v24 = vld [vmem:[#allocation2 + $0x1a] sm:$0xff] }
 0x560   : > { %v3302_v55 = vpop.f32.mrf.mxu2 }
 0x561   : > { %v3345_v52 = vmul.f32 %v8961_v32, %v3302_v55 }
 0x563   : > { %v3362_v34 = vadd.f32 %v8966_v4, %v3345_v52 }
 0x565   : > { %v3378_v41 = vmax.f32 %v3362_v34, 0.0  ;;  %v8987_v34 = vpop.f32.mrf.mxu0 }
 0x566   : > { %9948 = vst [vmem:[#allocation19_spill] sm:$0xff] %v8987_v34 }
 0x567   : > { %3394 = vst [vmem:[#allocation2 + $0x9] sm:$0xff] %v3378_v41 }
 0x568   : > { %v3304_v54 = vpop.f32.mrf.mxu2 }
 0x569   : > { %v3346_v17 = vmul.f32 %v8961_v32, %v3304_v54 }
 0x56b   : > { %v3363_v7 = vadd.f32 %v8966_v4, %v3346_v17 }
 0x56d   : > { %v3379_v57 = vmax.f32 %v3363_v7, 0.0 }
 0x56e   : > { %v3411_v40 = vld [vmem:[#allocation2 + $0x8] sm:$0xff] }
 0x56f   : > { %v3443_v45 = vpack.c.bf16 %v3379_v57, %v3378_v41  ;;  %3395 = vst [vmem:[#allocation2 + $0x11] sm:$0xff] %v3379_v57  ;;  %v3442_v53 = vpack.c.bf16 %v3411_v40, %v8976_v28 }
 0x570   : > { %v3307_v10 = vpop.f32.mrf.mxu2 }
 0x571   : > { %v3347_v36 = vmul.f32 %v8961_v32, %v3307_v10  ;;  %3666 = vmatmul.bf16.vlgmr.msrb.gmra.mxu3 %v3442_v53  ;;  %3715 = vmatmul.bf16.vlgmr.msrb.gmra.mxu0 %v3443_v45  ;;  %v7565_v53 = vld [vmem:[%s9929_s1 + $0x5b0] sm:$0xff] }
 0x572   : > { %4122 = vmatpush.bf16.msra.mxu2 %v7565_v53 }
 0x573   : > { %v3364_v43 = vadd.f32 %v8966_v4, %v3347_v36  ;;  %v8996_v36 = vpop.f32.mrf.mxu0 }
 0x574   : > { %9949 = vst [vmem:[#allocation20_spill] sm:$0xff] %v8996_v36 }
 0x575   : > { %v3380_v3 = vmax.f32 %v3364_v43, 0.0 }
 0x576   : > { %v3426_v55 = vld [vmem:[#allocation2 + $0x12] sm:$0xff] }
 0x577   : > { %3396 = vst [vmem:[#allocation2 + $0x31] sm:$0xff] %v3380_v3  ;;  %v3444_v52 = vpack.c.bf16 %v8984_v24, %v3426_v55  ;;  %v8999_v55 = vld [vmem:[#allocation2 + $0x42] sm:$0xff] }
 0x578   : > { %v3309_v41 = vpop.f32.mrf.mxu2 }
 0x579   : > { %v3348_v54 = vmul.f32 %v8961_v32, %v3309_v41  ;;  %3764 = vmatmul.bf16.vlgmr.msrb.gmra.mxu1 %v3444_v52 }
 0x57b   : > { %v3365_v17 = vadd.f32 %v8966_v4, %v3348_v54 }
 0x57d   : > { %v3381_v7 = vmax.f32 %v3365_v17, 0.0 }
 0x57e   : > { %v3413_v57 = vld [vmem:[#allocation2 + $0x30] sm:$0xff] }
 0x57f   : > { %3397 = vst [vmem:[#allocation2 + $0x39] sm:$0xff] %v3381_v7  ;;  %v3445_v40 = vpack.c.bf16 %v3413_v57, %v8976_v28  ;;  %v3446_v45 = vpack.c.bf16 %v3381_v7, %v3380_v3  ;;  %v9004_v57 = vpop.f32.mrf.mxu0 }
 0x580   : > { %v3312_v49 = vpop.f32.mrf.mxu2  ;;  %9950 = vst [vmem:[#allocation21_spill] sm:$0xff] %v9004_v57 }
 0x581   : > { %v3349_v10 = vmul.f32 %v8961_v32, %v3312_v49  ;;  %3671 = vmatmul.bf16.gmra.mxu3 %v3445_v40  ;;  %3720 = vmatmul.bf16.gmra.mxu0 %v3446_v45 }
 0x583   : > { %v3366_v43 = vadd.f32 %v8966_v4, %v3349_v10  ;;  %v7564_v10 = vld [vmem:[%s9929_s1 + $0x5a8] sm:$0xff] }
 0x584   : > { %4123 = vmatpush.bf16.msra.mxu2 %v7564_v10 }
 0x585   : > { %v3382_v52 = vmax.f32 %v3366_v43, 0.0 }
 0x586   : > { %v3428_v41 = vld [vmem:[#allocation2 + $0x3a] sm:$0xff] }
 0x587   : > { %3398 = vst [vmem:[#allocation2 + $0x59] sm:$0xff] %v3382_v52  ;;  %v3447_v3 = vpack.c.bf16 %v8999_v55, %v3428_v41 }
 0x588   : > { %v3314_v54 = vpop.f32.mrf.mxu2 }
 0x589   : > { %v3350_v17 = vmul.f32 %v8961_v32, %v3314_v54  ;;  %3769 = vmatmul.bf16.gmra.mxu1 %v3447_v3  ;;  %v9012_v54 = vld [vmem:[#allocation2 + $0x6a] sm:$0xff] }
 0x58b   : > { %v3367_v7 = vadd.f32 %v8966_v4, %v3350_v17 }
 0x58d   : > { %v3383_v40 = vmax.f32 %v3367_v7, 0.0  ;;  %v9014_v7 = vpop.f32.mrf.mxu0 }
 0x58e   : > { %v3415_v45 = vld [vmem:[#allocation2 + $0x58] sm:$0xff]  ;;  %9951 = vst [vmem:[#allocation22_spill] sm:$0xff] %v9014_v7 }
 0x58f   : > { %3399 = vst [vmem:[#allocation2 + $0x61] sm:$0xff] %v3383_v40  ;;  %v3448_v53 = vpack.c.bf16 %v3415_v45, %v8976_v28  ;;  %v3449_v49 = vpack.c.bf16 %v3383_v40, %v3382_v52 }
 0x590   : > { %v3317_v43 = vpop.f32.mrf.mxu2 }
 0x591   : > { %v3351_v41 = vmul.f32 %v8961_v32, %v3317_v43  ;;  %3676 = vmatmul.bf16.gmra.mxu3 %v3448_v53  ;;  %3725 = vmatmul.bf16.gmra.mxu0 %v3449_v49 }
 0x593   : > { %v3368_v3 = vadd.f32 %v8966_v4, %v3351_v41 }
 0x595   : > { %v3384_v17 = vmax.f32 %v3368_v3, 0.0  ;;  %v7563_v3 = vld [vmem:[%s9929_s1 + $0x5a0] sm:$0xff]  ;;  %v9023_v46 = vpop.f32.mrf.mxu0 }
 0x596   : > { %v3430_v60 = vld [vmem:[#allocation2 + $0x62] sm:$0xff]  ;;  %9952 = vst [vmem:[#allocation23_spill] sm:$0xff] %v9023_v46  ;;  %4124 = vmatpush.bf16.msra.mxu2 %v7563_v3 }
 0x597   : > { %3400 = vst [vmem:[#allocation2 + $0x81] sm:$0xff] %v3384_v17  ;;  %v3450_v52 = vpack.c.bf16 %v9012_v54, %v3430_v60 }
 0x598   : > { %v3319_v40 = vpop.f32.mrf.mxu2 }
 0x599   : > { %v3352_v45 = vmul.f32 %v8961_v32, %v3319_v40  ;;  %3774 = vmatmul.bf16.gmra.mxu1 %v3450_v52  ;;  %v9027_v40 = vld [vmem:[#allocation2 + $0x92] sm:$0xff] }
 0x59b   : > { %v3369_v43 = vadd.f32 %v8966_v4, %v3352_v45 }
 0x59d   : > { %v3385_v53 = vmax.f32 %v3369_v43, 0.0  ;;  %v9031_v14 = vpop.f32.mrf.mxu0 }
 0x59e   : > { %v3417_v49 = vld [vmem:[#allocation2 + $0x80] sm:$0xff]  ;;  %9953 = vst [vmem:[#allocation24_spill] sm:$0xff] %v9031_v14 }
 0x59f   : > { %3401 = vst [vmem:[#allocation2 + $0x89] sm:$0xff] %v3385_v53  ;;  %v3451_v10 = vpack.c.bf16 %v3417_v49, %v8976_v28  ;;  %v3452_v41 = vpack.c.bf16 %v3385_v53, %v3384_v17 }
 0x5a0   : > { %v3322_v15 = vpop.f32.mrf.mxu2 }
 0x5a1   : > { %v3353_v60 = vmul.f32 %v8961_v32, %v3322_v15  ;;  %3681 = vmatmul.bf16.gmra.mxu3 %v3451_v10  ;;  %3730 = vmatmul.bf16.gmra.mxu0 %v3452_v41 }
 0x5a3   : > { %v3370_v52 = vadd.f32 %v8966_v4, %v3353_v60 }
 0x5a5   : > { %v3386_v45 = vmax.f32 %v3370_v52, 0.0  ;;  %v7562_v52 = vld [vmem:[%s9929_s1 + $0x598] sm:$0xff] }
 0x5a6   : > { %v3432_v43 = vld [vmem:[#allocation2 + $0x8a] sm:$0xff]  ;;  %4125 = vmatpush.bf16.msra.mxu2 %v7562_v52 }
 0x5a7   : > { %3402 = vst [vmem:[#allocation2 + $0xa9] sm:$0xff] %v3386_v45  ;;  %v3453_v17 = vpack.c.bf16 %v9027_v40, %v3432_v43 }
 0x5a8   : > { %v3324_v53 = vpop.f32.mrf.mxu2 }
 0x5a9   : > { %v3354_v49 = vmul.f32 %v8961_v32, %v3324_v53  ;;  %3779 = vmatmul.bf16.gmra.mxu1 %v3453_v17  ;;  %v9040_v53 = vpop.f32.mrf.mxu0 }
 0x5aa   : > { %9954 = vst [vmem:[#allocation25_spill] sm:$0xff] %v9040_v53 }
 0x5ab   : > { %v3371_v15 = vadd.f32 %v8966_v4, %v3354_v49  ;;  %v9042_v49 = vld [vmem:[#allocation2 + $0xba] sm:$0xff] }
 0x5ad   : > { %v3387_v10 = vmax.f32 %v3371_v15, 0.0 }
 0x5ae   : > { %v3419_v41 = vld [vmem:[#allocation2 + $0xa8] sm:$0xff] }
 0x5af   : > { %3403 = vst [vmem:[#allocation2 + $0xb1] sm:$0xff] %v3387_v10  ;;  %v3454_v3 = vpack.c.bf16 %v3419_v41, %v8976_v28  ;;  %v3455_v60 = vpack.c.bf16 %v3387_v10, %v3386_v45 }
 0x5b0   : > { %v3327_v42 = vpop.f32.mrf.mxu2 }
 0x5b1   : > { %v3355_v43 = vmul.f32 %v8961_v32, %v3327_v42  ;;  %3686 = vmatmul.bf16.gmra.mxu3 %v3454_v3  ;;  %3735 = vmatmul.bf16.gmra.mxu0 %v3455_v60  ;;  %v9047_v60 = vpop.f32.mrf.mxu0 }
 0x5b2   : > { %9955 = vst [vmem:[#allocation26_spill] sm:$0xff] %v9047_v60 }
 0x5b3   : > { %v3372_v17 = vadd.f32 %v8966_v4, %v3355_v43 }
 0x5b5   : > { %v3388_v15 = vmax.f32 %v3372_v17, 0.0  ;;  %v7561_v17 = vld [vmem:[%s9929_s1 + $0x590] sm:$0xff] }
 0x5b6   : > { %v3434_v47 = vld [vmem:[#allocation2 + $0xb2] sm:$0xff]  ;;  %4126 = vmatpush.bf16.msra.mxu2 %v7561_v17 }
 0x5b7   : > { %3404 = vst [vmem:[#allocation2 + $0xd1] sm:$0xff] %v3388_v15  ;;  %v3456_v45 = vpack.c.bf16 %v9042_v49, %v3434_v47 }
 0x5b8   : > { %v3329_v10 = vpop.f32.mrf.mxu2 }
 0x5b9   : > { %v3356_v41 = vmul.f32 %v8961_v32, %v3329_v10  ;;  %3784 = vmatmul.bf16.gmra.mxu1 %v3456_v45  ;;  %v9055_v10 = vld [vmem:[#allocation2 + $0xe2] sm:$0xff] }
 0x5bb   : > { %v3373_v42 = vadd.f32 %v8966_v4, %v3356_v41 }
 0x5bd   : > { %v3389_v3 = vmax.f32 %v3373_v42, 0.0 }
 0x5be   : > { %v3421_v52 = vld [vmem:[#allocation2 + $0xd0] sm:$0xff] }
 0x5bf   : > { %3405 = vst [vmem:[#allocation2 + $0xd9] sm:$0xff] %v3389_v3  ;;  %v3457_v43 = vpack.c.bf16 %v3421_v52, %v8976_v28  ;;  %v3458_v63 = vpack.c.bf16 %v3389_v3, %v3388_v15  ;;  %v9058_v15 = vpop.f32.mrf.mxu0 }
 0x5c0   : > { %v3332_v13 = vpop.f32.mrf.mxu2  ;;  %9956 = vst [vmem:[#allocation27_spill] sm:$0xff] %v9058_v15 }
 0x5c1   : > { %v3357_v47 = vmul.f32 %v8961_v32, %v3332_v13  ;;  %3691 = vmatmul.bf16.gmra.mxu3 %v3457_v43  ;;  %3740 = vmatmul.bf16.gmra.mxu0 %v3458_v63  ;;  %v7560_v63 = vld [vmem:[%s9929_s1 + $0x588] sm:$0xff]  ;;  %v7574_v13 = vld [vmem:[%s9929_s1 + $0x5f8] sm:$0xff] }
 0x5c2   : > { %4127 = vmatpush.bf16.msra.mxu2 %v7560_v63  ;;  %4170 = vmatpush.bf16.msra.mxu3 %v7574_v13 }
 0x5c3   : > { %v3374_v45 = vadd.f32 %v8966_v4, %v3357_v47 }
 0x5c5   : > { %v3390_v41 = vmax.f32 %v3374_v45, 0.0  ;;  %v7573_v45 = vld [vmem:[%s9929_s1 + $0x5f0] sm:$0xff] }
 0x5c6   : > { %v3436_v42 = vld [vmem:[#allocation2 + $0xda] sm:$0xff]  ;;  %4171 = vmatpush.bf16.msra.mxu3 %v7573_v45 }
 0x5c7   : > { %3406 = vst [vmem:[#allocation2 + $0xf9] sm:$0xff] %v3390_v41  ;;  %v3459_v52 = vpack.c.bf16 %v9055_v10, %v3436_v42  ;;  %v9079_v13 = vpop.f32.mrf.mxu0  ;;  %v7571_v45 = vld [vmem:[%s9929_s1 + $0x5e0] sm:$0xff] }
 0x5c8   : > { %v3334_v3 = vpop.f32.mrf.mxu2  ;;  %9957 = vst [vmem:[#allocation28_spill] sm:$0xff] %v9079_v13 }
 0x5c9   : > { %v3358_v53 = vmul.f32 %v8961_v32, %v3334_v3  ;;  %3789 = vmatmul.bf16.gmra.mxu1 %v3459_v52  ;;  %v7582_v3 = vld [vmem:[%s9929_s1 + $0x638] sm:$0xff] }
 0x5ca   : > { %4219 = vmatpush.bf16.msra.mxu0 %v7582_v3 }
 0x5cb   : > { %v3375_v43 = vadd.f32 %v8966_v4, %v3358_v53  ;;  %v7572_v53 = vld [vmem:[%s9929_s1 + $0x5e8] sm:$0xff] }
 0x5cc   : > { %4172 = vmatpush.bf16.msra.mxu3 %v7572_v53  ;;  %v7570_v53 = vld [vmem:[%s9929_s1 + $0x5d8] sm:$0xff] }
 0x5cd   : > { %v3391_v17 = vmax.f32 %v3375_v43, 0.0 }
 0x5ce   : > { %v3423_v47 = vld [vmem:[#allocation2 + $0xf8] sm:$0xff] }
 0x5cf   : > { %3407 = vst [vmem:[#allocation2 + $0x101] sm:$0xff] %v3391_v17  ;;  %v3460_v42 = vpack.c.bf16 %v3423_v47, %v8976_v28  ;;  %v3461_v52 = vpack.c.bf16 %v3391_v17, %v3390_v41  ;;  %v9082_v41 = vld [vmem:[#allocation2 + $0x10a] sm:$0xff]  ;;  %v9099_v13 = vpop.f32.mrf.mxu0 }
 0x5d0   : > { %v3337_v15 = vpop.f32.mrf.mxu2  ;;  %4173 = vmatpush.bf16.msra.mxu3 %v7571_v45  ;;  %9958 = vst [vmem:[#allocation29_spill] sm:$0xff] %v9099_v13 }
 0x5d1   : > { %v3359_v63 = vmul.f32 %v8961_v32, %v3337_v15  ;;  %3696 = vmatmul.bf16.gmra.mxu3 %v3460_v42  ;;  %3745 = vmatmul.bf16.gmra.mxu0 %v3461_v52  ;;  %v7581_v15 = vld [vmem:[%s9929_s1 + $0x630] sm:$0xff] }
 0x5d2   : > { %4220 = vmatpush.bf16.msra.mxu0 %v7581_v15  ;;  %v7579_v15 = vld [vmem:[%s9929_s1 + $0x620] sm:$0xff] }
 0x5d3   : > { %v3376_v43 = vadd.f32 %v8966_v4, %v3359_v63  ;;  %v7580_v63 = vld [vmem:[%s9929_s1 + $0x628] sm:$0xff] }
 0x5d4   : > { %4174 = vmatpush.bf16.msra.mxu3 %v7570_v53  ;;  %v7578_v53 = vld [vmem:[%s9929_s1 + $0x618] sm:$0xff] }
 0x5d5   : > { %v3392_v17 = vmax.f32 %v3376_v43, 0.0 }
 0x5d6   : > { %v3438_v47 = vld [vmem:[#allocation2 + $0x102] sm:$0xff]  ;;  %4221 = vmatpush.bf16.msra.mxu0 %v7580_v63  ;;  %v9117_v63 = vld [vmem:[#allocation2 + $0x132] sm:$0xff] }
 0x5d7   : > { %3408 = vst [vmem:[#allocation2 + $0x121] sm:$0xff] %v3392_v17  ;;  %v3462_v42 = vpack.c.bf16 %v9082_v41, %v3438_v47 }
 0x5d8   : > { %v3339_v52 = vpop.f32.mrf.mxu2 }
 0x5d9   : > { %v3360_v3 = vmul.f32 %v8961_v32, %v3339_v52  ;;  %3794 = vmatmul.bf16.gmra.mxu1 %v3462_v42  ;;  %v7569_v32 = vld [vmem:[%s9929_s1 + $0x5d0] sm:$0xff] }
 0x5da   : > { %4175 = vmatpush.bf16.msra.mxu3 %v7569_v32  ;;  %4222 = vmatpush.bf16.msra.mxu0 %v7579_v15  ;;  %v7576_v15 = vld [vmem:[%s9929_s1 + $0x608] sm:$0xff] }
 0x5db   : > { %v3377_v43 = vadd.f32 %v8966_v4, %v3360_v3  ;;  %v7559_v4 = vld [vmem:[%s9929_s1 + $0x580] sm:$0xff]  ;;  %v7568_v3 = vld [vmem:[%s9929_s1 + $0x5c8] sm:$0xff] }
 0x5dc   : > { %4128 = vmatpush.bf16.msra.mxu2 %v7559_v4  ;;  %v7598_v4 = vld [vmem:[%s9929_s1 + $0x6b8] sm:$0xff] }
 0x5dd   : > { %v3393_v47 = vmax.f32 %v3377_v43, 0.0 }
 0x5de   : > { %v3425_v45 = vld [vmem:[#allocation2 + $0x120] sm:$0xff]  ;;  %4176 = vmatpush.bf16.msra.mxu3 %v7568_v3  ;;  %4223 = vmatpush.bf16.msra.mxu0 %v7578_v53 }
 0x5df   : > { %3409 = vst [vmem:[#allocation2 + $0x129] sm:$0xff] %v3393_v47  ;;  %v3463_v42 = vpack.c.bf16 %v3425_v45, %v8976_v28  ;;  %v3464_v52 = vpack.c.bf16 %v3393_v47, %v3392_v17  ;;  %v9119_v17 = vpop.f32.mrf.mxu0  ;;  %v7567_v47 = vld [vmem:[%s9929_s1 + $0x5c0] sm:$0xff]  ;;  %v7577_v45 = vld [vmem:[%s9929_s1 + $0x610] sm:$0xff] }
 0x5e0   : > { %9959 = vst [vmem:[#allocation30_spill] sm:$0xff] %v9119_v17  ;;  %4661 = vmatpush.bf16.msrb.mxu2 %v7598_v4 }
 0x5e1   : > { %3701 = vmatmul.bf16.gmra.mxu3 %v3463_v42  ;;  %3750 = vmatmul.bf16.gmra.mxu0 %v3464_v52  ;;  %v7575_v52 = vld [vmem:[%s9929_s1 + $0x600] sm:$0xff] }
 0x5e2   : > { %4177 = vmatpush.bf16.msra.mxu3 %v7567_v47  ;;  %4224 = vmatpush.bf16.msra.mxu0 %v7577_v45 }
 0x5e6   : > { %v3440_v43 = vld [vmem:[#allocation2 + $0x12a] sm:$0xff]  ;;  %4225 = vmatpush.bf16.msra.mxu0 %v7576_v15  ;;  %v9145_v15 = vld [vmem:[%s9930_s2 + $0x13] ss:$0 sm:$0xff] }
 0x5e7   : > { %v3465_v32 = vpack.c.bf16 %v9117_v63, %v3440_v43  ;;  %v9140_v43 = vld [vmem:[%s9930_s2 + $0x12] ss:$0 sm:$0xff] }
 0x5e9   : > { %3799 = vmatmul.bf16.gmra.mxu1 %v3465_v32 }
 0x5ea   : > { %4226 = vmatpush.bf16.msra.mxu0 %v7575_v52 }
 0x5ee   : > { %v3716_v42 = vpop.f32.mrf.mxu0 }
 0x5f4   : > { %v3667_v3 = vpop.f32.mrf.mxu3 }
 0x5f5   : > { %v3717_v53 = vadd.f32 %v3716_v42, %v3667_v3 }
 0x5f6   : > { %v3718_v47 = vpop.f32.mrf.mxu0  ;;  %v3765_v45 = vpop.f32.mrf.mxu1 }
 0x5f7   : > { %v3766_v32 = vadd.f32 %v3765_v45, %v3717_v53  ;;  %v7597_v53 = vld [vmem:[%s9929_s1 + $0x6b0] sm:$0xff] }
 0x5f8   : > { %4662 = vmatpush.bf16.msrb.mxu2 %v7597_v53 }
 0x5f9   : > { %v3808_v13 = vmul.f32 %v9140_v43, %v3766_v32 }
 0x5fb   : > { %v3825_v52 = vadd.f32 %v9145_v15, %v3808_v13 }
 0x5fc   : > { %v3669_v4 = vpop.f32.mrf.mxu3 }
 0x5fd   : > { %v3841_v17 = vmax.f32 %v3825_v52, 0.0  ;;  %v3719_v42 = vadd.f32 %v3718_v47, %v3669_v4 }
 0x5fe   : > { %v3721_v3 = vpop.f32.mrf.mxu0  ;;  %v3767_v60 = vpop.f32.mrf.mxu1 }
 0x5ff   : > { %3857 = vst [vmem:[#allocation2 + $0x9] sm:$0xff] %v3841_v17  ;;  %v3768_v46 = vadd.f32 %v3767_v60, %v3719_v42 }
 0x601   : > { %v3809_v45 = vmul.f32 %v9140_v43, %v3768_v46 }
 0x603   : > { %v3826_v14 = vadd.f32 %v9145_v15, %v3809_v45 }
 0x604   : > { %v3672_v57 = vpop.f32.mrf.mxu3 }
 0x605   : > { %v3842_v32 = vmax.f32 %v3826_v14, 0.0  ;;  %v3722_v7 = vadd.f32 %v3721_v3, %v3672_v57 }
 0x606   : > { %v3723_v13 = vpop.f32.mrf.mxu0  ;;  %v3770_v34 = vpop.f32.mrf.mxu1  ;;  %v3874_v52 = vld [vmem:[#allocation2 + $0x8] sm:$0xff] }
 0x607   : > { %v3906_v47 = vpack.c.bf16 %v3842_v32, %v3841_v17  ;;  %3858 = vst [vmem:[#allocation2 + $0x11] sm:$0xff] %v3842_v32  ;;  %v3771_v4 = vadd.f32 %v3770_v34, %v3722_v7  ;;  %v3905_v60 = vpack.c.bf16 %v3874_v52, %v8976_v28  ;;  %v7596_v7 = vld [vmem:[%s9929_s1 + $0x6a8] sm:$0xff] }
 0x608   : > { %4509 = vst [vmem:[#allocation2 + $0x9] sm:$0xff] %v8831_v56  ;;  %4663 = vmatpush.bf16.msrb.mxu2 %v7596_v7 }
 0x609   : > { %v3810_v42 = vmul.f32 %v9140_v43, %v3771_v4  ;;  %4129 = vmatmul.bf16.vlgmr.msra.gmra.mxu2 %v3905_v60  ;;  %4178 = vmatmul.bf16.vlgmr.msra.gmra.mxu3 %v3906_v47 }
 0x60b   : > { %v3827_v46 = vadd.f32 %v9145_v15, %v3810_v42 }
 0x60c   : > { %v3674_v53 = vpop.f32.mrf.mxu3 }
 0x60d   : > { %v3843_v45 = vmax.f32 %v3827_v46, 0.0  ;;  %v3724_v14 = vadd.f32 %v3723_v13, %v3674_v53 }
 0x60e   : > { %v3726_v57 = vpop.f32.mrf.mxu0  ;;  %v3772_v3 = vpop.f32.mrf.mxu1  ;;  %v3889_v36 = vld [vmem:[#allocation2 + $0x12] sm:$0xff] }
 0x60f   : > { %3859 = vst [vmem:[#allocation2 + $0x31] sm:$0xff] %v3843_v45  ;;  %v3773_v17 = vadd.f32 %v3772_v3, %v3724_v14  ;;  %v3907_v34 = vpack.c.bf16 %v8984_v24, %v3889_v36 }
 0x610   : > { %4510 = vst [vmem:[#allocation2 + $0x11] sm:$0xff] %v8836_v12 }
 0x611   : > { %v3811_v32 = vmul.f32 %v9140_v43, %v3773_v17  ;;  %4227 = vmatmul.bf16.vlgmr.msra.gmra.mxu0 %v3907_v34 }
 0x613   : > { %v3828_v52 = vadd.f32 %v9145_v15, %v3811_v32 }
 0x614   : > { %v3677_v13 = vpop.f32.mrf.mxu3 }
 0x615   : > { %v3727_v47 = vadd.f32 %v3726_v57, %v3677_v13  ;;  %v3844_v4 = vmax.f32 %v3828_v52, 0.0 }
 0x616   : > { %v3728_v60 = vpop.f32.mrf.mxu0  ;;  %v3775_v42 = vpop.f32.mrf.mxu1  ;;  %v3876_v46 = vld [vmem:[#allocation2 + $0x30] sm:$0xff] }
 0x617   : > { %v3776_v53 = vadd.f32 %v3775_v42, %v3727_v47  ;;  %v3908_v24 = vpack.c.bf16 %v3876_v46, %v8976_v28  ;;  %4511 = vst [vmem:[#allocation2 + $0x31] sm:$0xff] %v8849_v18  ;;  %v3909_v36 = vpack.c.bf16 %v3844_v4, %v3843_v45  ;;  %v7595_v47 = vld [vmem:[%s9929_s1 + $0x6a0] sm:$0xff] }
 0x618   : > { %3860 = vst [vmem:[#allocation2 + $0x39] sm:$0xff] %v3844_v4  ;;  %4664 = vmatpush.bf16.msrb.mxu2 %v7595_v47 }
 0x619   : > { %v3812_v14 = vmul.f32 %v9140_v43, %v3776_v53  ;;  %4134 = vmatmul.bf16.gmra.mxu2 %v3908_v24  ;;  %4183 = vmatmul.bf16.gmra.mxu3 %v3909_v36 }
 0x61b   : > { %v3829_v3 = vadd.f32 %v9145_v15, %v3812_v14 }
 0x61c   : > { %v3679_v17 = vpop.f32.mrf.mxu3 }
 0x61d   : > { %v3845_v34 = vmax.f32 %v3829_v3, 0.0  ;;  %v3729_v57 = vadd.f32 %v3728_v60, %v3679_v17 }
 0x61e   : > { %v3731_v7 = vpop.f32.mrf.mxu0  ;;  %v3777_v32 = vpop.f32.mrf.mxu1 }
 0x61f   : > { %3861 = vst [vmem:[#allocation2 + $0x59] sm:$0xff] %v3845_v34  ;;  %v3778_v52 = vadd.f32 %v3777_v32, %v3729_v57  ;;  %v3891_v13 = vld [vmem:[#allocation2 + $0x3a] sm:$0xff] }
 0x620   : > { %v3910_v45 = vpack.c.bf16 %v8999_v55, %v3891_v13  ;;  %4512 = vst [vmem:[#allocation2 + $0x39] sm:$0xff] %v8857_v16 }
 0x621   : > { %v3813_v4 = vmul.f32 %v9140_v43, %v3778_v52 }
 0x622   : > { %4232 = vmatmul.bf16.gmra.mxu0 %v3910_v45 }
 0x623   : > { %v3830_v42 = vadd.f32 %v9145_v15, %v3813_v4 }
 0x624   : > { %v3682_v60 = vpop.f32.mrf.mxu3 }
 0x625   : > { %v3732_v46 = vadd.f32 %v3731_v7, %v3682_v60  ;;  %v3846_v53 = vmax.f32 %v3830_v42, 0.0  ;;  %v7594_v60 = vld [vmem:[%s9929_s1 + $0x698] sm:$0xff] }
 0x626   : > { %v3733_v24 = vpop.f32.mrf.mxu0  ;;  %v3780_v36 = vpop.f32.mrf.mxu1  ;;  %v3878_v14 = vld [vmem:[#allocation2 + $0x58] sm:$0xff]  ;;  %4665 = vmatpush.bf16.msrb.mxu2 %v7594_v60 }
 0x627   : > { %v3781_v3 = vadd.f32 %v3780_v36, %v3732_v46  ;;  %v3911_v17 = vpack.c.bf16 %v3878_v14, %v8976_v28  ;;  %4513 = vst [vmem:[#allocation2 + $0x59] sm:$0xff] %v8864_v22  ;;  %v3912_v55 = vpack.c.bf16 %v3846_v53, %v3845_v34 }
 0x628   : > { %3862 = vst [vmem:[#allocation2 + $0x61] sm:$0xff] %v3846_v53 }
 0x629   : > { %v3814_v57 = vmul.f32 %v9140_v43, %v3781_v3  ;;  %4139 = vmatmul.bf16.gmra.mxu2 %v3911_v17  ;;  %4188 = vmatmul.bf16.gmra.mxu3 %v3912_v55 }
 0x62b   : > { %v3831_v32 = vadd.f32 %v9145_v15, %v3814_v57 }
 0x62c   : > { %v3684_v52 = vpop.f32.mrf.mxu3 }
 0x62d   : > { %v3847_v13 = vmax.f32 %v3831_v32, 0.0  ;;  %v3734_v7 = vadd.f32 %v3733_v24, %v3684_v52 }
 0x62e   : > { %v3736_v47 = vpop.f32.mrf.mxu0  ;;  %v3782_v45 = vpop.f32.mrf.mxu1 }
 0x62f   : > { %3863 = vst [vmem:[#allocation2 + $0x81] sm:$0xff] %v3847_v13  ;;  %v3783_v4 = vadd.f32 %v3782_v45, %v3734_v7  ;;  %v3893_v42 = vld [vmem:[#allocation2 + $0x62] sm:$0xff] }
 0x630   : > { %v3913_v34 = vpack.c.bf16 %v9012_v54, %v3893_v42  ;;  %4514 = vst [vmem:[#allocation2 + $0x61] sm:$0xff] %v8872_v23 }
 0x631   : > { %v3815_v46 = vmul.f32 %v9140_v43, %v3783_v4 }
 0x632   : > { %4237 = vmatmul.bf16.gmra.mxu0 %v3913_v34 }
 0x633   : > { %v3832_v53 = vadd.f32 %v9145_v15, %v3815_v46 }
 0x634   : > { %v3687_v24 = vpop.f32.mrf.mxu3 }
 0x635   : > { %v3737_v36 = vadd.f32 %v3736_v47, %v3687_v24  ;;  %v3848_v14 = vmax.f32 %v3832_v53, 0.0  ;;  %v7593_v53 = vld [vmem:[%s9929_s1 + $0x690] sm:$0xff] }
 0x636   : > { %v3738_v3 = vpop.f32.mrf.mxu0  ;;  %v3785_v17 = vpop.f32.mrf.mxu1  ;;  %v3880_v55 = vld [vmem:[#allocation2 + $0x80] sm:$0xff]  ;;  %4666 = vmatpush.bf16.msrb.mxu2 %v7593_v53 }
 0x637   : > { %v3786_v57 = vadd.f32 %v3785_v17, %v3737_v36  ;;  %v3914_v32 = vpack.c.bf16 %v3880_v55, %v8976_v28  ;;  %4515 = vst [vmem:[#allocation2 + $0x81] sm:$0xff] %v8879_v2  ;;  %v3915_v54 = vpack.c.bf16 %v3848_v14, %v3847_v13 }
 0x638   : > { %3864 = vst [vmem:[#allocation2 + $0x89] sm:$0xff] %v3848_v14 }
 0x639   : > { %v3816_v52 = vmul.f32 %v9140_v43, %v3786_v57  ;;  %4144 = vmatmul.bf16.gmra.mxu2 %v3914_v32  ;;  %4193 = vmatmul.bf16.gmra.mxu3 %v3915_v54 }
 0x63b   : > { %v3833_v7 = vadd.f32 %v9145_v15, %v3816_v52 }
 0x63c   : > { %v3689_v45 = vpop.f32.mrf.mxu3 }
 0x63d   : > { %v3849_v4 = vmax.f32 %v3833_v7, 0.0  ;;  %v3739_v47 = vadd.f32 %v3738_v3, %v3689_v45 }
 0x63e   : > { %v3741_v42 = vpop.f32.mrf.mxu0  ;;  %v3787_v60 = vpop.f32.mrf.mxu1 }
 0x63f   : > { %3865 = vst [vmem:[#allocation2 + $0xa9] sm:$0xff] %v3849_v4  ;;  %v3788_v34 = vadd.f32 %v3787_v60, %v3739_v47  ;;  %v3895_v46 = vld [vmem:[#allocation2 + $0x8a] sm:$0xff] }
 0x640   : > { %v3916_v13 = vpack.c.bf16 %v9027_v40, %v3895_v46  ;;  %4516 = vst [vmem:[#allocation2 + $0x89] sm:$0xff] %v8887_v9 }
 0x641   : > { %v3817_v24 = vmul.f32 %v9140_v43, %v3788_v34 }
 0x642   : > { %4242 = vmatmul.bf16.gmra.mxu0 %v3916_v13 }
 0x643   : > { %v3834_v36 = vadd.f32 %v9145_v15, %v3817_v24  ;;  %v7592_v24 = vld [vmem:[%s9929_s1 + $0x688] sm:$0xff] }
 0x644   : > { %v3692_v14 = vpop.f32.mrf.mxu3  ;;  %4667 = vmatpush.bf16.msrb.mxu2 %v7592_v24 }
 0x645   : > { %v3742_v3 = vadd.f32 %v3741_v42, %v3692_v14  ;;  %v3850_v17 = vmax.f32 %v3834_v36, 0.0 }
 0x646   : > { %v3743_v55 = vpop.f32.mrf.mxu0  ;;  %v3790_v57 = vpop.f32.mrf.mxu1  ;;  %v3882_v32 = vld [vmem:[#allocation2 + $0xa8] sm:$0xff] }
 0x647   : > { %v3791_v54 = vadd.f32 %v3790_v57, %v3742_v3  ;;  %v3917_v52 = vpack.c.bf16 %v3882_v32, %v8976_v28  ;;  %4517 = vst [vmem:[#allocation2 + $0xa9] sm:$0xff] %v8894_v21  ;;  %v3918_v40 = vpack.c.bf16 %v3850_v17, %v3849_v4 }
 0x648   : > { %3866 = vst [vmem:[#allocation2 + $0xb1] sm:$0xff] %v3850_v17 }
 0x649   : > { %v3818_v7 = vmul.f32 %v9140_v43, %v3791_v54  ;;  %4149 = vmatmul.bf16.gmra.mxu2 %v3917_v52  ;;  %4198 = vmatmul.bf16.gmra.mxu3 %v3918_v40 }
 0x64b   : > { %v3835_v45 = vadd.f32 %v9145_v15, %v3818_v7 }
 0x64c   : > { %v3694_v47 = vpop.f32.mrf.mxu3 }
 0x64d   : > { %v3851_v60 = vmax.f32 %v3835_v45, 0.0  ;;  %v3744_v42 = vadd.f32 %v3743_v55, %v3694_v47  ;;  %v7591_v45 = vld [vmem:[%s9929_s1 + $0x680] sm:$0xff] }
 0x64e   : > { %v3746_v34 = vpop.f32.mrf.mxu0  ;;  %v3792_v46 = vpop.f32.mrf.mxu1  ;;  %4668 = vmatpush.bf16.msrb.mxu2 %v7591_v45  ;;  %v7588_v45 = vld [vmem:[%s9929_s1 + $0x668] sm:$0xff] }
 0x64f   : > { %3867 = vst [vmem:[#allocation2 + $0xd1] sm:$0xff] %v3851_v60  ;;  %v3793_v53 = vadd.f32 %v3792_v46, %v3744_v42  ;;  %v3897_v13 = vld [vmem:[#allocation2 + $0xb2] sm:$0xff] }
 0x650   : > { %v3919_v4 = vpack.c.bf16 %v9042_v49, %v3897_v13  ;;  %4518 = vst [vmem:[#allocation2 + $0xb1] sm:$0xff] %v8902_v33 }
 0x651   : > { %v3819_v36 = vmul.f32 %v9140_v43, %v3793_v53 }
 0x652   : > { %4247 = vmatmul.bf16.gmra.mxu0 %v3919_v4 }
 0x653   : > { %v3836_v14 = vadd.f32 %v9145_v15, %v3819_v36 }
 0x654   : > { %v3697_v3 = vpop.f32.mrf.mxu3 }
 0x655   : > { %v3747_v17 = vadd.f32 %v3746_v34, %v3697_v3  ;;  %v3852_v55 = vmax.f32 %v3836_v14, 0.0  ;;  %v7590_v14 = vld [vmem:[%s9929_s1 + $0x678] sm:$0xff] }
 0x656   : > { %v3795_v57 = vpop.f32.mrf.mxu1  ;;  %v3884_v32 = vld [vmem:[#allocation2 + $0xd0] sm:$0xff]  ;;  %v3748_v49 = vpop.f32.mrf.mxu0  ;;  %4392 = vmatpush.bf16.msra.mxu1 %v7590_v14 }
 0x657   : > { %v3796_v54 = vadd.f32 %v3795_v57, %v3747_v17  ;;  %v3920_v52 = vpack.c.bf16 %v3884_v32, %v8976_v28  ;;  %4519 = vst [vmem:[#allocation2 + $0xd1] sm:$0xff] %v8909_v61  ;;  %v3921_v40 = vpack.c.bf16 %v3852_v55, %v3851_v60 }
 0x658   : > { %3868 = vst [vmem:[#allocation2 + $0xd9] sm:$0xff] %v3852_v55  ;;  %v7589_v55 = vld [vmem:[%s9929_s1 + $0x670] sm:$0xff] }
 0x659   : > { %v3820_v7 = vmul.f32 %v9140_v43, %v3796_v54  ;;  %4154 = vmatmul.bf16.gmra.mxu2 %v3920_v52  ;;  %4203 = vmatmul.bf16.gmra.mxu3 %v3921_v40 }
 0x65a   : > { %4393 = vmatpush.bf16.msra.mxu1 %v7589_v55 }
 0x65b   : > { %v3837_v47 = vadd.f32 %v9145_v15, %v3820_v7 }
 0x65c   : > { %v3699_v42 = vpop.f32.mrf.mxu3 }
 0x65d   : > { %v3853_v34 = vmax.f32 %v3837_v47, 0.0  ;;  %v3749_v46 = vadd.f32 %v3748_v49, %v3699_v42 }
 0x65e   : > { %v3797_v53 = vpop.f32.mrf.mxu1  ;;  %v3751_v36 = vpop.f32.mrf.mxu0  ;;  %4394 = vmatpush.bf16.msra.mxu1 %v7588_v45  ;;  %v4557_v45 = vld [vmem:[#allocation2 + $0xa] sm:$0xff] }
 0x65f   : > { %3869 = vst [vmem:[#allocation2 + $0xf9] sm:$0xff] %v3853_v34  ;;  %v3798_v13 = vadd.f32 %v3797_v53, %v3749_v46  ;;  %v3899_v60 = vld [vmem:[#allocation2 + $0xda] sm:$0xff] }
 0x660   : > { %v3922_v24 = vpack.c.bf16 %v9055_v10, %v3899_v60  ;;  %4520 = vst [vmem:[#allocation2 + $0xd9] sm:$0xff] %v8917_v8 }
 0x661   : > { %v3821_v4 = vmul.f32 %v9140_v43, %v3798_v13 }
 0x662   : > { %4252 = vmatmul.bf16.gmra.mxu0 %v3922_v24 }
 0x663   : > { %v3838_v3 = vadd.f32 %v9145_v15, %v3821_v4 }
 0x664   : > { %v3702_v17 = vpop.f32.mrf.mxu3 }
 0x665   : > { %v3752_v57 = vadd.f32 %v3751_v36, %v3702_v17  ;;  %v3854_v10 = vmax.f32 %v3838_v3, 0.0  ;;  %v7586_v3 = vld [vmem:[%s9929_s1 + $0x658] sm:$0xff] }
 0x666   : > { %v3800_v32 = vpop.f32.mrf.mxu1  ;;  %v3886_v54 = vld [vmem:[#allocation2 + $0xf8] sm:$0xff]  ;;  %v3753_v42 = vpop.f32.mrf.mxu0 }
 0x667   : > { %v3801_v52 = vadd.f32 %v3800_v32, %v3752_v57  ;;  %v3923_v40 = vpack.c.bf16 %v3886_v54, %v8976_v28  ;;  %4521 = vst [vmem:[#allocation2 + $0xf9] sm:$0xff] %v8924_v51  ;;  %v3924_v49 = vpack.c.bf16 %v3854_v10, %v3853_v34  ;;  %v7587_v34 = vld [vmem:[%s9929_s1 + $0x660] sm:$0xff] }
 0x668   : > { %3870 = vst [vmem:[#allocation2 + $0x101] sm:$0xff] %v3854_v10  ;;  %4395 = vmatpush.bf16.msra.mxu1 %v7587_v34  ;;  %v7585_v10 = vld [vmem:[%s9929_s1 + $0x650] sm:$0xff]  ;;  %v7583_v54 = vld [vmem:[%s9929_s1 + $0x640] sm:$0xff]  ;;  %v4528_v34 = vld [vmem:[#allocation2 + $0x38] sm:$0xff] }
 0x669   : > { %v3822_v7 = vmul.f32 %v9140_v43, %v3801_v52  ;;  %4159 = vmatmul.bf16.gmra.mxu2 %v3923_v40  ;;  %4208 = vmatmul.bf16.gmra.mxu3 %v3924_v49  ;;  %v7606_v40 = vld [vmem:[%s9929_s1 + $0x6f8] sm:$0xff] }
 0x66a   : > { %4834 = vmatpush.bf16.msrb.mxu3 %v7606_v40 }
 0x66b   : > { %v3839_v47 = vadd.f32 %v9145_v15, %v3822_v7  ;;  %v4525_v7 = vld [vmem:[#allocation2 + $0x8] sm:$0xff] }
 0x66c   : > { %v3704_v46 = vpop.f32.mrf.mxu3  ;;  %4396 = vmatpush.bf16.msra.mxu1 %v7586_v3 }
 0x66d   : > { %v3855_v53 = vmax.f32 %v3839_v47, 0.0  ;;  %v3754_v13 = vadd.f32 %v3753_v42, %v3704_v46  ;;  %v4558_v47 = vld [vmem:[#allocation2 + $0x12] sm:$0xff]  ;;  %v4541_v42 = vadd.f32 %v4525_v7, %v8831_v56 }
 0x66e   : > { %v3802_v60 = vpop.f32.mrf.mxu1  ;;  %v9268_v56 = vld [vmem:[%s9930_s2 + $0x14] ss:$0 sm:$0xff] }
 0x66f   : > { %3871 = vst [vmem:[#allocation2 + $0x121] sm:$0xff] %v3855_v53  ;;  %v3803_v24 = vadd.f32 %v3802_v60, %v3754_v13  ;;  %v3901_v4 = vld [vmem:[#allocation2 + $0x102] sm:$0xff] }
 0x670   : > { %v3925_v36 = vpack.c.bf16 %v9082_v41, %v3901_v4  ;;  %4522 = vst [vmem:[#allocation2 + $0x101] sm:$0xff] %v8932_v5  ;;  %4397 = vmatpush.bf16.msra.mxu1 %v7585_v10 }
 0x671   : > { %v3823_v14 = vmul.f32 %v9140_v43, %v3803_v24  ;;  %v7584_v43 = vld [vmem:[%s9929_s1 + $0x648] sm:$0xff] }
 0x672   : > { %4257 = vmatmul.bf16.gmra.mxu0 %v3925_v36  ;;  %v4544_v36 = vadd.f32 %v4528_v34, %v8857_v16  ;;  %v9275_v16 = vld [vmem:[%s9930_s2 + $0x15] ss:$0 sm:$0xff] }
 0x673   : > { %v3840_v17 = vadd.f32 %v9145_v15, %v3823_v14  ;;  %v4526_v15 = vld [vmem:[#allocation2 + $0x10] sm:$0xff] }
 0x674   : > { %4398 = vmatpush.bf16.msra.mxu1 %v7584_v43  ;;  %v4527_v14 = vld [vmem:[#allocation2 + $0x30] sm:$0xff] }
 0x675   : > { %v3856_v55 = vmax.f32 %v3840_v17, 0.0  ;;  %v4559_v17 = vld [vmem:[#allocation2 + $0x32] sm:$0xff] }
 0x676   : > { %v3888_v57 = vld [vmem:[#allocation2 + $0x120] sm:$0xff] }
 0x677   : > { %v3926_v41 = vpack.c.bf16 %v3888_v57, %v8976_v28  ;;  %4523 = vst [vmem:[#allocation2 + $0x121] sm:$0xff] %v8939_v25  ;;  %v3927_v32 = vpack.c.bf16 %v3856_v55, %v3855_v53  ;;  %v4542_v28 = vadd.f32 %v4526_v15, %v8836_v12  ;;  %v4573_v53 = vadd.f32 %v4557_v45, %v4541_v42  ;;  %v4530_v42 = vld [vmem:[#allocation2 + $0x60] sm:$0xff] }
 0x678   : > { %3872 = vst [vmem:[#allocation2 + $0x129] sm:$0xff] %v3856_v55  ;;  %4399 = vmatpush.bf16.msra.mxu1 %v7583_v54  ;;  %v4560_v55 = vld [vmem:[#allocation2 + $0x3a] sm:$0xff]  ;;  %v4543_v57 = vadd.f32 %v4527_v14, %v8849_v18  ;;  %v4562_v14 = vld [vmem:[#allocation2 + $0x62] sm:$0xff] }
 0x679   : > { %4164 = vmatmul.bf16.gmra.mxu2 %v3926_v41  ;;  %4213 = vmatmul.bf16.gmra.mxu3 %v3927_v32  ;;  %v4574_v46 = vadd.f32 %v4558_v47, %v4542_v28  ;;  %v4576_v10 = vadd.f32 %v4560_v55, %v4544_v36  ;;  %v4561_v36 = vld [vmem:[#allocation2 + $0x5a] sm:$0xff] }
 0x67a   : > { %v4575_v54 = vadd.f32 %v4559_v17, %v4543_v57 }
 0x67b   : > { %v4589_v13 = vpack.c.bf16 %v4574_v46, %v4573_v53 }
 0x67c   : > { %v4590_v40 = vpack.c.bf16 %v4576_v10, %v4575_v54 }
 0x67f   : > { %v3903_v52 = vld [vmem:[#allocation2 + $0x12a] sm:$0xff] }
 0x680   : > { %v3928_v49 = vpack.c.bf16 %v9117_v63, %v3903_v52  ;;  %4524 = vst [vmem:[#allocation2 + $0x129] sm:$0xff] %v8947_v38  ;;  %v7605_v63 = vld [vmem:[%s9929_s1 + $0x6f0] sm:$0xff] }
 0x681   : > { %4835 = vmatpush.bf16.msrb.mxu3 %v7605_v63  ;;  %v4529_v63 = vld [vmem:[#allocation2 + $0x58] sm:$0xff] }
 0x682   : > { %4262 = vmatmul.bf16.gmra.mxu0 %v3928_v49 }
 0x689   : > { %4669 = vmatmul.bf16.vlgmr.msrb.gmra.mxu2 %v4589_v13  ;;  %v7604_v13 = vld [vmem:[%s9929_s1 + $0x6e8] sm:$0xff] }
 0x68a   : > { %4836 = vmatpush.bf16.msrb.mxu3 %v7604_v13  ;;  %v4531_v13 = vld [vmem:[#allocation2 + $0x80] sm:$0xff] }
 0x68c   : > { %v4130_v12 = vpop.f32.mrf.mxu2  ;;  %v4179_v60 = vpop.f32.mrf.mxu3 }
 0x68d   : > { %v4180_v24 = vadd.f32 %v4179_v60, %v4130_v12 }
 0x68e   : > { %v4228_v4 = vpop.f32.mrf.mxu0 }
 0x68f   : > { %v4229_v3 = vadd.f32 %v4228_v4, %v4180_v24  ;;  %v4546_v24 = vadd.f32 %v4530_v42, %v8872_v23 }
 0x691   : > { %v4271_v43 = vmul.f32 %v9268_v56, %v4229_v3  ;;  %v4545_v3 = vadd.f32 %v4529_v63, %v8864_v22  ;;  %v4578_v17 = vadd.f32 %v4562_v14, %v4546_v24  ;;  %v4532_v22 = vld [vmem:[#allocation2 + $0x88] sm:$0xff]  ;;  %v4547_v24 = vadd.f32 %v4531_v13, %v8879_v2  ;;  %v4534_v2 = vld [vmem:[#allocation2 + $0xb0] sm:$0xff] }
 0x693   : > { %v4288_v49 = vadd.f32 %v9275_v16, %v4271_v43 }
 0x694   : > { %v4132_v41 = vpop.f32.mrf.mxu2  ;;  %v4181_v32 = vpop.f32.mrf.mxu3 }
 0x695   : > { %v4182_v15 = vadd.f32 %v4181_v32, %v4132_v41  ;;  %v4304_v46 = vmax.f32 %v4288_v49, 0.0  ;;  %v4577_v41 = vadd.f32 %v4561_v36, %v4545_v3 }
 0x696   : > { %v4230_v52 = vpop.f32.mrf.mxu0 }
 0x697   : > { %v4231_v28 = vadd.f32 %v4230_v52, %v4182_v15  ;;  %v4591_v15 = vpack.c.bf16 %v4578_v17, %v4577_v41 }
 0x699   : > { %v4272_v7 = vmul.f32 %v9268_v56, %v4231_v28  ;;  %4674 = vmatmul.bf16.gmra.mxu2 %v4590_v40 }
 0x69b   : > { %v4289_v18 = vadd.f32 %v9275_v16, %v4272_v7  ;;  %v7603_v7 = vld [vmem:[%s9929_s1 + $0x6e0] sm:$0xff] }
 0x69c   : > { %v4135_v45 = vpop.f32.mrf.mxu2  ;;  %v4184_v47 = vpop.f32.mrf.mxu3  ;;  %4837 = vmatpush.bf16.msrb.mxu3 %v7603_v7 }
 0x69d   : > { %v4305_v53 = vmax.f32 %v4289_v18, 0.0  ;;  %v4185_v12 = vadd.f32 %v4184_v47, %v4135_v45 }
 0x69f   : > { %v4320_v60 = vpack.c.bf16 %v4305_v53, %v4304_v46  ;;  %v4233_v34 = vpop.f32.mrf.mxu0  ;;  %v4548_v46 = vadd.f32 %v4532_v22, %v8887_v9  ;;  %v4550_v22 = vadd.f32 %v4534_v2, %v8902_v33 }
 0x6a0   : > { %v4234_v4 = vadd.f32 %v4233_v34, %v4185_v12  ;;  %v4564_v34 = vld [vmem:[#allocation2 + $0x8a] sm:$0xff] }
 0x6a1   : > { %4400 = vmatmul.bf16.vlgmr.msra.gmra.mxu1 %v4320_v60  ;;  %v4563_v60 = vld [vmem:[#allocation2 + $0x82] sm:$0xff]  ;;  %v4580_v63 = vadd.f32 %v4564_v34, %v4548_v46  ;;  %v4566_v46 = vld [vmem:[#allocation2 + $0xb2] sm:$0xff] }
 0x6a2   : > { %v4273_v32 = vmul.f32 %v9268_v56, %v4234_v4  ;;  %v4579_v3 = vadd.f32 %v4563_v60, %v4547_v24  ;;  %v4582_v13 = vadd.f32 %v4566_v46, %v4550_v22  ;;  %v7660_v24 = vld [vmem:[%s9929_s1 + $0x68] sm:$0xff]  ;;  %v5574_v22 = vadd.f32 %v8212_v39, %v8208_v29 }
 0x6a3   : > { %v7656_v29 = vld [vmem:[%s9929_s1 + $0x48] sm:$0xff] }
 0x6a4   : > { %v4137_v55 = vpop.f32.mrf.mxu2  ;;  %v4186_v57 = vpop.f32.mrf.mxu3  ;;  %v4290_v23 = vadd.f32 %v9275_v16, %v4273_v32  ;;  %v5575_v39 = vrot.slane %v5574_v22, 4 }
 0x6a5   : > { %v4187_v10 = vadd.f32 %v4186_v57, %v4137_v55  ;;  %v4592_v57 = vpack.c.bf16 %v4580_v63, %v4579_v3 }
 0x6a6   : > { %v4306_v18 = vmax.f32 %v4290_v23, 0.0  ;;  %v7662_v23 = vld [vmem:[%s9929_s1 + $0x78] sm:$0xff] }
 0x6a7   : > { %v4235_v43 = vpop.f32.mrf.mxu0  ;;  %5713 = vmatpush.bf16.msra.mxu2 %v7662_v23 }
 0x6a8   : > { %v4236_v54 = vadd.f32 %v4235_v43, %v4187_v10 }
 0x6a9   : > { %4679 = vmatmul.bf16.gmra.mxu2 %v4591_v15 }
 0x6aa   : > { %v4274_v52 = vmul.f32 %v9268_v56, %v4236_v54  ;;  %v7602_v54 = vld [vmem:[%s9929_s1 + $0x6d8] sm:$0xff] }
 0x6ab   : > { %4838 = vmatpush.bf16.msrb.mxu3 %v7602_v54 }
 0x6ac   : > { %v4291_v28 = vadd.f32 %v9275_v16, %v4274_v52  ;;  %v4140_v40 = vpop.f32.mrf.mxu2  ;;  %v4189_v49 = vpop.f32.mrf.mxu3 }
 0x6ad   : > { %v4190_v45 = vadd.f32 %v4189_v49, %v4140_v40 }
 0x6ae   : > { %v4307_v47 = vmax.f32 %v4291_v28, 0.0 }
 0x6af   : > { %v4238_v42 = vpop.f32.mrf.mxu0 }
 0x6b0   : > { %v4321_v53 = vpack.c.bf16 %v4307_v47, %v4306_v18  ;;  %v4239_v12 = vadd.f32 %v4238_v42, %v4190_v45  ;;  %v4533_v18 = vld [vmem:[#allocation2 + $0xa8] sm:$0xff]  ;;  %v7661_v45 = vld [vmem:[%s9929_s1 + $0x70] sm:$0xff] }
 0x6b1   : > { %v4565_v42 = vld [vmem:[#allocation2 + $0xaa] sm:$0xff]  ;;  %5714 = vmatpush.bf16.msra.mxu2 %v7661_v45 }
 0x6b2   : > { %4405 = vmatmul.bf16.gmra.mxu1 %v4321_v53  ;;  %v4275_v17 = vmul.f32 %v9268_v56, %v4239_v12  ;;  %v4549_v53 = vadd.f32 %v4533_v18, %v8894_v21  ;;  %v7659_v21 = vld [vmem:[%s9929_s1 + $0x60] sm:$0xff]  ;;  %v4567_v18 = vld [vmem:[#allocation2 + $0xd2] sm:$0xff] }
 0x6b4   : > { %v4142_v4 = vpop.f32.mrf.mxu2  ;;  %v4191_v36 = vpop.f32.mrf.mxu3  ;;  %v4292_v9 = vadd.f32 %v9275_v16, %v4275_v17  ;;  %v4581_v33 = vadd.f32 %v4565_v42, %v4549_v53 }
 0x6b5   : > { %v4192_v14 = vadd.f32 %v4191_v36, %v4142_v4  ;;  %5715 = vmatpush.bf16.msra.mxu2 %v7660_v24 }
 0x6b6   : > { %v4308_v52 = vmax.f32 %v4292_v9, 0.0  ;;  %v4593_v36 = vpack.c.bf16 %v4582_v13, %v4581_v33  ;;  %v5581_v13 = vadd.f32 %v8228_v44, %v8224_v58  ;;  %v5595_v58 = vadd.f32 %v8266_v26, %v8263_v11 }
 0x6b7   : > { %v4240_v55 = vpop.f32.mrf.mxu0 }
 0x6b8   : > { %v4241_v10 = vadd.f32 %v4240_v55, %v4192_v14  ;;  %v5553_v55 = vadd.f32 %v8167_v62, %v8163_v59  ;;  %v5567_v59 = vadd.f32 %v8197_v50, %v8193_v27  ;;  %v4568_v27 = vld [vmem:[#allocation2 + $0xda] sm:$0xff] }
 0x6b9   : > { %4684 = vmatmul.bf16.gmra.mxu2 %v4592_v57  ;;  %v5560_v57 = vadd.f32 %v8182_v35, %v8178_v31 }
 0x6ba   : > { %v4276_v41 = vmul.f32 %v9268_v56, %v4241_v10  ;;  %5716 = vmatpush.bf16.msra.mxu2 %v7659_v21  ;;  %v5554_v35 = vrot.slane %v5553_v55, 4  ;;  %v5568_v50 = vrot.slane %v5567_v59, 4  ;;  %v7655_v21 = vld [vmem:[%s9929_s1 + $0x40] sm:$0xff] }
 0x6bc   : > { %v4293_v32 = vadd.f32 %v9275_v16, %v4276_v41  ;;  %v4145_v43 = vpop.f32.mrf.mxu2  ;;  %v4194_v15 = vpop.f32.mrf.mxu3  ;;  %v5569_v33 = vadd.f32 %v5568_v50, %v5567_v59 }
 0x6bd   : > { %v4195_v28 = vadd.f32 %v4194_v15, %v4145_v43  ;;  %v7601_v43 = vld [vmem:[%s9929_s1 + $0x6d0] sm:$0xff]  ;;  %v7658_v15 = vld [vmem:[%s9929_s1 + $0x58] sm:$0xff] }
 0x6be   : > { %v4309_v40 = vmax.f32 %v4293_v32, 0.0  ;;  %v4536_v32 = vld [vmem:[#allocation2 + $0xd8] sm:$0xff]  ;;  %4839 = vmatpush.bf16.msrb.mxu3 %v7601_v43  ;;  %5717 = vmatpush.bf16.msra.mxu2 %v7658_v15  ;;  %v4538_v43 = vld [vmem:[#allocation2 + $0x100] sm:$0xff]  ;;  %v5602_v15 = vadd.f32 %v8288_v20, %v8283_v19 }
 0x6bf   : > { %v4243_v49 = vpop.f32.mrf.mxu0  ;;  %v4552_v31 = vadd.f32 %v4536_v32, %v8917_v8 }
 0x6c0   : > { %v4322_v7 = vpack.c.bf16 %v4309_v40, %v4308_v52  ;;  %v4244_v47 = vadd.f32 %v4243_v49, %v4195_v28  ;;  %v5561_v52 = vrot.slane %v5560_v57, 4  ;;  %v4535_v40 = vld [vmem:[#allocation2 + $0xd0] sm:$0xff] }
 0x6c1   : > { %v7657_v49 = vld [vmem:[%s9929_s1 + $0x50] sm:$0xff]  ;;  %v4551_v8 = vadd.f32 %v4535_v40, %v8909_v61  ;;  %v4584_v45 = vadd.f32 %v4568_v27, %v4552_v31  ;;  %v5588_v61 = vadd.f32 %v8244_v30, %v8241_v1  ;;  %v7638_v30 = vld [vmem:[%s9929_s1 + $0x7f8] sm:$0xff]  ;;  %v5603_v27 = vrot.slane %v5602_v15, 4 }
 0x6c2   : > { %4410 = vmatmul.bf16.gmra.mxu1 %v4322_v7  ;;  %v4277_v63 = vmul.f32 %v9268_v56, %v4244_v47  ;;  %5718 = vmatpush.bf16.msra.mxu2 %v7657_v49  ;;  %v5555_v47 = vadd.f32 %v5554_v35, %v5553_v55  ;;  %v5562_v42 = vadd.f32 %v5561_v52, %v5560_v57  ;;  %v5570_v57 = vrot.slane %v5569_v33, 2  ;;  %v7637_v35 = vld [vmem:[%s9929_s1 + $0x7f0] sm:$0xff] }
 0x6c3   : > { %v5589_v55 = vrot.slane %v5588_v61, 4  ;;  %v4554_v49 = vadd.f32 %v4538_v43, %v8932_v5 }
 0x6c4   : > { %v4147_v12 = vpop.f32.mrf.mxu2  ;;  %v4196_v60 = vpop.f32.mrf.mxu3  ;;  %v4294_v3 = vadd.f32 %v9275_v16, %v4277_v63 }
 0x6c5   : > { %v4197_v34 = vadd.f32 %v4196_v60, %v4147_v12  ;;  %v4583_v60 = vadd.f32 %v4567_v18, %v4551_v8  ;;  %v5590_v52 = vadd.f32 %v5589_v55, %v5588_v61  ;;  %v4537_v18 = vld [vmem:[#allocation2 + $0xf8] sm:$0xff] }
 0x6c6   : > { %v4310_v2 = vmax.f32 %v4294_v3, 0.0  ;;  %5719 = vmatpush.bf16.msra.mxu2 %v7656_v29  ;;  %v5576_v3 = vadd.f32 %v5575_v39, %v5574_v22  ;;  %v4553_v5 = vadd.f32 %v4537_v18, %v8924_v51 }
 0x6c7   : > { %v4245_v4 = vpop.f32.mrf.mxu0  ;;  %v4594_v63 = vpack.c.bf16 %v4584_v45, %v4583_v60  ;;  %v5591_v60 = vrot.slane %v5590_v52, 2 }
 0x6c8   : > { %v4246_v14 = vadd.f32 %v4245_v4, %v4197_v34  ;;  %v5556_v4 = vrot.slane %v5555_v47, 2 }
 0x6c9   : > { %4689 = vmatmul.bf16.gmra.mxu2 %v4593_v36  ;;  %v5563_v36 = vrot.slane %v5562_v42, 2 }
 0x6ca   : > { %v4278_v17 = vmul.f32 %v9268_v56, %v4246_v14  ;;  %v5582_v14 = vrot.slane %v5581_v13, 4  ;;  %5720 = vmatpush.bf16.msra.mxu2 %v7655_v21  ;;  %v5557_v11 = vadd.f32 %v5556_v4, %v5555_v47  ;;  %v4569_v47 = vld [vmem:[#allocation2 + $0xfa] sm:$0xff] }
 0x6cb   : > { %v5564_v26 = vadd.f32 %v5563_v36, %v5562_v42  ;;  %v4570_v42 = vld [vmem:[#allocation2 + $0x102] sm:$0xff]  ;;  %v4585_v4 = vadd.f32 %v4569_v47, %v4553_v5 }
 0x6cc   : > { %v4295_v10 = vadd.f32 %v9275_v16, %v4278_v17  ;;  %v4150_v9 = vpop.f32.mrf.mxu2  ;;  %v4199_v41 = vpop.f32.mrf.mxu3  ;;  %v5558_v19 = vrot.slane %v5557_v11, 1 }
 0x6cd   : > { %v4200_v54 = vadd.f32 %v4199_v41, %v4150_v9  ;;  %v5565_v20 = vrot.slane %v5564_v26, 1 }
 0x6ce   : > { %v4311_v23 = vmax.f32 %v4295_v10, 0.0  ;;  %v5596_v10 = vrot.slane %v5595_v58, 4  ;;  %5991 = vmatpush.bf16.msrb.mxu2 %v7638_v30 }
 0x6cf   : > { %v4248_v62 = vpop.f32.mrf.mxu0  ;;  %v5566_v29 = vadd.f32 %v5565_v20, %v5564_v26  ;;  %v7633_v20 = vld [vmem:[%s9929_s1 + $0x7d0] sm:$0xff] }
 0x6d0   : > { %v4323_v28 = vpack.c.bf16 %v4311_v23, %v4310_v2  ;;  %v4249_v7 = vadd.f32 %v4248_v62, %v4200_v54  ;;  %v5583_v2 = vadd.f32 %v5582_v14, %v5581_v13  ;;  %v7600_v54 = vld [vmem:[%s9929_s1 + $0x6c8] sm:$0xff]  ;;  %v5577_v23 = vrot.slane %v5576_v3, 2 }
 0x6d1   : > { %4840 = vmatpush.bf16.msrb.mxu3 %v7600_v54  ;;  %v5597_v22 = vadd.f32 %v5596_v10, %v5595_v58  ;;  %v4586_v13 = vadd.f32 %v4570_v42, %v4554_v49  ;;  %v7599_v42 = vld [vmem:[%s9929_s1 + $0x6c0] sm:$0xff] }
 0x6d2   : > { %4415 = vmatmul.bf16.gmra.mxu1 %v4323_v28  ;;  %v4279_v34 = vmul.f32 %v9268_v56, %v4249_v7  ;;  %v5571_v28 = vadd.f32 %v5570_v57, %v5569_v33  ;;  %5992 = vmatpush.bf16.msrb.mxu2 %v7637_v35  ;;  %v5584_v50 = vrot.slane %v5583_v2, 2  ;;  %v5578_v8 = vadd.f32 %v5577_v23, %v5576_v3 }
 0x6d3   : > { %v5598_v39 = vrot.slane %v5597_v22, 2  ;;  %v5604_v33 = vadd.f32 %v5603_v27, %v5602_v15  ;;  %v4595_v21 = vpack.c.bf16 %v4586_v13, %v4585_v4 }
 0x6d4   : > { %v4152_v46 = vpop.f32.mrf.mxu2  ;;  %v4201_v53 = vpop.f32.mrf.mxu3  ;;  %v4296_v17 = vadd.f32 %v9275_v16, %v4279_v34  ;;  %v5579_v36 = vrot.slane %v5578_v8, 1 }
 0x6d5   : > { %v4202_v12 = vadd.f32 %v4201_v53, %v4152_v46  ;;  %v7636_v46 = vld [vmem:[%s9929_s1 + $0x7e8] sm:$0xff]  ;;  %v5572_v53 = vrot.slane %v5571_v28, 1  ;;  %v5599_v55 = vadd.f32 %v5598_v39, %v5597_v22  ;;  %v5605_v57 = vrot.slane %v5604_v33, 2  ;;  %4841 = vmatpush.bf16.msrb.mxu3 %v7599_v42 }
 0x6d6   : > { %v4312_v59 = vmax.f32 %v4296_v17, 0.0  ;;  %5993 = vmatpush.bf16.msrb.mxu2 %v7636_v46  ;;  %v5592_v17 = vadd.f32 %v5591_v60, %v5590_v52  ;;  %v5580_v26 = vadd.f32 %v5579_v36, %v5578_v8  ;;  %v4572_v60 = vld [vmem:[#allocation2 + $0x12a] sm:$0xff] }
 0x6d7   : > { %v4250_v24 = vpop.f32.mrf.mxu0  ;;  %v5573_v51 = vadd.f32 %v5572_v53, %v5571_v28  ;;  %v5606_v35 = vadd.f32 %v5605_v57, %v5604_v33 }
 0x6d8   : > { %v4251_v44 = vadd.f32 %v4250_v24, %v4202_v12  ;;  %v5559_v12 = vadd.f32 %v5558_v19, %v5557_v11  ;;  %v5585_v24 = vadd.f32 %v5584_v50, %v5583_v2  ;;  %v5593_v15 = vrot.slane %v5592_v17, 1 }
 0x6d9   : > { %4694 = vmatmul.bf16.gmra.mxu2 %v4594_v63  ;;  %v5612_v28 = vpack.c.bf16 %v5580_v26, %v5580_v26  ;;  %v5607_v53 = vrot.slane %v5606_v35, 1 }
 0x6da   : > { %v4280_v1 = vmul.f32 %v9268_v56, %v4251_v44  ;;  %v7635_v44 = vld [vmem:[%s9929_s1 + $0x7e0] sm:$0xff]  ;;  %v5609_v3 = vpack.c.bf16 %v5559_v12, %v5559_v12  ;;  %v5586_v11 = vrot.slane %v5585_v24, 1  ;;  %v5594_v27 = vadd.f32 %v5593_v15, %v5592_v17 }
 0x6db   : > { %5994 = vmatpush.bf16.msrb.mxu2 %v7635_v44  ;;  %v5644_v5 = vunpack.c.l.b16 %v5612_v28  ;;  %v4571_v12 = vld [vmem:[#allocation2 + $0x122] sm:$0xff] }
 0x6dc   : > { %v4297_v9 = vadd.f32 %v9275_v16, %v4280_v1  ;;  %v4155_v41 = vpop.f32.mrf.mxu2  ;;  %v4204_v32 = vpop.f32.mrf.mxu3  ;;  %v5610_v1 = vpack.c.bf16 %v5566_v29, %v5566_v29  ;;  %v5641_v43 = vunpack.c.l.b16 %v5609_v3  ;;  %v5587_v52 = vadd.f32 %v5586_v11, %v5585_v24 }
 0x6dd   : > { %v4205_v62 = vadd.f32 %v4204_v32, %v4155_v41  ;;  %v7634_v41 = vld [vmem:[%s9929_s1 + $0x7d8] sm:$0xff]  ;;  %v5611_v32 = vpack.c.bf16 %v5573_v51, %v5573_v51 }
 0x6de   : > { %v4313_v31 = vmax.f32 %v4297_v9, 0.0  ;;  %v5642_v2 = vunpack.c.l.b16 %v5610_v1  ;;  %v5613_v47 = vpack.c.bf16 %v5587_v52, %v5587_v52 }
 0x6df   : > { %v4253_v40 = vpop.f32.mrf.mxu0  ;;  %5995 = vmatpush.bf16.msrb.mxu2 %v7634_v41  ;;  %v5643_v22 = vunpack.c.l.b16 %v5611_v32 }
 0x6e0   : > { %v4324_v7 = vpack.c.bf16 %v4313_v31, %v4312_v59  ;;  %v4254_v45 = vadd.f32 %v4253_v40, %v4205_v62  ;;  %v4540_v62 = vld [vmem:[#allocation2 + $0x128] sm:$0xff]  ;;  %v5600_v31 = vrot.slane %v5599_v55, 1  ;;  %v5650_v50 = vsel %vm5649_vm0, %v5642_v2, %v5641_v43 }
 0x6e1   : > { %v4556_v18 = vadd.f32 %v4540_v62, %v8947_v38  ;;  %v7632_v38 = vld [vmem:[%s9929_s1 + $0x7c8] sm:$0xff]  ;;  %v5652_v29 = vsel %vm5651_vm1, %v5643_v22, %v5650_v50 }
 0x6e2   : > { %4420 = vmatmul.bf16.gmra.mxu1 %v4324_v7  ;;  %v4281_v58 = vmul.f32 %v9268_v56, %v4254_v45  ;;  %v4539_v45 = vld [vmem:[#allocation2 + $0x120] sm:$0xff]  ;;  %v5601_v46 = vadd.f32 %v5600_v31, %v5599_v55  ;;  %v5654_v44 = vsel %vm5653_vm2, %v5644_v5, %v5652_v29  ;;  %v9401_v31 = vld [vmem:[%s9930_s2 + $0xe] ss:$0 sm:$0xff]  ;;  %v9421_v5 = vld [vmem:[%s9930_s2 + $0x18] ss:$0 sm:$0xff] }
 0x6e3   : > { %5996 = vmatpush.bf16.msrb.mxu2 %v7633_v20  ;;  %v4555_v39 = vadd.f32 %v4539_v45, %v8939_v25  ;;  %v2956_v28 = vmul.f32 %v9401_v31, %v8956_v37  ;;  %v9410_v20 = vld [vmem:[%s9930_s2 + $0xf] ss:$0 sm:$0xff] }
 0x6e4   : > { %v4157_v34 = vpop.f32.mrf.mxu2  ;;  %v4206_v61 = vpop.f32.mrf.mxu3  ;;  %v4298_v10 = vadd.f32 %v9275_v16, %v4281_v58  ;;  %v5608_v58 = vadd.f32 %v5607_v53, %v5606_v35 }
 0x6e5   : > { %v4207_v63 = vadd.f32 %v4206_v61, %v4157_v34  ;;  %v4588_v34 = vadd.f32 %v4572_v60, %v4556_v18  ;;  %v5614_v61 = vpack.c.bf16 %v5594_v27, %v5594_v27  ;;  %v4587_v36 = vadd.f32 %v4571_v12, %v4555_v39 }
 0x6e6   : > { %v4314_v40 = vmax.f32 %v4298_v10, 0.0  ;;  %v5616_v55 = vpack.c.bf16 %v5608_v58, %v5608_v58  ;;  %v2973_v27 = vadd.f32 %v9410_v20, %v2956_v28 }
 0x6e7   : > { %v4255_v14 = vpop.f32.mrf.mxu0  ;;  %5997 = vmatpush.bf16.msrb.mxu2 %v7632_v38  ;;  %v4596_v3 = vpack.c.bf16 %v4588_v34, %v4587_v36  ;;  %v5646_v17 = vunpack.c.l.b16 %v5614_v61  ;;  %v2958_v34 = vmul.f32 %v9401_v31, %v8974_v6 }
 0x6e8   : > { %v4256_v30 = vadd.f32 %v4255_v14, %v4207_v63  ;;  %v5645_v63 = vunpack.c.l.b16 %v5613_v47  ;;  %v7631_v14 = vld [vmem:[%s9929_s1 + $0x7c0] sm:$0xff]  ;;  %v5648_v43 = vunpack.c.l.b16 %v5616_v55  ;;  %v2989_v47 = vmax.f32 %v2973_v27, 0.0 }
 0x6e9   : > { %4699 = vmatmul.bf16.gmra.mxu2 %v4595_v21  ;;  %v5615_v21 = vpack.c.bf16 %v5601_v46, %v5601_v46  ;;  %v2975_v58 = vadd.f32 %v9410_v20, %v2958_v34 }
 0x6ea   : > { %v4282_v9 = vmul.f32 %v9268_v56, %v4256_v30  ;;  %v5656_v30 = vsel %vm5655_vm3, %v5645_v63, %v5654_v44  ;;  %v3005_v60 = vpack.c.bf16 %v2989_v47, %v2989_v47 }
 0x6eb   : > { %5998 = vmatpush.bf16.msrb.mxu2 %v7631_v14  ;;  %v5647_v26 = vunpack.c.l.b16 %v5615_v21  ;;  %v5658_v32 = vsel %vm5657_vm4, %v5646_v17, %v5656_v30 }
 0x6ec   : > { %v4299_v54 = vadd.f32 %v9275_v16, %v4282_v9  ;;  %v4160_v23 = vpop.f32.mrf.mxu2  ;;  %v4209_v59 = vpop.f32.mrf.mxu3 }
 0x6ed   : > { %v4210_v49 = vadd.f32 %v4209_v59, %v4160_v23  ;;  %v5660_v59 = vsel %vm5659_vm5, %v5647_v26, %v5658_v32 }
 0x6ee   : > { %v4315_v19 = vmax.f32 %v4299_v54, 0.0  ;;  %v5662_v52 = vsel %vm5661_vm6, %v5648_v43, %v5660_v59  ;;  %v7613_v59 = vld [vmem:[%s9929_s1 + $0x730] sm:$0xff] }
 0x6ef   : > { %v4258_v7 = vpop.f32.mrf.mxu0 }
 0x6f0   : > { %v4325_v8 = vpack.c.bf16 %v4315_v19, %v4314_v40  ;;  %v4259_v13 = vadd.f32 %v4258_v7, %v4210_v49  ;;  %v2955_v19 = vmul.f32 %v9401_v31, %v8954_v48  ;;  %v5663_v7 = vpack.c.b16 %v5662_v52, %v5662_v52 }
 0x6f2   : > { %4425 = vmatmul.bf16.gmra.mxu1 %v4325_v8  ;;  %v4283_v51 = vmul.f32 %v9268_v56, %v4259_v13  ;;  %v2972_v37 = vadd.f32 %v9410_v20, %v2955_v19 }
 0x6f4   : > { %v4162_v33 = vpop.f32.mrf.mxu2  ;;  %v4211_v24 = vpop.f32.mrf.mxu3  ;;  %v4300_v57 = vadd.f32 %v9275_v16, %v4283_v51  ;;  %v2988_v53 = vmax.f32 %v2972_v37, 0.0  ;;  %v7614_v51 = vld [vmem:[%s9929_s1 + $0x738] sm:$0xff] }
 0x6f5   : > { %v4212_v4 = vadd.f32 %v4211_v24, %v4162_v33  ;;  %v2957_v24 = vmul.f32 %v9401_v31, %v8970_v0  ;;  %5007 = vmatpush.bf16.msrb.mxu0 %v7614_v51  ;;  %v2991_v0 = vmax.f32 %v2975_v58, 0.0  ;;  %v9964_v58 = vld [vmem:[#allocation24_spill] sm:$0xff] }
 0x6f6   : > { %v4316_v15 = vmax.f32 %v4300_v57, 0.0  ;;  %v3004_v29 = vpack.c.bf16 %v2988_v53, %v2988_v53 }
 0x6f7   : > { %v4260_v25 = vpop.f32.mrf.mxu0  ;;  %v2974_v6 = vadd.f32 %v9410_v20, %v2957_v24 }
 0x6f8   : > { %v4261_v1 = vadd.f32 %v4260_v25, %v4212_v4  ;;  %v5361_v33 = vunpack.c.l.b16 %v3004_v29 }
 0x6f9   : > { %4704 = vmatmul.bf16.gmra.mxu2 %v4596_v3  ;;  %v2990_v17 = vmax.f32 %v2974_v6, 0.0  ;;  %5008 = vmatpush.bf16.msrb.mxu0 %v7613_v59 }
 0x6fa   : > { %v4284_v11 = vmul.f32 %v9268_v56, %v4261_v1  ;;  %v3007_v1 = vpack.c.bf16 %v2991_v0, %v2991_v0 }
 0x6fb   : > { %v3006_v30 = vpack.c.bf16 %v2990_v17, %v2990_v17 }
 0x6fc   : > { %v4301_v10 = vadd.f32 %v9275_v16, %v4284_v11  ;;  %v4165_v9 = vpop.f32.mrf.mxu2  ;;  %v4214_v41 = vpop.f32.mrf.mxu3  ;;  %v5364_v57 = vunpack.c.l.b16 %v3007_v1  ;;  %v9960_v11 = vld [vmem:[#allocation20_spill] sm:$0xff] }
 0x6fd   : > { %v4215_v2 = vadd.f32 %v4214_v41, %v4165_v9  ;;  %v2960_v26 = vmul.f32 %v9401_v31, %v9960_v11  ;;  %v5363_v9 = vunpack.c.l.b16 %v3006_v30  ;;  %v9961_v41 = vld [vmem:[#allocation19_spill] sm:$0xff] }
 0x6fe   : > { %v4317_v54 = vmax.f32 %v4301_v10, 0.0  ;;  %v2959_v32 = vmul.f32 %v9401_v31, %v9961_v41  ;;  %v7611_v30 = vld [vmem:[%s9929_s1 + $0x720] sm:$0xff] }
 0x6ff   : > { %v4263_v23 = vpop.f32.mrf.mxu0 }
 0x700   : > { %v4326_v62 = vpack.c.bf16 %v4317_v54, %v4316_v15  ;;  %v4264_v35 = vadd.f32 %v4263_v23, %v4215_v2  ;;  %v2977_v2 = vadd.f32 %v9410_v20, %v2960_v26  ;;  %v5378_v23 = vpack.c.b16 %v5364_v57, %v5363_v9 }
 0x702   : > { %4430 = vmatmul.bf16.gmra.mxu1 %v4326_v62  ;;  %v4285_v18 = vmul.f32 %v9268_v56, %v4264_v35  ;;  %v2976_v62 = vadd.f32 %v9410_v20, %v2959_v32  ;;  %v2993_v28 = vmax.f32 %v2977_v2, 0.0 }
 0x704   : > { %v4167_v40 = vpop.f32.mrf.mxu2  ;;  %v4216_v49 = vpop.f32.mrf.mxu3  ;;  %v4302_v45 = vadd.f32 %v9275_v16, %v4285_v18  ;;  %v2992_v19 = vmax.f32 %v2976_v62, 0.0 }
 0x705   : > { %v4217_v22 = vadd.f32 %v4216_v49, %v4167_v40 }
 0x706   : > { %v4318_v13 = vmax.f32 %v4302_v45, 0.0 }
 0x707   : > { %v4265_v50 = vpop.f32.mrf.mxu0 }
 0x708   : > { %v4266_v8 = vadd.f32 %v4265_v50, %v4217_v22  ;;  %v3009_v22 = vpack.c.bf16 %v2993_v28, %v2993_v28  ;;  %v9962_v50 = vld [vmem:[#allocation22_spill] sm:$0xff] }
 0x709   : > { %5721 = vmatmul.bf16.vlgmr.msra.gmra.mxu2 %v5663_v7  ;;  %v3008_v7 = vpack.c.bf16 %v2992_v19, %v2992_v19 }
 0x70a   : > { %v4286_v48 = vmul.f32 %v9268_v56, %v4266_v8  ;;  %v9427_v56 = vld [vmem:[%s9930_s2 + $0x19] ss:$0 sm:$0xff]  ;;  %v5366_v27 = vunpack.c.l.b16 %v3009_v22  ;;  %v2962_v8 = vmul.f32 %v9401_v31, %v9962_v50 }
 0x70b   : > { %v5365_v45 = vunpack.c.l.b16 %v3008_v7  ;;  %v7610_v7 = vld [vmem:[%s9929_s1 + $0x718] sm:$0xff] }
 0x70c   : > { %v4303_v42 = vadd.f32 %v9275_v16, %v4286_v48  ;;  %v4670_v46 = vpop.f32.mrf.mxu2  ;;  %v5362_v16 = vunpack.c.l.b16 %v3005_v60  ;;  %v9963_v48 = vld [vmem:[#allocation21_spill] sm:$0xff]  ;;  %v2979_v53 = vadd.f32 %v9410_v20, %v2962_v8  ;;  %v7612_v60 = vld [vmem:[%s9929_s1 + $0x728] sm:$0xff] }
 0x70d   : > { %v4713_v39 = vmul.f32 %v9421_v5, %v4670_v46  ;;  %v2961_v47 = vmul.f32 %v9401_v31, %v9963_v48  ;;  %5009 = vmatpush.bf16.msrb.mxu0 %v7612_v60  ;;  %v9968_v60 = vld [vmem:[#allocation28_spill] sm:$0xff] }
 0x70e   : > { %v4319_v12 = vmax.f32 %v4303_v42, 0.0  ;;  %v5377_v36 = vpack.c.b16 %v5362_v16, %v5361_v33  ;;  %v2995_v16 = vmax.f32 %v2979_v53, 0.0 }
 0x70f   : > { %v4730_v63 = vadd.f32 %v9427_v56, %v4713_v39 }
 0x710   : > { %v4327_v38 = vpack.c.bf16 %v4319_v12, %v4318_v13  ;;  %v5379_v12 = vpack.c.b16 %v5366_v27, %v5365_v45  ;;  %v3011_v24 = vpack.c.bf16 %v2995_v16, %v2995_v16  ;;  %v9969_v16 = vld [vmem:[#allocation27_spill] sm:$0xff] }
 0x711   : > { %v4746_v14 = vmax.f32 %v4730_v63, 0.0  ;;  %5010 = vmatpush.bf16.msrb.mxu0 %v7611_v30 }
 0x712   : > { %4435 = vmatmul.bf16.gmra.mxu1 %v4327_v38  ;;  %v2978_v38 = vadd.f32 %v9410_v20, %v2961_v47  ;;  %v7630_v47 = vld [vmem:[%s9929_s1 + $0x7b8] sm:$0xff] }
 0x713   : > { %5942 = vmatpush.bf16.msra.mxu3 %v7630_v47 }
 0x714   : > { %v4672_v61 = vpop.f32.mrf.mxu2  ;;  %v2994_v33 = vmax.f32 %v2978_v38, 0.0  ;;  %v2968_v38 = vmul.f32 %v9401_v31, %v9968_v60  ;;  %v9973_v60 = vld [vmem:[#allocation3_spill] sm:$0xff] }
 0x715   : > { %v4714_v4 = vmul.f32 %v9421_v5, %v4672_v61  ;;  %5011 = vmatpush.bf16.msrb.mxu0 %v7610_v7 }
 0x716   : > { %v3010_v63 = vpack.c.bf16 %v2994_v33, %v2994_v33 }
 0x717   : > { %v4731_v44 = vadd.f32 %v9427_v56, %v4714_v4 }
 0x718   : > { %v5367_v6 = vunpack.c.l.b16 %v3010_v63  ;;  %v2985_v63 = vadd.f32 %v9410_v20, %v2968_v38 }
 0x719   : > { %v4747_v21 = vmax.f32 %v4731_v44, 0.0  ;;  %5999 = vmatmul.bf16.vlgmr.msrb.gmra.mxu2 %v5377_v36  ;;  %v5368_v36 = vunpack.c.l.b16 %v3011_v24  ;;  %v2964_v44 = vmul.f32 %v9401_v31, %v9964_v58  ;;  %v7628_v24 = vld [vmem:[%s9929_s1 + $0x7a8] sm:$0xff]  ;;  %v7609_v58 = vld [vmem:[%s9929_s1 + $0x710] sm:$0xff] }
 0x71a   : > { %5012 = vmatpush.bf16.msrb.mxu0 %v7609_v58 }
 0x71b   : > { %v4762_v25 = vpack.c.bf16 %v4747_v21, %v4746_v14  ;;  %v9965_v14 = vld [vmem:[#allocation23_spill] sm:$0xff]  ;;  %v5380_v1 = vpack.c.b16 %v5368_v36, %v5367_v6 }
 0x71c   : > { %v4675_v3 = vpop.f32.mrf.mxu2  ;;  %v2963_v21 = vmul.f32 %v9401_v31, %v9965_v14  ;;  %v7627_v14 = vld [vmem:[%s9929_s1 + $0x7a0] sm:$0xff] }
 0x71d   : > { %4842 = vmatmul.bf16.vlgmr.msrb.gmra.mxu3 %v4762_v25  ;;  %v4715_v55 = vmul.f32 %v9421_v5, %v4675_v3  ;;  %v2981_v3 = vadd.f32 %v9410_v20, %v2964_v44 }
 0x71f   : > { %v4732_v43 = vadd.f32 %v9427_v56, %v4715_v55  ;;  %v2980_v55 = vadd.f32 %v9410_v20, %v2963_v21  ;;  %v2997_v26 = vmax.f32 %v2981_v3, 0.0  ;;  %v3001_v21 = vmax.f32 %v2985_v63, 0.0 }
 0x721   : > { %v4748_v35 = vmax.f32 %v4732_v43, 0.0  ;;  %v2996_v41 = vmax.f32 %v2980_v55, 0.0  ;;  %v3013_v32 = vpack.c.bf16 %v2997_v26, %v2997_v26  ;;  %v9970_v26 = vld [vmem:[#allocation30_spill] sm:$0xff] }
 0x723   : > { %v3012_v43 = vpack.c.bf16 %v2996_v41, %v2996_v41  ;;  %v5370_v2 = vunpack.c.l.b16 %v3013_v32  ;;  %v9971_v32 = vld [vmem:[#allocation29_spill] sm:$0xff] }
 0x724   : > { %v4677_v10 = vpop.f32.mrf.mxu2 }
 0x725   : > { %v4716_v15 = vmul.f32 %v9421_v5, %v4677_v10  ;;  %v5369_v62 = vunpack.c.l.b16 %v3012_v43  ;;  %v2969_v43 = vmul.f32 %v9401_v31, %v9971_v32  ;;  %v9976_v32 = vld [vmem:[#allocation8_spill] sm:$0xff] }
 0x727   : > { %v4733_v54 = vadd.f32 %v9427_v56, %v4716_v15  ;;  %v5381_v22 = vpack.c.b16 %v5370_v2, %v5369_v62 }
 0x729   : > { %v4749_v52 = vmax.f32 %v4733_v54, 0.0  ;;  %6004 = vmatmul.bf16.gmra.mxu2 %v5378_v23  ;;  %v9966_v54 = vld [vmem:[#allocation26_spill] sm:$0xff] }
 0x72a   : > { %v2966_v23 = vmul.f32 %v9401_v31, %v9966_v54  ;;  %v7624_v54 = vld [vmem:[%s9929_s1 + $0x788] sm:$0xff] }
 0x72b   : > { %v4763_v40 = vpack.c.bf16 %v4749_v52, %v4748_v35  ;;  %v9967_v35 = vld [vmem:[#allocation25_spill] sm:$0xff] }
 0x72c   : > { %v4680_v49 = vpop.f32.mrf.mxu2  ;;  %v2965_v52 = vmul.f32 %v9401_v31, %v9967_v35  ;;  %v7608_v35 = vld [vmem:[%s9929_s1 + $0x708] sm:$0xff] }
 0x72d   : > { %4847 = vmatmul.bf16.gmra.mxu3 %v4763_v40  ;;  %v4717_v18 = vmul.f32 %v9421_v5, %v4680_v49  ;;  %v2983_v49 = vadd.f32 %v9410_v20, %v2966_v23  ;;  %5013 = vmatpush.bf16.msrb.mxu0 %v7608_v35 }
 0x72f   : > { %v4734_v42 = vadd.f32 %v9427_v56, %v4717_v18  ;;  %v2982_v18 = vadd.f32 %v9410_v20, %v2965_v52  ;;  %v2999_v8 = vmax.f32 %v2983_v49, 0.0 }
 0x731   : > { %v4750_v29 = vmax.f32 %v4734_v42, 0.0  ;;  %v2998_v48 = vmax.f32 %v2982_v18, 0.0  ;;  %v3015_v42 = vpack.c.bf16 %v2999_v8, %v2999_v8 }
 0x734   : > { %v4682_v37 = vpop.f32.mrf.mxu2 }
 0x735   : > { %v4718_v46 = vmul.f32 %v9421_v5, %v4682_v37 }
 0x737   : > { %v4735_v13 = vadd.f32 %v9427_v56, %v4718_v46  ;;  %v3014_v46 = vpack.c.bf16 %v2998_v48, %v2998_v48 }
 0x739   : > { %v4751_v39 = vmax.f32 %v4735_v13, 0.0  ;;  %6009 = vmatmul.bf16.gmra.mxu2 %v5379_v12  ;;  %v7629_v13 = vld [vmem:[%s9929_s1 + $0x7b0] sm:$0xff]  ;;  %v5372_v12 = vunpack.c.l.b16 %v3015_v42  ;;  %v7607_v42 = vld [vmem:[%s9929_s1 + $0x700] sm:$0xff] }
 0x73a   : > { %5943 = vmatpush.bf16.msra.mxu3 %v7629_v13  ;;  %5014 = vmatpush.bf16.msrb.mxu0 %v7607_v42 }
 0x73b   : > { %v4764_v34 = vpack.c.bf16 %v4751_v39, %v4750_v29  ;;  %v5371_v39 = vunpack.c.l.b16 %v3014_v46  ;;  %v9972_v46 = vld [vmem:[#allocation4_spill] sm:$0xff] }
 0x73c   : > { %v4685_v61 = vpop.f32.mrf.mxu2 }
 0x73d   : > { %4852 = vmatmul.bf16.gmra.mxu3 %v4764_v34  ;;  %v4719_v4 = vmul.f32 %v9421_v5, %v4685_v61  ;;  %v2967_v34 = vmul.f32 %v9401_v31, %v9969_v16  ;;  %v5382_v36 = vpack.c.b16 %v5372_v12, %v5371_v39 }
 0x73e   : > { %5944 = vmatpush.bf16.msra.mxu3 %v7628_v24 }
 0x73f   : > { %v4736_v0 = vadd.f32 %v9427_v56, %v4719_v4  ;;  %v2984_v44 = vadd.f32 %v9410_v20, %v2967_v34 }
 0x741   : > { %v4752_v57 = vmax.f32 %v4736_v0, 0.0  ;;  %v3000_v3 = vmax.f32 %v2984_v44, 0.0  ;;  %v9974_v44 = vld [vmem:[#allocation6_spill] sm:$0xff] }
 0x742   : > { %5945 = vmatpush.bf16.msra.mxu3 %v7627_v14  ;;  %v9975_v14 = vld [vmem:[#allocation5_spill] sm:$0xff] }
 0x743   : > { %v3016_v30 = vpack.c.bf16 %v3000_v3, %v3000_v3 }
 0x744   : > { %v4687_v51 = vpop.f32.mrf.mxu2 }
 0x745   : > { %v4720_v25 = vmul.f32 %v9421_v5, %v4687_v51  ;;  %v5373_v41 = vunpack.c.l.b16 %v3016_v30 }
 0x747   : > { %v4737_v17 = vadd.f32 %v9427_v56, %v4720_v25 }
 0x749   : > { %v4753_v11 = vmax.f32 %v4737_v17, 0.0  ;;  %6014 = vmatmul.bf16.gmra.mxu2 %v5380_v1  ;;  %v7626_v17 = vld [vmem:[%s9929_s1 + $0x798] sm:$0xff]  ;;  %v3017_v1 = vpack.c.bf16 %v3001_v21, %v3001_v21 }
 0x74a   : > { %5946 = vmatpush.bf16.msra.mxu3 %v7626_v17  ;;  %v7622_v17 = vld [vmem:[%s9929_s1 + $0x778] sm:$0xff] }
 0x74b   : > { %v4765_v10 = vpack.c.bf16 %v4753_v11, %v4752_v57  ;;  %v7625_v57 = vld [vmem:[%s9929_s1 + $0x790] sm:$0xff]  ;;  %v5374_v11 = vunpack.c.l.b16 %v3017_v1  ;;  %5180 = vmatpush.bf16.msrb.mxu1 %v7622_v17 }
 0x74c   : > { %v4690_v9 = vpop.f32.mrf.mxu2 }
 0x74d   : > { %4857 = vmatmul.bf16.gmra.mxu3 %v4765_v10  ;;  %v4721_v15 = vmul.f32 %v9421_v5, %v4690_v9  ;;  %v2970_v10 = vmul.f32 %v9401_v31, %v9970_v26  ;;  %v5383_v62 = vpack.c.b16 %v5374_v11, %v5373_v41  ;;  %v2986_v31 = vadd.f32 %v9410_v20, %v2969_v43 }
 0x74e   : > { %5947 = vmatpush.bf16.msra.mxu3 %v7625_v57  ;;  %v9580_v57 = vld [vmem:[%s9930_s2 + $0x1a] ss:$0 sm:$0xff] }
 0x74f   : > { %v4738_v28 = vadd.f32 %v9427_v56, %v4721_v15  ;;  %v2987_v23 = vadd.f32 %v9410_v20, %v2970_v10  ;;  %v3002_v7 = vmax.f32 %v2986_v31, 0.0 }
 0x751   : > { %v4754_v27 = vmax.f32 %v4738_v28, 0.0  ;;  %v3003_v49 = vmax.f32 %v2987_v23, 0.0 }
 0x752   : > { %5948 = vmatpush.bf16.msra.mxu3 %v7624_v54  ;;  %v9977_v54 = vld [vmem:[#allocation7_spill] sm:$0xff] }
 0x753   : > { %v3019_v18 = vpack.c.bf16 %v3003_v49, %v3003_v49 }
 0x754   : > { %v4692_v59 = vpop.f32.mrf.mxu2 }
 0x755   : > { %v4722_v40 = vmul.f32 %v9421_v5, %v4692_v59  ;;  %v5376_v8 = vunpack.c.l.b16 %v3019_v18 }
 0x757   : > { %v4739_v19 = vadd.f32 %v9427_v56, %v4722_v40  ;;  %v7623_v40 = vld [vmem:[%s9929_s1 + $0x780] sm:$0xff] }
 0x758   : > { %5949 = vmatpush.bf16.msra.mxu3 %v7623_v40 }
 0x759   : > { %v4755_v50 = vmax.f32 %v4739_v19, 0.0  ;;  %6019 = vmatmul.bf16.gmra.mxu2 %v5381_v22 }
 0x75b   : > { %v4766_v37 = vpack.c.bf16 %v4755_v50, %v4754_v27  ;;  %v3018_v27 = vpack.c.bf16 %v3002_v7, %v3002_v7 }
 0x75c   : > { %v4695_v45 = vpop.f32.mrf.mxu2 }
 0x75d   : > { %4862 = vmatmul.bf16.gmra.mxu3 %v4766_v37  ;;  %v4723_v53 = vmul.f32 %v9421_v5, %v4695_v45  ;;  %v9547_v37 = vld [vmem:[%s9930_s2 + $0x6] ss:$0 sm:$0xff]  ;;  %v5375_v45 = vunpack.c.l.b16 %v3018_v27 }
 0x75e   : > { %v1466_v38 = vmul.f32 %v9547_v37, %v9973_v60  ;;  %v1468_v21 = vmul.f32 %v9547_v37, %v9975_v14  ;;  %v1471_v43 = vmul.f32 %v9547_v37, %v9976_v32  ;;  %v1470_v23 = vmul.f32 %v9547_v37, %v9977_v54  ;;  %v9980_v14 = vld [vmem:[#allocation12_spill] sm:$0xff] }
 0x75f   : > { %v4740_v61 = vadd.f32 %v9427_v56, %v4723_v53  ;;  %v1467_v53 = vmul.f32 %v9547_v37, %v9972_v46  ;;  %v5384_v12 = vpack.c.b16 %v5376_v8, %v5375_v45 }
 0x761   : > { %v4756_v51 = vmax.f32 %v4740_v61, 0.0 }
 0x764   : > { %v4697_v29 = vpop.f32.mrf.mxu2 }
 0x765   : > { %v4724_v33 = vmul.f32 %v9421_v5, %v4697_v29  ;;  %v9562_v29 = vld [vmem:[%s9930_s2 + $0x7] ss:$0 sm:$0xff] }
 0x766   : > { %v1484_v16 = vadd.f32 %v9562_v29, %v1467_v53  ;;  %v1485_v3 = vadd.f32 %v9562_v29, %v1468_v21  ;;  %v1488_v35 = vadd.f32 %v9562_v29, %v1471_v43  ;;  %v9979_v53 = vld [vmem:[#allocation9_spill] sm:$0xff]  ;;  %v1475_v21 = vmul.f32 %v9547_v37, %v9980_v14  ;;  %v7619_v43 = vld [vmem:[%s9929_s1 + $0x760] sm:$0xff] }
 0x767   : > { %v4741_v4 = vadd.f32 %v9427_v56, %v4724_v33 }
 0x768   : > { %v1500_v33 = vmax.f32 %v1484_v16, 0.0 }
 0x769   : > { %v4757_v6 = vmax.f32 %v4741_v4, 0.0  ;;  %6024 = vmatmul.bf16.gmra.mxu2 %v5382_v36 }
 0x76a   : > { %v1516_v63 = vpack.c.bf16 %v1500_v33, %v1500_v33  ;;  %v7620_v33 = vld [vmem:[%s9929_s1 + $0x768] sm:$0xff] }
 0x76b   : > { %v4767_v0 = vpack.c.bf16 %v4757_v6, %v4756_v51  ;;  %v1469_v51 = vmul.f32 %v9547_v37, %v9974_v44 }
 0x76c   : > { %v4700_v25 = vpop.f32.mrf.mxu2  ;;  %v5314_v58 = vunpack.c.l.b16 %v1516_v63 }
 0x76d   : > { %4867 = vmatmul.bf16.gmra.mxu3 %v4767_v0  ;;  %v4725_v55 = vmul.f32 %v9421_v5, %v4700_v25  ;;  %v1486_v25 = vadd.f32 %v9562_v29, %v1469_v51 }
 0x76f   : > { %v4742_v15 = vadd.f32 %v9427_v56, %v4725_v55  ;;  %v1502_v1 = vmax.f32 %v1486_v25, 0.0  ;;  %v1501_v55 = vmax.f32 %v1485_v3, 0.0  ;;  %v9981_v3 = vld [vmem:[#allocation11_spill] sm:$0xff] }
 0x770   : > { %v1474_v17 = vmul.f32 %v9547_v37, %v9981_v3 }
 0x771   : > { %v4758_v52 = vmax.f32 %v4742_v15, 0.0  ;;  %v1518_v11 = vpack.c.bf16 %v1502_v1, %v1502_v1  ;;  %v1517_v26 = vpack.c.bf16 %v1501_v55, %v1501_v55  ;;  %v1492_v55 = vadd.f32 %v9562_v29, %v1475_v21  ;;  %v7617_v21 = vld [vmem:[%s9929_s1 + $0x750] sm:$0xff] }
 0x773   : > { %v5316_v41 = vunpack.c.l.b16 %v1518_v11 }
 0x774   : > { %v4702_v9 = vpop.f32.mrf.mxu2 }
 0x775   : > { %v4726_v2 = vmul.f32 %v9421_v5, %v4702_v9  ;;  %v9586_v9 = vld [vmem:[%s9930_s2 + $0x1b] ss:$0 sm:$0xff] }
 0x777   : > { %v4743_v59 = vadd.f32 %v9427_v56, %v4726_v2  ;;  %v5315_v2 = vunpack.c.l.b16 %v1517_v26 }
 0x779   : > { %v4759_v28 = vmax.f32 %v4743_v59, 0.0  ;;  %6029 = vmatmul.bf16.gmra.mxu2 %v5383_v62 }
 0x77b   : > { %v4768_v19 = vpack.c.bf16 %v4759_v28, %v4758_v52  ;;  %v5330_v52 = vpack.c.b16 %v5316_v41, %v5315_v2  ;;  %v1487_v28 = vadd.f32 %v9562_v29, %v1470_v23 }
 0x77c   : > { %v4705_v22 = vpop.f32.mrf.mxu2 }
 0x77d   : > { %4872 = vmatmul.bf16.gmra.mxu3 %v4768_v19  ;;  %v4727_v50 = vmul.f32 %v9421_v5, %v4705_v22  ;;  %v7621_v19 = vld [vmem:[%s9929_s1 + $0x770] sm:$0xff]  ;;  %v1504_v22 = vmax.f32 %v1488_v35, 0.0  ;;  %v1503_v27 = vmax.f32 %v1487_v28, 0.0 }
 0x77e   : > { %5181 = vmatpush.bf16.msrb.mxu1 %v7621_v19  ;;  %v9983_v19 = vld [vmem:[#allocation13_spill] sm:$0xff] }
 0x77f   : > { %v4744_v48 = vadd.f32 %v9427_v56, %v4727_v50  ;;  %v1520_v50 = vpack.c.bf16 %v1504_v22, %v1504_v22  ;;  %v1519_v8 = vpack.c.bf16 %v1503_v27, %v1503_v27  ;;  %v1476_v22 = vmul.f32 %v9547_v37, %v9983_v19 }
 0x781   : > { %v5318_v45 = vunpack.c.l.b16 %v1520_v50  ;;  %v5317_v46 = vunpack.c.l.b16 %v1519_v8 }
 0x782   : > { %5182 = vmatpush.bf16.msrb.mxu1 %v7620_v33  ;;  %v9985_v33 = vld [vmem:[#allocation15_spill] sm:$0xff] }
 0x784   : > { %v4707_v20 = vpop.f32.mrf.mxu2 }
 0x785   : > { %v4728_v47 = vmul.f32 %v9421_v5, %v4707_v20  ;;  %v4760_v5 = vmax.f32 %v4744_v48, 0.0  ;;  %v9978_v48 = vld [vmem:[#allocation10_spill] sm:$0xff] }
 0x786   : > { %5183 = vmatpush.bf16.msrb.mxu1 %v7619_v43 }
 0x787   : > { %v4745_v13 = vadd.f32 %v9427_v56, %v4728_v47  ;;  %v1483_v56 = vadd.f32 %v9562_v29, %v1466_v38  ;;  %v1473_v47 = vmul.f32 %v9547_v37, %v9978_v48 }
 0x789   : > { %v4761_v39 = vmax.f32 %v4745_v13, 0.0  ;;  %6034 = vmatmul.bf16.gmra.mxu2 %v5384_v12  ;;  %v1499_v24 = vmax.f32 %v1483_v56, 0.0  ;;  %v1472_v13 = vmul.f32 %v9547_v37, %v9979_v53  ;;  %v1490_v38 = vadd.f32 %v9562_v29, %v1473_v47  ;;  %v7618_v47 = vld [vmem:[%s9929_s1 + $0x758] sm:$0xff] }
 0x78a   : > { %5184 = vmatpush.bf16.msrb.mxu1 %v7618_v47 }
 0x78b   : > { %v4769_v34 = vpack.c.bf16 %v4761_v39, %v4760_v5  ;;  %v1515_v36 = vpack.c.bf16 %v1499_v24, %v1499_v24  ;;  %v5331_v39 = vpack.c.b16 %v5318_v45, %v5317_v46  ;;  %v1489_v16 = vadd.f32 %v9562_v29, %v1472_v13 }
 0x78c   : > { %v9565_v61 = vpop.f32.mrf.mxu2  ;;  %v1506_v24 = vmax.f32 %v1490_v38, 0.0 }
 0x78d   : > { %4877 = vmatmul.bf16.gmra.mxu3 %v4769_v34  ;;  %v5313_v6 = vunpack.c.l.b16 %v1515_v36  ;;  %v1505_v36 = vmax.f32 %v1489_v16, 0.0 }
 0x78e   : > { %5185 = vmatpush.bf16.msrb.mxu1 %v7617_v21 }
 0x78f   : > { %v5329_v0 = vpack.c.b16 %v5314_v58, %v5313_v6  ;;  %v1522_v58 = vpack.c.bf16 %v1506_v24, %v1506_v24  ;;  %v1521_v44 = vpack.c.bf16 %v1505_v36, %v1505_v36  ;;  %v1478_v24 = vmul.f32 %v9547_v37, %v9985_v33 }
 0x791   : > { %v5320_v6 = vunpack.c.l.b16 %v1522_v58  ;;  %v5319_v25 = vunpack.c.l.b16 %v1521_v44 }
 0x793   : > { %v5332_v26 = vpack.c.b16 %v5320_v6, %v5319_v25 }
 0x794   : > { %v5724_v4 = vpop.f32.mrf.mxu2 }
 0x79d   : > { %5950 = vmatmul.bf16.vlgmr.msra.gmra.mxu3 %v5329_v0 }
 0x7a0   : > { %v4843_v30 = vpop.f32.mrf.mxu3 }
 0x7a1   : > { %v4886_v10 = vmul.f32 %v9580_v57, %v4843_v30 }
 0x7a3   : > { %v4903_v59 = vadd.f32 %v9586_v9, %v4886_v10  ;;  %v1491_v10 = vadd.f32 %v9562_v29, %v1474_v17 }
 0x7a5   : > { %v4919_v40 = vmax.f32 %v4903_v59, 0.0  ;;  %v1507_v23 = vmax.f32 %v1491_v10, 0.0  ;;  %v7645_v10 = vld [vmem:[%s9929_s1 + $0x830] sm:$0xff] }
 0x7a8   : > { %v4845_v15 = vpop.f32.mrf.mxu3 }
 0x7a9   : > { %v4887_v62 = vmul.f32 %v9580_v57, %v4845_v15  ;;  %v1508_v15 = vmax.f32 %v1492_v55, 0.0 }
 0x7ab   : > { %v4904_v31 = vadd.f32 %v9586_v9, %v4887_v62  ;;  %v1524_v59 = vpack.c.bf16 %v1508_v15, %v1508_v15  ;;  %v1523_v62 = vpack.c.bf16 %v1507_v23, %v1507_v23 }
 0x7ad   : > { %v4920_v49 = vmax.f32 %v4904_v31, 0.0  ;;  %5955 = vmatmul.bf16.gmra.mxu3 %v5330_v52  ;;  %v5322_v31 = vunpack.c.l.b16 %v1524_v59  ;;  %v9982_v52 = vld [vmem:[#allocation14_spill] sm:$0xff] }
 0x7ae   : > { %v1477_v28 = vmul.f32 %v9547_v37, %v9982_v52 }
 0x7af   : > { %v4935_v7 = vpack.c.bf16 %v4920_v49, %v4919_v40  ;;  %v5321_v49 = vunpack.c.l.b16 %v1523_v62 }
 0x7b0   : > { %v4848_v18 = vpop.f32.mrf.mxu3  ;;  %v1494_v27 = vadd.f32 %v9562_v29, %v1477_v28 }
 0x7b1   : > { %5015 = vmatmul.bf16.vlgmr.msrb.gmra.mxu0 %v4935_v7  ;;  %v4888_v20 = vmul.f32 %v9580_v57, %v4848_v18  ;;  %v5333_v8 = vpack.c.b16 %v5322_v31, %v5321_v49 }
 0x7b3   : > { %v4905_v12 = vadd.f32 %v9586_v9, %v4888_v20  ;;  %v1493_v20 = vadd.f32 %v9562_v29, %v1476_v22 }
 0x7b5   : > { %v4921_v34 = vmax.f32 %v4905_v12, 0.0  ;;  %v1509_v13 = vmax.f32 %v1493_v20, 0.0 }
 0x7b8   : > { %v4850_v42 = vpop.f32.mrf.mxu3 }
 0x7b9   : > { %v4889_v60 = vmul.f32 %v9580_v57, %v4850_v42  ;;  %v1510_v42 = vmax.f32 %v1494_v27, 0.0 }
 0x7bb   : > { %v4906_v5 = vadd.f32 %v9586_v9, %v4889_v60  ;;  %v1526_v12 = vpack.c.bf16 %v1510_v42, %v1510_v42  ;;  %v1525_v60 = vpack.c.bf16 %v1509_v13, %v1509_v13 }
 0x7bd   : > { %v4922_v56 = vmax.f32 %v4906_v5, 0.0  ;;  %5960 = vmatmul.bf16.gmra.mxu3 %v5331_v39  ;;  %v5324_v5 = vunpack.c.l.b16 %v1526_v12  ;;  %v9984_v39 = vld [vmem:[#allocation16_spill] sm:$0xff] }
 0x7be   : > { %v1479_v16 = vmul.f32 %v9547_v37, %v9984_v39 }
 0x7bf   : > { %v4936_v63 = vpack.c.bf16 %v4922_v56, %v4921_v34  ;;  %v5323_v56 = vunpack.c.l.b16 %v1525_v60 }
 0x7c0   : > { %v4853_v4 = vpop.f32.mrf.mxu3  ;;  %v1496_v36 = vadd.f32 %v9562_v29, %v1479_v16 }
 0x7c1   : > { %5020 = vmatmul.bf16.gmra.mxu0 %v4936_v63  ;;  %v4890_v51 = vmul.f32 %v9580_v57, %v4853_v4  ;;  %v5334_v44 = vpack.c.b16 %v5324_v5, %v5323_v56  ;;  %v7639_v56 = vld [vmem:[%s9929_s1 + $0x800] sm:$0xff] }
 0x7c3   : > { %v4907_v1 = vadd.f32 %v9586_v9, %v4890_v51  ;;  %v1495_v51 = vadd.f32 %v9562_v29, %v1478_v24 }
 0x7c5   : > { %v4923_v41 = vmax.f32 %v4907_v1, 0.0  ;;  %v1511_v17 = vmax.f32 %v1495_v51, 0.0  ;;  %v9652_v1 = vpop.f32.mrf.mxu1 }
 0x7c8   : > { %v4855_v0 = vpop.f32.mrf.mxu3 }
 0x7c9   : > { %v4891_v30 = vmul.f32 %v9580_v57, %v4855_v0  ;;  %v1512_v0 = vmax.f32 %v1496_v36, 0.0 }
 0x7cb   : > { %v4908_v11 = vadd.f32 %v9586_v9, %v4891_v30  ;;  %v7646_v30 = vld [vmem:[%s9929_s1 + $0x838] sm:$0xff]  ;;  %v1528_v55 = vpack.c.bf16 %v1512_v0, %v1512_v0 }
 0x7cc   : > { %6040 = vmatpush.bf16.msra.mxu0 %v7646_v30 }
 0x7cd   : > { %v4924_v32 = vmax.f32 %v4908_v11, 0.0  ;;  %5965 = vmatmul.bf16.gmra.mxu3 %v5332_v26  ;;  %v1527_v11 = vpack.c.bf16 %v1511_v17, %v1511_v17 }
 0x7cf   : > { %v4937_v2 = vpack.c.bf16 %v4924_v32, %v4923_v41  ;;  %v5326_v41 = vunpack.c.l.b16 %v1528_v55  ;;  %v9986_v32 = vld [vmem:[#allocation18_spill] sm:$0xff] }
 0x7d0   : > { %v4858_v54 = vpop.f32.mrf.mxu3  ;;  %v1481_v43 = vmul.f32 %v9547_v37, %v9986_v32  ;;  %6041 = vmatpush.bf16.msra.mxu0 %v7645_v10 }
 0x7d1   : > { %5025 = vmatmul.bf16.gmra.mxu0 %v4937_v2  ;;  %v4892_v35 = vmul.f32 %v9580_v57, %v4858_v54  ;;  %v5325_v2 = vunpack.c.l.b16 %v1527_v11  ;;  %v9987_v54 = vld [vmem:[#allocation17_spill] sm:$0xff] }
 0x7d2   : > { %v1480_v23 = vmul.f32 %v9547_v37, %v9987_v54  ;;  %v1498_v31 = vadd.f32 %v9562_v29, %v1481_v43  ;;  %v7643_v37 = vld [vmem:[%s9929_s1 + $0x820] sm:$0xff] }
 0x7d3   : > { %v4909_v7 = vadd.f32 %v9586_v9, %v4892_v35  ;;  %v7644_v35 = vld [vmem:[%s9929_s1 + $0x828] sm:$0xff]  ;;  %v5335_v28 = vpack.c.b16 %v5326_v41, %v5325_v2 }
 0x7d4   : > { %6042 = vmatpush.bf16.msra.mxu0 %v7644_v35  ;;  %v1497_v49 = vadd.f32 %v9562_v29, %v1480_v23  ;;  %v7642_v29 = vld [vmem:[%s9929_s1 + $0x818] sm:$0xff] }
 0x7d5   : > { %v4925_v45 = vmax.f32 %v4909_v7, 0.0  ;;  %v7616_v7 = vld [vmem:[%s9929_s1 + $0x748] sm:$0xff]  ;;  %v9723_v35 = vld [vmem:[%s9930_s2 + $0x1c] ss:$0 sm:$0xff] }
 0x7d6   : > { %5186 = vmatpush.bf16.msrb.mxu1 %v7616_v7 }
 0x7d8   : > { %v4860_v40 = vpop.f32.mrf.mxu3  ;;  %6043 = vmatpush.bf16.msra.mxu0 %v7643_v37 }
 0x7d9   : > { %v4893_v18 = vmul.f32 %v9580_v57, %v4860_v40  ;;  %v4403_v40 = vpop.f32.mrf.mxu1 }
 0x7db   : > { %v4910_v50 = vadd.f32 %v9586_v9, %v4893_v18  ;;  %v1514_v18 = vmax.f32 %v1498_v31, 0.0 }
 0x7dc   : > { %6044 = vmatpush.bf16.msra.mxu0 %v7642_v29 }
 0x7dd   : > { %v4926_v48 = vmax.f32 %v4910_v50, 0.0  ;;  %5970 = vmatmul.bf16.gmra.mxu3 %v5333_v8  ;;  %v1513_v8 = vmax.f32 %v1497_v49, 0.0  ;;  %v1530_v20 = vpack.c.bf16 %v1514_v18, %v1514_v18  ;;  %v7654_v49 = vld [vmem:[%s9929_s1 + $0x878] sm:$0xff] }
 0x7df   : > { %v4938_v46 = vpack.c.bf16 %v4926_v48, %v4925_v45  ;;  %v7641_v45 = vld [vmem:[%s9929_s1 + $0x810] sm:$0xff]  ;;  %v1529_v48 = vpack.c.bf16 %v1513_v8, %v1513_v8 }
 0x7e0   : > { %v4863_v53 = vpop.f32.mrf.mxu3  ;;  %6045 = vmatpush.bf16.msra.mxu0 %v7641_v45 }
 0x7e1   : > { %5030 = vmatmul.bf16.gmra.mxu0 %v4938_v46  ;;  %v4894_v38 = vmul.f32 %v9580_v57, %v4863_v53  ;;  %v4406_v42 = vpop.f32.mrf.mxu1  ;;  %v5328_v46 = vunpack.c.l.b16 %v1530_v20  ;;  %v5327_v13 = vunpack.c.l.b16 %v1529_v48 }
 0x7e3   : > { %v4911_v63 = vadd.f32 %v9586_v9, %v4894_v38  ;;  %v7640_v38 = vld [vmem:[%s9929_s1 + $0x808] sm:$0xff]  ;;  %v5336_v39 = vpack.c.b16 %v5328_v46, %v5327_v13 }
 0x7e4   : > { %6046 = vmatpush.bf16.msra.mxu0 %v7640_v38 }
 0x7e5   : > { %v4927_v6 = vmax.f32 %v4911_v63, 0.0 }
 0x7e8   : > { %v4865_v34 = vpop.f32.mrf.mxu3  ;;  %6047 = vmatpush.bf16.msra.mxu0 %v7639_v56 }
 0x7e9   : > { %v4895_v4 = vmul.f32 %v9580_v57, %v4865_v34  ;;  %v4408_v24 = vpop.f32.mrf.mxu1 }
 0x7eb   : > { %v4912_v58 = vadd.f32 %v9586_v9, %v4895_v4  ;;  %v7615_v4 = vld [vmem:[%s9929_s1 + $0x740] sm:$0xff] }
 0x7ec   : > { %5187 = vmatpush.bf16.msrb.mxu1 %v7615_v4 }
 0x7ed   : > { %v4928_v14 = vmax.f32 %v4912_v58, 0.0  ;;  %5975 = vmatmul.bf16.gmra.mxu3 %v5334_v44  ;;  %v9702_v44 = vld [vmem:[%s9930_s2 + $0x16] ss:$0 sm:$0xff] }
 0x7ee   : > { %v4445_v21 = vmul.f32 %v9702_v44, %v4403_v40  ;;  %v4446_v2 = vmul.f32 %v9702_v44, %v4406_v42  ;;  %v9730_v40 = vld [vmem:[%s9930_s2 + $0x1d] ss:$0 sm:$0xff] }
 0x7ef   : > { %v4939_v25 = vpack.c.bf16 %v4928_v14, %v4927_v6 }
 0x7f0   : > { %v4868_v3 = vpop.f32.mrf.mxu3  ;;  %6089 = vmatpush.bf16.msra.mxu1 %v7654_v49 }
 0x7f1   : > { %5035 = vmatmul.bf16.gmra.mxu0 %v4939_v25  ;;  %v4896_v26 = vmul.f32 %v9580_v57, %v4868_v3  ;;  %v4411_v14 = vpop.f32.mrf.mxu1  ;;  %v4444_v25 = vmul.f32 %v9702_v44, %v9652_v1  ;;  %v9713_v3 = vld [vmem:[%s9930_s2 + $0x17] ss:$0 sm:$0xff]  ;;  %v4447_v1 = vmul.f32 %v9702_v44, %v4408_v24 }
 0x7f2   : > { %v4462_v55 = vadd.f32 %v9713_v3, %v4445_v21  ;;  %v4463_v31 = vadd.f32 %v9713_v3, %v4446_v2  ;;  %v4448_v42 = vmul.f32 %v9702_v44, %v4411_v14 }
 0x7f3   : > { %v4913_v59 = vadd.f32 %v9586_v9, %v4896_v26 }
 0x7f4   : > { %v4478_v26 = vmax.f32 %v4462_v55, 0.0 }
 0x7f5   : > { %v4929_v19 = vmax.f32 %v4913_v59, 0.0 }
 0x7f8   : > { %v4870_v15 = vpop.f32.mrf.mxu3 }
 0x7f9   : > { %v4897_v62 = vmul.f32 %v9580_v57, %v4870_v15  ;;  %v4413_v10 = vpop.f32.mrf.mxu1 }
 0x7fa   : > { %v4449_v20 = vmul.f32 %v9702_v44, %v4413_v10 }
 0x7fb   : > { %v4914_v52 = vadd.f32 %v9586_v9, %v4897_v62  ;;  %v4464_v62 = vadd.f32 %v9713_v3, %v4447_v1 }
 0x7fc   : > { %v4466_v13 = vadd.f32 %v9713_v3, %v4449_v20 }
 0x7fd   : > { %v4930_v22 = vmax.f32 %v4914_v52, 0.0  ;;  %5980 = vmatmul.bf16.gmra.mxu3 %v5335_v28  ;;  %v4480_v52 = vmax.f32 %v4464_v62, 0.0 }
 0x7ff   : > { %v4940_v27 = vpack.c.bf16 %v4930_v22, %v4929_v19  ;;  %v4479_v19 = vmax.f32 %v4463_v31, 0.0  ;;  %v4496_v37 = vpack.c.bf16 %v4480_v52, %v4480_v52 }
 0x800   : > { %v4873_v50 = vpop.f32.mrf.mxu3 }
 0x801   : > { %5040 = vmatmul.bf16.gmra.mxu0 %v4940_v27  ;;  %v4898_v47 = vmul.f32 %v9580_v57, %v4873_v50  ;;  %v4416_v54 = vpop.f32.mrf.mxu1  ;;  %v4495_v50 = vpack.c.bf16 %v4479_v19, %v4479_v19  ;;  %v5412_v29 = vunpack.c.l.b16 %v4496_v37 }
 0x803   : > { %v4915_v12 = vadd.f32 %v9586_v9, %v4898_v47  ;;  %v5411_v47 = vunpack.c.l.b16 %v4495_v50 }
 0x805   : > { %v4931_v16 = vmax.f32 %v4915_v12, 0.0  ;;  %v5426_v12 = vpack.c.b16 %v5412_v29, %v5411_v47  ;;  %v7651_v29 = vld [vmem:[%s9929_s1 + $0x860] sm:$0xff] }
 0x808   : > { %v4875_v53 = vpop.f32.mrf.mxu3 }
 0x809   : > { %v4899_v60 = vmul.f32 %v9580_v57, %v4875_v53  ;;  %v4418_v27 = vpop.f32.mrf.mxu1 }
 0x80b   : > { %v4916_v5 = vadd.f32 %v9586_v9, %v4899_v60  ;;  %v4465_v60 = vadd.f32 %v9713_v3, %v4448_v42 }
 0x80d   : > { %v4932_v34 = vmax.f32 %v4916_v5, 0.0  ;;  %5985 = vmatmul.bf16.gmra.mxu3 %v5336_v39  ;;  %v4482_v5 = vmax.f32 %v4466_v13, 0.0 }
 0x80f   : > { %v4941_v33 = vpack.c.bf16 %v4932_v34, %v4931_v16  ;;  %v7653_v16 = vld [vmem:[%s9929_s1 + $0x870] sm:$0xff]  ;;  %v4481_v34 = vmax.f32 %v4465_v60, 0.0 }
 0x810   : > { %v4878_v63 = vpop.f32.mrf.mxu3  ;;  %6090 = vmatpush.bf16.msra.mxu1 %v7653_v16 }
 0x811   : > { %5045 = vmatmul.bf16.gmra.mxu0 %v4941_v33  ;;  %v4900_v36 = vmul.f32 %v9580_v57, %v4878_v63  ;;  %v4421_v38 = vpop.f32.mrf.mxu1  ;;  %v4498_v33 = vpack.c.bf16 %v4482_v5, %v4482_v5  ;;  %v4497_v4 = vpack.c.bf16 %v4481_v34, %v4481_v34 }
 0x812   : > { %v4452_v49 = vmul.f32 %v9702_v44, %v4421_v38 }
 0x813   : > { %v4917_v51 = vadd.f32 %v9586_v9, %v4900_v36 }
 0x815   : > { %v4933_v17 = vmax.f32 %v4917_v51, 0.0  ;;  %v4451_v51 = vmul.f32 %v9702_v44, %v4418_v27  ;;  %v4469_v27 = vadd.f32 %v9713_v3, %v4452_v49 }
 0x817   : > { %v4468_v55 = vadd.f32 %v9713_v3, %v4451_v51  ;;  %v4485_v20 = vmax.f32 %v4469_v27, 0.0 }
 0x818   : > { %v4880_v58 = vpop.f32.mrf.mxu3 }
 0x819   : > { %v4901_v6 = vmul.f32 %v9580_v57, %v4880_v58  ;;  %v4461_v57 = vadd.f32 %v9713_v3, %v4444_v25  ;;  %v5414_v58 = vunpack.c.l.b16 %v4498_v33  ;;  %v4423_v21 = vpop.f32.mrf.mxu1  ;;  %v4450_v25 = vmul.f32 %v9702_v44, %v4416_v54 }
 0x81a   : > { %v4453_v62 = vmul.f32 %v9702_v44, %v4423_v21 }
 0x81b   : > { %v4918_v0 = vadd.f32 %v9586_v9, %v4901_v6  ;;  %v4477_v41 = vmax.f32 %v4461_v57, 0.0  ;;  %v4494_v9 = vpack.c.bf16 %v4478_v26, %v4478_v26  ;;  %v4467_v57 = vadd.f32 %v9713_v3, %v4450_v25 }
 0x81c   : > { %v4484_v26 = vmax.f32 %v4468_v55, 0.0  ;;  %v4470_v37 = vadd.f32 %v9713_v3, %v4453_v62 }
 0x81d   : > { %v4934_v30 = vmax.f32 %v4918_v0, 0.0  ;;  %v4493_v32 = vpack.c.bf16 %v4477_v41, %v4477_v41  ;;  %v5410_v43 = vunpack.c.l.b16 %v4494_v9  ;;  %v5413_v0 = vunpack.c.l.b16 %v4497_v4  ;;  %v7652_v41 = vld [vmem:[%s9929_s1 + $0x868] sm:$0xff] }
 0x81e   : > { %v4483_v9 = vmax.f32 %v4467_v57, 0.0  ;;  %6091 = vmatpush.bf16.msra.mxu1 %v7652_v41  ;;  %v4500_v1 = vpack.c.bf16 %v4484_v26, %v4484_v26  ;;  %v4486_v50 = vmax.f32 %v4470_v37, 0.0 }
 0x81f   : > { %v4942_v11 = vpack.c.bf16 %v4934_v30, %v4933_v17  ;;  %v5409_v15 = vunpack.c.l.b16 %v4493_v32 }
 0x820   : > { %v4499_v54 = vpack.c.bf16 %v4483_v9, %v4483_v9 }
 0x821   : > { %5050 = vmatmul.bf16.gmra.mxu0 %v4942_v11  ;;  %v5425_v59 = vpack.c.b16 %v5410_v43, %v5409_v15  ;;  %v5427_v11 = vpack.c.b16 %v5414_v58, %v5413_v0  ;;  %v4426_v32 = vpop.f32.mrf.mxu1  ;;  %v7650_v58 = vld [vmem:[%s9929_s1 + $0x858] sm:$0xff] }
 0x822   : > { %6092 = vmatpush.bf16.msra.mxu1 %v7651_v29  ;;  %v4454_v16 = vmul.f32 %v9702_v44, %v4426_v32 }
 0x826   : > { %6093 = vmatpush.bf16.msra.mxu1 %v7650_v58  ;;  %v7647_v58 = vld [vmem:[%s9929_s1 + $0x840] sm:$0xff] }
 0x82e   : > { %v5016_v23 = vpop.f32.mrf.mxu0 }
 0x82f   : > { %v5059_v28 = vmul.f32 %v9723_v35, %v5016_v23 }
 0x831   : > { %6048 = vmatmul.bf16.vlgmr.msra.gmra.mxu0 %v5425_v59  ;;  %v5076_v7 = vadd.f32 %v9730_v40, %v5059_v28  ;;  %v5416_v59 = vunpack.c.l.b16 %v4500_v1  ;;  %v5415_v28 = vunpack.c.l.b16 %v4499_v54 }
 0x833   : > { %v5092_v45 = vmax.f32 %v5076_v7, 0.0  ;;  %v5428_v7 = vpack.c.b16 %v5416_v59, %v5415_v28  ;;  %v7649_v59 = vld [vmem:[%s9929_s1 + $0x850] sm:$0xff] }
 0x834   : > { %6094 = vmatpush.bf16.msra.mxu1 %v7649_v59 }
 0x836   : > { %v5018_v22 = vpop.f32.mrf.mxu0 }
 0x837   : > { %v5060_v18 = vmul.f32 %v9723_v35, %v5018_v22 }
 0x839   : > { %v5077_v8 = vadd.f32 %v9730_v40, %v5060_v18  ;;  %v4428_v18 = vpop.f32.mrf.mxu1 }
 0x83a   : > { %v4455_v60 = vmul.f32 %v9702_v44, %v4428_v18 }
 0x83b   : > { %v5093_v48 = vmax.f32 %v5077_v8, 0.0 }
 0x83c   : > { %v4472_v33 = vadd.f32 %v9713_v3, %v4455_v60 }
 0x83d   : > { %v5108_v46 = vpack.c.bf16 %v5093_v48, %v5092_v45  ;;  %v4502_v48 = vpack.c.bf16 %v4486_v50, %v4486_v50 }
 0x83e   : > { %v5021_v53 = vpop.f32.mrf.mxu0  ;;  %v4488_v4 = vmax.f32 %v4472_v33, 0.0 }
 0x83f   : > { %5188 = vmatmul.bf16.vlgmr.msrb.gmra.mxu1 %v5108_v46  ;;  %v5061_v39 = vmul.f32 %v9723_v35, %v5021_v53  ;;  %v4501_v46 = vpack.c.bf16 %v4485_v20, %v4485_v20 }
 0x840   : > { %v4504_v21 = vpack.c.bf16 %v4488_v4, %v4488_v4 }
 0x841   : > { %6053 = vmatmul.bf16.gmra.mxu0 %v5426_v12  ;;  %v5078_v24 = vadd.f32 %v9730_v40, %v5061_v39  ;;  %v4431_v13 = vpop.f32.mrf.mxu1  ;;  %v5418_v12 = vunpack.c.l.b16 %v4502_v48  ;;  %v5417_v39 = vunpack.c.l.b16 %v4501_v46 }
 0x842   : > { %v5420_v55 = vunpack.c.l.b16 %v4504_v21  ;;  %v4456_v41 = vmul.f32 %v9702_v44, %v4431_v13 }
 0x843   : > { %v5094_v6 = vmax.f32 %v5078_v24, 0.0  ;;  %v5429_v24 = vpack.c.b16 %v5418_v12, %v5417_v39 }
 0x846   : > { %v5023_v56 = vpop.f32.mrf.mxu0 }
 0x847   : > { %v5062_v63 = vmul.f32 %v9723_v35, %v5023_v56 }
 0x849   : > { %v5079_v36 = vadd.f32 %v9730_v40, %v5062_v63  ;;  %v4471_v63 = vadd.f32 %v9713_v3, %v4454_v16  ;;  %v4433_v51 = vpop.f32.mrf.mxu1 }
 0x84b   : > { %v5095_v14 = vmax.f32 %v5079_v36, 0.0 }
 0x84d   : > { %v5109_v17 = vpack.c.bf16 %v5095_v14, %v5094_v6  ;;  %v4487_v6 = vmax.f32 %v4471_v63, 0.0 }
 0x84e   : > { %v5026_v30 = vpop.f32.mrf.mxu0 }
 0x84f   : > { %5193 = vmatmul.bf16.gmra.mxu1 %v5109_v17  ;;  %v5063_v10 = vmul.f32 %v9723_v35, %v5026_v30  ;;  %v4503_v17 = vpack.c.bf16 %v4487_v6, %v4487_v6 }
 0x851   : > { %6058 = vmatmul.bf16.gmra.mxu0 %v5427_v11  ;;  %v5080_v15 = vadd.f32 %v9730_v40, %v5063_v10  ;;  %v4457_v11 = vmul.f32 %v9702_v44, %v4433_v51  ;;  %v5419_v10 = vunpack.c.l.b16 %v4503_v17  ;;  %v4436_v32 = vpop.f32.mrf.mxu1 }
 0x852   : > { %v4458_v29 = vmul.f32 %v9702_v44, %v4436_v32 }
 0x853   : > { %v5096_v31 = vmax.f32 %v5080_v15, 0.0  ;;  %v4474_v1 = vadd.f32 %v9713_v3, %v4457_v11  ;;  %v5430_v15 = vpack.c.b16 %v5420_v55, %v5419_v10 }
 0x854   : > { %v4475_v46 = vadd.f32 %v9713_v3, %v4458_v29 }
 0x855   : > { %v4490_v54 = vmax.f32 %v4474_v1, 0.0 }
 0x856   : > { %v5028_v43 = vpop.f32.mrf.mxu0  ;;  %v4491_v12 = vmax.f32 %v4475_v46, 0.0 }
 0x857   : > { %v5064_v2 = vmul.f32 %v9723_v35, %v5028_v43 }
 0x858   : > { %v4507_v39 = vpack.c.bf16 %v4491_v12, %v4491_v12 }
 0x859   : > { %v5081_v23 = vadd.f32 %v9730_v40, %v5064_v2  ;;  %v4473_v2 = vadd.f32 %v9713_v3, %v4456_v41 }
 0x85b   : > { %v5097_v52 = vmax.f32 %v5081_v23, 0.0  ;;  %v4489_v62 = vmax.f32 %v4473_v2, 0.0 }
 0x85d   : > { %v5110_v19 = vpack.c.bf16 %v5097_v52, %v5096_v31  ;;  %v4506_v52 = vpack.c.bf16 %v4490_v54, %v4490_v54 }
 0x85e   : > { %v5031_v22 = vpop.f32.mrf.mxu0 }
 0x85f   : > { %5198 = vmatmul.bf16.gmra.mxu1 %v5110_v19  ;;  %v5065_v8 = vmul.f32 %v9723_v35, %v5031_v22  ;;  %v4438_v19 = vpop.f32.mrf.mxu1  ;;  %v4505_v22 = vpack.c.bf16 %v4489_v62, %v4489_v62 }
 0x860   : > { %v4459_v18 = vmul.f32 %v9702_v44, %v4438_v19 }
 0x861   : > { %6063 = vmatmul.bf16.gmra.mxu0 %v5428_v7  ;;  %v5082_v47 = vadd.f32 %v9730_v40, %v5065_v8  ;;  %v5422_v7 = vunpack.c.l.b16 %v4506_v52  ;;  %v5421_v8 = vunpack.c.l.b16 %v4505_v22 }
 0x862   : > { %v4476_v48 = vadd.f32 %v9713_v3, %v4459_v18 }
 0x863   : > { %v5098_v38 = vmax.f32 %v5082_v47, 0.0  ;;  %v5431_v47 = vpack.c.b16 %v5422_v7, %v5421_v8 }
 0x866   : > { %v5033_v45 = vpop.f32.mrf.mxu0 }
 0x867   : > { %v5066_v42 = vmul.f32 %v9723_v35, %v5033_v45 }
 0x869   : > { %v5083_v53 = vadd.f32 %v9730_v40, %v5066_v42  ;;  %v7648_v42 = vld [vmem:[%s9929_s1 + $0x848] sm:$0xff] }
 0x86a   : > { %6095 = vmatpush.bf16.msra.mxu1 %v7648_v42 }
 0x86b   : > { %v5099_v5 = vmax.f32 %v5083_v53, 0.0  ;;  %v4492_v53 = vmax.f32 %v4476_v48, 0.0 }
 0x86d   : > { %v5111_v34 = vpack.c.bf16 %v5099_v5, %v5098_v38  ;;  %v4508_v44 = vpack.c.bf16 %v4492_v53, %v4492_v53 }
 0x86e   : > { %v5036_v56 = vpop.f32.mrf.mxu0  ;;  %6096 = vmatpush.bf16.msra.mxu1 %v7647_v58 }
 0x86f   : > { %5203 = vmatmul.bf16.gmra.mxu1 %v5111_v34  ;;  %v5067_v36 = vmul.f32 %v9723_v35, %v5036_v56  ;;  %v5424_v34 = vunpack.c.l.b16 %v4508_v44 }
 0x871   : > { %6068 = vmatmul.bf16.gmra.mxu0 %v5429_v24  ;;  %v5084_v0 = vadd.f32 %v9730_v40, %v5067_v36  ;;  %v5423_v24 = vunpack.c.l.b16 %v4507_v39 }
 0x873   : > { %v5100_v57 = vmax.f32 %v5084_v0, 0.0  ;;  %v5432_v4 = vpack.c.b16 %v5424_v34, %v5423_v24 }
 0x876   : > { %v5038_v14 = vpop.f32.mrf.mxu0 }
 0x877   : > { %v5068_v25 = vmul.f32 %v9723_v35, %v5038_v14 }
 0x879   : > { %v5085_v30 = vadd.f32 %v9730_v40, %v5068_v25 }
 0x87b   : > { %v5101_v26 = vmax.f32 %v5085_v30, 0.0  ;;  %v9814_v30 = vld [vmem:[%s9930_s2 + $0x1e] ss:$0 sm:$0xff] }
 0x87d   : > { %v5112_v9 = vpack.c.bf16 %v5101_v26, %v5100_v57  ;;  %v9820_v57 = vld [vmem:[%s9930_s2 + $0x1f] ss:$0 sm:$0xff] }
 0x87e   : > { %v5041_v43 = vpop.f32.mrf.mxu0 }
 0x87f   : > { %5208 = vmatmul.bf16.gmra.mxu1 %v5112_v9  ;;  %v5069_v23 = vmul.f32 %v9723_v35, %v5041_v43 }
 0x881   : > { %6073 = vmatmul.bf16.gmra.mxu0 %v5430_v15  ;;  %v5086_v28 = vadd.f32 %v9730_v40, %v5069_v23 }
 0x883   : > { %v5102_v27 = vmax.f32 %v5086_v28, 0.0 }
 0x886   : > { %v5043_v31 = vpop.f32.mrf.mxu0 }
 0x887   : > { %v5070_v49 = vmul.f32 %v9723_v35, %v5043_v31 }
 0x889   : > { %v5087_v37 = vadd.f32 %v9730_v40, %v5070_v49 }
 0x88b   : > { %v5103_v50 = vmax.f32 %v5087_v37, 0.0 }
 0x88d   : > { %v5113_v20 = vpack.c.bf16 %v5103_v50, %v5102_v27 }
 0x88e   : > { %v5046_v45 = vpop.f32.mrf.mxu0 }
 0x88f   : > { %5213 = vmatmul.bf16.gmra.mxu1 %v5113_v20  ;;  %v5071_v13 = vmul.f32 %v9723_v35, %v5046_v45 }
 0x891   : > { %6078 = vmatmul.bf16.gmra.mxu0 %v5431_v47  ;;  %v5088_v38 = vadd.f32 %v9730_v40, %v5071_v13 }
 0x893   : > { %v5104_v56 = vmax.f32 %v5088_v38, 0.0 }
 0x896   : > { %v5048_v60 = vpop.f32.mrf.mxu0 }
 0x897   : > { %v5072_v5 = vmul.f32 %v9723_v35, %v5048_v60 }
 0x899   : > { %v5089_v16 = vadd.f32 %v9730_v40, %v5072_v5 }
 0x89b   : > { %v5105_v33 = vmax.f32 %v5089_v16, 0.0 }
 0x89d   : > { %v5114_v3 = vpack.c.bf16 %v5105_v33, %v5104_v56 }
 0x89e   : > { %v5051_v63 = vpop.f32.mrf.mxu0 }
 0x89f   : > { %5218 = vmatmul.bf16.gmra.mxu1 %v5114_v3  ;;  %v5073_v36 = vmul.f32 %v9723_v35, %v5051_v63 }
 0x8a1   : > { %6083 = vmatmul.bf16.gmra.mxu0 %v5432_v4  ;;  %v5090_v6 = vadd.f32 %v9730_v40, %v5073_v36 }
 0x8a3   : > { %v5106_v0 = vmax.f32 %v5090_v6, 0.0 }
 0x8a6   : > { %v5053_v51 = vpop.f32.mrf.mxu0 }
 0x8a7   : > { %v5074_v14 = vmul.f32 %v9723_v35, %v5053_v51 }
 0x8a9   : > { %v5091_v21 = vadd.f32 %v9730_v40, %v5074_v14 }
 0x8ab   : > { %v5107_v25 = vmax.f32 %v5091_v21, 0.0 }
 0x8ad   : > { %v5115_v17 = vpack.c.bf16 %v5107_v25, %v5106_v0 }
 0x8af   : > { %5223 = vmatmul.bf16.gmra.mxu1 %v5115_v17 }
 0x8bc   : > { %v5189_v55 = vpop.f32.mrf.mxu1 }
 0x8bd   : > { %v5232_v11 = vmul.f32 %v9814_v30, %v5189_v55 }
 0x8bf   : > { %v5249_v35 = vadd.f32 %v9820_v57, %v5232_v11 }
 0x8c1   : > { %v5265_v26 = vmax.f32 %v5249_v35, 0.0 }
 0x8c3   : > { %v5281_v9 = vpack.c.bf16 %v5265_v26, %v5265_v26 }
 0x8c4   : > { %v5191_v40 = vpop.f32.mrf.mxu1 }
 0x8c5   : > { %v5233_v10 = vmul.f32 %v9814_v30, %v5191_v40  ;;  %v5457_v15 = vunpack.c.l.b16 %v5281_v9 }
 0x8c7   : > { %v5250_v41 = vadd.f32 %v9820_v57, %v5233_v10 }
 0x8c9   : > { %v5266_v32 = vmax.f32 %v5250_v41, 0.0 }
 0x8cb   : > { %v5282_v43 = vpack.c.bf16 %v5266_v32, %v5266_v32 }
 0x8cc   : > { %v5194_v1 = vpop.f32.mrf.mxu1 }
 0x8cd   : > { %v5458_v2 = vunpack.c.l.b16 %v5282_v43  ;;  %v5234_v54 = vmul.f32 %v9814_v30, %v5194_v1 }
 0x8cf   : > { %v5473_v23 = vpack.c.b16 %v5458_v2, %v5457_v15  ;;  %v5251_v59 = vadd.f32 %v9820_v57, %v5234_v54 }
 0x8d1   : > { %6097 = vmatmul.bf16.vlgmr.msra.gmra.mxu1 %v5473_v23  ;;  %v5267_v31 = vmax.f32 %v5251_v59, 0.0 }
 0x8d3   : > { %v5283_v49 = vpack.c.bf16 %v5267_v31, %v5267_v31 }
 0x8d4   : > { %v5196_v62 = vpop.f32.mrf.mxu1 }
 0x8d5   : > { %v5235_v52 = vmul.f32 %v9814_v30, %v5196_v62  ;;  %v5459_v7 = vunpack.c.l.b16 %v5283_v49 }
 0x8d7   : > { %v5252_v28 = vadd.f32 %v9820_v57, %v5235_v52 }
 0x8d9   : > { %v5268_v19 = vmax.f32 %v5252_v28, 0.0 }
 0x8db   : > { %v5284_v22 = vpack.c.bf16 %v5268_v19, %v5268_v19 }
 0x8dc   : > { %v5199_v37 = vpop.f32.mrf.mxu1 }
 0x8dd   : > { %v5460_v18 = vunpack.c.l.b16 %v5284_v22  ;;  %v5236_v27 = vmul.f32 %v9814_v30, %v5199_v37  ;;  %v5951_v37 = vpop.f32.mrf.mxu3 }
 0x8df   : > { %v5474_v50 = vpack.c.b16 %v5460_v18, %v5459_v7  ;;  %v5253_v8 = vadd.f32 %v9820_v57, %v5236_v27 }
 0x8e1   : > { %6102 = vmatmul.bf16.gmra.mxu1 %v5474_v50  ;;  %v5269_v20 = vmax.f32 %v5253_v8, 0.0  ;;  %v6000_v50 = vpop.f32.mrf.mxu2 }
 0x8e3   : > { %v5285_v47 = vpack.c.bf16 %v5269_v20, %v5269_v20 }
 0x8e4   : > { %v5201_v29 = vpop.f32.mrf.mxu1 }
 0x8e5   : > { %v5237_v45 = vmul.f32 %v9814_v30, %v5201_v29  ;;  %v5461_v13 = vunpack.c.l.b16 %v5285_v47  ;;  %v6049_v29 = vpop.f32.mrf.mxu0 }
 0x8e7   : > { %v5254_v48 = vadd.f32 %v9820_v57, %v5237_v45 }
 0x8e9   : > { %v5270_v42 = vmax.f32 %v5254_v48, 0.0 }
 0x8eb   : > { %v5286_v46 = vpack.c.bf16 %v5270_v42, %v5270_v42 }
 0x8ec   : > { %v5204_v53 = vpop.f32.mrf.mxu1 }
 0x8ed   : > { %v5462_v12 = vunpack.c.l.b16 %v5286_v46  ;;  %v5238_v60 = vmul.f32 %v9814_v30, %v5204_v53  ;;  %v5953_v46 = vpop.f32.mrf.mxu3 }
 0x8ef   : > { %v5475_v44 = vpack.c.b16 %v5462_v12, %v5461_v13  ;;  %v5255_v38 = vadd.f32 %v9820_v57, %v5238_v60  ;;  %v6002_v12 = vpop.f32.mrf.mxu2 }
 0x8f1   : > { %6107 = vmatmul.bf16.gmra.mxu1 %v5475_v44  ;;  %v5271_v39 = vmax.f32 %v5255_v38, 0.0  ;;  %v6051_v38 = vpop.f32.mrf.mxu0 }
 0x8f3   : > { %v5287_v56 = vpack.c.bf16 %v5271_v39, %v5271_v39 }
 0x8f4   : > { %v5206_v5 = vpop.f32.mrf.mxu1 }
 0x8f5   : > { %v5239_v16 = vmul.f32 %v9814_v30, %v5206_v5  ;;  %v5463_v63 = vunpack.c.l.b16 %v5287_v56 }
 0x8f7   : > { %v5256_v34 = vadd.f32 %v9820_v57, %v5239_v16 }
 0x8f9   : > { %v5272_v33 = vmax.f32 %v5256_v34, 0.0  ;;  %v5956_v34 = vpop.f32.mrf.mxu3 }
 0x8fb   : > { %v5288_v24 = vpack.c.bf16 %v5272_v33, %v5272_v33 }
 0x8fc   : > { %v5209_v3 = vpop.f32.mrf.mxu1 }
 0x8fd   : > { %v5464_v4 = vunpack.c.l.b16 %v5288_v24  ;;  %v5240_v36 = vmul.f32 %v9814_v30, %v5209_v3  ;;  %v6005_v3 = vpop.f32.mrf.mxu2 }
 0x8ff   : > { %v5476_v58 = vpack.c.b16 %v5464_v4, %v5463_v63  ;;  %v5257_v51 = vadd.f32 %v9820_v57, %v5240_v36  ;;  %v6054_v4 = vpop.f32.mrf.mxu0  ;;  %v5734_v36 = vperm.slane %v9565_v61, 0 }
 0x901   : > { %6112 = vmatmul.bf16.gmra.mxu1 %v5476_v58  ;;  %v5273_v14 = vmax.f32 %v5257_v51, 0.0  ;;  %v5958_v58 = vpop.f32.mrf.mxu3  ;;  %v5952_v51 = vadd.f32 %v5951_v37, %v5734_v36 }
 0x903   : > { %v5289_v25 = vpack.c.bf16 %v5273_v14, %v5273_v14  ;;  %v6001_v14 = vadd.f32 %v6000_v50, %v5952_v51 }
 0x904   : > { %v5211_v6 = vpop.f32.mrf.mxu1 }
 0x905   : > { %v5241_v21 = vmul.f32 %v9814_v30, %v5211_v6  ;;  %v5465_v35 = vunpack.c.l.b16 %v5289_v25  ;;  %v6007_v6 = vpop.f32.mrf.mxu2 }
 0x907   : > { %v5258_v0 = vadd.f32 %v9820_v57, %v5241_v21  ;;  %v6050_v21 = vadd.f32 %v6049_v29, %v6001_v14 }
 0x909   : > { %v5274_v17 = vmax.f32 %v5258_v0, 0.0  ;;  %v5961_v0 = vpop.f32.mrf.mxu3 }
 0x90b   : > { %v5290_v55 = vpack.c.bf16 %v5274_v17, %v5274_v17  ;;  %v5954_v17 = vadd.f32 %v5953_v46, %v5734_v36 }
 0x90c   : > { %v5214_v11 = vpop.f32.mrf.mxu1 }
 0x90d   : > { %v5466_v40 = vunpack.c.l.b16 %v5290_v55  ;;  %v5242_v26 = vmul.f32 %v9814_v30, %v5214_v11  ;;  %v5727_v55 = vrot.slane %v9565_v61, 1 }
 0x90f   : > { %v5477_v10 = vpack.c.b16 %v5466_v40, %v5465_v35  ;;  %v5259_v41 = vadd.f32 %v9820_v57, %v5242_v26  ;;  %v9864_v35 = vld [vmem:[%s9930_s2 + $0x21] ss:$0 sm:$0xff]  ;;  %v6010_v26 = vpop.f32.mrf.mxu2 }
 0x911   : > { %6117 = vmatmul.bf16.gmra.mxu1 %v5477_v10  ;;  %v5275_v32 = vmax.f32 %v5259_v41, 0.0  ;;  %v5735_v10 = vperm.slane %v5727_v55, 0  ;;  %v6003_v41 = vadd.f32 %v6002_v12, %v5954_v17 }
 0x913   : > { %v5291_v15 = vpack.c.bf16 %v5275_v32, %v5275_v32 }
 0x914   : > { %v5216_v9 = vpop.f32.mrf.mxu1 }
 0x915   : > { %v5243_v43 = vmul.f32 %v9814_v30, %v5216_v9  ;;  %v5467_v59 = vunpack.c.l.b16 %v5291_v15  ;;  %v5957_v15 = vadd.f32 %v5956_v34, %v5735_v10 }
 0x917   : > { %v5260_v1 = vadd.f32 %v9820_v57, %v5243_v43  ;;  %v6052_v43 = vadd.f32 %v6051_v38, %v6003_v41 }
 0x919   : > { %v5276_v2 = vmax.f32 %v5260_v1, 0.0 }
 0x91b   : > { %v5292_v54 = vpack.c.bf16 %v5276_v2, %v5276_v2 }
 0x91c   : > { %v5219_v23 = vpop.f32.mrf.mxu1 }
 0x91d   : > { %v5468_v62 = vunpack.c.l.b16 %v5292_v54  ;;  %v5244_v31 = vmul.f32 %v9814_v30, %v5219_v23  ;;  %v5963_v54 = vpop.f32.mrf.mxu3 }
 0x91f   : > { %v5478_v52 = vpack.c.b16 %v5468_v62, %v5467_v59  ;;  %v5261_v28 = vadd.f32 %v9820_v57, %v5244_v31  ;;  %v6006_v59 = vadd.f32 %v6005_v3, %v5957_v15  ;;  %v6012_v31 = vpop.f32.mrf.mxu2 }
 0x921   : > { %6122 = vmatmul.bf16.gmra.mxu1 %v5478_v52  ;;  %v5277_v19 = vmax.f32 %v5261_v28, 0.0  ;;  %v6055_v52 = vadd.f32 %v6054_v4, %v6006_v59 }
 0x923   : > { %v5293_v18 = vpack.c.bf16 %v5277_v19, %v5277_v19  ;;  %v5959_v19 = vadd.f32 %v5958_v58, %v5735_v10 }
 0x924   : > { %v5221_v49 = vpop.f32.mrf.mxu1 }
 0x925   : > { %v5245_v22 = vmul.f32 %v9814_v30, %v5221_v49  ;;  %v5469_v45 = vunpack.c.l.b16 %v5293_v18  ;;  %v5966_v18 = vpop.f32.mrf.mxu3  ;;  %v6008_v50 = vadd.f32 %v6007_v6, %v5959_v19 }
 0x927   : > { %v5262_v7 = vadd.f32 %v9820_v57, %v5245_v22  ;;  %v5728_v22 = vrot.slane %v9565_v61, 2 }
 0x929   : > { %v5278_v27 = vmax.f32 %v5262_v7, 0.0 }
 0x92b   : > { %v5294_v8 = vpack.c.bf16 %v5278_v27, %v5278_v27  ;;  %v5736_v27 = vperm.slane %v5728_v22, 0 }
 0x92c   : > { %v5224_v20 = vpop.f32.mrf.mxu1 }
 0x92d   : > { %v5470_v48 = vunpack.c.l.b16 %v5294_v8  ;;  %v5246_v47 = vmul.f32 %v9814_v30, %v5224_v20  ;;  %v5968_v12 = vpop.f32.mrf.mxu3  ;;  %v5964_v38 = vadd.f32 %v5963_v54, %v5736_v27 }
 0x92f   : > { %v5479_v42 = vpack.c.b16 %v5470_v48, %v5469_v45  ;;  %v5263_v53 = vadd.f32 %v9820_v57, %v5246_v47  ;;  %v6015_v45 = vpop.f32.mrf.mxu2  ;;  %v5962_v48 = vadd.f32 %v5961_v0, %v5736_v27 }
 0x931   : > { %6127 = vmatmul.bf16.gmra.mxu1 %v5479_v42  ;;  %v5279_v60 = vmax.f32 %v5263_v53, 0.0  ;;  %v6011_v53 = vadd.f32 %v6010_v26, %v5962_v48 }
 0x933   : > { %v5295_v39 = vpack.c.bf16 %v5279_v60, %v5279_v60 }
 0x934   : > { %v5226_v13 = vpop.f32.mrf.mxu1 }
 0x935   : > { %v5247_v44 = vmul.f32 %v9814_v30, %v5226_v13  ;;  %v5471_v33 = vunpack.c.l.b16 %v5295_v39  ;;  %v6056_v30 = vpop.f32.mrf.mxu0  ;;  %v5971_v4 = vpop.f32.mrf.mxu3 }
 0x936   : > { %v6057_v29 = vadd.f32 %v6056_v30, %v6008_v50 }
 0x937   : > { %v5264_v5 = vadd.f32 %v9820_v57, %v5247_v44  ;;  %v9857_v57 = vld [vmem:[%s9930_s2 + $0x20] ss:$0 sm:$0xff] }
 0x939   : > { %v5280_v16 = vmax.f32 %v5264_v5, 0.0  ;;  %v5729_v5 = vrot.slane %v9565_v61, 3 }
 0x93b   : > { %v5296_v56 = vpack.c.bf16 %v5280_v16, %v5280_v16  ;;  %v6017_v16 = vpop.f32.mrf.mxu2 }
 0x93d   : > { %v5472_v24 = vunpack.c.l.b16 %v5296_v56  ;;  %v6059_v32 = vpop.f32.mrf.mxu0  ;;  %v5973_v26 = vpop.f32.mrf.mxu3 }
 0x93e   : > { %v6060_v60 = vadd.f32 %v6059_v32, %v6011_v53 }
 0x93f   : > { %v5480_v63 = vpack.c.b16 %v5472_v24, %v5471_v33  ;;  %v5737_v33 = vperm.slane %v5729_v5, 0  ;;  %v6013_v24 = vadd.f32 %v6012_v31, %v5964_v38 }
 0x941   : > { %6132 = vmatmul.bf16.gmra.mxu1 %v5480_v63  ;;  %v5967_v58 = vadd.f32 %v5966_v18, %v5737_v33  ;;  %v5969_v55 = vadd.f32 %v5968_v12, %v5737_v33 }
 0x943   : > { %v6020_v30 = vpop.f32.mrf.mxu2  ;;  %v6016_v14 = vadd.f32 %v6015_v45, %v5967_v58 }
 0x945   : > { %v6061_v28 = vpop.f32.mrf.mxu0 }
 0x946   : > { %v6062_v63 = vadd.f32 %v6061_v28, %v6013_v24 }
 0x94d   : > { %v6064_v42 = vpop.f32.mrf.mxu0 }
 0x94e   : > { %v6098_v25 = vpop.f32.mrf.mxu1 }
 0x94f   : > { %v6099_v11 = vadd.f32 %v6098_v25, %v6050_v21  ;;  %v6065_v25 = vadd.f32 %v6064_v42, %v6016_v14 }
 0x951   : > { %v6141_v40 = vmul.f32 %v9857_v57, %v6099_v11  ;;  %v5730_v11 = vrot.slane %v9565_v61, 4 }
 0x953   : > { %v6158_v9 = vadd.f32 %v9864_v35, %v6141_v40  ;;  %v5738_v41 = vperm.slane %v5730_v11, 0 }
 0x955   : > { %6174 = vst [vmem:[%s9870_s29] sm:$0xff] %v6158_v9  ;;  %v6066_v56 = vpop.f32.mrf.mxu0  ;;  %v6018_v9 = vadd.f32 %v6017_v16, %v5969_v55  ;;  %v5972_v54 = vadd.f32 %v5971_v4, %v5738_v41  ;;  %v5974_v22 = vadd.f32 %v5973_v26, %v5738_v41  ;;  %v5732_v16 = vrot.slane %v9565_v61, 6 }
 0x956   : > { %v6100_v1 = vpop.f32.mrf.mxu1  ;;  %v5733_v26 = vrot.slane %v9565_v61, 7 }
 0x957   : > { %v6101_v2 = vadd.f32 %v6100_v1, %v6052_v43  ;;  %v6022_v43 = vpop.f32.mrf.mxu2  ;;  %v6067_v1 = vadd.f32 %v6066_v56, %v6018_v9  ;;  %v6021_v31 = vadd.f32 %v6020_v30, %v5972_v54  ;;  %v5740_v24 = vperm.slane %v5732_v16, 0 }
 0x959   : > { %v6142_v23 = vmul.f32 %v9857_v57, %v6101_v2 }
 0x95b   : > { %v6159_v62 = vadd.f32 %v9864_v35, %v6142_v23 }
 0x95d   : > { %6175 = vst [vmem:[%s9870_s29 + $0x8] sm:$0xff] %v6159_v62  ;;  %v6069_v0 = vpop.f32.mrf.mxu0  ;;  %v5976_v62 = vpop.f32.mrf.mxu3 }
 0x95e   : > { %v6103_v49 = vpop.f32.mrf.mxu1  ;;  %v6070_v28 = vadd.f32 %v6069_v0, %v6021_v31 }
 0x95f   : > { %v6104_v37 = vadd.f32 %v6103_v49, %v6055_v52  ;;  %v6025_v19 = vpop.f32.mrf.mxu2 }
 0x961   : > { %v6143_v7 = vmul.f32 %v9857_v57, %v6104_v37  ;;  %v5731_v37 = vrot.slane %v9565_v61, 5 }
 0x963   : > { %v6160_v8 = vadd.f32 %v9864_v35, %v6143_v7  ;;  %v5739_v50 = vperm.slane %v5731_v37, 0 }
 0x965   : > { %6176 = vst [vmem:[%s9870_s29 + $0x10] sm:$0xff] %v6160_v8  ;;  %v6071_v15 = vpop.f32.mrf.mxu0  ;;  %v6023_v8 = vadd.f32 %v6022_v43, %v5974_v22 }
 0x966   : > { %v6105_v20 = vpop.f32.mrf.mxu1 }
 0x967   : > { %v6106_v47 = vadd.f32 %v6105_v20, %v6057_v29  ;;  %v5978_v20 = vpop.f32.mrf.mxu3  ;;  %v6072_v45 = vadd.f32 %v6071_v15, %v6023_v8 }
 0x969   : > { %v6144_v46 = vmul.f32 %v9857_v57, %v6106_v47  ;;  %v5977_v47 = vadd.f32 %v5976_v62, %v5739_v50 }
 0x96b   : > { %v6161_v13 = vadd.f32 %v9864_v35, %v6144_v46  ;;  %v6027_v46 = vpop.f32.mrf.mxu2  ;;  %v6026_v12 = vadd.f32 %v6025_v19, %v5977_v47 }
 0x96d   : > { %6177 = vst [vmem:[%s9870_s29 + $0x18] sm:$0xff] %v6161_v13  ;;  %v6074_v18 = vpop.f32.mrf.mxu0 }
 0x96e   : > { %v6108_v44 = vpop.f32.mrf.mxu1 }
 0x96f   : > { %v6109_v39 = vadd.f32 %v6108_v44, %v6060_v60  ;;  %v6075_v44 = vadd.f32 %v6074_v18, %v6026_v12  ;;  %v5981_v38 = vpop.f32.mrf.mxu3 }
 0x971   : > { %v6145_v34 = vmul.f32 %v9857_v57, %v6109_v39  ;;  %v5979_v39 = vadd.f32 %v5978_v20, %v5739_v50 }
 0x973   : > { %v6162_v3 = vadd.f32 %v9864_v35, %v6145_v34  ;;  %v6030_v33 = vpop.f32.mrf.mxu2 }
 0x975   : > { %6178 = vst [vmem:[%s9870_s29 + $0x20] sm:$0xff] %v6162_v3  ;;  %v6076_v13 = vpop.f32.mrf.mxu0  ;;  %v6028_v3 = vadd.f32 %v6027_v46, %v5979_v39 }
 0x976   : > { %v6110_v36 = vpop.f32.mrf.mxu1 }
 0x977   : > { %v6111_v51 = vadd.f32 %v6110_v36, %v6062_v63  ;;  %v6077_v36 = vadd.f32 %v6076_v13, %v6028_v3  ;;  %v5983_v30 = vpop.f32.mrf.mxu3 }
 0x979   : > { %v6146_v6 = vmul.f32 %v9857_v57, %v6111_v51  ;;  %v5982_v51 = vadd.f32 %v5981_v38, %v5740_v24 }
 0x97b   : > { %v6163_v21 = vadd.f32 %v9864_v35, %v6146_v6 }
 0x97d   : > { %6179 = vst [vmem:[%s9870_s29 + $0x28] sm:$0xff] %v6163_v21  ;;  %v6079_v4 = vpop.f32.mrf.mxu0  ;;  %v6031_v21 = vadd.f32 %v6030_v33, %v5982_v51 }
 0x97e   : > { %v6113_v17 = vpop.f32.mrf.mxu1 }
 0x97f   : > { %v6114_v40 = vadd.f32 %v6113_v17, %v6065_v25  ;;  %v6032_v25 = vpop.f32.mrf.mxu2  ;;  %v6080_v17 = vadd.f32 %v6079_v4, %v6031_v21  ;;  %v5986_v9 = vpop.f32.mrf.mxu3 }
 0x981   : > { %v6147_v10 = vmul.f32 %v9857_v57, %v6114_v40  ;;  %v5984_v40 = vadd.f32 %v5983_v30, %v5740_v24 }
 0x983   : > { %v6164_v32 = vadd.f32 %v9864_v35, %v6147_v10  ;;  %v6033_v43 = vadd.f32 %v6032_v25, %v5984_v40 }
 0x985   : > { %6180 = vst [vmem:[%s9870_s29 + $0x30] sm:$0xff] %v6164_v32  ;;  %v6081_v55 = vpop.f32.mrf.mxu0  ;;  %v5741_v32 = vperm.slane %v5733_v26, 0 }
 0x986   : > { %v6115_v2 = vpop.f32.mrf.mxu1  ;;  %v6082_v15 = vadd.f32 %v6081_v55, %v6033_v43 }
 0x987   : > { %v6116_v23 = vadd.f32 %v6115_v2, %v6067_v1  ;;  %v5987_v54 = vadd.f32 %v5986_v9, %v5741_v32 }
 0x989   : > { %v6148_v59 = vmul.f32 %v9857_v57, %v6116_v23 }
 0x98b   : > { %v6165_v52 = vadd.f32 %v9864_v35, %v6148_v59  ;;  %v6035_v59 = vpop.f32.mrf.mxu2 }
 0x98c   : > { %v6036_v61 = vadd.f32 %v6035_v59, %v5987_v54 }
 0x98d   : > { %6181 = vst [vmem:[%s9870_s29 + $0x38] sm:$0xff] %v6165_v52  ;;  %v6084_v62 = vpop.f32.mrf.mxu0 }
 0x98e   : > { %v6118_v49 = vpop.f32.mrf.mxu1 }
 0x98f   : > { %v6119_v7 = vadd.f32 %v6118_v49, %v6070_v28  ;;  %v5988_v28 = vpop.f32.mrf.mxu3  ;;  %v6085_v49 = vadd.f32 %v6084_v62, %v6036_v61 }
 0x990   : > { %v5989_v22 = vadd.f32 %v5988_v28, %v5741_v32 }
 0x991   : > { %v6149_v27 = vmul.f32 %v9857_v57, %v6119_v7 }
 0x993   : > { %v6166_v29 = vadd.f32 %v9864_v35, %v6149_v27  ;;  %v6037_v18 = vpop.f32.mrf.mxu2 }
 0x994   : > { %v6038_v50 = vadd.f32 %v6037_v18, %v5989_v22 }
 0x995   : > { %6182 = vst [vmem:[%s9870_s29 + $0x40] sm:$0xff] %v6166_v29  ;;  %v6086_v27 = vpop.f32.mrf.mxu0 }
 0x996   : > { %v6120_v48 = vpop.f32.mrf.mxu1  ;;  %v6087_v29 = vadd.f32 %v6086_v27, %v6038_v50 }
 0x997   : > { %v6121_v42 = vadd.f32 %v6120_v48, %v6072_v45 }
 0x999   : > { %v6150_v53 = vmul.f32 %v9857_v57, %v6121_v42 }
 0x99b   : > { %v6167_v60 = vadd.f32 %v9864_v35, %v6150_v53 }
 0x99d   : > { %6183 = vst [vmem:[%s9870_s29 + $0x48] sm:$0xff] %v6167_v60 }
 0x99e   : > { %v6123_v5 = vpop.f32.mrf.mxu1 }
 0x99f   : > { %v6124_v34 = vadd.f32 %v6123_v5, %v6075_v44 }
 0x9a1   : > { %v6151_v56 = vmul.f32 %v9857_v57, %v6124_v34 }
 0x9a3   : > { %v6168_v63 = vadd.f32 %v9864_v35, %v6151_v56 }
 0x9a5   : > { %6184 = vst [vmem:[%s9870_s29 + $0x50] sm:$0xff] %v6168_v63 }
 0x9a6   : > { %v6125_v58 = vpop.f32.mrf.mxu1 }
 0x9a7   : > { %v6126_v6 = vadd.f32 %v6125_v58, %v6077_v36 }
 0x9a9   : > { %v6152_v14 = vmul.f32 %v9857_v57, %v6126_v6 }
 0x9ab   : > { %v6169_v0 = vadd.f32 %v9864_v35, %v6152_v14 }
 0x9ad   : > { %6185 = vst [vmem:[%s9870_s29 + $0x58] sm:$0xff] %v6169_v0 }
 0x9ae   : > { %v6128_v11 = vpop.f32.mrf.mxu1 }
 0x9af   : > { %v6129_v10 = vadd.f32 %v6128_v11, %v6080_v17 }
 0x9b1   : > { %v6153_v41 = vmul.f32 %v9857_v57, %v6129_v10 }
 0x9b3   : > { %v6170_v1 = vadd.f32 %v9864_v35, %v6153_v41 }
 0x9b5   : > { %6186 = vst [vmem:[%s9870_s29 + $0x60] sm:$0xff] %v6170_v1 }
 0x9b6   : > { %v6130_v2 = vpop.f32.mrf.mxu1 }
 0x9b7   : > { %v6131_v23 = vadd.f32 %v6130_v2, %v6082_v15 }
 0x9b9   : > { %v6154_v31 = vmul.f32 %v9857_v57, %v6131_v23 }
 0x9bb   : > { %v6171_v52 = vadd.f32 %v9864_v35, %v6154_v31 }
 0x9bd   : > { %6187 = vst [vmem:[%s9870_s29 + $0x68] sm:$0xff] %v6171_v52 }
 0x9be   : > { %v6133_v19 = vpop.f32.mrf.mxu1 }
 0x9bf   : > { %v6134_v37 = vadd.f32 %v6133_v19, %v6085_v49 }
 0x9c1   : > { %v6155_v7 = vmul.f32 %v9857_v57, %v6134_v37 }
 0x9c3   : > { %v6172_v8 = vadd.f32 %v9864_v35, %v6155_v7 }
 0x9c5   : > { %6188 = vst [vmem:[%s9870_s29 + $0x70] sm:$0xff] %v6172_v8 }
 0x9c6   : > { %v6135_v20 = vpop.f32.mrf.mxu1 }
 0x9c7   : > { %v6136_v45 = vadd.f32 %v6135_v20, %v6087_v29 }
 0x9c9   : > { %v6156_v48 = vmul.f32 %v9857_v57, %v6136_v45 }
 0x9cb   : > { %v6173_v47 = vadd.f32 %v9864_v35, %v6156_v48 }
 0x9cd   : > { %6189 = vst [vmem:[%s9870_s29 + $0x78] sm:$0xff] %v6173_v47 }
 0x9ce PF: > { %s13_s12 = sadd.s32 1, %s7771_s12  }
 0x9cf   : > { %p10_p4 = scmp.ge.s32.totalorder %s13_s12, 4  }
 0x9d1   :  { %12 = sbr.rel (!%p10_p4) target bundleno = 1 (0x1), region = 62 }

</bundles_post_ra>
